<compile_context>
chip_gen: v7x
topology: tpu7x:2x2x1
jax: 0.10.0
libtpu: 0.0.40
codegen_flags: <defaults>
</compile_context>

<pallas_src>
import jax
import jax.numpy as jnp
import numpy as np
from jax import lax
from jax.experimental import pallas as pl
from jax.experimental.pallas import tpu as pltpu


def _build_kernel(H, W, C, Cr, dense_out):
    def kernel(x_ref, w1c_ref, w2c_ref,
               s0_ref, t0_ref, s1_ref, t1_ref, s2_ref, t2_ref,
               alpha_ref, fc1w_ref, fc1b_ref, fc2w_ref, fc2b_ref, se_alpha_ref,
               out_ref, pad_ref, col_ref):
        alpha = alpha_ref[0]        # shared PReLU slope (used twice, like self.prelu)
        se_alpha = se_alpha_ref[0]  # SE-block PReLU slope

        # --- zero only the 1-pixel border of the shared padded scratch ---
        zrow = jnp.zeros((1, W + 2, C), jnp.float32)
        pad_ref[0:1, :, :] = zrow
        pad_ref[H + 1:H + 2, :, :] = zrow
        zcol = jnp.zeros((H, 1, C), jnp.float32)
        pad_ref[1:H + 1, 0:1, :] = zcol
        pad_ref[1:H + 1, W + 1:W + 2, :] = zcol

        # --- bn0 (inference affine), written straight into the pad interior ---
        pad_ref[1:H + 1, 1:W + 1, :] = x_ref[0] * s0_ref[...] + t0_ref[...]

        def conv(w_ref):
            # im2col: one (H*W, 9*C) patch matrix, then a single MXU matmul (K=9*C).
            for kh in range(3):
                for kw in range(3):
                    j = kh * 3 + kw
                    col_ref[:, j * C:(j + 1) * C] = (
                        pad_ref[kh:kh + H, kw:kw + W, :].reshape(H * W, C))
            return jnp.dot(col_ref[...], w_ref[...],
                           preferred_element_type=jnp.float32)

        # --- conv1 -> bn1 -> PReLU ---
        z = conv(w1c_ref) * s1_ref[...] + t1_ref[...]           # (H*W, C)
        z = jnp.where(z >= 0, z, alpha * z)

        # --- conv2 -> bn2 (pad interior is overwritten; border stays zero) ---
        pad_ref[1:H + 1, 1:W + 1, :] = z.reshape(H, W, C)
        o = conv(w2c_ref) * s2_ref[...] + t2_ref[...]           # (H*W, C)

        # --- SE: global avg pool -> fc1 -> PReLU -> fc2 -> sigmoid (VPU only) ---
        ybar = jnp.sum(o, axis=0, keepdims=True) * (1.0 / (H * W))   # (1, C)
        logits = fc2b_ref[...]                                       # (1, C)
        for j in range(Cr):
            hj = (jnp.sum(ybar * fc1w_ref[j:j + 1, :], axis=-1, keepdims=True)
                  + fc1b_ref[:, j:j + 1])                            # (1, 1)
            hj = jnp.where(hj >= 0, hj, se_alpha * hj)
            logits = logits + hj * fc2w_ref[j:j + 1, :]
        gate = 1.0 / (1.0 + jnp.exp(-logits))                        # (1, C)

        # --- SE scale + residual add (pre-bn0 input) + final PReLU (shared alpha) ---
        o = o * gate + x_ref[0].reshape(H * W, C)
        o = jnp.where(o >= 0, o, alpha * o)

        if dense_out:
            # lane-dense (H*W*C/128, 128) slab -> unmasked vector stores.
            out_ref[0] = o.reshape(out_ref.shape[1], out_ref.shape[2])
        else:
            out_ref[0] = o

    return kernel


def irblock_forward(x_nchw, p, dense_out=True):
    """x_nchw: (B, C, H, W) float32. Returns (B, C, H, W)."""
    B, C, H, W = x_nchw.shape
    Cr = p["fc1w"].shape[0]
    x = jnp.transpose(x_nchw, (0, 2, 3, 1))                    # NHWC

    # im2col-reshaped weights: (kh, kw, ci) along K, co along N.
    w1c = p["w1"].reshape(9 * C, C)
    w2c = p["w2"].reshape(9 * C, C)
    s0 = p["s0"].reshape(1, 1, C)
    t0 = p["t0"].reshape(1, 1, C)

    LANES = 128
    dense_out = dense_out and (H * W * C) % LANES == 0
    if dense_out:
        out_rows = (H * W * C) // LANES
        out_shape = jax.ShapeDtypeStruct((B, out_rows, LANES), jnp.float32)
        out_spec = pl.BlockSpec((1, out_rows, LANES), lambda b: (b, 0, 0))
    else:
        out_shape = jax.ShapeDtypeStruct((B, H * W, C), jnp.float32)
        out_spec = pl.BlockSpec((1, H * W, C), lambda b: (b, 0, 0))

    smem_spec = pl.BlockSpec(memory_space=pltpu.MemorySpace.SMEM)

    def const_spec(shape):
        return pl.BlockSpec(shape, lambda b, _s=shape: (0,) * len(_s))

    out = pl.pallas_call(
        _build_kernel(H, W, C, Cr, dense_out),
        out_shape=out_shape,
        grid_spec=pltpu.PrefetchScalarGridSpec(
            num_scalar_prefetch=0,
            grid=(B,),
            in_specs=[
                pl.BlockSpec((1, H, W, C), lambda b: (b, 0, 0, 0)),   # x
                const_spec((9 * C, C)),                               # w1 (im2col)
                const_spec((9 * C, C)),                               # w2 (im2col)
                const_spec((1, 1, C)), const_spec((1, 1, C)),         # bn0 scale/shift
                const_spec((1, C)), const_spec((1, C)),               # bn1 scale/shift
                const_spec((1, C)), const_spec((1, C)),               # bn2 scale/shift
                smem_spec,                                            # shared PReLU alpha
                const_spec((Cr, C)), const_spec((1, Cr)),             # SE fc1 W, b
                const_spec((Cr, C)), const_spec((1, C)),              # SE fc2 W^T, b
                smem_spec,                                            # SE PReLU alpha
            ],
            out_specs=out_spec,
            scratch_shapes=[
                pltpu.VMEM((H + 2, W + 2, C), jnp.float32),   # shared zero-padded image
                pltpu.VMEM((H * W, 9 * C), jnp.float32),      # im2col patch matrix
            ],
        ),
        compiler_params=pltpu.CompilerParams(
            dimension_semantics=("parallel",)),
    )(x, w1c, w2c, s0, t0, p["s1"], p["t1"], p["s2"], p["t2"],
      p["alpha"], p["fc1w"], p["fc1b"], p["fc2w"], p["fc2b"], p["se_alpha"])

    out_nhwc = out.reshape(B, H, W, C)
    return jnp.transpose(out_nhwc, (0, 3, 1, 2))


def irblock_reference(x_nchw, p):
    """Pure-JAX reference (NHWC internally), for correctness check."""
    x = jnp.transpose(x_nchw, (0, 2, 3, 1))
    dn = ("NHWC", "HWIO", "NHWC")
    alpha = p["alpha"][0]
    se_alpha = p["se_alpha"][0]

    y = x * p["s0"] + p["t0"]
    y = lax.conv_general_dilated(y, p["w1"], (1, 1), "SAME", dimension_numbers=dn)
    y = y * p["s1"] + p["t1"]
    y = jnp.where(y >= 0, y, alpha * y)
    y = lax.conv_general_dilated(y, p["w2"], (1, 1), "SAME", dimension_numbers=dn)
    y = y * p["s2"] + p["t2"]
    # SE
    ybar = jnp.mean(y, axis=(1, 2))                           # (B, C)
    h = ybar @ p["fc1w"].T + p["fc1b"]
    h = jnp.where(h >= 0, h, se_alpha * h)
    g = 1.0 / (1.0 + jnp.exp(-(h @ p["fc2w"] + p["fc2b"])))
    y = y * g[:, None, None, :]
    y = y + x
    y = jnp.where(y >= 0, y, alpha * y)
    return jnp.transpose(y, (0, 3, 1, 2))


def make_params(key, C, reduction=16):
    Cr = C // reduction
    eps = 1e-5
    ks = jax.random.split(key, 16)

    def bn_fold(kg, kb, km, kv, n):
        gamma = 1.0 + 0.1 * jax.random.normal(kg, (n,), jnp.float32)
        beta = 0.1 * jax.random.normal(kb, (n,), jnp.float32)
        mean = 0.1 * jax.random.normal(km, (n,), jnp.float32)
        var = jax.random.uniform(kv, (n,), jnp.float32, 0.5, 1.5)
        s = gamma / jnp.sqrt(var + eps)
        t = beta - mean * s
        return s.reshape(1, n), t.reshape(1, n)

    s0, t0 = bn_fold(ks[0], ks[1], ks[2], ks[3], C)
    s1, t1 = bn_fold(ks[4], ks[5], ks[6], ks[7], C)
    s2, t2 = bn_fold(ks[8], ks[9], ks[10], ks[11], C)

    p = dict(
        w1=0.1 * jax.random.normal(ks[12], (3, 3, C, C), jnp.float32),   # HWIO
        w2=0.1 * jax.random.normal(ks[13], (3, 3, C, C), jnp.float32),   # HWIO
        s0=s0, t0=t0, s1=s1, t1=t1, s2=s2, t2=t2,
        alpha=jnp.array([0.25], jnp.float32),        # nn.PReLU() default init
        se_alpha=jnp.array([0.25], jnp.float32),
        fc1w=0.1 * jax.random.normal(ks[14], (Cr, C), jnp.float32),      # (out, in)
        fc1b=0.05 * jnp.ones((1, Cr), jnp.float32),
        fc2w=0.1 * jax.random.normal(ks[15], (Cr, C), jnp.float32),      # fc2.weight^T
        fc2b=0.05 * jnp.ones((1, C), jnp.float32),
    )
    return p


if __name__ == "__main__":
    B, C, H, W = 2, 32, 16, 16       # inplanes = planes = 32 (SE reduction 16 -> Cr=2)
    key = jax.random.PRNGKey(0)
    kx, kp = jax.random.split(key)
    x = jax.random.normal(kx, (B, C, H, W), dtype=jnp.float32)
    params = make_params(kp, C)

    ref = jax.block_until_ready(irblock_reference(x, params))

    def run_and_check(dense):
        out = jax.block_until_ready(irblock_forward(x, params, dense_out=dense))
        np.testing.assert_allclose(np.asarray(out), np.asarray(ref),
                                   rtol=1e-3, atol=1e-3)
        return out

    try:
        run_and_check(True)      # lane-dense (H*W*C/128, 128) output store
    except Exception:
        # TODO(synk): fallback if this Mosaic build rejects the in-kernel
        # (H*W, C) -> (H*W*C/128, 128) relayout; all other optimizations kept.
        run_and_check(False)

    print("KERNEL_OK")
</pallas_src>

<mosaic_0001>
module attributes {stable_mosaic.version = 11 : i64} {
  func.func @kernel(%arg0: i32, %arg1: memref<1x16x16x32xf32, #tpu.memory_space<vmem>>, %arg2: memref<288x32xf32, #tpu.memory_space<vmem>>, %arg3: memref<288x32xf32, #tpu.memory_space<vmem>>, %arg4: memref<1x1x32xf32, #tpu.memory_space<vmem>>, %arg5: memref<1x1x32xf32, #tpu.memory_space<vmem>>, %arg6: memref<1x32xf32, #tpu.memory_space<vmem>>, %arg7: memref<1x32xf32, #tpu.memory_space<vmem>>, %arg8: memref<1x32xf32, #tpu.memory_space<vmem>>, %arg9: memref<1x32xf32, #tpu.memory_space<vmem>>, %arg10: memref<1xf32, #tpu.memory_space<smem>>, %arg11: memref<2x32xf32, #tpu.memory_space<vmem>>, %arg12: memref<1x2xf32, #tpu.memory_space<vmem>>, %arg13: memref<2x32xf32, #tpu.memory_space<vmem>>, %arg14: memref<1x32xf32, #tpu.memory_space<vmem>>, %arg15: memref<1xf32, #tpu.memory_space<smem>>, %arg16: memref<1x64x128xf32, #tpu.memory_space<vmem>>, %arg17: memref<18x18x32xf32, #tpu.memory_space<vmem>>, %arg18: memref<256x288xf32, #tpu.memory_space<vmem>>) attributes {dimension_semantics = [#tpu.dimension_semantics<parallel>], iteration_bounds = array<i64: 2>, scalar_prefetch = 0 : i64, scratch_operands = 2 : i64, tpu.core_type = #tpu.core_type<tc>, window_params = [{transform_indices = @transform_0, window_bounds = array<i64: 1, 16, 16, 32>}, {pipeline_mode = #tpu.pipeline_mode<synchronous>, transform_indices = @transform_1, window_bounds = array<i64: 288, 32>}, {pipeline_mode = #tpu.pipeline_mode<synchronous>, transform_indices = @transform_2, window_bounds = array<i64: 288, 32>}, {pipeline_mode = #tpu.pipeline_mode<synchronous>, transform_indices = @transform_3, window_bounds = array<i64: 1, 1, 32>}, {pipeline_mode = #tpu.pipeline_mode<synchronous>, transform_indices = @transform_4, window_bounds = array<i64: 1, 1, 32>}, {pipeline_mode = #tpu.pipeline_mode<synchronous>, transform_indices = @transform_5, window_bounds = array<i64: 1, 32>}, {pipeline_mode = #tpu.pipeline_mode<synchronous>, transform_indices = @transform_6, window_bounds = array<i64: 1, 32>}, {pipeline_mode = #tpu.pipeline_mode<synchronous>, transform_indices = @transform_7, window_bounds = array<i64: 1, 32>}, {pipeline_mode = #tpu.pipeline_mode<synchronous>, transform_indices = @transform_8, window_bounds = array<i64: 1, 32>}, {transform_indices = @transform_9, window_bounds = array<i64: 1>}, {pipeline_mode = #tpu.pipeline_mode<synchronous>, transform_indices = @transform_10, window_bounds = array<i64: 2, 32>}, {pipeline_mode = #tpu.pipeline_mode<synchronous>, transform_indices = @transform_11, window_bounds = array<i64: 1, 2>}, {pipeline_mode = #tpu.pipeline_mode<synchronous>, transform_indices = @transform_12, window_bounds = array<i64: 2, 32>}, {pipeline_mode = #tpu.pipeline_mode<synchronous>, transform_indices = @transform_13, window_bounds = array<i64: 1, 32>}, {transform_indices = @transform_14, window_bounds = array<i64: 1>}, {transform_indices = @transform_15, window_bounds = array<i64: 1, 64, 128>}]} {
    %c0 = arith.constant 0 : index
    %0 = memref.load %arg10[%c0] : memref<1xf32, #tpu.memory_space<smem>>
    %c0_0 = arith.constant 0 : index
    %1 = memref.load %arg15[%c0_0] : memref<1xf32, #tpu.memory_space<smem>>
    %cst = arith.constant 0.000000e+00 : f32
    %2 = vector.broadcast %cst : f32 to vector<1x18x32xf32>
    %c0_1 = arith.constant 0 : index
    %c0_2 = arith.constant 0 : index
    %c0_3 = arith.constant 0 : index
    %3 = vector.load %arg17[%c0_1, %c0_2, %c0_3] : memref<18x18x32xf32, #tpu.memory_space<vmem>>, vector<1x18x32xf32>
    tpu.vector_store %arg17[%c0_1, %c0_2, %c0_3], %2 {strides = array<i32>} : memref<18x18x32xf32, #tpu.memory_space<vmem>>, vector<1x18x32xf32>,
    %c17 = arith.constant 17 : index
    %c0_4 = arith.constant 0 : index
    %c0_5 = arith.constant 0 : index
    %4 = vector.load %arg17[%c17, %c0_4, %c0_5] : memref<18x18x32xf32, #tpu.memory_space<vmem>>, vector<1x18x32xf32>
    tpu.vector_store %arg17[%c17, %c0_4, %c0_5], %2 {strides = array<i32>} : memref<18x18x32xf32, #tpu.memory_space<vmem>>, vector<1x18x32xf32>,
    %cst_6 = arith.constant 0.000000e+00 : f32
    %5 = vector.broadcast %cst_6 : f32 to vector<16x1x32xf32>
    %c1 = arith.constant 1 : index
    %c0_7 = arith.constant 0 : index
    %c0_8 = arith.constant 0 : index
    %6 = vector.load %arg17[%c1, %c0_7, %c0_8] : memref<18x18x32xf32, #tpu.memory_space<vmem>>, vector<16x1x32xf32>
    tpu.vector_store %arg17[%c1, %c0_7, %c0_8], %5 {strides = array<i32>} : memref<18x18x32xf32, #tpu.memory_space<vmem>>, vector<16x1x32xf32>,
    %c1_9 = arith.constant 1 : index
    %c17_10 = arith.constant 17 : index
    %c0_11 = arith.constant 0 : index
    %7 = vector.load %arg17[%c1_9, %c17_10, %c0_11] : memref<18x18x32xf32, #tpu.memory_space<vmem>>, vector<16x1x32xf32>
    tpu.vector_store %arg17[%c1_9, %c17_10, %c0_11], %5 {strides = array<i32>} : memref<18x18x32xf32, #tpu.memory_space<vmem>>, vector<16x1x32xf32>,
    %c0_12 = arith.constant 0 : index
    %c0_13 = arith.constant 0 : index
    %c0_14 = arith.constant 0 : index
    %c0_15 = arith.constant 0 : index
    %8 = vector.load %arg1[%c0_12, %c0_13, %c0_14, %c0_15] : memref<1x16x16x32xf32, #tpu.memory_space<vmem>>, vector<1x16x16x32xf32>
    %9 = vector.shape_cast %8 : vector<1x16x16x32xf32> to vector<16x16x32xf32>
    %c0_16 = arith.constant 0 : index
    %c0_17 = arith.constant 0 : index
    %c0_18 = arith.constant 0 : index
    %10 = vector.load %arg4[%c0_16, %c0_17, %c0_18] : memref<1x1x32xf32, #tpu.memory_space<vmem>>, vector<1x1x32xf32>
    %11 = vector.broadcast %10 : vector<1x1x32xf32> to vector<16x16x32xf32>
    %12 = arith.mulf %9, %11 : vector<16x16x32xf32>
    %c0_19 = arith.constant 0 : index
    %c0_20 = arith.constant 0 : index
    %c0_21 = arith.constant 0 : index
    %13 = vector.load %arg5[%c0_19, %c0_20, %c0_21] : memref<1x1x32xf32, #tpu.memory_space<vmem>>, vector<1x1x32xf32>
    %14 = vector.broadcast %13 : vector<1x1x32xf32> to vector<16x16x32xf32>
    %15 = arith.addf %12, %14 : vector<16x16x32xf32>
    %c1_22 = arith.constant 1 : index
    %c1_23 = arith.constant 1 : index
    %c0_24 = arith.constant 0 : index
    %16 = vector.load %arg17[%c1_22, %c1_23, %c0_24] : memref<18x18x32xf32, #tpu.memory_space<vmem>>, vector<16x16x32xf32>
    tpu.vector_store %arg17[%c1_22, %c1_23, %c0_24], %15 {strides = array<i32>} : memref<18x18x32xf32, #tpu.memory_space<vmem>>, vector<16x16x32xf32>,
    %c0_25 = arith.constant 0 : index
    %c0_26 = arith.constant 0 : index
    %c0_27 = arith.constant 0 : index
    %17 = vector.load %arg17[%c0_25, %c0_26, %c0_27] : memref<18x18x32xf32, #tpu.memory_space<vmem>>, vector<16x16x32xf32>
    %18 = vector.shape_cast %17 : vector<16x16x32xf32> to vector<256x32xf32>
    %c0_28 = arith.constant 0 : index
    %c0_29 = arith.constant 0 : index
    %19 = vector.load %arg18[%c0_28, %c0_29] : memref<256x288xf32, #tpu.memory_space<vmem>>, vector<256x32xf32>
    tpu.vector_store %arg18[%c0_28, %c0_29], %18 {strides = array<i32>} : memref<256x288xf32, #tpu.memory_space<vmem>>, vector<256x32xf32>,
    %c0_30 = arith.constant 0 : index
    %c1_31 = arith.constant 1 : index
    %c0_32 = arith.constant 0 : index
    %20 = vector.load %arg17[%c0_30, %c1_31, %c0_32] : memref<18x18x32xf32, #tpu.memory_space<vmem>>, vector<16x16x32xf32>
    %21 = vector.shape_cast %20 : vector<16x16x32xf32> to vector<256x32xf32>
    %c0_33 = arith.constant 0 : index
    %c32 = arith.constant 32 : index
    %22 = vector.load %arg18[%c0_33, %c32] : memref<256x288xf32, #tpu.memory_space<vmem>>, vector<256x32xf32>
    tpu.vector_store %arg18[%c0_33, %c32], %21 {strides = array<i32>} : memref<256x288xf32, #tpu.memory_space<vmem>>, vector<256x32xf32>,
    %c0_34 = arith.constant 0 : index
    %c2 = arith.constant 2 : index
    %c0_35 = arith.constant 0 : index
    %23 = vector.load %arg17[%c0_34, %c2, %c0_35] : memref<18x18x32xf32, #tpu.memory_space<vmem>>, vector<16x16x32xf32>
    %24 = vector.shape_cast %23 : vector<16x16x32xf32> to vector<256x32xf32>
    %c0_36 = arith.constant 0 : index
    %c64 = arith.constant 64 : index
    %25 = vector.load %arg18[%c0_36, %c64] : memref<256x288xf32, #tpu.memory_space<vmem>>, vector<256x32xf32>
    tpu.vector_store %arg18[%c0_36, %c64], %24 {strides = array<i32>} : memref<256x288xf32, #tpu.memory_space<vmem>>, vector<256x32xf32>,
    %c1_37 = arith.constant 1 : index
    %c0_38 = arith.constant 0 : index
    %c0_39 = arith.constant 0 : index
    %26 = vector.load %arg17[%c1_37, %c0_38, %c0_39] : memref<18x18x32xf32, #tpu.memory_space<vmem>>, vector<16x16x32xf32>
    %27 = vector.shape_cast %26 : vector<16x16x32xf32> to vector<256x32xf32>
    %c0_40 = arith.constant 0 : index
    %c96 = arith.constant 96 : index
    %28 = vector.load %arg18[%c0_40, %c96] : memref<256x288xf32, #tpu.memory_space<vmem>>, vector<256x32xf32>
    tpu.vector_store %arg18[%c0_40, %c96], %27 {strides = array<i32>} : memref<256x288xf32, #tpu.memory_space<vmem>>, vector<256x32xf32>,
    %c1_41 = arith.constant 1 : index
    %c1_42 = arith.constant 1 : index
    %c0_43 = arith.constant 0 : index
    %29 = vector.load %arg17[%c1_41, %c1_42, %c0_43] : memref<18x18x32xf32, #tpu.memory_space<vmem>>, vector<16x16x32xf32>
    %30 = vector.shape_cast %29 : vector<16x16x32xf32> to vector<256x32xf32>
    %c0_44 = arith.constant 0 : index
    %c128 = arith.constant 128 : index
    %31 = vector.load %arg18[%c0_44, %c128] : memref<256x288xf32, #tpu.memory_space<vmem>>, vector<256x32xf32>
    tpu.vector_store %arg18[%c0_44, %c128], %30 {strides = array<i32>} : memref<256x288xf32, #tpu.memory_space<vmem>>, vector<256x32xf32>,
    %c1_45 = arith.constant 1 : index
    %c2_46 = arith.constant 2 : index
    %c0_47 = arith.constant 0 : index
    %32 = vector.load %arg17[%c1_45, %c2_46, %c0_47] : memref<18x18x32xf32, #tpu.memory_space<vmem>>, vector<16x16x32xf32>
    %33 = vector.shape_cast %32 : vector<16x16x32xf32> to vector<256x32xf32>
    %c0_48 = arith.constant 0 : index
    %c160 = arith.constant 160 : index
    %34 = vector.load %arg18[%c0_48, %c160] : memref<256x288xf32, #tpu.memory_space<vmem>>, vector<256x32xf32>
    tpu.vector_store %arg18[%c0_48, %c160], %33 {strides = array<i32>} : memref<256x288xf32, #tpu.memory_space<vmem>>, vector<256x32xf32>,
    %c2_49 = arith.constant 2 : index
    %c0_50 = arith.constant 0 : index
    %c0_51 = arith.constant 0 : index
    %35 = vector.load %arg17[%c2_49, %c0_50, %c0_51] : memref<18x18x32xf32, #tpu.memory_space<vmem>>, vector<16x16x32xf32>
    %36 = vector.shape_cast %35 : vector<16x16x32xf32> to vector<256x32xf32>
    %c0_52 = arith.constant 0 : index
    %c192 = arith.constant 192 : index
    %37 = vector.load %arg18[%c0_52, %c192] : memref<256x288xf32, #tpu.memory_space<vmem>>, vector<256x32xf32>
    tpu.vector_store %arg18[%c0_52, %c192], %36 {strides = array<i32>} : memref<256x288xf32, #tpu.memory_space<vmem>>, vector<256x32xf32>,
    %c2_53 = arith.constant 2 : index
    %c1_54 = arith.constant 1 : index
    %c0_55 = arith.constant 0 : index
    %38 = vector.load %arg17[%c2_53, %c1_54, %c0_55] : memref<18x18x32xf32, #tpu.memory_space<vmem>>, vector<16x16x32xf32>
    %39 = vector.shape_cast %38 : vector<16x16x32xf32> to vector<256x32xf32>
    %c0_56 = arith.constant 0 : index
    %c224 = arith.constant 224 : index
    %40 = vector.load %arg18[%c0_56, %c224] : memref<256x288xf32, #tpu.memory_space<vmem>>, vector<256x32xf32>
    tpu.vector_store %arg18[%c0_56, %c224], %39 {strides = array<i32>} : memref<256x288xf32, #tpu.memory_space<vmem>>, vector<256x32xf32>,
    %c2_57 = arith.constant 2 : index
    %c2_58 = arith.constant 2 : index
    %c0_59 = arith.constant 0 : index
    %41 = vector.load %arg17[%c2_57, %c2_58, %c0_59] : memref<18x18x32xf32, #tpu.memory_space<vmem>>, vector<16x16x32xf32>
    %42 = vector.shape_cast %41 : vector<16x16x32xf32> to vector<256x32xf32>
    %c0_60 = arith.constant 0 : index
    %c256 = arith.constant 256 : index
    %43 = vector.load %arg18[%c0_60, %c256] : memref<256x288xf32, #tpu.memory_space<vmem>>, vector<256x32xf32>
    tpu.vector_store %arg18[%c0_60, %c256], %42 {strides = array<i32>} : memref<256x288xf32, #tpu.memory_space<vmem>>, vector<256x32xf32>,
    %c0_61 = arith.constant 0 : index
    %c0_62 = arith.constant 0 : index
    %44 = vector.load %arg18[%c0_61, %c0_62] : memref<256x288xf32, #tpu.memory_space<vmem>>, vector<256x288xf32>
    %c0_63 = arith.constant 0 : index
    %c0_64 = arith.constant 0 : index
    %45 = vector.load %arg2[%c0_63, %c0_64] : memref<288x32xf32, #tpu.memory_space<vmem>>, vector<288x32xf32>
    %cst_65 = arith.constant dense<0.000000e+00> : vector<256x32xf32>
    %46 = tpu.matmul %44, %45, %cst_65 {dimension_numbers = #tpu.dot_dimension_numbers<[1], [0], [0], [1], [0, 0, 1, 1], [], []>} : vector<256x288xf32>, vector<288x32xf32>, vector<256x32xf32> -> vector<256x32xf32>
    %c0_66 = arith.constant 0 : index
    %c0_67 = arith.constant 0 : index
    %47 = vector.load %arg6[%c0_66, %c0_67] : memref<1x32xf32, #tpu.memory_space<vmem>>, vector<1x32xf32>
    %48 = vector.broadcast %47 : vector<1x32xf32> to vector<256x32xf32>
    %49 = arith.mulf %46, %48 : vector<256x32xf32>
    %c0_68 = arith.constant 0 : index
    %c0_69 = arith.constant 0 : index
    %50 = vector.load %arg7[%c0_68, %c0_69] : memref<1x32xf32, #tpu.memory_space<vmem>>, vector<1x32xf32>
    %51 = vector.broadcast %50 : vector<1x32xf32> to vector<256x32xf32>
    %52 = arith.addf %49, %51 : vector<256x32xf32>
    %cst_70 = arith.constant 0.000000e+00 : f32
    %53 = vector.broadcast %cst_70 : f32 to vector<256x32xf32>
    %54 = arith.cmpf oge, %52, %53 : vector<256x32xf32>
    %55 = vector.broadcast %0 : f32 to vector<256x32xf32>
    %56 = arith.mulf %55, %52 : vector<256x32xf32>
    %57 = arith.select %54, %52, %56 : vector<256x32xi1>, vector<256x32xf32>
    %58 = vector.shape_cast %57 : vector<256x32xf32> to vector<16x16x32xf32>
    %c1_71 = arith.constant 1 : index
    %c1_72 = arith.constant 1 : index
    %c0_73 = arith.constant 0 : index
    %59 = vector.load %arg17[%c1_71, %c1_72, %c0_73] : memref<18x18x32xf32, #tpu.memory_space<vmem>>, vector<16x16x32xf32>
    tpu.vector_store %arg17[%c1_71, %c1_72, %c0_73], %58 {strides = array<i32>} : memref<18x18x32xf32, #tpu.memory_space<vmem>>, vector<16x16x32xf32>,
    %c0_74 = arith.constant 0 : index
    %c0_75 = arith.constant 0 : index
    %c0_76 = arith.constant 0 : index
    %60 = vector.load %arg17[%c0_74, %c0_75, %c0_76] : memref<18x18x32xf32, #tpu.memory_space<vmem>>, vector<16x16x32xf32>
    %61 = vector.shape_cast %60 : vector<16x16x32xf32> to vector<256x32xf32>
    %c0_77 = arith.constant 0 : index
    %c0_78 = arith.constant 0 : index
    %62 = vector.load %arg18[%c0_77, %c0_78] : memref<256x288xf32, #tpu.memory_space<vmem>>, vector<256x32xf32>
    tpu.vector_store %arg18[%c0_77, %c0_78], %61 {strides = array<i32>} : memref<256x288xf32, #tpu.memory_space<vmem>>, vector<256x32xf32>,
    %c0_79 = arith.constant 0 : index
    %c1_80 = arith.constant 1 : index
    %c0_81 = arith.constant 0 : index
    %63 = vector.load %arg17[%c0_79, %c1_80, %c0_81] : memref<18x18x32xf32, #tpu.memory_space<vmem>>, vector<16x16x32xf32>
    %64 = vector.shape_cast %63 : vector<16x16x32xf32> to vector<256x32xf32>
    %c0_82 = arith.constant 0 : index
    %c32_83 = arith.constant 32 : index
    %65 = vector.load %arg18[%c0_82, %c32_83] : memref<256x288xf32, #tpu.memory_space<vmem>>, vector<256x32xf32>
    tpu.vector_store %arg18[%c0_82, %c32_83], %64 {strides = array<i32>} : memref<256x288xf32, #tpu.memory_space<vmem>>, vector<256x32xf32>,
    %c0_84 = arith.constant 0 : index
    %c2_85 = arith.constant 2 : index
    %c0_86 = arith.constant 0 : index
    %66 = vector.load %arg17[%c0_84, %c2_85, %c0_86] : memref<18x18x32xf32, #tpu.memory_space<vmem>>, vector<16x16x32xf32>
    %67 = vector.shape_cast %66 : vector<16x16x32xf32> to vector<256x32xf32>
    %c0_87 = arith.constant 0 : index
    %c64_88 = arith.constant 64 : index
    %68 = vector.load %arg18[%c0_87, %c64_88] : memref<256x288xf32, #tpu.memory_space<vmem>>, vector<256x32xf32>
    tpu.vector_store %arg18[%c0_87, %c64_88], %67 {strides = array<i32>} : memref<256x288xf32, #tpu.memory_space<vmem>>, vector<256x32xf32>,
    %c1_89 = arith.constant 1 : index
    %c0_90 = arith.constant 0 : index
    %c0_91 = arith.constant 0 : index
    %69 = vector.load %arg17[%c1_89, %c0_90, %c0_91] : memref<18x18x32xf32, #tpu.memory_space<vmem>>, vector<16x16x32xf32>
    %70 = vector.shape_cast %69 : vector<16x16x32xf32> to vector<256x32xf32>
    %c0_92 = arith.constant 0 : index
    %c96_93 = arith.constant 96 : index
    %71 = vector.load %arg18[%c0_92, %c96_93] : memref<256x288xf32, #tpu.memory_space<vmem>>, vector<256x32xf32>
    tpu.vector_store %arg18[%c0_92, %c96_93], %70 {strides = array<i32>} : memref<256x288xf32, #tpu.memory_space<vmem>>, vector<256x32xf32>,
    %c1_94 = arith.constant 1 : index
    %c1_95 = arith.constant 1 : index
    %c0_96 = arith.constant 0 : index
    %72 = vector.load %arg17[%c1_94, %c1_95, %c0_96] : memref<18x18x32xf32, #tpu.memory_space<vmem>>, vector<16x16x32xf32>
    %73 = vector.shape_cast %72 : vector<16x16x32xf32> to vector<256x32xf32>
    %c0_97 = arith.constant 0 : index
    %c128_98 = arith.constant 128 : index
    %74 = vector.load %arg18[%c0_97, %c128_98] : memref<256x288xf32, #tpu.memory_space<vmem>>, vector<256x32xf32>
    tpu.vector_store %arg18[%c0_97, %c128_98], %73 {strides = array<i32>} : memref<256x288xf32, #tpu.memory_space<vmem>>, vector<256x32xf32>,
    %c1_99 = arith.constant 1 : index
    %c2_100 = arith.constant 2 : index
    %c0_101 = arith.constant 0 : index
    %75 = vector.load %arg17[%c1_99, %c2_100, %c0_101] : memref<18x18x32xf32, #tpu.memory_space<vmem>>, vector<16x16x32xf32>
    %76 = vector.shape_cast %75 : vector<16x16x32xf32> to vector<256x32xf32>
    %c0_102 = arith.constant 0 : index
    %c160_103 = arith.constant 160 : index
    %77 = vector.load %arg18[%c0_102, %c160_103] : memref<256x288xf32, #tpu.memory_space<vmem>>, vector<256x32xf32>
    tpu.vector_store %arg18[%c0_102, %c160_103], %76 {strides = array<i32>} : memref<256x288xf32, #tpu.memory_space<vmem>>, vector<256x32xf32>,
    %c2_104 = arith.constant 2 : index
    %c0_105 = arith.constant 0 : index
    %c0_106 = arith.constant 0 : index
    %78 = vector.load %arg17[%c2_104, %c0_105, %c0_106] : memref<18x18x32xf32, #tpu.memory_space<vmem>>, vector<16x16x32xf32>
    %79 = vector.shape_cast %78 : vector<16x16x32xf32> to vector<256x32xf32>
    %c0_107 = arith.constant 0 : index
    %c192_108 = arith.constant 192 : index
    %80 = vector.load %arg18[%c0_107, %c192_108] : memref<256x288xf32, #tpu.memory_space<vmem>>, vector<256x32xf32>
    tpu.vector_store %arg18[%c0_107, %c192_108], %79 {strides = array<i32>} : memref<256x288xf32, #tpu.memory_space<vmem>>, vector<256x32xf32>,
    %c2_109 = arith.constant 2 : index
    %c1_110 = arith.constant 1 : index
    %c0_111 = arith.constant 0 : index
    %81 = vector.load %arg17[%c2_109, %c1_110, %c0_111] : memref<18x18x32xf32, #tpu.memory_space<vmem>>, vector<16x16x32xf32>
    %82 = vector.shape_cast %81 : vector<16x16x32xf32> to vector<256x32xf32>
    %c0_112 = arith.constant 0 : index
    %c224_113 = arith.constant 224 : index
    %83 = vector.load %arg18[%c0_112, %c224_113] : memref<256x288xf32, #tpu.memory_space<vmem>>, vector<256x32xf32>
    tpu.vector_store %arg18[%c0_112, %c224_113], %82 {strides = array<i32>} : memref<256x288xf32, #tpu.memory_space<vmem>>, vector<256x32xf32>,
    %c2_114 = arith.constant 2 : index
    %c2_115 = arith.constant 2 : index
    %c0_116 = arith.constant 0 : index
    %84 = vector.load %arg17[%c2_114, %c2_115, %c0_116] : memref<18x18x32xf32, #tpu.memory_space<vmem>>, vector<16x16x32xf32>
    %85 = vector.shape_cast %84 : vector<16x16x32xf32> to vector<256x32xf32>
    %c0_117 = arith.constant 0 : index
    %c256_118 = arith.constant 256 : index
    %86 = vector.load %arg18[%c0_117, %c256_118] : memref<256x288xf32, #tpu.memory_space<vmem>>, vector<256x32xf32>
    tpu.vector_store %arg18[%c0_117, %c256_118], %85 {strides = array<i32>} : memref<256x288xf32, #tpu.memory_space<vmem>>, vector<256x32xf32>,
    %c0_119 = arith.constant 0 : index
    %c0_120 = arith.constant 0 : index
    %87 = vector.load %arg18[%c0_119, %c0_120] : memref<256x288xf32, #tpu.memory_space<vmem>>, vector<256x288xf32>
    %c0_121 = arith.constant 0 : index
    %c0_122 = arith.constant 0 : index
    %88 = vector.load %arg3[%c0_121, %c0_122] : memref<288x32xf32, #tpu.memory_space<vmem>>, vector<288x32xf32>
    %cst_123 = arith.constant dense<0.000000e+00> : vector<256x32xf32>
    %89 = tpu.matmul %87, %88, %cst_123 {dimension_numbers = #tpu.dot_dimension_numbers<[1], [0], [0], [1], [0, 0, 1, 1], [], []>} : vector<256x288xf32>, vector<288x32xf32>, vector<256x32xf32> -> vector<256x32xf32>
    %c0_124 = arith.constant 0 : index
    %c0_125 = arith.constant 0 : index
    %90 = vector.load %arg8[%c0_124, %c0_125] : memref<1x32xf32, #tpu.memory_space<vmem>>, vector<1x32xf32>
    %91 = vector.broadcast %90 : vector<1x32xf32> to vector<256x32xf32>
    %92 = arith.mulf %89, %91 : vector<256x32xf32>
    %c0_126 = arith.constant 0 : index
    %c0_127 = arith.constant 0 : index
    %93 = vector.load %arg9[%c0_126, %c0_127] : memref<1x32xf32, #tpu.memory_space<vmem>>, vector<1x32xf32>
    %94 = vector.broadcast %93 : vector<1x32xf32> to vector<256x32xf32>
    %95 = arith.addf %92, %94 : vector<256x32xf32>
    %cst_128 = arith.constant dense<0.000000e+00> : vector<32xf32>
    %96 = vector.multi_reduction <add>, %95, %cst_128 [0] : vector<256x32xf32> to vector<32xf32>
    %97 = vector.shape_cast %96 : vector<32xf32> to vector<1x32xf32>
    %cst_129 = arith.constant 3.906250e-03 : f32
    %98 = vector.broadcast %cst_129 : f32 to vector<1x32xf32>
    %99 = arith.mulf %97, %98 : vector<1x32xf32>
    %c0_130 = arith.constant 0 : index
    %c0_131 = arith.constant 0 : index
    %100 = vector.load %arg14[%c0_130, %c0_131] : memref<1x32xf32, #tpu.memory_space<vmem>>, vector<1x32xf32>
    %c0_132 = arith.constant 0 : index
    %c0_133 = arith.constant 0 : index
    %101 = vector.load %arg11[%c0_132, %c0_133] : memref<2x32xf32, #tpu.memory_space<vmem>>, vector<1x32xf32>
    %102 = arith.mulf %99, %101 : vector<1x32xf32>
    %cst_134 = arith.constant dense<0.000000e+00> : vector<1xf32>
    %103 = vector.multi_reduction <add>, %102, %cst_134 [1] : vector<1x32xf32> to vector<1xf32>
    %104 = vector.shape_cast %103 : vector<1xf32> to vector<1x1xf32>
    %c0_135 = arith.constant 0 : index
    %c0_136 = arith.constant 0 : index
    %105 = vector.load %arg12[%c0_135, %c0_136] : memref<1x2xf32, #tpu.memory_space<vmem>>, vector<1x1xf32>
    %106 = arith.addf %104, %105 : vector<1x1xf32>
    %cst_137 = arith.constant 0.000000e+00 : f32
    %107 = vector.broadcast %cst_137 : f32 to vector<1x1xf32>
    %108 = arith.cmpf oge, %106, %107 : vector<1x1xf32>
    %109 = vector.broadcast %1 : f32 to vector<1x1xf32>
    %110 = arith.mulf %109, %106 : vector<1x1xf32>
    %111 = arith.select %108, %106, %110 : vector<1x1xi1>, vector<1x1xf32>
    %c0_138 = arith.constant 0 : index
    %c0_139 = arith.constant 0 : index
    %112 = vector.load %arg13[%c0_138, %c0_139] : memref<2x32xf32, #tpu.memory_space<vmem>>, vector<1x32xf32>
    %113 = vector.broadcast %111 : vector<1x1xf32> to vector<1x32xf32>
    %114 = arith.mulf %113, %112 : vector<1x32xf32>
    %115 = arith.addf %100, %114 : vector<1x32xf32>
    %c1_140 = arith.constant 1 : index
    %c0_141 = arith.constant 0 : index
    %116 = vector.load %arg11[%c1_140, %c0_141] : memref<2x32xf32, #tpu.memory_space<vmem>>, vector<1x32xf32>
    %117 = arith.mulf %99, %116 : vector<1x32xf32>
    %cst_142 = arith.constant dense<0.000000e+00> : vector<1xf32>
    %118 = vector.multi_reduction <add>, %117, %cst_142 [1] : vector<1x32xf32> to vector<1xf32>
    %119 = vector.shape_cast %118 : vector<1xf32> to vector<1x1xf32>
    %c0_143 = arith.constant 0 : index
    %c1_144 = arith.constant 1 : index
    %120 = vector.load %arg12[%c0_143, %c1_144] : memref<1x2xf32, #tpu.memory_space<vmem>>, vector<1x1xf32>
    %121 = arith.addf %119, %120 : vector<1x1xf32>
    %cst_145 = arith.constant 0.000000e+00 : f32
    %122 = vector.broadcast %cst_145 : f32 to vector<1x1xf32>
    %123 = arith.cmpf oge, %121, %122 : vector<1x1xf32>
    %124 = vector.broadcast %1 : f32 to vector<1x1xf32>
    %125 = arith.mulf %124, %121 : vector<1x1xf32>
    %126 = arith.select %123, %121, %125 : vector<1x1xi1>, vector<1x1xf32>
    %c1_146 = arith.constant 1 : index
    %c0_147 = arith.constant 0 : index
    %127 = vector.load %arg13[%c1_146, %c0_147] : memref<2x32xf32, #tpu.memory_space<vmem>>, vector<1x32xf32>
    %128 = vector.broadcast %126 : vector<1x1xf32> to vector<1x32xf32>
    %129 = arith.mulf %128, %127 : vector<1x32xf32>
    %130 = arith.addf %115, %129 : vector<1x32xf32>
    %cst_148 = arith.constant 0.000000e+00 : f32
    %131 = vector.broadcast %cst_148 : f32 to vector<1x32xf32>
    %132 = arith.subf %131, %130 : vector<1x32xf32>
    %133 = math.exp %132 : vector<1x32xf32>
    %cst_149 = arith.constant 1.000000e+00 : f32
    %134 = vector.broadcast %cst_149 : f32 to vector<1x32xf32>
    %135 = arith.addf %134, %133 : vector<1x32xf32>
    %cst_150 = arith.constant 1.000000e+00 : f32
    %136 = vector.broadcast %cst_150 : f32 to vector<1x32xf32>
    %137 = arith.divf %136, %135 : vector<1x32xf32>
    %138 = vector.broadcast %137 : vector<1x32xf32> to vector<256x32xf32>
    %139 = arith.mulf %95, %138 : vector<256x32xf32>
    %c0_151 = arith.constant 0 : index
    %c0_152 = arith.constant 0 : index
    %c0_153 = arith.constant 0 : index
    %c0_154 = arith.constant 0 : index
    %140 = vector.load %arg1[%c0_151, %c0_152, %c0_153, %c0_154] : memref<1x16x16x32xf32, #tpu.memory_space<vmem>>, vector<1x16x16x32xf32>
    %141 = vector.shape_cast %140 : vector<1x16x16x32xf32> to vector<16x16x32xf32>
    %142 = vector.shape_cast %141 : vector<16x16x32xf32> to vector<256x32xf32>
    %143 = arith.addf %139, %142 : vector<256x32xf32>
    %cst_155 = arith.constant 0.000000e+00 : f32
    %144 = vector.broadcast %cst_155 : f32 to vector<256x32xf32>
    %145 = arith.cmpf oge, %143, %144 : vector<256x32xf32>
    %146 = vector.broadcast %0 : f32 to vector<256x32xf32>
    %147 = arith.mulf %146, %143 : vector<256x32xf32>
    %148 = arith.select %145, %143, %147 : vector<256x32xi1>, vector<256x32xf32>
    %149 = vector.shape_cast %148 : vector<256x32xf32> to vector<64x128xf32>
    %c0_156 = arith.constant 0 : index
    %c0_157 = arith.constant 0 : index
    %c0_158 = arith.constant 0 : index
    %150 = vector.load %arg16[%c0_156, %c0_157, %c0_158] : memref<1x64x128xf32, #tpu.memory_space<vmem>>, vector<1x64x128xf32>
    %151 = vector.shape_cast %150 : vector<1x64x128xf32> to vector<64x128xf32>
    %152 = vector.shape_cast %149 : vector<64x128xf32> to vector<1x64x128xf32>
    tpu.vector_store %arg16[%c0_156, %c0_157, %c0_158], %152 {strides = array<i32>} : memref<1x64x128xf32, #tpu.memory_space<vmem>>, vector<1x64x128xf32>,
    return
  }
  func.func @transform_0(%arg0: i32) -> (i32, i32, i32, i32) {
    %c0_i32 = arith.constant 0 : i32
    %c0_i32_0 = arith.constant 0 : i32
    %c0_i32_1 = arith.constant 0 : i32
    %c0_i32_2 = arith.constant 0 : i32
    return %arg0, %c0_i32, %c0_i32_0, %c0_i32_1 : i32, i32, i32, i32
  }
  func.func @transform_1(%arg0: i32) -> (i32, i32) {
    %c0_i32 = arith.constant 0 : i32
    %c0_i32_0 = arith.constant 0 : i32
    %c0_i32_1 = arith.constant 0 : i32
    return %c0_i32, %c0_i32_0 : i32, i32
  }
  func.func @transform_2(%arg0: i32) -> (i32, i32) {
    %c0_i32 = arith.constant 0 : i32
    %c0_i32_0 = arith.constant 0 : i32
    %c0_i32_1 = arith.constant 0 : i32
    return %c0_i32, %c0_i32_0 : i32, i32
  }
  func.func @transform_3(%arg0: i32) -> (i32, i32, i32) {
    %c0_i32 = arith.constant 0 : i32
    %c0_i32_0 = arith.constant 0 : i32
    %c0_i32_1 = arith.constant 0 : i32
    %c0_i32_2 = arith.constant 0 : i32
    return %c0_i32, %c0_i32_0, %c0_i32_1 : i32, i32, i32
  }
  func.func @transform_4(%arg0: i32) -> (i32, i32, i32) {
    %c0_i32 = arith.constant 0 : i32
    %c0_i32_0 = arith.constant 0 : i32
    %c0_i32_1 = arith.constant 0 : i32
    %c0_i32_2 = arith.constant 0 : i32
    return %c0_i32, %c0_i32_0, %c0_i32_1 : i32, i32, i32
  }
  func.func @transform_5(%arg0: i32) -> (i32, i32) {
    %c0_i32 = arith.constant 0 : i32
    %c0_i32_0 = arith.constant 0 : i32
    %c0_i32_1 = arith.constant 0 : i32
    return %c0_i32, %c0_i32_0 : i32, i32
  }
  func.func @transform_6(%arg0: i32) -> (i32, i32) {
    %c0_i32 = arith.constant 0 : i32
    %c0_i32_0 = arith.constant 0 : i32
    %c0_i32_1 = arith.constant 0 : i32
    return %c0_i32, %c0_i32_0 : i32, i32
  }
  func.func @transform_7(%arg0: i32) -> (i32, i32) {
    %c0_i32 = arith.constant 0 : i32
    %c0_i32_0 = arith.constant 0 : i32
    %c0_i32_1 = arith.constant 0 : i32
    return %c0_i32, %c0_i32_0 : i32, i32
  }
  func.func @transform_8(%arg0: i32) -> (i32, i32) {
    %c0_i32 = arith.constant 0 : i32
    %c0_i32_0 = arith.constant 0 : i32
    %c0_i32_1 = arith.constant 0 : i32
    return %c0_i32, %c0_i32_0 : i32, i32
  }
  func.func @transform_9(%arg0: i32) -> i32 {
    %c0_i32 = arith.constant 0 : i32
    %c0_i32_0 = arith.constant 0 : i32
    return %c0_i32 : i32
  }
  func.func @transform_10(%arg0: i32) -> (i32, i32) {
    %c0_i32 = arith.constant 0 : i32
    %c0_i32_0 = arith.constant 0 : i32
    %c0_i32_1 = arith.constant 0 : i32
    return %c0_i32, %c0_i32_0 : i32, i32
  }
  func.func @transform_11(%arg0: i32) -> (i32, i32) {
    %c0_i32 = arith.constant 0 : i32
    %c0_i32_0 = arith.constant 0 : i32
    %c0_i32_1 = arith.constant 0 : i32
    return %c0_i32, %c0_i32_0 : i32, i32
  }
  func.func @transform_12(%arg0: i32) -> (i32, i32) {
    %c0_i32 = arith.constant 0 : i32
    %c0_i32_0 = arith.constant 0 : i32
    %c0_i32_1 = arith.constant 0 : i32
    return %c0_i32, %c0_i32_0 : i32, i32
  }
  func.func @transform_13(%arg0: i32) -> (i32, i32) {
    %c0_i32 = arith.constant 0 : i32
    %c0_i32_0 = arith.constant 0 : i32
    %c0_i32_1 = arith.constant 0 : i32
    return %c0_i32, %c0_i32_0 : i32, i32
  }
  func.func @transform_14(%arg0: i32) -> i32 {
    %c0_i32 = arith.constant 0 : i32
    %c0_i32_0 = arith.constant 0 : i32
    return %c0_i32 : i32
  }
  func.func @transform_15(%arg0: i32) -> (i32, i32, i32) {
    %c0_i32 = arith.constant 0 : i32
    %c0_i32_0 = arith.constant 0 : i32
    %c0_i32_1 = arith.constant 0 : i32
    return %arg0, %c0_i32, %c0_i32_0 : i32, i32, i32
  }
}

module attributes {stable_mosaic.version = 11 : i64} {
  func.func @kernel(%arg0: i32, %arg1: memref<1x16x16x32xf32, #tpu.memory_space<vmem>>, %arg2: memref<288x32xf32, #tpu.memory_space<vmem>>, %arg3: memref<288x32xf32, #tpu.memory_space<vmem>>, %arg4: memref<1x1x32xf32, #tpu.memory_space<vmem>>, %arg5: memref<1x1x32xf32, #tpu.memory_space<vmem>>, %arg6: memref<1x32xf32, #tpu.memory_space<vmem>>, %arg7: memref<1x32xf32, #tpu.memory_space<vmem>>, %arg8: memref<1x32xf32, #tpu.memory_space<vmem>>, %arg9: memref<1x32xf32, #tpu.memory_space<vmem>>, %arg10: memref<1xf32, #tpu.memory_space<smem>>, %arg11: memref<2x32xf32, #tpu.memory_space<vmem>>, %arg12: memref<1x2xf32, #tpu.memory_space<vmem>>, %arg13: memref<2x32xf32, #tpu.memory_space<vmem>>, %arg14: memref<1x32xf32, #tpu.memory_space<vmem>>, %arg15: memref<1xf32, #tpu.memory_space<smem>>, %arg16: memref<1x256x32xf32, #tpu.memory_space<vmem>>, %arg17: memref<18x18x32xf32, #tpu.memory_space<vmem>>, %arg18: memref<256x288xf32, #tpu.memory_space<vmem>>) attributes {dimension_semantics = [#tpu.dimension_semantics<parallel>], iteration_bounds = array<i64: 2>, scalar_prefetch = 0 : i64, scratch_operands = 2 : i64, tpu.core_type = #tpu.core_type<tc>, window_params = [{transform_indices = @transform_0, window_bounds = array<i64: 1, 16, 16, 32>}, {pipeline_mode = #tpu.pipeline_mode<synchronous>, transform_indices = @transform_1, window_bounds = array<i64: 288, 32>}, {pipeline_mode = #tpu.pipeline_mode<synchronous>, transform_indices = @transform_2, window_bounds = array<i64: 288, 32>}, {pipeline_mode = #tpu.pipeline_mode<synchronous>, transform_indices = @transform_3, window_bounds = array<i64: 1, 1, 32>}, {pipeline_mode = #tpu.pipeline_mode<synchronous>, transform_indices = @transform_4, window_bounds = array<i64: 1, 1, 32>}, {pipeline_mode = #tpu.pipeline_mode<synchronous>, transform_indices = @transform_5, window_bounds = array<i64: 1, 32>}, {pipeline_mode = #tpu.pipeline_mode<synchronous>, transform_indices = @transform_6, window_bounds = array<i64: 1, 32>}, {pipeline_mode = #tpu.pipeline_mode<synchronous>, transform_indices = @transform_7, window_bounds = array<i64: 1, 32>}, {pipeline_mode = #tpu.pipeline_mode<synchronous>, transform_indices = @transform_8, window_bounds = array<i64: 1, 32>}, {transform_indices = @transform_9, window_bounds = array<i64: 1>}, {pipeline_mode = #tpu.pipeline_mode<synchronous>, transform_indices = @transform_10, window_bounds = array<i64: 2, 32>}, {pipeline_mode = #tpu.pipeline_mode<synchronous>, transform_indices = @transform_11, window_bounds = array<i64: 1, 2>}, {pipeline_mode = #tpu.pipeline_mode<synchronous>, transform_indices = @transform_12, window_bounds = array<i64: 2, 32>}, {pipeline_mode = #tpu.pipeline_mode<synchronous>, transform_indices = @transform_13, window_bounds = array<i64: 1, 32>}, {transform_indices = @transform_14, window_bounds = array<i64: 1>}, {transform_indices = @transform_15, window_bounds = array<i64: 1, 256, 32>}]} {
    %c0 = arith.constant 0 : index
    %0 = memref.load %arg10[%c0] : memref<1xf32, #tpu.memory_space<smem>>
    %c0_0 = arith.constant 0 : index
    %1 = memref.load %arg15[%c0_0] : memref<1xf32, #tpu.memory_space<smem>>
    %cst = arith.constant 0.000000e+00 : f32
    %2 = vector.broadcast %cst : f32 to vector<1x18x32xf32>
    %c0_1 = arith.constant 0 : index
    %c0_2 = arith.constant 0 : index
    %c0_3 = arith.constant 0 : index
    %3 = vector.load %arg17[%c0_1, %c0_2, %c0_3] : memref<18x18x32xf32, #tpu.memory_space<vmem>>, vector<1x18x32xf32>
    tpu.vector_store %arg17[%c0_1, %c0_2, %c0_3], %2 {strides = array<i32>} : memref<18x18x32xf32, #tpu.memory_space<vmem>>, vector<1x18x32xf32>,
    %c17 = arith.constant 17 : index
    %c0_4 = arith.constant 0 : index
    %c0_5 = arith.constant 0 : index
    %4 = vector.load %arg17[%c17, %c0_4, %c0_5] : memref<18x18x32xf32, #tpu.memory_space<vmem>>, vector<1x18x32xf32>
    tpu.vector_store %arg17[%c17, %c0_4, %c0_5], %2 {strides = array<i32>} : memref<18x18x32xf32, #tpu.memory_space<vmem>>, vector<1x18x32xf32>,
    %cst_6 = arith.constant 0.000000e+00 : f32
    %5 = vector.broadcast %cst_6 : f32 to vector<16x1x32xf32>
    %c1 = arith.constant 1 : index
    %c0_7 = arith.constant 0 : index
    %c0_8 = arith.constant 0 : index
    %6 = vector.load %arg17[%c1, %c0_7, %c0_8] : memref<18x18x32xf32, #tpu.memory_space<vmem>>, vector<16x1x32xf32>
    tpu.vector_store %arg17[%c1, %c0_7, %c0_8], %5 {strides = array<i32>} : memref<18x18x32xf32, #tpu.memory_space<vmem>>, vector<16x1x32xf32>,
    %c1_9 = arith.constant 1 : index
    %c17_10 = arith.constant 17 : index
    %c0_11 = arith.constant 0 : index
    %7 = vector.load %arg17[%c1_9, %c17_10, %c0_11] : memref<18x18x32xf32, #tpu.memory_space<vmem>>, vector<16x1x32xf32>
    tpu.vector_store %arg17[%c1_9, %c17_10, %c0_11], %5 {strides = array<i32>} : memref<18x18x32xf32, #tpu.memory_space<vmem>>, vector<16x1x32xf32>,
    %c0_12 = arith.constant 0 : index
    %c0_13 = arith.constant 0 : index
    %c0_14 = arith.constant 0 : index
    %c0_15 = arith.constant 0 : index
    %8 = vector.load %arg1[%c0_12, %c0_13, %c0_14, %c0_15] : memref<1x16x16x32xf32, #tpu.memory_space<vmem>>, vector<1x16x16x32xf32>
    %9 = vector.shape_cast %8 : vector<1x16x16x32xf32> to vector<16x16x32xf32>
    %c0_16 = arith.constant 0 : index
    %c0_17 = arith.constant 0 : index
    %c0_18 = arith.constant 0 : index
    %10 = vector.load %arg4[%c0_16, %c0_17, %c0_18] : memref<1x1x32xf32, #tpu.memory_space<vmem>>, vector<1x1x32xf32>
    %11 = vector.broadcast %10 : vector<1x1x32xf32> to vector<16x16x32xf32>
    %12 = arith.mulf %9, %11 : vector<16x16x32xf32>
    %c0_19 = arith.constant 0 : index
    %c0_20 = arith.constant 0 : index
    %c0_21 = arith.constant 0 : index
    %13 = vector.load %arg5[%c0_19, %c0_20, %c0_21] : memref<1x1x32xf32, #tpu.memory_space<vmem>>, vector<1x1x32xf32>
    %14 = vector.broadcast %13 : vector<1x1x32xf32> to vector<16x16x32xf32>
    %15 = arith.addf %12, %14 : vector<16x16x32xf32>
    %c1_22 = arith.constant 1 : index
    %c1_23 = arith.constant 1 : index
    %c0_24 = arith.constant 0 : index
    %16 = vector.load %arg17[%c1_22, %c1_23, %c0_24] : memref<18x18x32xf32, #tpu.memory_space<vmem>>, vector<16x16x32xf32>
    tpu.vector_store %arg17[%c1_22, %c1_23, %c0_24], %15 {strides = array<i32>} : memref<18x18x32xf32, #tpu.memory_space<vmem>>, vector<16x16x32xf32>,
    %c0_25 = arith.constant 0 : index
    %c0_26 = arith.constant 0 : index
    %c0_27 = arith.constant 0 : index
    %17 = vector.load %arg17[%c0_25, %c0_26, %c0_27] : memref<18x18x32xf32, #tpu.memory_space<vmem>>, vector<16x16x32xf32>
    %18 = vector.shape_cast %17 : vector<16x16x32xf32> to vector<256x32xf32>
    %c0_28 = arith.constant 0 : index
    %c0_29 = arith.constant 0 : index
    %19 = vector.load %arg18[%c0_28, %c0_29] : memref<256x288xf32, #tpu.memory_space<vmem>>, vector<256x32xf32>
    tpu.vector_store %arg18[%c0_28, %c0_29], %18 {strides = array<i32>} : memref<256x288xf32, #tpu.memory_space<vmem>>, vector<256x32xf32>,
    %c0_30 = arith.constant 0 : index
    %c1_31 = arith.constant 1 : index
    %c0_32 = arith.constant 0 : index
    %20 = vector.load %arg17[%c0_30, %c1_31, %c0_32] : memref<18x18x32xf32, #tpu.memory_space<vmem>>, vector<16x16x32xf32>
    %21 = vector.shape_cast %20 : vector<16x16x32xf32> to vector<256x32xf32>
    %c0_33 = arith.constant 0 : index
    %c32 = arith.constant 32 : index
    %22 = vector.load %arg18[%c0_33, %c32] : memref<256x288xf32, #tpu.memory_space<vmem>>, vector<256x32xf32>
    tpu.vector_store %arg18[%c0_33, %c32], %21 {strides = array<i32>} : memref<256x288xf32, #tpu.memory_space<vmem>>, vector<256x32xf32>,
    %c0_34 = arith.constant 0 : index
    %c2 = arith.constant 2 : index
    %c0_35 = arith.constant 0 : index
    %23 = vector.load %arg17[%c0_34, %c2, %c0_35] : memref<18x18x32xf32, #tpu.memory_space<vmem>>, vector<16x16x32xf32>
    %24 = vector.shape_cast %23 : vector<16x16x32xf32> to vector<256x32xf32>
    %c0_36 = arith.constant 0 : index
    %c64 = arith.constant 64 : index
    %25 = vector.load %arg18[%c0_36, %c64] : memref<256x288xf32, #tpu.memory_space<vmem>>, vector<256x32xf32>
    tpu.vector_store %arg18[%c0_36, %c64], %24 {strides = array<i32>} : memref<256x288xf32, #tpu.memory_space<vmem>>, vector<256x32xf32>,
    %c1_37 = arith.constant 1 : index
    %c0_38 = arith.constant 0 : index
    %c0_39 = arith.constant 0 : index
    %26 = vector.load %arg17[%c1_37, %c0_38, %c0_39] : memref<18x18x32xf32, #tpu.memory_space<vmem>>, vector<16x16x32xf32>
    %27 = vector.shape_cast %26 : vector<16x16x32xf32> to vector<256x32xf32>
    %c0_40 = arith.constant 0 : index
    %c96 = arith.constant 96 : index
    %28 = vector.load %arg18[%c0_40, %c96] : memref<256x288xf32, #tpu.memory_space<vmem>>, vector<256x32xf32>
    tpu.vector_store %arg18[%c0_40, %c96], %27 {strides = array<i32>} : memref<256x288xf32, #tpu.memory_space<vmem>>, vector<256x32xf32>,
    %c1_41 = arith.constant 1 : index
    %c1_42 = arith.constant 1 : index
    %c0_43 = arith.constant 0 : index
    %29 = vector.load %arg17[%c1_41, %c1_42, %c0_43] : memref<18x18x32xf32, #tpu.memory_space<vmem>>, vector<16x16x32xf32>
    %30 = vector.shape_cast %29 : vector<16x16x32xf32> to vector<256x32xf32>
    %c0_44 = arith.constant 0 : index
    %c128 = arith.constant 128 : index
    %31 = vector.load %arg18[%c0_44, %c128] : memref<256x288xf32, #tpu.memory_space<vmem>>, vector<256x32xf32>
    tpu.vector_store %arg18[%c0_44, %c128], %30 {strides = array<i32>} : memref<256x288xf32, #tpu.memory_space<vmem>>, vector<256x32xf32>,
    %c1_45 = arith.constant 1 : index
    %c2_46 = arith.constant 2 : index
    %c0_47 = arith.constant 0 : index
    %32 = vector.load %arg17[%c1_45, %c2_46, %c0_47] : memref<18x18x32xf32, #tpu.memory_space<vmem>>, vector<16x16x32xf32>
    %33 = vector.shape_cast %32 : vector<16x16x32xf32> to vector<256x32xf32>
    %c0_48 = arith.constant 0 : index
    %c160 = arith.constant 160 : index
    %34 = vector.load %arg18[%c0_48, %c160] : memref<256x288xf32, #tpu.memory_space<vmem>>, vector<256x32xf32>
    tpu.vector_store %arg18[%c0_48, %c160], %33 {strides = array<i32>} : memref<256x288xf32, #tpu.memory_space<vmem>>, vector<256x32xf32>,
    %c2_49 = arith.constant 2 : index
    %c0_50 = arith.constant 0 : index
    %c0_51 = arith.constant 0 : index
    %35 = vector.load %arg17[%c2_49, %c0_50, %c0_51] : memref<18x18x32xf32, #tpu.memory_space<vmem>>, vector<16x16x32xf32>
    %36 = vector.shape_cast %35 : vector<16x16x32xf32> to vector<256x32xf32>
    %c0_52 = arith.constant 0 : index
    %c192 = arith.constant 192 : index
    %37 = vector.load %arg18[%c0_52, %c192] : memref<256x288xf32, #tpu.memory_space<vmem>>, vector<256x32xf32>
    tpu.vector_store %arg18[%c0_52, %c192], %36 {strides = array<i32>} : memref<256x288xf32, #tpu.memory_space<vmem>>, vector<256x32xf32>,
    %c2_53 = arith.constant 2 : index
    %c1_54 = arith.constant 1 : index
    %c0_55 = arith.constant 0 : index
    %38 = vector.load %arg17[%c2_53, %c1_54, %c0_55] : memref<18x18x32xf32, #tpu.memory_space<vmem>>, vector<16x16x32xf32>
    %39 = vector.shape_cast %38 : vector<16x16x32xf32> to vector<256x32xf32>
    %c0_56 = arith.constant 0 : index
    %c224 = arith.constant 224 : index
    %40 = vector.load %arg18[%c0_56, %c224] : memref<256x288xf32, #tpu.memory_space<vmem>>, vector<256x32xf32>
    tpu.vector_store %arg18[%c0_56, %c224], %39 {strides = array<i32>} : memref<256x288xf32, #tpu.memory_space<vmem>>, vector<256x32xf32>,
    %c2_57 = arith.constant 2 : index
    %c2_58 = arith.constant 2 : index
    %c0_59 = arith.constant 0 : index
    %41 = vector.load %arg17[%c2_57, %c2_58, %c0_59] : memref<18x18x32xf32, #tpu.memory_space<vmem>>, vector<16x16x32xf32>
    %42 = vector.shape_cast %41 : vector<16x16x32xf32> to vector<256x32xf32>
    %c0_60 = arith.constant 0 : index
    %c256 = arith.constant 256 : index
    %43 = vector.load %arg18[%c0_60, %c256] : memref<256x288xf32, #tpu.memory_space<vmem>>, vector<256x32xf32>
    tpu.vector_store %arg18[%c0_60, %c256], %42 {strides = array<i32>} : memref<256x288xf32, #tpu.memory_space<vmem>>, vector<256x32xf32>,
    %c0_61 = arith.constant 0 : index
    %c0_62 = arith.constant 0 : index
    %44 = vector.load %arg18[%c0_61, %c0_62] : memref<256x288xf32, #tpu.memory_space<vmem>>, vector<256x288xf32>
    %c0_63 = arith.constant 0 : index
    %c0_64 = arith.constant 0 : index
    %45 = vector.load %arg2[%c0_63, %c0_64] : memref<288x32xf32, #tpu.memory_space<vmem>>, vector<288x32xf32>
    %cst_65 = arith.constant dense<0.000000e+00> : vector<256x32xf32>
    %46 = tpu.matmul %44, %45, %cst_65 {dimension_numbers = #tpu.dot_dimension_numbers<[1], [0], [0], [1], [0, 0, 1, 1], [], []>} : vector<256x288xf32>, vector<288x32xf32>, vector<256x32xf32> -> vector<256x32xf32>
    %c0_66 = arith.constant 0 : index
    %c0_67 = arith.constant 0 : index
    %47 = vector.load %arg6[%c0_66, %c0_67] : memref<1x32xf32, #tpu.memory_space<vmem>>, vector<1x32xf32>
    %48 = vector.broadcast %47 : vector<1x32xf32> to vector<256x32xf32>
    %49 = arith.mulf %46, %48 : vector<256x32xf32>
    %c0_68 = arith.constant 0 : index
    %c0_69 = arith.constant 0 : index
    %50 = vector.load %arg7[%c0_68, %c0_69] : memref<1x32xf32, #tpu.memory_space<vmem>>, vector<1x32xf32>
    %51 = vector.broadcast %50 : vector<1x32xf32> to vector<256x32xf32>
    %52 = arith.addf %49, %51 : vector<256x32xf32>
    %cst_70 = arith.constant 0.000000e+00 : f32
    %53 = vector.broadcast %cst_70 : f32 to vector<256x32xf32>
    %54 = arith.cmpf oge, %52, %53 : vector<256x32xf32>
    %55 = vector.broadcast %0 : f32 to vector<256x32xf32>
    %56 = arith.mulf %55, %52 : vector<256x32xf32>
    %57 = arith.select %54, %52, %56 : vector<256x32xi1>, vector<256x32xf32>
    %58 = vector.shape_cast %57 : vector<256x32xf32> to vector<16x16x32xf32>
    %c1_71 = arith.constant 1 : index
    %c1_72 = arith.constant 1 : index
    %c0_73 = arith.constant 0 : index
    %59 = vector.load %arg17[%c1_71, %c1_72, %c0_73] : memref<18x18x32xf32, #tpu.memory_space<vmem>>, vector<16x16x32xf32>
    tpu.vector_store %arg17[%c1_71, %c1_72, %c0_73], %58 {strides = array<i32>} : memref<18x18x32xf32, #tpu.memory_space<vmem>>, vector<16x16x32xf32>,
    %c0_74 = arith.constant 0 : index
    %c0_75 = arith.constant 0 : index
    %c0_76 = arith.constant 0 : index
    %60 = vector.load %arg17[%c0_74, %c0_75, %c0_76] : memref<18x18x32xf32, #tpu.memory_space<vmem>>, vector<16x16x32xf32>
    %61 = vector.shape_cast %60 : vector<16x16x32xf32> to vector<256x32xf32>
    %c0_77 = arith.constant 0 : index
    %c0_78 = arith.constant 0 : index
    %62 = vector.load %arg18[%c0_77, %c0_78] : memref<256x288xf32, #tpu.memory_space<vmem>>, vector<256x32xf32>
    tpu.vector_store %arg18[%c0_77, %c0_78], %61 {strides = array<i32>} : memref<256x288xf32, #tpu.memory_space<vmem>>, vector<256x32xf32>,
    %c0_79 = arith.constant 0 : index
    %c1_80 = arith.constant 1 : index
    %c0_81 = arith.constant 0 : index
    %63 = vector.load %arg17[%c0_79, %c1_80, %c0_81] : memref<18x18x32xf32, #tpu.memory_space<vmem>>, vector<16x16x32xf32>
    %64 = vector.shape_cast %63 : vector<16x16x32xf32> to vector<256x32xf32>
    %c0_82 = arith.constant 0 : index
    %c32_83 = arith.constant 32 : index
    %65 = vector.load %arg18[%c0_82, %c32_83] : memref<256x288xf32, #tpu.memory_space<vmem>>, vector<256x32xf32>
    tpu.vector_store %arg18[%c0_82, %c32_83], %64 {strides = array<i32>} : memref<256x288xf32, #tpu.memory_space<vmem>>, vector<256x32xf32>,
    %c0_84 = arith.constant 0 : index
    %c2_85 = arith.constant 2 : index
    %c0_86 = arith.constant 0 : index
    %66 = vector.load %arg17[%c0_84, %c2_85, %c0_86] : memref<18x18x32xf32, #tpu.memory_space<vmem>>, vector<16x16x32xf32>
    %67 = vector.shape_cast %66 : vector<16x16x32xf32> to vector<256x32xf32>
    %c0_87 = arith.constant 0 : index
    %c64_88 = arith.constant 64 : index
    %68 = vector.load %arg18[%c0_87, %c64_88] : memref<256x288xf32, #tpu.memory_space<vmem>>, vector<256x32xf32>
    tpu.vector_store %arg18[%c0_87, %c64_88], %67 {strides = array<i32>} : memref<256x288xf32, #tpu.memory_space<vmem>>, vector<256x32xf32>,
    %c1_89 = arith.constant 1 : index
    %c0_90 = arith.constant 0 : index
    %c0_91 = arith.constant 0 : index
    %69 = vector.load %arg17[%c1_89, %c0_90, %c0_91] : memref<18x18x32xf32, #tpu.memory_space<vmem>>, vector<16x16x32xf32>
    %70 = vector.shape_cast %69 : vector<16x16x32xf32> to vector<256x32xf32>
    %c0_92 = arith.constant 0 : index
    %c96_93 = arith.constant 96 : index
    %71 = vector.load %arg18[%c0_92, %c96_93] : memref<256x288xf32, #tpu.memory_space<vmem>>, vector<256x32xf32>
    tpu.vector_store %arg18[%c0_92, %c96_93], %70 {strides = array<i32>} : memref<256x288xf32, #tpu.memory_space<vmem>>, vector<256x32xf32>,
    %c1_94 = arith.constant 1 : index
    %c1_95 = arith.constant 1 : index
    %c0_96 = arith.constant 0 : index
    %72 = vector.load %arg17[%c1_94, %c1_95, %c0_96] : memref<18x18x32xf32, #tpu.memory_space<vmem>>, vector<16x16x32xf32>
    %73 = vector.shape_cast %72 : vector<16x16x32xf32> to vector<256x32xf32>
    %c0_97 = arith.constant 0 : index
    %c128_98 = arith.constant 128 : index
    %74 = vector.load %arg18[%c0_97, %c128_98] : memref<256x288xf32, #tpu.memory_space<vmem>>, vector<256x32xf32>
    tpu.vector_store %arg18[%c0_97, %c128_98], %73 {strides = array<i32>} : memref<256x288xf32, #tpu.memory_space<vmem>>, vector<256x32xf32>,
    %c1_99 = arith.constant 1 : index
    %c2_100 = arith.constant 2 : index
    %c0_101 = arith.constant 0 : index
    %75 = vector.load %arg17[%c1_99, %c2_100, %c0_101] : memref<18x18x32xf32, #tpu.memory_space<vmem>>, vector<16x16x32xf32>
    %76 = vector.shape_cast %75 : vector<16x16x32xf32> to vector<256x32xf32>
    %c0_102 = arith.constant 0 : index
    %c160_103 = arith.constant 160 : index
    %77 = vector.load %arg18[%c0_102, %c160_103] : memref<256x288xf32, #tpu.memory_space<vmem>>, vector<256x32xf32>
    tpu.vector_store %arg18[%c0_102, %c160_103], %76 {strides = array<i32>} : memref<256x288xf32, #tpu.memory_space<vmem>>, vector<256x32xf32>,
    %c2_104 = arith.constant 2 : index
    %c0_105 = arith.constant 0 : index
    %c0_106 = arith.constant 0 : index
    %78 = vector.load %arg17[%c2_104, %c0_105, %c0_106] : memref<18x18x32xf32, #tpu.memory_space<vmem>>, vector<16x16x32xf32>
    %79 = vector.shape_cast %78 : vector<16x16x32xf32> to vector<256x32xf32>
    %c0_107 = arith.constant 0 : index
    %c192_108 = arith.constant 192 : index
    %80 = vector.load %arg18[%c0_107, %c192_108] : memref<256x288xf32, #tpu.memory_space<vmem>>, vector<256x32xf32>
    tpu.vector_store %arg18[%c0_107, %c192_108], %79 {strides = array<i32>} : memref<256x288xf32, #tpu.memory_space<vmem>>, vector<256x32xf32>,
    %c2_109 = arith.constant 2 : index
    %c1_110 = arith.constant 1 : index
    %c0_111 = arith.constant 0 : index
    %81 = vector.load %arg17[%c2_109, %c1_110, %c0_111] : memref<18x18x32xf32, #tpu.memory_space<vmem>>, vector<16x16x32xf32>
    %82 = vector.shape_cast %81 : vector<16x16x32xf32> to vector<256x32xf32>
    %c0_112 = arith.constant 0 : index
    %c224_113 = arith.constant 224 : index
    %83 = vector.load %arg18[%c0_112, %c224_113] : memref<256x288xf32, #tpu.memory_space<vmem>>, vector<256x32xf32>
    tpu.vector_store %arg18[%c0_112, %c224_113], %82 {strides = array<i32>} : memref<256x288xf32, #tpu.memory_space<vmem>>, vector<256x32xf32>,
    %c2_114 = arith.constant 2 : index
    %c2_115 = arith.constant 2 : index
    %c0_116 = arith.constant 0 : index
    %84 = vector.load %arg17[%c2_114, %c2_115, %c0_116] : memref<18x18x32xf32, #tpu.memory_space<vmem>>, vector<16x16x32xf32>
    %85 = vector.shape_cast %84 : vector<16x16x32xf32> to vector<256x32xf32>
    %c0_117 = arith.constant 0 : index
    %c256_118 = arith.constant 256 : index
    %86 = vector.load %arg18[%c0_117, %c256_118] : memref<256x288xf32, #tpu.memory_space<vmem>>, vector<256x32xf32>
    tpu.vector_store %arg18[%c0_117, %c256_118], %85 {strides = array<i32>} : memref<256x288xf32, #tpu.memory_space<vmem>>, vector<256x32xf32>,
    %c0_119 = arith.constant 0 : index
    %c0_120 = arith.constant 0 : index
    %87 = vector.load %arg18[%c0_119, %c0_120] : memref<256x288xf32, #tpu.memory_space<vmem>>, vector<256x288xf32>
    %c0_121 = arith.constant 0 : index
    %c0_122 = arith.constant 0 : index
    %88 = vector.load %arg3[%c0_121, %c0_122] : memref<288x32xf32, #tpu.memory_space<vmem>>, vector<288x32xf32>
    %cst_123 = arith.constant dense<0.000000e+00> : vector<256x32xf32>
    %89 = tpu.matmul %87, %88, %cst_123 {dimension_numbers = #tpu.dot_dimension_numbers<[1], [0], [0], [1], [0, 0, 1, 1], [], []>} : vector<256x288xf32>, vector<288x32xf32>, vector<256x32xf32> -> vector<256x32xf32>
    %c0_124 = arith.constant 0 : index
    %c0_125 = arith.constant 0 : index
    %90 = vector.load %arg8[%c0_124, %c0_125] : memref<1x32xf32, #tpu.memory_space<vmem>>, vector<1x32xf32>
    %91 = vector.broadcast %90 : vector<1x32xf32> to vector<256x32xf32>
    %92 = arith.mulf %89, %91 : vector<256x32xf32>
    %c0_126 = arith.constant 0 : index
    %c0_127 = arith.constant 0 : index
    %93 = vector.load %arg9[%c0_126, %c0_127] : memref<1x32xf32, #tpu.memory_space<vmem>>, vector<1x32xf32>
    %94 = vector.broadcast %93 : vector<1x32xf32> to vector<256x32xf32>
    %95 = arith.addf %92, %94 : vector<256x32xf32>
    %cst_128 = arith.constant dense<0.000000e+00> : vector<32xf32>
    %96 = vector.multi_reduction <add>, %95, %cst_128 [0] : vector<256x32xf32> to vector<32xf32>
    %97 = vector.shape_cast %96 : vector<32xf32> to vector<1x32xf32>
    %cst_129 = arith.constant 3.906250e-03 : f32
    %98 = vector.broadcast %cst_129 : f32 to vector<1x32xf32>
    %99 = arith.mulf %97, %98 : vector<1x32xf32>
    %c0_130 = arith.constant 0 : index
    %c0_131 = arith.constant 0 : index
    %100 = vector.load %arg14[%c0_130, %c0_131] : memref<1x32xf32, #tpu.memory_space<vmem>>, vector<1x32xf32>
    %c0_132 = arith.constant 0 : index
    %c0_133 = arith.constant 0 : index
    %101 = vector.load %arg11[%c0_132, %c0_133] : memref<2x32xf32, #tpu.memory_space<vmem>>, vector<1x32xf32>
    %102 = arith.mulf %99, %101 : vector<1x32xf32>
    %cst_134 = arith.constant dense<0.000000e+00> : vector<1xf32>
    %103 = vector.multi_reduction <add>, %102, %cst_134 [1] : vector<1x32xf32> to vector<1xf32>
    %104 = vector.shape_cast %103 : vector<1xf32> to vector<1x1xf32>
    %c0_135 = arith.constant 0 : index
    %c0_136 = arith.constant 0 : index
    %105 = vector.load %arg12[%c0_135, %c0_136] : memref<1x2xf32, #tpu.memory_space<vmem>>, vector<1x1xf32>
    %106 = arith.addf %104, %105 : vector<1x1xf32>
    %cst_137 = arith.constant 0.000000e+00 : f32
    %107 = vector.broadcast %cst_137 : f32 to vector<1x1xf32>
    %108 = arith.cmpf oge, %106, %107 : vector<1x1xf32>
    %109 = vector.broadcast %1 : f32 to vector<1x1xf32>
    %110 = arith.mulf %109, %106 : vector<1x1xf32>
    %111 = arith.select %108, %106, %110 : vector<1x1xi1>, vector<1x1xf32>
    %c0_138 = arith.constant 0 : index
    %c0_139 = arith.constant 0 : index
    %112 = vector.load %arg13[%c0_138, %c0_139] : memref<2x32xf32, #tpu.memory_space<vmem>>, vector<1x32xf32>
    %113 = vector.broadcast %111 : vector<1x1xf32> to vector<1x32xf32>
    %114 = arith.mulf %113, %112 : vector<1x32xf32>
    %115 = arith.addf %100, %114 : vector<1x32xf32>
    %c1_140 = arith.constant 1 : index
    %c0_141 = arith.constant 0 : index
    %116 = vector.load %arg11[%c1_140, %c0_141] : memref<2x32xf32, #tpu.memory_space<vmem>>, vector<1x32xf32>
    %117 = arith.mulf %99, %116 : vector<1x32xf32>
    %cst_142 = arith.constant dense<0.000000e+00> : vector<1xf32>
    %118 = vector.multi_reduction <add>, %117, %cst_142 [1] : vector<1x32xf32> to vector<1xf32>
    %119 = vector.shape_cast %118 : vector<1xf32> to vector<1x1xf32>
    %c0_143 = arith.constant 0 : index
    %c1_144 = arith.constant 1 : index
    %120 = vector.load %arg12[%c0_143, %c1_144] : memref<1x2xf32, #tpu.memory_space<vmem>>, vector<1x1xf32>
    %121 = arith.addf %119, %120 : vector<1x1xf32>
    %cst_145 = arith.constant 0.000000e+00 : f32
    %122 = vector.broadcast %cst_145 : f32 to vector<1x1xf32>
    %123 = arith.cmpf oge, %121, %122 : vector<1x1xf32>
    %124 = vector.broadcast %1 : f32 to vector<1x1xf32>
    %125 = arith.mulf %124, %121 : vector<1x1xf32>
    %126 = arith.select %123, %121, %125 : vector<1x1xi1>, vector<1x1xf32>
    %c1_146 = arith.constant 1 : index
    %c0_147 = arith.constant 0 : index
    %127 = vector.load %arg13[%c1_146, %c0_147] : memref<2x32xf32, #tpu.memory_space<vmem>>, vector<1x32xf32>
    %128 = vector.broadcast %126 : vector<1x1xf32> to vector<1x32xf32>
    %129 = arith.mulf %128, %127 : vector<1x32xf32>
    %130 = arith.addf %115, %129 : vector<1x32xf32>
    %cst_148 = arith.constant 0.000000e+00 : f32
    %131 = vector.broadcast %cst_148 : f32 to vector<1x32xf32>
    %132 = arith.subf %131, %130 : vector<1x32xf32>
    %133 = math.exp %132 : vector<1x32xf32>
    %cst_149 = arith.constant 1.000000e+00 : f32
    %134 = vector.broadcast %cst_149 : f32 to vector<1x32xf32>
    %135 = arith.addf %134, %133 : vector<1x32xf32>
    %cst_150 = arith.constant 1.000000e+00 : f32
    %136 = vector.broadcast %cst_150 : f32 to vector<1x32xf32>
    %137 = arith.divf %136, %135 : vector<1x32xf32>
    %138 = vector.broadcast %137 : vector<1x32xf32> to vector<256x32xf32>
    %139 = arith.mulf %95, %138 : vector<256x32xf32>
    %c0_151 = arith.constant 0 : index
    %c0_152 = arith.constant 0 : index
    %c0_153 = arith.constant 0 : index
    %c0_154 = arith.constant 0 : index
    %140 = vector.load %arg1[%c0_151, %c0_152, %c0_153, %c0_154] : memref<1x16x16x32xf32, #tpu.memory_space<vmem>>, vector<1x16x16x32xf32>
    %141 = vector.shape_cast %140 : vector<1x16x16x32xf32> to vector<16x16x32xf32>
    %142 = vector.shape_cast %141 : vector<16x16x32xf32> to vector<256x32xf32>
    %143 = arith.addf %139, %142 : vector<256x32xf32>
    %cst_155 = arith.constant 0.000000e+00 : f32
    %144 = vector.broadcast %cst_155 : f32 to vector<256x32xf32>
    %145 = arith.cmpf oge, %143, %144 : vector<256x32xf32>
    %146 = vector.broadcast %0 : f32 to vector<256x32xf32>
    %147 = arith.mulf %146, %143 : vector<256x32xf32>
    %148 = arith.select %145, %143, %147 : vector<256x32xi1>, vector<256x32xf32>
    %c0_156 = arith.constant 0 : index
    %c0_157 = arith.constant 0 : index
    %c0_158 = arith.constant 0 : index
    %149 = vector.load %arg16[%c0_156, %c0_157, %c0_158] : memref<1x256x32xf32, #tpu.memory_space<vmem>>, vector<1x256x32xf32>
    %150 = vector.shape_cast %149 : vector<1x256x32xf32> to vector<256x32xf32>
    %151 = vector.shape_cast %148 : vector<256x32xf32> to vector<1x256x32xf32>
    tpu.vector_store %arg16[%c0_156, %c0_157, %c0_158], %151 {strides = array<i32>} : memref<1x256x32xf32, #tpu.memory_space<vmem>>, vector<1x256x32xf32>,
    return
  }
  func.func @transform_0(%arg0: i32) -> (i32, i32, i32, i32) {
    %c0_i32 = arith.constant 0 : i32
    %c0_i32_0 = arith.constant 0 : i32
    %c0_i32_1 = arith.constant 0 : i32
    %c0_i32_2 = arith.constant 0 : i32
    return %arg0, %c0_i32, %c0_i32_0, %c0_i32_1 : i32, i32, i32, i32
  }
  func.func @transform_1(%arg0: i32) -> (i32, i32) {
    %c0_i32 = arith.constant 0 : i32
    %c0_i32_0 = arith.constant 0 : i32
    %c0_i32_1 = arith.constant 0 : i32
    return %c0_i32, %c0_i32_0 : i32, i32
  }
  func.func @transform_2(%arg0: i32) -> (i32, i32) {
    %c0_i32 = arith.constant 0 : i32
    %c0_i32_0 = arith.constant 0 : i32
    %c0_i32_1 = arith.constant 0 : i32
    return %c0_i32, %c0_i32_0 : i32, i32
  }
  func.func @transform_3(%arg0: i32) -> (i32, i32, i32) {
    %c0_i32 = arith.constant 0 : i32
    %c0_i32_0 = arith.constant 0 : i32
    %c0_i32_1 = arith.constant 0 : i32
    %c0_i32_2 = arith.constant 0 : i32
    return %c0_i32, %c0_i32_0, %c0_i32_1 : i32, i32, i32
  }
  func.func @transform_4(%arg0: i32) -> (i32, i32, i32) {
    %c0_i32 = arith.constant 0 : i32
    %c0_i32_0 = arith.constant 0 : i32
    %c0_i32_1 = arith.constant 0 : i32
    %c0_i32_2 = arith.constant 0 : i32
    return %c0_i32, %c0_i32_0, %c0_i32_1 : i32, i32, i32
  }
  func.func @transform_5(%arg0: i32) -> (i32, i32) {
    %c0_i32 = arith.constant 0 : i32
    %c0_i32_0 = arith.constant 0 : i32
    %c0_i32_1 = arith.constant 0 : i32
    return %c0_i32, %c0_i32_0 : i32, i32
  }
  func.func @transform_6(%arg0: i32) -> (i32, i32) {
    %c0_i32 = arith.constant 0 : i32
    %c0_i32_0 = arith.constant 0 : i32
    %c0_i32_1 = arith.constant 0 : i32
    return %c0_i32, %c0_i32_0 : i32, i32
  }
  func.func @transform_7(%arg0: i32) -> (i32, i32) {
    %c0_i32 = arith.constant 0 : i32
    %c0_i32_0 = arith.constant 0 : i32
    %c0_i32_1 = arith.constant 0 : i32
    return %c0_i32, %c0_i32_0 : i32, i32
  }
  func.func @transform_8(%arg0: i32) -> (i32, i32) {
    %c0_i32 = arith.constant 0 : i32
    %c0_i32_0 = arith.constant 0 : i32
    %c0_i32_1 = arith.constant 0 : i32
    return %c0_i32, %c0_i32_0 : i32, i32
  }
  func.func @transform_9(%arg0: i32) -> i32 {
    %c0_i32 = arith.constant 0 : i32
    %c0_i32_0 = arith.constant 0 : i32
    return %c0_i32 : i32
  }
  func.func @transform_10(%arg0: i32) -> (i32, i32) {
    %c0_i32 = arith.constant 0 : i32
    %c0_i32_0 = arith.constant 0 : i32
    %c0_i32_1 = arith.constant 0 : i32
    return %c0_i32, %c0_i32_0 : i32, i32
  }
  func.func @transform_11(%arg0: i32) -> (i32, i32) {
    %c0_i32 = arith.constant 0 : i32
    %c0_i32_0 = arith.constant 0 : i32
    %c0_i32_1 = arith.constant 0 : i32
    return %c0_i32, %c0_i32_0 : i32, i32
  }
  func.func @transform_12(%arg0: i32) -> (i32, i32) {
    %c0_i32 = arith.constant 0 : i32
    %c0_i32_0 = arith.constant 0 : i32
    %c0_i32_1 = arith.constant 0 : i32
    return %c0_i32, %c0_i32_0 : i32, i32
  }
  func.func @transform_13(%arg0: i32) -> (i32, i32) {
    %c0_i32 = arith.constant 0 : i32
    %c0_i32_0 = arith.constant 0 : i32
    %c0_i32_1 = arith.constant 0 : i32
    return %c0_i32, %c0_i32_0 : i32, i32
  }
  func.func @transform_14(%arg0: i32) -> i32 {
    %c0_i32 = arith.constant 0 : i32
    %c0_i32_0 = arith.constant 0 : i32
    return %c0_i32 : i32
  }
  func.func @transform_15(%arg0: i32) -> (i32, i32, i32) {
    %c0_i32 = arith.constant 0 : i32
    %c0_i32_0 = arith.constant 0 : i32
    %c0_i32_1 = arith.constant 0 : i32
    return %arg0, %c0_i32, %c0_i32_0 : i32, i32, i32
  }
}

</mosaic_0001>

<bundles_post_ra>
// kernel: tpu_custom_call.1
= control target key start
LH: loop header
LB: loop body
LE: loop exit
PB: predicated region body
PF: predicated region fallthrough
CT: control target
= control target key end

     0   :  { %s5934_s22 = smov 0   ;;  %s9249_s0 = inlined_call_operand.vmem [shape: f32[2,16,16,32], index: 0, kind: input, shape index: {}]   ;;  %s9250_s1 = inlined_call_operand.vmem [shape: f32[288,32], index: 1, kind: input, shape index: {}]   ;;  %s9251_s2 = inlined_call_operand.vmem [shape: f32[288,32], index: 2, kind: input, shape index: {}]   ;;  %s9252_s3 = inlined_call_operand.vmem [shape: f32[1,1,32], index: 3, kind: input, shape index: {}]   ;;  %s9253_s4 = inlined_call_operand.vmem [shape: f32[1,1,32], index: 4, kind: input, shape index: {}]   ;;  %s9254_s5 = inlined_call_operand.vmem [shape: f32[1,32], index: 5, kind: input, shape index: {}]   ;;  %s9255_s6 = inlined_call_operand.vmem [shape: f32[1,32], index: 6, kind: input, shape index: {}]   ;;  %s9256_s7 = inlined_call_operand.vmem [shape: f32[1,32], index: 7, kind: input, shape index: {}]   ;;  %s9257_s8 = inlined_call_operand.vmem [shape: f32[1,32], index: 8, kind: input, shape index: {}]   ;;  %s9258_s9 = inlined_call_operand.<no memory space> [shape: f32[1], index: 9, kind: input, shape index: {}]   ;;  %s9259_s10 = inlined_call_operand.vmem [shape: f32[2,32], index: 10, kind: input, shape index: {}]   ;;  %s9260_s11 = inlined_call_operand.vmem [shape: f32[1,2], index: 11, kind: input, shape index: {}]   ;;  %s9261_s12 = inlined_call_operand.vmem [shape: f32[2,32], index: 12, kind: input, shape index: {}]   ;;  %s9262_s13 = inlined_call_operand.vmem [shape: f32[1,32], index: 13, kind: input, shape index: {}]   ;;  %s9263_s14 = inlined_call_operand.<no memory space> [shape: f32[1], index: 14, kind: input, shape index: {}]   ;;  %s9264_s15 = inlined_call_operand.vmem [shape: f32[2,256,32], index: 15, kind: output, shape index: {}]  }
   0x1   :  { %20 = sst [smem:[#allocation4]] %s9258_s9 }
   0x2   :  { %21 = sst [smem:[#allocation5]] %s9263_s14 }
   0x3 LB: > { %s5423_s23 = sadd.s32 4294967295, %s5839_s22   ;;  %p5427_p0 = scmp.ge.s32.totalorder %s5839_s22, 1  ;;  %s5839_s22 = sphi %s5934_s22, %s27_s22  }
   0x4   : > { %p439_p1 = scmp.lt.s32.totalorder %s5839_s22, 3 }
   0x6   : > { %p440_p2 = pnand %p5427_p0, %p439_p1 }
   0x8   : > { %443 = sbr.rel (%p440_p2) target bundleno = 1575 (0x627), region = 80 }
   0xf   : > { %vm9265_vm0 = vcmask 261120   ;;  %vm502_vm1 = vcmask 254976   ;;  %vm509_vm2 = vcmask 253952   ;;  %v5841_v0 = vmov 0.0   ;;  %p5948_p3 = scmp.lt.s32.totalorder %s5423_s23, 1  ;;  %v2128_v1 = vld [vmem:[%s9250_s1] sm:$0xff] }
  0x10   : > { %500 = vst.msk [vmem:[#allocation2] sm:$0xff] %vm9265_vm0, %v5841_v0  ;;  %501 = vst.msk [vmem:[#allocation2 + $0x8] sm:$0xff] %vm9265_vm0, %v5841_v0  ;;  %v2129_v2 = vld [vmem:[%s9250_s1 + $0x8] sm:$0xff]  ;;  %v5842_v3 = vmov 0.0|0.0   ;;  %v2130_v5 = vld [vmem:[%s9250_s1 + $0x10] sm:$0xff]  ;;  %s5843_s28 = smov 64  }
  0x11   : > { %505 = vst.msk [vmem:[#allocation2 + $0x198] sm:$0xff] %vm9265_vm0, %v5841_v0  ;;  %506 = vst.msk [vmem:[#allocation2 + $0x1a0] sm:$0xff] %vm9265_vm0, %v5841_v0  ;;  %s9335_s23 = smov (!%p5948_p3, %s5423_s23), 1  ;;  %5690 = vmatprep.subr.bf16.mxu0 %v5842_v3  ;;  %v5691_v4 = vpack.c.bf16 %v2129_v2, %v2128_v1  ;;  %v2131_v6 = vld [vmem:[%s9250_s1 + $0x18] sm:$0xff]  ;;  %v6007_v7 = vld [vmem:[%s9252_s3] ss:$0 sm:$0xff] }
  0x12   : > { %503 = vst.msk [vmem:[#allocation2 + $0x10] sm:$0x3] %vm502_vm1, %v5841_v0  ;;  %507 = vst.msk [vmem:[#allocation2 + $0x1a8] sm:$0x3] %vm502_vm1, %v5841_v0  ;;  %s5504_s16 = sshll.u32 %s9335_s23, 8  ;;  %v5694_v9 = vpack.c.bf16 %v2131_v6, %v2130_v5  ;;  %v2132_v10 = vld [vmem:[%s9250_s1 + $0x20] sm:$0xff] }
  0x13   : > { %511 = vst.msk [vmem:[#allocation2 + $0x30] sm:$0x1] %vm509_vm2, %v5841_v0  ;;  %510 = vst.msk [vmem:[#allocation2 + $0x18] sm:$0x1] %vm509_vm2, %v5841_v0  ;;  %5692 = vmatpush1.bf16.msra.mxu0 %v5691_v4  ;;  %s6014_s21 = scalar_lea.vmem %s9249_s0, %s5504_s16  ;;  %v6019_v8 = vld [vmem:[%s9253_s4] ss:$0 sm:$0xff]  ;;  %s9068_s18 = scalar_lea.vmem %s9264_s15, %s5504_s16 }
  0x14   : > { %512 = vst.msk [vmem:[#allocation2 + $0x48] sm:$0x1] %vm509_vm2, %v5841_v0  ;;  %513 = vst.msk [vmem:[#allocation2 + $0x60] sm:$0x1] %vm509_vm2, %v5841_v0  ;;  %5693 = vmatprep.subr.bf16.mxu0 %v5842_v3  ;;  %v2133_v11 = vld [vmem:[%s9250_s1 + $0x28] sm:$0xff]  ;;  %v542_v12 = vld [vmem:[%s6014_s21] sm:$0xff] }
  0x15   : > { %514 = vst.msk [vmem:[#allocation2 + $0x78] sm:$0x1] %vm509_vm2, %v5841_v0  ;;  %515 = vst.msk [vmem:[#allocation2 + $0x90] sm:$0x1] %vm509_vm2, %v5841_v0  ;;  %v543_v13 = vld [vmem:[%s6014_s21 + $0x8] sm:$0xff]  ;;  %v544_v14 = vld [vmem:[%s6014_s21 + $0x10] sm:$0xff]  ;;  %v581_v17 = vmul.f32 %v6007_v7, %v542_v12  ;;  %v5697_v23 = vpack.c.bf16 %v2133_v11, %v2132_v10 }
  0x16   : > { %516 = vst.msk [vmem:[#allocation2 + $0xa8] sm:$0x1] %vm509_vm2, %v5841_v0  ;;  %517 = vst.msk [vmem:[#allocation2 + $0xc0] sm:$0x1] %vm509_vm2, %v5841_v0  ;;  %v582_v18 = vmul.f32 %v6007_v7, %v543_v13  ;;  %v583_v19 = vmul.f32 %v6007_v7, %v544_v14  ;;  %s5844_s29 = smov 32   ;;  %v545_v21 = vld [vmem:[%s6014_s21 + $0x18] sm:$0xff] }
  0x17   : > { %518 = vst.msk [vmem:[#allocation2 + $0xd8] sm:$0x1] %vm509_vm2, %v5841_v0  ;;  %519 = vst.msk [vmem:[#allocation2 + $0xf0] sm:$0x1] %vm509_vm2, %v5841_v0  ;;  %v941_v15 = vld [vmem:[#allocation2 + $0x2] sm:$0xff]  ;;  %v2134_v24 = vld [vmem:[%s9250_s1 + $0x30] sm:$0xff]  ;;  %v620_v26 = vadd.f32 %v6019_v8, %v581_v17  ;;  %v584_v29 = vmul.f32 %v6007_v7, %v545_v21  ;;  %5695 = vmatpush1.bf16.msra.mxu0 %v5694_v9 }
  0x18   : > { %520 = vst.msk [vmem:[#allocation2 + $0x108] sm:$0x1] %vm509_vm2, %v5841_v0  ;;  %521 = vst.msk [vmem:[#allocation2 + $0x120] sm:$0x1] %vm509_vm2, %v5841_v0  ;;  %v748_v16 = vld [vmem:[#allocation2 + $0x1] sm:$0xff]  ;;  %1005 = vrot.lane.b32.xlu1 %v941_v15, %s5843_s28  ;;  %v2135_v25 = vld [vmem:[%s9250_s1 + $0x38] sm:$0xff]  ;;  %v621_v27 = vadd.f32 %v6019_v8, %v582_v18  ;;  %v622_v28 = vadd.f32 %v6019_v8, %v583_v19  ;;  %5696 = vmatprep.subr.bf16.mxu0 %v5842_v3 }
  0x19   : > { %522 = vst.msk [vmem:[#allocation2 + $0x138] sm:$0x1] %vm509_vm2, %v5841_v0  ;;  %523 = vst.msk [vmem:[#allocation2 + $0x150] sm:$0x1] %vm509_vm2, %v5841_v0  ;;  %v749_v20 = vld [vmem:[#allocation2 + $0x9] sm:$0xff]  ;;  %812 = vrot.lane.b32.xlu0 %v748_v16, %s5844_s29  ;;  %v546_v22 = vld [vmem:[%s6014_s21 + $0x20] sm:$0xff]  ;;  %v623_v40 = vadd.f32 %v6019_v8, %v584_v29  ;;  %v5700_v51 = vpack.c.bf16 %v2135_v25, %v2134_v24 }
  0x1a   : > { %524 = vst.msk [vmem:[#allocation2 + $0x168] sm:$0x1] %vm509_vm2, %v5841_v0  ;;  %525 = vst.msk [vmem:[#allocation2 + $0x180] sm:$0x1] %vm509_vm2, %v5841_v0  ;;  %v547_v30 = vld [vmem:[%s6014_s21 + $0x28] sm:$0xff]  ;;  %v548_v31 = vld [vmem:[%s6014_s21 + $0x30] sm:$0xff]  ;;  %v585_v33 = vmul.f32 %v6007_v7, %v546_v22 }
  0x1b   : > { %526 = vst.msk [vmem:[#allocation2 + $0x29] sm:$0x1] %vm509_vm2, %v5841_v0  ;;  %527 = vst.msk [vmem:[#allocation2 + $0x41] sm:$0x1] %vm509_vm2, %v5841_v0  ;;  %v549_v32 = vld [vmem:[%s6014_s21 + $0x38] sm:$0xff]  ;;  %v586_v34 = vmul.f32 %v6007_v7, %v547_v30  ;;  %v587_v35 = vmul.f32 %v6007_v7, %v548_v31  ;;  %v550_v37 = vld [vmem:[%s6014_s21 + $0x40] sm:$0xff]  ;;  %5698 = vmatpush1.bf16.msra.mxu0 %v5697_v23 }
  0x1c   : > { %528 = vst.msk [vmem:[#allocation2 + $0x59] sm:$0x1] %vm509_vm2, %v5841_v0  ;;  %529 = vst.msk [vmem:[#allocation2 + $0x71] sm:$0x1] %vm509_vm2, %v5841_v0  ;;  %v588_v36 = vmul.f32 %v6007_v7, %v549_v32  ;;  %v551_v38 = vld [vmem:[%s6014_s21 + $0x48] sm:$0xff]  ;;  %v552_v39 = vld [vmem:[%s6014_s21 + $0x50] sm:$0xff]  ;;  %v589_v41 = vmul.f32 %v6007_v7, %v550_v37  ;;  %814 = vrot.lane.b32.xlu1 %v749_v20, %s5844_s29  ;;  %v624_v44 = vadd.f32 %v6019_v8, %v585_v33 }
  0x1d   : > { %530 = vst.msk [vmem:[#allocation2 + $0x89] sm:$0x1] %vm509_vm2, %v5841_v0  ;;  %531 = vst.msk [vmem:[#allocation2 + $0xa1] sm:$0x1] %vm509_vm2, %v5841_v0  ;;  %v590_v42 = vmul.f32 %v6007_v7, %v551_v38  ;;  %v591_v43 = vmul.f32 %v6007_v7, %v552_v39  ;;  %v625_v45 = vadd.f32 %v6019_v8, %v586_v34  ;;  %v685_v48 = vld [vmem:[#allocation2 + $0x8] sm:$0xff]  ;;  %v553_v54 = vld [vmem:[%s6014_s21 + $0x58] sm:$0xff]  ;;  %5699 = vmatprep.subr.bf16.mxu0 %v5842_v3 }
  0x1e   : > { %532 = vst.msk [vmem:[#allocation2 + $0xb9] sm:$0x1] %vm509_vm2, %v5841_v0  ;;  %533 = vst.msk [vmem:[#allocation2 + $0xd1] sm:$0x1] %vm509_vm2, %v5841_v0  ;;  %v626_v46 = vadd.f32 %v6019_v8, %v587_v35  ;;  %v627_v47 = vadd.f32 %v6019_v8, %v588_v36  ;;  %v942_v49 = vld [vmem:[#allocation2 + $0xa] sm:$0xff]  ;;  %v628_v50 = vadd.f32 %v6019_v8, %v589_v41  ;;  %v684_v55 = vld [vmem:[#allocation2] sm:$0xff] }
  0x1f   : > { %534 = vst.msk [vmem:[#allocation2 + $0xe9] sm:$0x1] %vm509_vm2, %v5841_v0  ;;  %535 = vst.msk [vmem:[#allocation2 + $0x101] sm:$0x1] %vm509_vm2, %v5841_v0  ;;  %v629_v52 = vadd.f32 %v6019_v8, %v590_v42  ;;  %v630_v53 = vadd.f32 %v6019_v8, %v591_v43  ;;  %v2136_v56 = vld [vmem:[%s9250_s1 + $0x40] sm:$0xff]  ;;  %v2137_v57 = vld [vmem:[%s9250_s1 + $0x48] sm:$0xff]  ;;  %v592_v58 = vmul.f32 %v6007_v7, %v553_v54  ;;  %5701 = vmatpush1.bf16.msra.mxu0 %v5700_v51 }
  0x20   : > { %536 = vst.msk [vmem:[#allocation2 + $0x119] sm:$0x1] %vm509_vm2, %v5841_v0  ;;  %537 = vst.msk [vmem:[#allocation2 + $0x131] sm:$0x1] %vm509_vm2, %v5841_v0  ;;  %v554_v59 = vld [vmem:[%s6014_s21 + $0x60] sm:$0xff]  ;;  %1007 = vrot.lane.b32.xlu1 %v942_v49, %s5843_s28  ;;  %v5703_v63 = vpack.c.bf16 %v2137_v57, %v2136_v56  ;;  %v2139_v1 = vld [vmem:[%s9250_s1 + $0x58] sm:$0xff]  ;;  %5702 = vmatprep.subr.bf16.mxu0 %v5842_v3 }
  0x21   : > { %538 = vst.msk [vmem:[#allocation2 + $0x149] sm:$0x1] %vm509_vm2, %v5841_v0  ;;  %539 = vst.msk [vmem:[#allocation2 + $0x161] sm:$0x1] %vm509_vm2, %v5841_v0  ;;  %v631_v60 = vadd.f32 %v6019_v8, %v592_v58  ;;  %v593_v61 = vmul.f32 %v6007_v7, %v554_v59  ;;  %v2160_v62 = vld [vmem:[%s9250_s1 + $0x100] sm:$0xff]  ;;  %v2161_v2 = vld [vmem:[%s9250_s1 + $0x108] sm:$0xff] }
  0x22   : > { %540 = vst.msk [vmem:[#allocation2 + $0x179] sm:$0x1] %vm509_vm2, %v5841_v0  ;;  %541 = vst.msk [vmem:[#allocation2 + $0x191] sm:$0x1] %vm509_vm2, %v5841_v0  ;;  %v2138_v0 = vld [vmem:[%s9250_s1 + $0x50] sm:$0xff]  ;;  %v5738_v10 = vpack.c.bf16 %v2161_v2, %v2160_v62  ;;  %v6137_v16 = vld [vmem:[%s9250_s1 + $0x60] sm:$0xff] }
  0x23   : > { %652 = vst.msk [vmem:[#allocation2 + $0x19] sm:$0xff] %vm9265_vm0, %v620_v26  ;;  %653 = vst.msk [vmem:[#allocation2 + $0x21] sm:$0xff] %vm9265_vm0, %v621_v27  ;;  %v632_v9 = vadd.f32 %v6019_v8, %v593_v61  ;;  %v2141_v17 = vld [vmem:[%s9250_s1 + $0x68] sm:$0xff]  ;;  %5704 = vmatpush1.bf16.msra.mxu0 %v5703_v63  ;;  %v5706_v21 = vpack.c.bf16 %v2139_v1, %v2138_v0  ;;  %s5845_s26 = smov 96   ;;  %v2142_v35 = vld [vmem:[%s9250_s1 + $0x70] sm:$0xff]  ;;  %vm908_vm3 = vcmask 523520  }
  0x24   : > { %654 = vst.msk [vmem:[#allocation2 + $0x31] sm:$0xff] %vm9265_vm0, %v622_v28  ;;  %655 = vst.msk [vmem:[#allocation2 + $0x39] sm:$0xff] %vm9265_vm0, %v623_v40  ;;  %5739 = vmatprep.subr.bf16.mxu1 %v5738_v10  ;;  %5705 = vmatprep.subr.bf16.mxu0 %v5842_v3  ;;  %v5709_v34 = vpack.c.bf16 %v2141_v17, %v6137_v16  ;;  %v2143_v38 = vld [vmem:[%s9250_s1 + $0x78] sm:$0xff]  ;;  %v2144_v42 = vld [vmem:[%s9250_s1 + $0x80] sm:$0xff]  ;;  %vm1101_vm4 = vcmask 785920   ;;  %vm1294_vm5 = vcmask 1048320  }
  0x25   : > { %717 = vst.msk [vmem:[#allocation3 + $0x18] sm:$0xff] %vm9265_vm0, %v685_v48  ;;  %656 = vst.msk [vmem:[#allocation2 + $0x49] sm:$0xff] %vm9265_vm0, %v624_v44  ;;  %5741 = vmatpush3.bf16.msra.mxu1 %v5738_v10  ;;  %v5712_v44 = vpack.c.bf16 %v2143_v38, %v2142_v35  ;;  %v2163_v51 = vld [vmem:[%s9250_s1 + $0x118] sm:$0xff]  ;;  %v555_v54 = vld [vmem:[%s6014_s21 + $0x68] sm:$0xff]  ;;  %s7105_s27 = sld [smem:[#allocation4]]  ;;  %s5847_s14 = smov 127  }
  0x26   : > { %657 = vst.msk [vmem:[#allocation2 + $0x51] sm:$0xff] %vm9265_vm0, %v625_v45  ;;  %658 = vst.msk [vmem:[#allocation2 + $0x61] sm:$0xff] %vm9265_vm0, %v626_v46  ;;  %v2145_v45 = vld [vmem:[%s9250_s1 + $0x88] sm:$0xff]  ;;  %v594_v56 = vmul.f32 %v6007_v7, %v555_v54  ;;  %v556_v57 = vld [vmem:[%s6014_s21 + $0x70] sm:$0xff] }
  0x27   : > { %659 = vst.msk [vmem:[#allocation2 + $0x69] sm:$0xff] %vm9265_vm0, %v627_v47  ;;  %716 = vst.msk [vmem:[#allocation3] sm:$0xff] %vm9265_vm0, %v684_v55  ;;  %5707 = vmatpush1.bf16.msra.mxu0 %v5706_v21  ;;  %v5715_v55 = vpack.c.bf16 %v2145_v45, %v2144_v42  ;;  %v2146_v58 = vld [vmem:[%s9250_s1 + $0x90] sm:$0xff]  ;;  %v2147_v59 = vld [vmem:[%s9250_s1 + $0x98] sm:$0xff] }
  0x28   : > { %660 = vst.msk [vmem:[#allocation2 + $0x79] sm:$0xff] %vm9265_vm0, %v628_v50  ;;  %661 = vst.msk [vmem:[#allocation2 + $0x81] sm:$0xff] %vm9265_vm0, %v629_v52  ;;  %5708 = vmatprep.subr.bf16.mxu0 %v5842_v3  ;;  %v2162_v50 = vld [vmem:[%s9250_s1 + $0x110] sm:$0xff]  ;;  %v557_v61 = vld [vmem:[%s6014_s21 + $0x78] sm:$0xff]  ;;  %v633_v62 = vadd.f32 %v6019_v8, %v594_v56  ;;  %v5718_v2 = vpack.c.bf16 %v2147_v59, %v2146_v58 }
  0x29   : > { %662 = vst.msk [vmem:[#allocation2 + $0x91] sm:$0xff] %vm9265_vm0, %v630_v53  ;;  %663 = vst.msk [vmem:[#allocation2 + $0x99] sm:$0xff] %vm9265_vm0, %v631_v60  ;;  %v5742_v52 = vpack.c.bf16 %v2163_v51, %v2162_v50  ;;  %v595_v60 = vmul.f32 %v6007_v7, %v556_v57  ;;  %v596_v0 = vmul.f32 %v6007_v7, %v557_v61  ;;  %v2148_v10 = vld [vmem:[%s9250_s1 + $0xa0] sm:$0xff]  ;;  %v2150_v16 = vld [vmem:[%s9250_s1 + $0xb0] sm:$0xff] }
  0x2a   : > { %v6109_v4 = vld [vmem:[#allocation2 + $0x1a] sm:$0xff]  ;;  %664 = vst.msk [vmem:[#allocation2 + $0xa9] sm:$0xff] %vm9265_vm0, %v632_v9  ;;  %v6158_v22 = vld [vmem:[#allocation2 + $0x22] sm:$0xff]  ;;  %665 = vst.msk [vmem:[#allocation2 + $0xb1] sm:$0xff] %vm9265_vm0, %v633_v62 }
  0x2b   : > { %v6111_v5 = vld [vmem:[#allocation2 + $0x30] sm:$0xff]  ;;  %1455 = vrot.lane.b32.xlu0 %v6109_v4, %s5844_s29  ;;  %v1134_v11 = vld [vmem:[#allocation2 + $0x18] sm:$0xff]  ;;  %v6120_v12 = vld [vmem:[#allocation2 + $0x20] sm:$0xff]  ;;  %5710 = vmatpush1.bf16.msra.mxu0 %v5709_v34  ;;  %v634_v1 = vadd.f32 %v6019_v8, %v595_v60  ;;  %v635_v9 = vadd.f32 %v6019_v8, %v596_v0 }
  0x2c   : > { %v6113_v6 = vld [vmem:[#allocation2 + $0x31] sm:$0xff]  ;;  %720 = vst.msk [vmem:[#allocation3 + $0x60] sm:$0xff] %vm9265_vm0, %v6111_v5  ;;  %1648 = vrot.lane.b32.xlu1 %v6111_v5, %s5843_s28  ;;  %v6130_v14 = vld [vmem:[#allocation2 + $0x19] sm:$0xff]  ;;  %718 = vst.msk [vmem:[#allocation3 + $0x30] sm:$0xff] %vm9265_vm0, %v1134_v11  ;;  %5711 = vmatprep.subr.bf16.mxu0 %v5842_v3 }
  0x2d   : > { %1361 = vst.msk [vmem:[#allocation3 + $0x38] sm:$0xff] %vm9265_vm0, %v6113_v6  ;;  %v6128_v13 = vld [vmem:[#allocation2 + $0x38] sm:$0xff]  ;;  %719 = vst.msk [vmem:[#allocation3 + $0x48] sm:$0xff] %vm9265_vm0, %v6120_v12  ;;  %v6148_v19 = vld [vmem:[#allocation2 + $0x48] sm:$0xff]  ;;  %5743 = vmatprep.subr.bf16.mxu1 %v5742_v52 }
  0x2e   : > { %v6132_v15 = vld [vmem:[#allocation2 + $0x39] sm:$0xff]  ;;  %v6150_v20 = vld [vmem:[#allocation2 + $0x21] sm:$0xff]  ;;  %1359 = vst.msk [vmem:[#allocation3 + $0x8] sm:$0xff] %vm9265_vm0, %v6130_v14  ;;  %721 = vst.msk [vmem:[#allocation3 + $0x78] sm:$0xff] %vm9265_vm0, %v6128_v13  ;;  %5745 = vmatpush3.bf16.msra.mxu1 %v5742_v52 }
  0x2f   : > { %v6146_v18 = vld [vmem:[#allocation2 + $0x32] sm:$0xff]  ;;  %1362 = vst.msk [vmem:[#allocation3 + $0x50] sm:$0xff] %vm9265_vm0, %v6132_v15  ;;  %v6160_v23 = vld [vmem:[#allocation2 + $0x49] sm:$0xff]  ;;  %v6162_v24 = vld [vmem:[#allocation2 + $0x3a] sm:$0xff]  ;;  %1840 = vrot.lane.b32.xlu0 %v6113_v6, %s5845_s26  ;;  %5713 = vmatpush1.bf16.msra.mxu0 %v5712_v44 }
  0x30   : > { %v6164_v25 = vld [vmem:[#allocation2 + $0x50] sm:$0xff]  ;;  %1360 = vst.msk [vmem:[#allocation3 + $0x20] sm:$0xff] %vm9265_vm0, %v6150_v20  ;;  %2000 = vst.msk [vmem:[#allocation3 + $0x10] sm:$0xff] %vm9265_vm0, %v6146_v18  ;;  %v6179_v28 = vld [vmem:[#allocation2 + $0x60] sm:$0xff]  ;;  %1198 = vrot.lane.b32.xlu1 %v1134_v11, %s5845_s26  ;;  %5714 = vmatprep.subr.bf16.mxu0 %v5842_v3 }
  0x31   : > { %722 = vst.msk [vmem:[#allocation3 + $0x90] sm:$0xff] %vm9265_vm0, %v6148_v19  ;;  %v6175_v26 = vld [vmem:[#allocation2 + $0x51] sm:$0xff]  ;;  %2001 = vst.msk [vmem:[#allocation3 + $0x28] sm:$0xff] %vm9265_vm0, %v6162_v24  ;;  %v6188_v29 = vld [vmem:[#allocation2 + $0x61] sm:$0xff]  ;;  %5746 = vmatprep.subr.bf16.mxu1 %v5842_v3 }
  0x32   : > { %v6177_v27 = vld [vmem:[#allocation2 + $0x4a] sm:$0xff]  ;;  %1363 = vst.msk [vmem:[#allocation3 + $0x68] sm:$0xff] %vm9265_vm0, %v6160_v23  ;;  %723 = vst.msk [vmem:[#allocation3 + $0xa8] sm:$0xff] %vm9265_vm0, %v6164_v25  ;;  %v6190_v30 = vld [vmem:[#allocation2 + $0x52] sm:$0xff] }
  0x33   : > { %v6192_v31 = vld [vmem:[#allocation2 + $0x68] sm:$0xff]  ;;  %2002 = vst.msk [vmem:[#allocation3 + $0x40] sm:$0xff] %vm9265_vm0, %v6177_v27  ;;  %1364 = vst.msk [vmem:[#allocation3 + $0x80] sm:$0xff] %vm9265_vm0, %v6175_v26  ;;  %v6214_v36 = vld [vmem:[#allocation2 + $0x79] sm:$0xff]  ;;  %1457 = vrot.lane.b32.xlu0 %v6158_v22, %s5844_s29  ;;  %5716 = vmatpush1.bf16.msra.mxu0 %v5715_v55 }
  0x34   : > { %724 = vst.msk [vmem:[#allocation3 + $0xc0] sm:$0xff] %vm9265_vm0, %v6179_v28  ;;  %v6200_v32 = vld [vmem:[#allocation2 + $0x69] sm:$0xff]  ;;  %2003 = vst.msk [vmem:[#allocation3 + $0x58] sm:$0xff] %vm9265_vm0, %v6190_v30  ;;  %v6228_v39 = vld [vmem:[#allocation2 + $0x81] sm:$0xff]  ;;  %1200 = vrot.lane.b32.xlu1 %v6120_v12, %s5845_s26  ;;  %5717 = vmatprep.subr.bf16.mxu0 %v5842_v3 }
  0x35   : > { %v6202_v33 = vld [vmem:[#allocation2 + $0x62] sm:$0xff]  ;;  %1365 = vst.msk [vmem:[#allocation3 + $0x98] sm:$0xff] %vm9265_vm0, %v6188_v29  ;;  %725 = vst.msk [vmem:[#allocation3 + $0xd8] sm:$0xff] %vm9265_vm0, %v6192_v31  ;;  %v6216_v37 = vld [vmem:[#allocation2 + $0x6a] sm:$0xff] }
  0x36   : > { %2004 = vst.msk [vmem:[#allocation3 + $0x70] sm:$0xff] %vm9265_vm0, %v6202_v33  ;;  %1366 = vst.msk [vmem:[#allocation3 + $0xb0] sm:$0xff] %vm9265_vm0, %v6200_v32  ;;  %v6230_v40 = vld [vmem:[#allocation2 + $0x7a] sm:$0xff]  ;;  %v6238_v41 = vld [vmem:[#allocation2 + $0x91] sm:$0xff] }
  0x37   : > { %2005 = vst.msk [vmem:[#allocation3 + $0x88] sm:$0xff] %vm9265_vm0, %v6216_v37  ;;  %1367 = vst.msk [vmem:[#allocation3 + $0xc8] sm:$0xff] %vm9265_vm0, %v6214_v36  ;;  %v6243_v43 = vld [vmem:[#allocation2 + $0x82] sm:$0xff]  ;;  %v6252_v46 = vld [vmem:[#allocation2 + $0x99] sm:$0xff]  ;;  %1650 = vrot.lane.b32.xlu0 %v6128_v13, %s5843_s28  ;;  %5719 = vmatpush1.bf16.msra.mxu0 %v5718_v2 }
  0x38   : > { %2006 = vst.msk [vmem:[#allocation3 + $0xa0] sm:$0xff] %vm9265_vm0, %v6230_v40  ;;  %1368 = vst.msk [vmem:[#allocation3 + $0xe0] sm:$0xff] %vm9265_vm0, %v6228_v39  ;;  %v6254_v47 = vld [vmem:[#allocation2 + $0x92] sm:$0xff]  ;;  %v6261_v48 = vld [vmem:[#allocation2 + $0xa9] sm:$0xff]  ;;  %816 = vrot.lane.b32.xlu1 %v6130_v14, %s5844_s29  ;;  %5720 = vmatprep.subr.bf16.mxu0 %v5842_v3 }
  0x39   : > { %2007 = vst.msk [vmem:[#allocation3 + $0xb8] sm:$0xff] %vm9265_vm0, %v6243_v43  ;;  %1369 = vst.msk [vmem:[#allocation3 + $0xf8] sm:$0xff] %vm9265_vm0, %v6238_v41  ;;  %v6263_v49 = vld [vmem:[#allocation2 + $0x9a] sm:$0xff]  ;;  %v6336_v21 = vld [vmem:[#allocation2 + $0xb0] sm:$0xff] }
  0x3a   : > { %2008 = vst.msk [vmem:[#allocation3 + $0xd0] sm:$0xff] %vm9265_vm0, %v6254_v47  ;;  %1370 = vst.msk [vmem:[#allocation3 + $0x110] sm:$0xff] %vm9265_vm0, %v6252_v46  ;;  %v2034_v53 = vld [vmem:[#allocation3 + $0x10] sm:$0xff]  ;;  %v2037_v63 = vld [vmem:[#allocation3 + $0x28] sm:$0xff] }
  0x3b   : > { %2009 = vst.msk [vmem:[#allocation3 + $0xe8] sm:$0xff] %vm9265_vm0, %v6263_v49  ;;  %1371 = vst.msk [vmem:[#allocation3 + $0x128] sm:$0xff] %vm9265_vm0, %v6261_v48  ;;  %5586 = vmatprep.mubr.msk.f32.mxu1 %vm9265_vm0, %v2034_v53  ;;  %1842 = vrot.lane.b32.xlu0 %v6132_v15, %s5845_s26  ;;  %v2040_v11 = vld [vmem:[#allocation3 + $0x40] sm:$0xff]  ;;  %v2043_v14 = vld [vmem:[#allocation3 + $0x58] sm:$0xff] }
  0x3c   : > { %1009 = vrot.lane.b32.xlu1 %v6109_v4, %s5843_s28  ;;  %v2149_v4 = vld [vmem:[%s9250_s1 + $0xa8] sm:$0xff]  ;;  %5587 = vmatmul.mubr.msk.f32.vlgmr.msra.gmra.mrb[0].mxu1 %vm9265_vm0, %v2037_v63  ;;  %666 = vst.msk [vmem:[#allocation2 + $0xc1] sm:$0xff] %vm9265_vm0, %v634_v1  ;;  %667 = vst.msk [vmem:[#allocation2 + $0xc9] sm:$0xff] %vm9265_vm0, %v635_v9  ;;  %v2151_v17 = vld [vmem:[%s9250_s1 + $0xb8] sm:$0xff] }
  0x3d   : > { %5589 = vmatprep.mubr.msk.f32.mxu1 %vm9265_vm0, %v2040_v11  ;;  %v5721_v12 = vpack.c.bf16 %v2149_v4, %v2148_v10  ;;  %v6338_v34 = vld [vmem:[#allocation2 + $0xb1] sm:$0xff]  ;;  %v5724_v38 = vpack.c.bf16 %v2151_v17, %v2150_v16  ;;  %731 = vst.msk [vmem:[#allocation3 + $0x168] sm:$0xff] %vm9265_vm0, %v6336_v21  ;;  %v558_v51 = vld [vmem:[%s6014_s21 + $0x80] sm:$0xff]  ;;  %v2157_v59 = vld [vmem:[%s9250_s1 + $0xe8] sm:$0xff] }
  0x3e   : > { %v6340_v35 = vld [vmem:[#allocation2 + $0xaa] sm:$0xff]  ;;  %v6346_v45 = vld [vmem:[#allocation2 + $0xb2] sm:$0xff]  ;;  %1372 = vst.msk [vmem:[#allocation3 + $0x140] sm:$0xff] %vm9265_vm0, %v6338_v34  ;;  %v597_v52 = vmul.f32 %v6007_v7, %v558_v51  ;;  %v2156_v58 = vld [vmem:[%s9250_s1 + $0xe0] sm:$0xff] }
  0x3f   : > { %1459 = vrot.lane.b32.xlu0 %v6146_v18, %s5844_s29  ;;  %5722 = vmatpush1.bf16.msra.mxu0 %v5721_v12  ;;  %2010 = vst.msk [vmem:[#allocation3 + $0x100] sm:$0xff] %vm9265_vm0, %v6340_v35  ;;  %2011 = vst.msk [vmem:[#allocation3 + $0x118] sm:$0xff] %vm9265_vm0, %v6346_v45  ;;  %v2154_v55 = vld [vmem:[%s9250_s1 + $0xd0] sm:$0xff]  ;;  %v2155_v56 = vld [vmem:[%s9250_s1 + $0xd8] sm:$0xff] }
  0x40   : > { %1202 = vrot.lane.b32.xlu1 %v6111_v5, %s5845_s26  ;;  %5590 = vmatmul.mubr.msk.f32.gmra.mrb[2].mxu1 %vm9265_vm0, %v2043_v14  ;;  %v2152_v5 = vld [vmem:[%s9250_s1 + $0xc0] sm:$0xff]  ;;  %v636_v54 = vadd.f32 %v6019_v8, %v597_v52  ;;  %v2158_v61 = vld [vmem:[%s9250_s1 + $0xf0] sm:$0xff]  ;;  %v2159_v62 = vld [vmem:[%s9250_s1 + $0xf8] sm:$0xff] }
  0x41   : > { %5723 = vmatprep.subr.bf16.mxu0 %v5842_v3  ;;  %v559_v0 = vld [vmem:[%s6014_s21 + $0x88] sm:$0xff]  ;;  %v5736_v1 = vpack.c.bf16 %v2159_v62, %v2158_v61  ;;  %v2046_v10 = vld [vmem:[#allocation3 + $0x70] sm:$0xff]  ;;  %v561_v17 = vld [vmem:[%s6014_s21 + $0x98] sm:$0xff] }
  0x42   : > { %668 = vst.msk [vmem:[#allocation2 + $0xd9] sm:$0xff] %vm9265_vm0, %v636_v54  ;;  %5592 = vmatprep.mubr.msk.f32.mxu1 %vm9265_vm0, %v2046_v10  ;;  %v562_v52 = vld [vmem:[%s6014_s21 + $0xa0] sm:$0xff]  ;;  %v564_v61 = vld [vmem:[%s6014_s21 + $0xb0] sm:$0xff] }
  0x43   : > { %1652 = vrot.lane.b32.xlu0 %v6148_v19, %s5843_s28  ;;  %v6342_v42 = vld [vmem:[#allocation2 + $0xc0] sm:$0xff]  ;;  %v6358_v50 = vld [vmem:[#allocation2 + $0xc8] sm:$0xff]  ;;  %5725 = vmatpush1.bf16.msra.mxu0 %v5724_v38  ;;  %v603_v62 = vmul.f32 %v6007_v7, %v564_v61 }
  0x44   : > { %818 = vrot.lane.b32.xlu1 %v6150_v20, %s5844_s29  ;;  %v6344_v44 = vld [vmem:[#allocation2 + $0xc1] sm:$0xff]  ;;  %732 = vst.msk [vmem:[#allocation3 + $0x180] sm:$0xff] %vm9265_vm0, %v6342_v42  ;;  %733 = vst.msk [vmem:[#allocation3 + $0x198] sm:$0xff] %vm9265_vm0, %v6358_v50  ;;  %5726 = vmatprep.subr.bf16.mxu0 %v5842_v3  ;;  %v6382_v57 = vld [vmem:[#allocation2 + $0xc9] sm:$0xff] }
  0x45   : > { %v2153_v20 = vld [vmem:[%s9250_s1 + $0xc8] sm:$0xff]  ;;  %1373 = vst.msk [vmem:[#allocation3 + $0x158] sm:$0xff] %vm9265_vm0, %v6344_v44  ;;  %1374 = vst.msk [vmem:[#allocation3 + $0x170] sm:$0xff] %vm9265_vm0, %v6382_v57 }
  0x46   : > { %v5727_v53 = vpack.c.bf16 %v2153_v20, %v2152_v5  ;;  %v6398_v60 = vld [vmem:[#allocation2 + $0xc2] sm:$0xff]  ;;  %v6436_v4 = vld [vmem:[#allocation2 + $0xca] sm:$0xff]  ;;  %v600_v5 = vmul.f32 %v6007_v7, %v561_v17  ;;  %v1590_v20 = vld [vmem:[#allocation2 + $0x78] sm:$0xff] }
  0x47   : > { %1844 = vrot.lane.b32.xlu0 %v6160_v23, %s5845_s26  ;;  %2012 = vst.msk [vmem:[#allocation3 + $0x130] sm:$0xff] %vm9265_vm0, %v6398_v60  ;;  %2013 = vst.msk [vmem:[#allocation3 + $0x148] sm:$0xff] %vm9265_vm0, %v6436_v4 }
  0x48   : > { %1011 = vrot.lane.b32.xlu1 %v6158_v22, %s5843_s28  ;;  %5728 = vmatpush1.bf16.msra.mxu0 %v5727_v53  ;;  %v5730_v22 = vpack.c.bf16 %v2155_v56, %v2154_v55 }
  0x49   : > { %5729 = vmatprep.subr.bf16.mxu0 %v5842_v3  ;;  %v6413_v63 = vld [vmem:[#allocation2 + $0xd8] sm:$0xff] }
  0x4a   : > { %734 = vst.msk [vmem:[#allocation3 + $0x1b0] sm:$0xff] %vm9265_vm0, %v6413_v63  ;;  %v6425_v9 = vld [vmem:[#allocation2 + $0xd9] sm:$0xff] }
  0x4b   : > { %1461 = vrot.lane.b32.xlu0 %v6162_v24, %s5844_s29  ;;  %1375 = vst.msk [vmem:[#allocation3 + $0x188] sm:$0xff] %vm9265_vm0, %v6425_v9 }
  0x4c   : > { %1204 = vrot.lane.b32.xlu1 %v6128_v13, %s5845_s26  ;;  %5731 = vmatpush1.bf16.msra.mxu0 %v5730_v22  ;;  %v5733_v13 = vpack.c.bf16 %v2157_v59, %v2156_v58  ;;  %v2058_v58 = vld [vmem:[#allocation3 + $0xd0] sm:$0xff] }
  0x4d   : > { %5732 = vmatprep.subr.bf16.mxu0 %v5842_v3 }
  0x4f   : > { %1654 = vrot.lane.b32.xlu0 %v6164_v25, %s5843_s28 }
  0x50   : > { %820 = vrot.lane.b32.xlu1 %v6113_v6, %s5844_s29  ;;  %v598_v6 = vmul.f32 %v6007_v7, %v559_v0  ;;  %5734 = vmatpush1.bf16.msra.mxu0 %v5733_v13  ;;  %v694_v13 = vld [vmem:[#allocation2 + $0x78] sm:$0xff]  ;;  %v642_v0 = vadd.f32 %v6019_v8, %v603_v62 }
  0x51   : > { %5735 = vmatprep.subr.bf16.mxu0 %v5842_v3  ;;  %726 = vst.msk [vmem:[#allocation3 + $0xf0] sm:$0xff] %vm9265_vm0, %v694_v13 }
  0x52   : > { %v637_v2 = vadd.f32 %v6019_v8, %v598_v6  ;;  %674 = vst.msk [vmem:[#allocation2 + $0x121] sm:$0xff] %vm9265_vm0, %v642_v0 }
  0x53   : > { %1846 = vrot.lane.b32.xlu0 %v6175_v26, %s5845_s26 }
  0x54   : > { %1013 = vrot.lane.b32.xlu1 %v6146_v18, %s5843_s28  ;;  %669 = vst.msk [vmem:[#allocation2 + $0xe1] sm:$0xff] %vm9265_vm0, %v637_v2  ;;  %5737 = vmatpush1.bf16.msra.mxu0 %v5736_v1  ;;  %v2049_v18 = vld [vmem:[#allocation3 + $0x88] sm:$0xff] }
  0x55   : > { %5593 = vmatmul.mubr.msk.f32.gmra.mrb[4].mxu1 %vm9265_vm0, %v2049_v18  ;;  %v695_v18 = vld [vmem:[#allocation2 + $0x80] sm:$0xff] }
  0x56   : > { %727 = vst.msk [vmem:[#allocation3 + $0x108] sm:$0xff] %vm9265_vm0, %v695_v18 }
  0x57   : > { %1463 = vrot.lane.b32.xlu0 %v6177_v27, %s5844_s29 }
  0x58   : > { %1206 = vrot.lane.b32.xlu1 %v6148_v19, %s5845_s26  ;;  %v560_v19 = vld [vmem:[%s6014_s21 + $0x90] sm:$0xff] }
  0x59   : > { %v599_v12 = vmul.f32 %v6007_v7, %v560_v19 }
  0x5b   : > { %1656 = vrot.lane.b32.xlu0 %v6179_v28, %s5843_s28  ;;  %v6444_v11 = vld [vmem:[#allocation2 + $0xe0] sm:$0xff]  ;;  %v638_v14 = vadd.f32 %v6019_v8, %v599_v12  ;;  %v565_v12 = vld [vmem:[%s6014_s21 + $0xb8] sm:$0xff] }
  0x5c   : > { %822 = vrot.lane.b32.xlu1 %v6132_v15, %s5844_s29  ;;  %735 = vst.msk [vmem:[#allocation3 + $0x1c8] sm:$0xff] %vm9265_vm0, %v6444_v11  ;;  %v6455_v16 = vld [vmem:[#allocation2 + $0xe1] sm:$0xff] }
  0x5d   : > { %670 = vst.msk [vmem:[#allocation2 + $0xf1] sm:$0xff] %vm9265_vm0, %v638_v14  ;;  %1376 = vst.msk [vmem:[#allocation3 + $0x1a0] sm:$0xff] %vm9265_vm0, %v6455_v16  ;;  %v6464_v15 = vld [vmem:[#allocation2 + $0xda] sm:$0xff]  ;;  %v6494_v51 = vld [vmem:[#allocation2 + $0xe2] sm:$0xff]  ;;  %v604_v14 = vmul.f32 %v6007_v7, %v565_v12 }
  0x5e   : > { %2014 = vst.msk [vmem:[#allocation3 + $0x160] sm:$0xff] %vm9265_vm0, %v6464_v15  ;;  %2015 = vst.msk [vmem:[#allocation3 + $0x178] sm:$0xff] %vm9265_vm0, %v6494_v51 }
  0x5f   : > { %1848 = vrot.lane.b32.xlu0 %v6188_v29, %s5845_s26 }
  0x60   : > { %1015 = vrot.lane.b32.xlu1 %v6162_v24, %s5843_s28 }
  0x63   : > { %1465 = vrot.lane.b32.xlu0 %v6190_v30, %s5844_s29 }
  0x64   : > { %1208 = vrot.lane.b32.xlu1 %v6164_v25, %s5845_s26  ;;  %v6472_v24 = vld [vmem:[#allocation2 + $0xf0] sm:$0xff]  ;;  %v639_v25 = vadd.f32 %v6019_v8, %v600_v5  ;;  %v643_v5 = vadd.f32 %v6019_v8, %v604_v14 }
  0x65   : > { %736 = vst.msk [vmem:[#allocation3 + $0x1e0] sm:$0xff] %vm9265_vm0, %v6472_v24  ;;  %v6483_v38 = vld [vmem:[#allocation2 + $0xf1] sm:$0xff] }
  0x66   : > { %671 = vst.msk [vmem:[#allocation2 + $0xf9] sm:$0xff] %vm9265_vm0, %v639_v25  ;;  %1377 = vst.msk [vmem:[#allocation3 + $0x1b8] sm:$0xff] %vm9265_vm0, %v6483_v38  ;;  %v6587_v25 = vld [vmem:[#allocation2 + $0x121] sm:$0xff] }
  0x67   : > { %1658 = vrot.lane.b32.xlu0 %v6192_v31, %s5843_s28  ;;  %675 = vst.msk [vmem:[#allocation2 + $0x129] sm:$0xff] %vm9265_vm0, %v643_v5  ;;  %1381 = vst.msk [vmem:[#allocation3 + $0x218] sm:$0xff] %vm9265_vm0, %v6587_v25 }
  0x68   : > { %824 = vrot.lane.b32.xlu1 %v6160_v23, %s5844_s29  ;;  %v2052_v23 = vld [vmem:[#allocation3 + $0xa0] sm:$0xff] }
  0x69   : > { %5595 = vmatprep.mubr.msk.f32.mxu1 %vm9265_vm0, %v2052_v23  ;;  %v2064_v23 = vld [vmem:[#allocation3 + $0x100] sm:$0xff] }
  0x6b   : > { %1850 = vrot.lane.b32.xlu0 %v6200_v32, %s5845_s26 }
  0x6c   : > { %1017 = vrot.lane.b32.xlu1 %v6177_v27, %s5843_s28  ;;  %v2055_v27 = vld [vmem:[#allocation3 + $0xb8] sm:$0xff] }
  0x6d   : > { %5596 = vmatmul.mubr.msk.f32.gmra.mrb[6].mxu1 %vm9265_vm0, %v2055_v27  ;;  %v6508_v54 = vld [vmem:[#allocation2 + $0xf9] sm:$0xff]  ;;  %v2067_v27 = vld [vmem:[#allocation3 + $0x118] sm:$0xff] }
  0x6e   : > { %1378 = vst.msk [vmem:[#allocation3 + $0x1d0] sm:$0xff] %vm9265_vm0, %v6508_v54  ;;  %v6517_v55 = vld [vmem:[#allocation2 + $0xf2] sm:$0xff]  ;;  %5598 = vmatprep.mubr.msk.f32.mxu1 %vm9265_vm0, %v2058_v58  ;;  %v6541_v59 = vld [vmem:[#allocation2 + $0xfa] sm:$0xff]  ;;  %v6621_v61 = vld [vmem:[#allocation2 + $0x129] sm:$0xff] }
  0x6f   : > { %1467 = vrot.lane.b32.xlu0 %v6202_v33, %s5844_s29  ;;  %2016 = vst.msk [vmem:[#allocation3 + $0x190] sm:$0xff] %vm9265_vm0, %v6517_v55  ;;  %2017 = vst.msk [vmem:[#allocation3 + $0x1a8] sm:$0xff] %vm9265_vm0, %v6541_v59  ;;  %v6632_v0 = vld [vmem:[#allocation2 + $0x122] sm:$0xff] }
  0x70   : > { %1210 = vrot.lane.b32.xlu1 %v6179_v28, %s5845_s26  ;;  %v601_v28 = vmul.f32 %v6007_v7, %v562_v52  ;;  %1382 = vst.msk [vmem:[#allocation3 + $0x230] sm:$0xff] %vm9265_vm0, %v6621_v61  ;;  %2020 = vst.msk [vmem:[#allocation3 + $0x1f0] sm:$0xff] %vm9265_vm0, %v6632_v0 }
  0x72   : > { %v640_v53 = vadd.f32 %v6019_v8, %v601_v28 }
  0x73   : > { %1660 = vrot.lane.b32.xlu0 %v1590_v20, %s5843_s28 }
  0x74   : > { %826 = vrot.lane.b32.xlu1 %v6175_v26, %s5844_s29  ;;  %672 = vst.msk [vmem:[#allocation2 + $0x109] sm:$0xff] %vm9265_vm0, %v640_v53  ;;  %v1591_v26 = vld [vmem:[#allocation2 + $0x80] sm:$0xff]  ;;  %v696_v53 = vld [vmem:[#allocation2 + $0x90] sm:$0xff] }
  0x75   : > { %728 = vst.msk [vmem:[#allocation3 + $0x120] sm:$0xff] %vm9265_vm0, %v696_v53 }
  0x77   : > { %1852 = vrot.lane.b32.xlu0 %v6214_v36, %s5845_s26 }
  0x78   : > { %1019 = vrot.lane.b32.xlu1 %v6190_v30, %s5843_s28  ;;  %v563_v30 = vld [vmem:[%s6014_s21 + $0xa8] sm:$0xff] }
  0x79   : > { %v602_v56 = vmul.f32 %v6007_v7, %v563_v30 }
  0x7b   : > { %1469 = vrot.lane.b32.xlu0 %v6216_v37, %s5844_s29  ;;  %v6531_v22 = vld [vmem:[#allocation2 + $0x109] sm:$0xff] }
  0x7c   : > { %1212 = vrot.lane.b32.xlu1 %v6192_v31, %s5845_s26  ;;  %v641_v31 = vadd.f32 %v6019_v8, %v602_v56  ;;  %1379 = vst.msk [vmem:[#allocation3 + $0x1e8] sm:$0xff] %vm9265_vm0, %v6531_v22  ;;  %v566_v56 = vld [vmem:[%s6014_s21 + $0xc0] sm:$0xff] }
  0x7e   : > { %673 = vst.msk [vmem:[#allocation2 + $0x111] sm:$0xff] %vm9265_vm0, %v641_v31  ;;  %v605_v31 = vmul.f32 %v6007_v7, %v566_v56 }
  0x7f   : > { %1662 = vrot.lane.b32.xlu0 %v1591_v26, %s5843_s28 }
  0x80   : > { %828 = vrot.lane.b32.xlu1 %v6188_v29, %s5844_s29  ;;  %v1592_v29 = vld [vmem:[#allocation2 + $0x90] sm:$0xff] }
  0x83   : > { %1854 = vrot.lane.b32.xlu0 %v6228_v39, %s5845_s26 }
  0x84   : > { %1021 = vrot.lane.b32.xlu1 %v6202_v33, %s5843_s28  ;;  %v2061_v33 = vld [vmem:[#allocation3 + $0xe8] sm:$0xff] }
  0x85   : > { %5599 = vmatmul.mubr.msk.f32.gmra.mrb[8].mxu1 %vm9265_vm0, %v2061_v33  ;;  %v6556_v2 = vld [vmem:[#allocation2 + $0x111] sm:$0xff] }
  0x86   : > { %1380 = vst.msk [vmem:[#allocation3 + $0x200] sm:$0xff] %vm9265_vm0, %v6556_v2  ;;  %v6568_v10 = vld [vmem:[#allocation2 + $0x10a] sm:$0xff]  ;;  %5601 = vmatprep.mubr.msk.f32.mxu1 %vm9265_vm0, %v2064_v23  ;;  %v6601_v28 = vld [vmem:[#allocation2 + $0x112] sm:$0xff] }
  0x87   : > { %1471 = vrot.lane.b32.xlu0 %v6230_v40, %s5844_s29  ;;  %2018 = vst.msk [vmem:[#allocation3 + $0x1c0] sm:$0xff] %vm9265_vm0, %v6568_v10  ;;  %2019 = vst.msk [vmem:[#allocation3 + $0x1d8] sm:$0xff] %vm9265_vm0, %v6601_v28  ;;  %v2073_v23 = vld [vmem:[#allocation3 + $0x148] sm:$0xff] }
  0x88   : > { %1214 = vrot.lane.b32.xlu1 %v1590_v20, %s5845_s26 }
  0x89   : > { %5602 = vmatmul.mubr.msk.f32.gmra.mrb[10].mxu1 %vm9265_vm0, %v2067_v27  ;;  %v6665_v27 = vld [vmem:[#allocation2 + $0x12a] sm:$0xff] }
  0x8a   : > { %v1006_v6 = vpop.permute.xlu1 %1005  ;;  %2021 = vst.msk [vmem:[#allocation3 + $0x208] sm:$0xff] %vm9265_vm0, %v6665_v27 }
  0x8b   : > { %1664 = vrot.lane.b32.xlu0 %v1592_v29, %s5843_s28  ;;  %v813_v1 = vpop.permute.xlu0 %812 }
  0x8c   : > { %830 = vrot.lane.b32.xlu1 %v6200_v32, %s5844_s29  ;;  %909 = vst.msk [vmem:[#allocation3] sm:$0xff] %vm908_vm3, %v813_v1  ;;  %v6565_v32 = vld [vmem:[#allocation2 + $0x98] sm:$0xff] }
  0x8d   : > { %1102 = vst.msk [vmem:[#allocation3] sm:$0xff] %vm1101_vm4, %v1006_v6  ;;  %v697_v6 = vld [vmem:[#allocation2 + $0x98] sm:$0xff] }
  0x8e   : > { %729 = vst.msk [vmem:[#allocation3 + $0x138] sm:$0xff] %vm9265_vm0, %v697_v6 }
  0x8f   : > { %1856 = vrot.lane.b32.xlu0 %v6238_v41, %s5845_s26 }
  0x90   : > { %1023 = vrot.lane.b32.xlu1 %v6216_v37, %s5843_s28  ;;  %v815_v37 = vpop.permute.xlu1 %814 }
  0x91   : > { %910 = vst.msk [vmem:[#allocation3 + $0x18] sm:$0xff] %vm908_vm3, %v815_v37  ;;  %v567_v37 = vld [vmem:[%s6014_s21 + $0xc8] sm:$0xff] }
  0x92   : > { %v606_v18 = vmul.f32 %v6007_v7, %v567_v37 }
  0x93   : > { %1473 = vrot.lane.b32.xlu0 %v6243_v43, %s5844_s29 }
  0x94   : > { %1216 = vrot.lane.b32.xlu1 %v1591_v26, %s5845_s26  ;;  %v1008_v19 = vpop.permute.xlu1 %1007  ;;  %v645_v14 = vadd.f32 %v6019_v8, %v606_v18 }
  0x95   : > { %1103 = vst.msk [vmem:[#allocation3 + $0x18] sm:$0xff] %vm1101_vm4, %v1008_v19 }
  0x96   : > { %677 = vst.msk [vmem:[#allocation2 + $0x141] sm:$0xff] %vm9265_vm0, %v645_v14 }
  0x97   : > { %1666 = vrot.lane.b32.xlu0 %v6565_v32, %s5843_s28 }
  0x98   : > { %832 = vrot.lane.b32.xlu1 %v6214_v36, %s5844_s29 }
  0x9b   : > { %1858 = vrot.lane.b32.xlu0 %v6252_v46, %s5845_s26 }
  0x9c   : > { %1025 = vrot.lane.b32.xlu1 %v6230_v40, %s5843_s28  ;;  %v6596_v40 = vld [vmem:[#allocation2 + $0xa8] sm:$0xff] }
  0x9d   : > { %v1456_v17 = vpop.permute.xlu0 %1455 }
  0x9e   : > { %1551 = vst.msk [vmem:[#allocation3 + $0x8] sm:$0xff] %vm908_vm3, %v1456_v17  ;;  %v1649_v36 = vpop.permute.xlu1 %1648 }
  0x9f   : > { %1744 = vst.msk [vmem:[#allocation3 + $0x8] sm:$0xff] %vm1101_vm4, %v1649_v36  ;;  %1475 = vrot.lane.b32.xlu0 %v6254_v47, %s5844_s29  ;;  %v2070_v36 = vld [vmem:[#allocation3 + $0x130] sm:$0xff] }
  0xa0   : > { %1218 = vrot.lane.b32.xlu1 %v1592_v29, %s5845_s26  ;;  %5604 = vmatprep.mubr.msk.f32.mxu1 %vm9265_vm0, %v2070_v36 }
  0xa1   : > { %v1841_v20 = vpop.permute.xlu0 %1840  ;;  %5605 = vmatmul.mubr.msk.f32.gmra.mrb[12].mxu1 %vm9265_vm0, %v2073_v23 }
  0xa2   : > { %1936 = vst.msk [vmem:[#allocation3 + $0x8] sm:$0xff] %vm1294_vm5, %v1841_v20  ;;  %v1199_v52 = vpop.permute.xlu1 %1198 }
  0xa3   : > { %1668 = vrot.lane.b32.xlu0 %v6596_v40, %s5843_s28  ;;  %1295 = vst.msk [vmem:[#allocation3] sm:$0xff] %vm1294_vm5, %v1199_v52  ;;  %v698_v52 = vld [vmem:[#allocation2 + $0xa8] sm:$0xff] }
  0xa4   : > { %834 = vrot.lane.b32.xlu1 %v6228_v39, %s5844_s29  ;;  %v644_v39 = vadd.f32 %v6019_v8, %v605_v31  ;;  %730 = vst.msk [vmem:[#allocation3 + $0x150] sm:$0xff] %vm9265_vm0, %v698_v52 }
  0xa5   : > { %v1458_v26 = vpop.permute.xlu0 %1457 }
  0xa6   : > { %1552 = vst.msk [vmem:[#allocation3 + $0x20] sm:$0xff] %vm908_vm3, %v1458_v26  ;;  %v1201_v30 = vpop.permute.xlu1 %1200  ;;  %v568_v26 = vld [vmem:[%s6014_s21 + $0xd0] sm:$0xff] }
  0xa7   : > { %1860 = vrot.lane.b32.xlu0 %v6261_v48, %s5845_s26  ;;  %1296 = vst.msk [vmem:[#allocation3 + $0x18] sm:$0xff] %vm1294_vm5, %v1201_v30  ;;  %v607_v30 = vmul.f32 %v6007_v7, %v568_v26 }
  0xa8   : > { %1027 = vrot.lane.b32.xlu1 %v6243_v43, %s5843_s28  ;;  %676 = vst.msk [vmem:[#allocation2 + $0x139] sm:$0xff] %vm9265_vm0, %v644_v39  ;;  %v6685_v39 = vld [vmem:[#allocation2 + $0x141] sm:$0xff] }
  0xa9   : > { %v1651_v58 = vpop.permute.xlu0 %1650  ;;  %v2033_v29 = vld [vmem:[#allocation3 + $0x8] sm:$0xff]  ;;  %1384 = vst.msk [vmem:[#allocation3 + $0x260] sm:$0xff] %vm9265_vm0, %v6685_v39 }
  0xaa   : > { %1745 = vst.msk [vmem:[#allocation3 + $0x20] sm:$0xff] %vm1101_vm4, %v1651_v58  ;;  %2324 = vmatprep.mubr.f32.mxu0 %v2033_v29  ;;  %v817_v33 = vpop.permute.xlu1 %816  ;;  %v2032_v13 = vld [vmem:[#allocation3] sm:$0xff]  ;;  %v646_v58 = vadd.f32 %v6019_v8, %v607_v30 }
  0xab   : > { %1477 = vrot.lane.b32.xlu0 %v6263_v49, %s5844_s29  ;;  %911 = vst.msk [vmem:[#allocation3 + $0x30] sm:$0xff] %vm908_vm3, %v817_v33  ;;  %2325 = vmatmul.mubr.f32.vlgmr.msra.gmra.mrb[0].mxu0 %v2032_v13  ;;  %v569_v13 = vld [vmem:[%s6014_s21 + $0xd8] sm:$0xff] }
  0xac   : > { %1220 = vrot.lane.b32.xlu1 %v6565_v32, %s5845_s26  ;;  %678 = vst.msk [vmem:[#allocation2 + $0x151] sm:$0xff] %vm9265_vm0, %v646_v58 }
  0xad   : > { %v1843_v43 = vpop.permute.xlu0 %1842 }
  0xae   : > { %1937 = vst.msk [vmem:[#allocation3 + $0x20] sm:$0xff] %vm1294_vm5, %v1843_v43  ;;  %v1010_v62 = vpop.permute.xlu1 %1009  ;;  %v2035_v19 = vld [vmem:[#allocation3 + $0x18] sm:$0xff]  ;;  %v6713_v43 = vld [vmem:[%s9252_s3] ss:$0 sm:$0xff] }
  0xaf   : > { %1670 = vrot.lane.b32.xlu0 %v6336_v21, %s5843_s28  ;;  %1104 = vst.msk [vmem:[#allocation3 + $0x30] sm:$0xff] %vm1101_vm4, %v1010_v62  ;;  %v6652_v5 = vld [vmem:[#allocation2 + $0x139] sm:$0xff]  ;;  %v608_v62 = vmul.f32 %v6713_v43, %v569_v13 }
  0xb0   : > { %836 = vrot.lane.b32.xlu1 %v6238_v41, %s5844_s29  ;;  %1383 = vst.msk [vmem:[#allocation3 + $0x248] sm:$0xff] %vm9265_vm0, %v6652_v5  ;;  %v2082_v13 = vld [vmem:[#allocation3 + $0x190] sm:$0xff] }
  0xb1   : > { %v1460_v1 = vpop.permute.xlu0 %1459 }
  0xb2   : > { %1553 = vst.msk [vmem:[#allocation3 + $0x38] sm:$0xff] %vm908_vm3, %v1460_v1  ;;  %v1203_v32 = vpop.permute.xlu1 %1202 }
  0xb3   : > { %1862 = vrot.lane.b32.xlu0 %v6338_v34, %s5845_s26  ;;  %1297 = vst.msk [vmem:[#allocation3 + $0x30] sm:$0xff] %vm1294_vm5, %v1203_v32  ;;  %v6721_v32 = vld [vmem:[%s9253_s4] ss:$0 sm:$0xff] }
  0xb4   : > { %1029 = vrot.lane.b32.xlu1 %v6254_v47, %s5843_s28  ;;  %v647_v37 = vadd.f32 %v6721_v32, %v608_v62  ;;  %v2085_v62 = vld [vmem:[#allocation3 + $0x1a8] sm:$0xff] }
  0xb5   : > { %v1653_v12 = vpop.permute.xlu0 %1652  ;;  %v2036_v41 = vld [vmem:[#allocation3 + $0x20] sm:$0xff] }
  0xb6   : > { %1746 = vst.msk [vmem:[#allocation3 + $0x38] sm:$0xff] %vm1101_vm4, %v1653_v12  ;;  %2329 = vmatprep.mubr.f32.mxu0 %v2036_v41  ;;  %v819_v17 = vpop.permute.xlu1 %818  ;;  %v2079_v41 = vld [vmem:[#allocation3 + $0x178] sm:$0xff] }
  0xb7   : > { %1479 = vrot.lane.b32.xlu0 %v6340_v35, %s5844_s29  ;;  %2330 = vmatmul.mubr.f32.gmra.mrb[2].mxu0 %v2035_v19  ;;  %912 = vst.msk [vmem:[#allocation3 + $0x48] sm:$0xff] %vm908_vm3, %v819_v17  ;;  %v6725_v19 = vld [vmem:[#allocation2 + $0x151] sm:$0xff]  ;;  %v6738_v17 = vld [vmem:[#allocation2 + $0x142] sm:$0xff] }
  0xb8   : > { %1222 = vrot.lane.b32.xlu1 %v6596_v40, %s5845_s26  ;;  %679 = vst.msk [vmem:[#allocation2 + $0x159] sm:$0xff] %vm9265_vm0, %v647_v37  ;;  %1385 = vst.msk [vmem:[#allocation3 + $0x278] sm:$0xff] %vm9265_vm0, %v6725_v19  ;;  %v572_v37 = vld [vmem:[%s6014_s21 + $0xf0] sm:$0xff] }
  0xb9   : > { %v1845_v47 = vpop.permute.xlu0 %1844  ;;  %2023 = vst.msk [vmem:[#allocation3 + $0x238] sm:$0xff] %vm9265_vm0, %v6738_v17 }
  0xba   : > { %1938 = vst.msk [vmem:[#allocation3 + $0x38] sm:$0xff] %vm1294_vm5, %v1845_v47  ;;  %v1012_v20 = vpop.permute.xlu1 %1011  ;;  %v2038_v56 = vld [vmem:[#allocation3 + $0x30] sm:$0xff] }
  0xbb   : > { %1672 = vrot.lane.b32.xlu0 %v6342_v42, %s5843_s28  ;;  %1105 = vst.msk [vmem:[#allocation3 + $0x48] sm:$0xff] %vm1101_vm4, %v1012_v20  ;;  %v570_v47 = vld [vmem:[%s6014_s21 + $0xe0] sm:$0xff] }
  0xbc   : > { %838 = vrot.lane.b32.xlu1 %v6252_v46, %s5844_s29  ;;  %v609_v23 = vmul.f32 %v6713_v43, %v570_v47 }
  0xbd   : > { %v1462_v40 = vpop.permute.xlu0 %1461 }
  0xbe   : > { %1554 = vst.msk [vmem:[#allocation3 + $0x50] sm:$0xff] %vm908_vm3, %v1462_v40  ;;  %v1205_v53 = vpop.permute.xlu1 %1204 }
  0xbf   : > { %1864 = vrot.lane.b32.xlu0 %v6344_v44, %s5845_s26  ;;  %1298 = vst.msk [vmem:[#allocation3 + $0x48] sm:$0xff] %vm1294_vm5, %v1205_v53  ;;  %v6757_v26 = vld [vmem:[#allocation2 + $0x159] sm:$0xff] }
  0xc0   : > { %1031 = vrot.lane.b32.xlu1 %v6263_v49, %s5843_s28  ;;  %v6696_v49 = vld [vmem:[#allocation2 + $0x13a] sm:$0xff]  ;;  %1386 = vst.msk [vmem:[#allocation3 + $0x290] sm:$0xff] %vm9265_vm0, %v6757_v26 }
  0xc1   : > { %v1655_v31 = vpop.permute.xlu0 %1654  ;;  %v2039_v46 = vld [vmem:[#allocation3 + $0x38] sm:$0xff]  ;;  %2022 = vst.msk [vmem:[#allocation3 + $0x220] sm:$0xff] %vm9265_vm0, %v6696_v49 }
  0xc2   : > { %1747 = vst.msk [vmem:[#allocation3 + $0x50] sm:$0xff] %vm1101_vm4, %v1655_v31  ;;  %2334 = vmatprep.mubr.f32.mxu0 %v2039_v46  ;;  %v821_v29 = vpop.permute.xlu1 %820  ;;  %v571_v46 = vld [vmem:[%s6014_s21 + $0xe8] sm:$0xff] }
  0xc3   : > { %1481 = vrot.lane.b32.xlu0 %v6346_v45, %s5844_s29  ;;  %913 = vst.msk [vmem:[#allocation3 + $0x60] sm:$0xff] %vm908_vm3, %v821_v29  ;;  %2335 = vmatmul.mubr.f32.gmra.mrb[4].mxu0 %v2038_v56  ;;  %v6768_v56 = vld [vmem:[#allocation2 + $0x152] sm:$0xff]  ;;  %v610_v58 = vmul.f32 %v6713_v43, %v571_v46 }
  0xc4   : > { %1224 = vrot.lane.b32.xlu1 %v6336_v21, %s5845_s26  ;;  %2024 = vst.msk [vmem:[#allocation3 + $0x250] sm:$0xff] %vm9265_vm0, %v6768_v56 }
  0xc5   : > { %v1847_v7 = vpop.permute.xlu0 %1846 }
  0xc6   : > { %1939 = vst.msk [vmem:[#allocation3 + $0x50] sm:$0xff] %vm1294_vm5, %v1847_v7  ;;  %v1014_v8 = vpop.permute.xlu1 %1013 }
  0xc7   : > { %1674 = vrot.lane.b32.xlu0 %v6358_v50, %s5843_s28  ;;  %1106 = vst.msk [vmem:[#allocation3 + $0x60] sm:$0xff] %vm1101_vm4, %v1014_v8 }
  0xc8   : > { %840 = vrot.lane.b32.xlu1 %v6261_v48, %s5844_s29  ;;  %v2041_v48 = vld [vmem:[#allocation3 + $0x48] sm:$0xff] }
  0xc9   : > { %v1464_v33 = vpop.permute.xlu0 %1463 }
  0xca   : > { %1555 = vst.msk [vmem:[#allocation3 + $0x68] sm:$0xff] %vm908_vm3, %v1464_v33  ;;  %v1207_v21 = vpop.permute.xlu1 %1206 }
  0xcb   : > { %1866 = vrot.lane.b32.xlu0 %v6382_v57, %s5845_s26  ;;  %1299 = vst.msk [vmem:[#allocation3 + $0x60] sm:$0xff] %vm1294_vm5, %v1207_v21 }
  0xcc   : > { %1033 = vrot.lane.b32.xlu1 %v6340_v35, %s5843_s28  ;;  %v2076_v35 = vld [vmem:[#allocation3 + $0x160] sm:$0xff] }
  0xcd   : > { %v1657_v6 = vpop.permute.xlu0 %1656  ;;  %v2042_v1 = vld [vmem:[#allocation3 + $0x50] sm:$0xff]  ;;  %5607 = vmatprep.mubr.msk.f32.mxu1 %vm9265_vm0, %v2076_v35 }
  0xce   : > { %1748 = vst.msk [vmem:[#allocation3 + $0x68] sm:$0xff] %vm1101_vm4, %v1657_v6  ;;  %2339 = vmatprep.mubr.f32.mxu0 %v2042_v1  ;;  %v823_v18 = vpop.permute.xlu1 %822  ;;  %5608 = vmatmul.mubr.msk.f32.gmra.mrb[14].mxu1 %vm9265_vm0, %v2079_v41  ;;  %v6800_v6 = vld [vmem:[#allocation2 + $0x15a] sm:$0xff] }
  0xcf   : > { %1483 = vrot.lane.b32.xlu0 %v6398_v60, %s5844_s29  ;;  %914 = vst.msk [vmem:[#allocation3 + $0x78] sm:$0xff] %vm908_vm3, %v823_v18  ;;  %2340 = vmatmul.mubr.f32.gmra.mrb[6].mxu0 %v2041_v48  ;;  %v611_v18 = vmul.f32 %v6713_v43, %v572_v37 }
  0xd0   : > { %1226 = vrot.lane.b32.xlu1 %v6342_v42, %s5845_s26  ;;  %5610 = vmatprep.mubr.msk.f32.mxu1 %vm9265_vm0, %v2082_v13  ;;  %2025 = vst.msk [vmem:[#allocation3 + $0x268] sm:$0xff] %vm9265_vm0, %v6800_v6 }
  0xd1   : > { %v1849_v12 = vpop.permute.xlu0 %1848 }
  0xd2   : > { %1940 = vst.msk [vmem:[#allocation3 + $0x68] sm:$0xff] %vm1294_vm5, %v1849_v12  ;;  %v1016_v14 = vpop.permute.xlu1 %1015  ;;  %v2044_v20 = vld [vmem:[#allocation3 + $0x60] sm:$0xff]  ;;  %5611 = vmatmul.mubr.msk.f32.gmra.mrb[16].mxu1 %vm9265_vm0, %v2085_v62 }
  0xd3   : > { %1676 = vrot.lane.b32.xlu0 %v6413_v63, %s5843_s28  ;;  %1107 = vst.msk [vmem:[#allocation3 + $0x78] sm:$0xff] %vm1101_vm4, %v1016_v14 }
  0xd4   : > { %842 = vrot.lane.b32.xlu1 %v6338_v34, %s5844_s29  ;;  %v648_v34 = vadd.f32 %v6721_v32, %v609_v23 }
  0xd5   : > { %v1466_v42 = vpop.permute.xlu0 %1465 }
  0xd6   : > { %1556 = vst.msk [vmem:[#allocation3 + $0x80] sm:$0xff] %vm908_vm3, %v1466_v42  ;;  %v1209_v36 = vpop.permute.xlu1 %1208 }
  0xd7   : > { %1868 = vrot.lane.b32.xlu0 %v6425_v9, %s5845_s26  ;;  %1300 = vst.msk [vmem:[#allocation3 + $0x78] sm:$0xff] %vm1294_vm5, %v1209_v36 }
  0xd8   : > { %1035 = vrot.lane.b32.xlu1 %v6346_v45, %s5843_s28  ;;  %680 = vst.msk [vmem:[#allocation2 + $0x169] sm:$0xff] %vm9265_vm0, %v648_v34 }
  0xd9   : > { %v1659_v52 = vpop.permute.xlu0 %1658  ;;  %v2045_v40 = vld [vmem:[#allocation3 + $0x68] sm:$0xff] }
  0xda   : > { %1749 = vst.msk [vmem:[#allocation3 + $0x80] sm:$0xff] %vm1101_vm4, %v1659_v52  ;;  %2344 = vmatprep.mubr.f32.mxu0 %v2045_v40  ;;  %v825_v53 = vpop.permute.xlu1 %824 }
  0xdb   : > { %1485 = vrot.lane.b32.xlu0 %v6436_v4, %s5844_s29  ;;  %915 = vst.msk [vmem:[#allocation3 + $0x90] sm:$0xff] %vm908_vm3, %v825_v53  ;;  %2345 = vmatmul.mubr.f32.gmra.mrb[8].mxu0 %v2044_v20  ;;  %v573_v20 = vld [vmem:[%s6014_s21 + $0xf8] sm:$0xff] }
  0xdc   : > { %1228 = vrot.lane.b32.xlu1 %v6358_v50, %s5845_s26  ;;  %v612_v52 = vmul.f32 %v6713_v43, %v573_v20  ;;  %v706_v20 = vld [vmem:[#allocation2 + $0x108] sm:$0xff] }
  0xdd   : > { %v1851_v45 = vpop.permute.xlu0 %1850  ;;  %738 = vst.msk [vmem:[#allocation3 + $0x210] sm:$0xff] %vm9265_vm0, %v706_v20  ;;  %v2109_v20 = vld [vmem:[#allocation3 + $0x268] sm:$0xff] }
  0xde   : > { %1941 = vst.msk [vmem:[#allocation3 + $0x80] sm:$0xff] %vm1294_vm5, %v1851_v45  ;;  %v1018_v30 = vpop.permute.xlu1 %1017  ;;  %v2047_v29 = vld [vmem:[#allocation3 + $0x78] sm:$0xff] }
  0xdf   : > { %1678 = vrot.lane.b32.xlu0 %v6444_v11, %s5843_s28  ;;  %1108 = vst.msk [vmem:[#allocation3 + $0x90] sm:$0xff] %vm1101_vm4, %v1018_v30  ;;  %v6787_v21 = vld [vmem:[#allocation2 + $0x169] sm:$0xff] }
  0xe0   : > { %844 = vrot.lane.b32.xlu1 %v6344_v44, %s5844_s29  ;;  %v649_v44 = vadd.f32 %v6721_v32, %v610_v58  ;;  %1387 = vst.msk [vmem:[#allocation3 + $0x2a8] sm:$0xff] %vm9265_vm0, %v6787_v21  ;;  %v2088_v30 = vld [vmem:[#allocation3 + $0x1c0] sm:$0xff] }
  0xe1   : > { %v1468_v31 = vpop.permute.xlu0 %1467  ;;  %5613 = vmatprep.mubr.msk.f32.mxu1 %vm9265_vm0, %v2088_v30 }
  0xe2   : > { %1557 = vst.msk [vmem:[#allocation3 + $0x98] sm:$0xff] %vm908_vm3, %v1468_v31  ;;  %v1211_v50 = vpop.permute.xlu1 %1210 }
  0xe3   : > { %1870 = vrot.lane.b32.xlu0 %v6455_v16, %s5845_s26  ;;  %1301 = vst.msk [vmem:[#allocation3 + $0x90] sm:$0xff] %vm1294_vm5, %v1211_v50 }
  0xe4   : > { %1037 = vrot.lane.b32.xlu1 %v6398_v60, %s5843_s28  ;;  %681 = vst.msk [vmem:[#allocation2 + $0x171] sm:$0xff] %vm9265_vm0, %v649_v44 }
  0xe5   : > { %v1661_v7 = vpop.permute.xlu0 %1660  ;;  %v2048_v8 = vld [vmem:[#allocation3 + $0x80] sm:$0xff] }
  0xe6   : > { %1750 = vst.msk [vmem:[#allocation3 + $0x98] sm:$0xff] %vm1101_vm4, %v1661_v7  ;;  %2349 = vmatprep.mubr.f32.mxu0 %v2048_v8  ;;  %v827_v33 = vpop.permute.xlu1 %826 }
  0xe7   : > { %1487 = vrot.lane.b32.xlu0 %v6464_v15, %s5844_s29  ;;  %916 = vst.msk [vmem:[#allocation3 + $0xa8] sm:$0xff] %vm908_vm3, %v827_v33  ;;  %2350 = vmatmul.mubr.f32.gmra.mrb[10].mxu0 %v2047_v29 }
  0xe8   : > { %1230 = vrot.lane.b32.xlu1 %v6413_v63, %s5845_s26 }
  0xe9   : > { %v1853_v60 = vpop.permute.xlu0 %1852 }
  0xea   : > { %1942 = vst.msk [vmem:[#allocation3 + $0x98] sm:$0xff] %vm1294_vm5, %v1853_v60  ;;  %v1020_v48 = vpop.permute.xlu1 %1019  ;;  %v2050_v35 = vld [vmem:[#allocation3 + $0x90] sm:$0xff] }
  0xeb   : > { %1680 = vrot.lane.b32.xlu0 %v6472_v24, %s5843_s28  ;;  %1109 = vst.msk [vmem:[#allocation3 + $0xa8] sm:$0xff] %vm1101_vm4, %v1020_v48  ;;  %v6826_v47 = vld [vmem:[#allocation2 + $0x16a] sm:$0xff]  ;;  %v6853_v50 = vld [vmem:[#allocation2 + $0x172] sm:$0xff] }
  0xec   : > { %846 = vrot.lane.b32.xlu1 %v6382_v57, %s5844_s29  ;;  %v650_v57 = vadd.f32 %v6721_v32, %v611_v18  ;;  %2026 = vst.msk [vmem:[#allocation3 + $0x280] sm:$0xff] %vm9265_vm0, %v6826_v47  ;;  %2027 = vst.msk [vmem:[#allocation3 + $0x298] sm:$0xff] %vm9265_vm0, %v6853_v50 }
  0xed   : > { %v1470_v63 = vpop.permute.xlu0 %1469 }
  0xee   : > { %1558 = vst.msk [vmem:[#allocation3 + $0xb0] sm:$0xff] %vm908_vm3, %v1470_v63  ;;  %v1213_v1 = vpop.permute.xlu1 %1212 }
  0xef   : > { %1872 = vrot.lane.b32.xlu0 %v6483_v38, %s5845_s26  ;;  %1302 = vst.msk [vmem:[#allocation3 + $0xa8] sm:$0xff] %vm1294_vm5, %v1213_v1  ;;  %v705_v1 = vld [vmem:[#allocation2 + $0xf8] sm:$0xff] }
  0xf0   : > { %1039 = vrot.lane.b32.xlu1 %v6436_v4, %s5843_s28  ;;  %682 = vst.msk [vmem:[#allocation2 + $0x181] sm:$0xff] %vm9265_vm0, %v650_v57  ;;  %v1601_v4 = vld [vmem:[#allocation2 + $0xf8] sm:$0xff]  ;;  %737 = vst.msk [vmem:[#allocation3 + $0x1f8] sm:$0xff] %vm9265_vm0, %v705_v1 }
  0xf1   : > { %v1663_v12 = vpop.permute.xlu0 %1662  ;;  %v2051_v41 = vld [vmem:[#allocation3 + $0x98] sm:$0xff] }
  0xf2   : > { %1751 = vst.msk [vmem:[#allocation3 + $0xb0] sm:$0xff] %vm1101_vm4, %v1663_v12  ;;  %2354 = vmatprep.mubr.f32.mxu0 %v2051_v41  ;;  %v829_v14 = vpop.permute.xlu1 %828  ;;  %v2094_v41 = vld [vmem:[#allocation3 + $0x1f0] sm:$0xff] }
  0xf3   : > { %1489 = vrot.lane.b32.xlu0 %v6494_v51, %s5844_s29  ;;  %917 = vst.msk [vmem:[#allocation3 + $0xc0] sm:$0xff] %vm908_vm3, %v829_v14  ;;  %2355 = vmatmul.mubr.f32.gmra.mrb[12].mxu0 %v2050_v35  ;;  %v2097_v14 = vld [vmem:[#allocation3 + $0x208] sm:$0xff] }
  0xf4   : > { %1232 = vrot.lane.b32.xlu1 %v6444_v11, %s5845_s26 }
  0xf5   : > { %v1855_v42 = vpop.permute.xlu0 %1854 }
  0xf6   : > { %1943 = vst.msk [vmem:[#allocation3 + $0xb0] sm:$0xff] %vm1294_vm5, %v1855_v42  ;;  %v1022_v36 = vpop.permute.xlu1 %1021  ;;  %v2053_v40 = vld [vmem:[#allocation3 + $0xa8] sm:$0xff] }
  0xf7   : > { %1682 = vrot.lane.b32.xlu0 %v1601_v4, %s5843_s28  ;;  %1110 = vst.msk [vmem:[#allocation3 + $0xc0] sm:$0xff] %vm1101_vm4, %v1022_v36 }
  0xf8   : > { %848 = vrot.lane.b32.xlu1 %v6425_v9, %s5844_s29  ;;  %v651_v9 = vadd.f32 %v6721_v32, %v612_v52  ;;  %v2091_v32 = vld [vmem:[#allocation3 + $0x1d8] sm:$0xff] }
  0xf9   : > { %v1472_v23 = vpop.permute.xlu0 %1471  ;;  %5614 = vmatmul.mubr.msk.f32.gmra.mrb[18].mxu1 %vm9265_vm0, %v2091_v32 }
  0xfa   : > { %1559 = vst.msk [vmem:[#allocation3 + $0xc8] sm:$0xff] %vm908_vm3, %v1472_v23  ;;  %v1215_v11 = vpop.permute.xlu1 %1214  ;;  %5616 = vmatprep.mubr.msk.f32.mxu1 %vm9265_vm0, %v2094_v41 }
  0xfb   : > { %1874 = vrot.lane.b32.xlu0 %v6508_v54, %s5845_s26  ;;  %1303 = vst.msk [vmem:[#allocation3 + $0xc0] sm:$0xff] %vm1294_vm5, %v1215_v11 }
  0xfc   : > { %1041 = vrot.lane.b32.xlu1 %v6464_v15, %s5843_s28  ;;  %683 = vst.msk [vmem:[#allocation2 + $0x189] sm:$0xff] %vm9265_vm0, %v651_v9  ;;  %v1602_v15 = vld [vmem:[#allocation2 + $0x108] sm:$0xff] }
  0xfd   : > { %v1665_v34 = vpop.permute.xlu0 %1664  ;;  %v2054_v53 = vld [vmem:[#allocation3 + $0xb0] sm:$0xff]  ;;  %5617 = vmatmul.mubr.msk.f32.gmra.mrb[20].mxu1 %vm9265_vm0, %v2097_v14 }
  0xfe   : > { %1752 = vst.msk [vmem:[#allocation3 + $0xc8] sm:$0xff] %vm1101_vm4, %v1665_v34  ;;  %2359 = vmatprep.mubr.f32.mxu0 %v2054_v53  ;;  %v831_v45 = vpop.permute.xlu1 %830  ;;  %v1605_v34 = vld [vmem:[#allocation2 + $0x128] sm:$0xff] }
  0xff   : > { %1491 = vrot.lane.b32.xlu0 %v6517_v55, %s5844_s29  ;;  %918 = vst.msk [vmem:[#allocation3 + $0xd8] sm:$0xff] %vm908_vm3, %v831_v45  ;;  %2360 = vmatmul.mubr.f32.gmra.mrb[14].mxu0 %v2053_v40 }
 0x100   : > { %1234 = vrot.lane.b32.xlu1 %v6472_v24, %s5845_s26 }
 0x101   : > { %v1857_v43 = vpop.permute.xlu0 %1856 }
 0x102   : > { %1944 = vst.msk [vmem:[#allocation3 + $0xc8] sm:$0xff] %vm1294_vm5, %v1857_v43  ;;  %v1024_v31 = vpop.permute.xlu1 %1023  ;;  %v2056_v58 = vld [vmem:[#allocation3 + $0xc0] sm:$0xff] }
 0x103   : > { %1684 = vrot.lane.b32.xlu0 %v1602_v15, %s5843_s28  ;;  %1111 = vst.msk [vmem:[#allocation3 + $0xd8] sm:$0xff] %vm1101_vm4, %v1024_v31  ;;  %v6873_v33 = vld [vmem:[#allocation2 + $0x182] sm:$0xff]  ;;  %v6904_v42 = vld [vmem:[#allocation2 + $0x18a] sm:$0xff] }
 0x104   : > { %850 = vrot.lane.b32.xlu1 %v6455_v16, %s5844_s29  ;;  %v1603_v16 = vld [vmem:[#allocation2 + $0x110] sm:$0xff]  ;;  %2028 = vst.msk [vmem:[#allocation3 + $0x2b0] sm:$0xff] %vm9265_vm0, %v6873_v33  ;;  %2029 = vst.msk [vmem:[#allocation3 + $0x2c8] sm:$0xff] %vm9265_vm0, %v6904_v42 }
 0x105   : > { %v1474_v24 = vpop.permute.xlu0 %1473 }
 0x106   : > { %1560 = vst.msk [vmem:[#allocation3 + $0xe0] sm:$0xff] %vm908_vm3, %v1474_v24  ;;  %v1217_v46 = vpop.permute.xlu1 %1216 }
 0x107   : > { %1876 = vrot.lane.b32.xlu0 %v6531_v22, %s5845_s26  ;;  %1304 = vst.msk [vmem:[#allocation3 + $0xd8] sm:$0xff] %vm1294_vm5, %v1217_v46  ;;  %v2100_v46 = vld [vmem:[#allocation3 + $0x220] sm:$0xff] }
 0x108   : > { %1043 = vrot.lane.b32.xlu1 %v6494_v51, %s5843_s28  ;;  %5619 = vmatprep.mubr.msk.f32.mxu1 %vm9265_vm0, %v2100_v46 }
 0x109   : > { %v1667_v29 = vpop.permute.xlu0 %1666  ;;  %v2057_v7 = vld [vmem:[#allocation3 + $0xc8] sm:$0xff] }
 0x10a   : > { %1753 = vst.msk [vmem:[#allocation3 + $0xe0] sm:$0xff] %vm1101_vm4, %v1667_v29  ;;  %2364 = vmatprep.mubr.f32.mxu0 %v2057_v7  ;;  %v833_v8 = vpop.permute.xlu1 %832  ;;  %v2103_v29 = vld [vmem:[#allocation3 + $0x238] sm:$0xff] }
 0x10b   : > { %1493 = vrot.lane.b32.xlu0 %v6541_v59, %s5844_s29  ;;  %919 = vst.msk [vmem:[#allocation3 + $0xf0] sm:$0xff] %vm908_vm3, %v833_v8  ;;  %2365 = vmatmul.mubr.f32.gmra.mrb[16].mxu0 %v2056_v58 }
 0x10c   : > { %1236 = vrot.lane.b32.xlu1 %v1601_v4, %s5845_s26  ;;  %5620 = vmatmul.mubr.msk.f32.gmra.mrb[22].mxu1 %vm9265_vm0, %v2103_v29 }
 0x10d   : > { %v1859_v44 = vpop.permute.xlu0 %1858 }
 0x10e   : > { %1945 = vst.msk [vmem:[#allocation3 + $0xe0] sm:$0xff] %vm1294_vm5, %v1859_v44  ;;  %v1026_v51 = vpop.permute.xlu1 %1025  ;;  %v2059_v63 = vld [vmem:[#allocation3 + $0xd8] sm:$0xff] }
 0x10f   : > { %1686 = vrot.lane.b32.xlu0 %v1603_v16, %s5843_s28  ;;  %1112 = vst.msk [vmem:[#allocation3 + $0xf0] sm:$0xff] %vm1101_vm4, %v1026_v51  ;;  %v6881_v60 = vpop.f32.mrb[0].mxu1  ;;  %v708_v51 = vld [vmem:[#allocation2 + $0x120] sm:$0xff] }
 0x110   : > { %852 = vrot.lane.b32.xlu1 %v6483_v38, %s5844_s29  ;;  %v6884_v48 = vpop.f32.mrb[1].mxu1  ;;  %740 = vst.msk [vmem:[#allocation3 + $0x240] sm:$0xff] %vm9265_vm0, %v708_v51 }
 0x111   : > { %v1476_v13 = vpop.permute.xlu0 %1475 }
 0x112   : > { %1561 = vst.msk [vmem:[#allocation3 + $0xf8] sm:$0xff] %vm908_vm3, %v1476_v13  ;;  %v1219_v62 = vpop.permute.xlu1 %1218 }
 0x113   : > { %1878 = vrot.lane.b32.xlu0 %v6556_v2, %s5845_s26  ;;  %1305 = vst.msk [vmem:[#allocation3 + $0xf0] sm:$0xff] %vm1294_vm5, %v1219_v62  ;;  %v6892_v18 = vpop.f32.mrb[2].mxu1 }
 0x114   : > { %1045 = vrot.lane.b32.xlu1 %v6517_v55, %s5843_s28  ;;  %v6895_v12 = vpop.f32.mrb[3].mxu1  ;;  %v1604_v55 = vld [vmem:[#allocation2 + $0x120] sm:$0xff] }
 0x115   : > { %v1669_v37 = vpop.permute.xlu0 %1668  ;;  %v2060_v38 = vld [vmem:[#allocation3 + $0xe0] sm:$0xff] }
 0x116   : > { %1754 = vst.msk [vmem:[#allocation3 + $0xf8] sm:$0xff] %vm1101_vm4, %v1669_v37  ;;  %2369 = vmatprep.mubr.f32.mxu0 %v2060_v38  ;;  %v835_v35 = vpop.permute.xlu1 %834 }
 0x117   : > { %1495 = vrot.lane.b32.xlu0 %v6568_v10, %s5844_s29  ;;  %920 = vst.msk [vmem:[#allocation3 + $0x108] sm:$0xff] %vm908_vm3, %v835_v35  ;;  %2370 = vmatmul.mubr.f32.gmra.mrb[18].mxu0 %v2059_v63  ;;  %v1607_v63 = vld [vmem:[#allocation2 + $0x140] sm:$0xff] }
 0x118   : > { %1238 = vrot.lane.b32.xlu1 %v1602_v15, %s5845_s26  ;;  %v707_v15 = vld [vmem:[#allocation2 + $0x110] sm:$0xff] }
 0x119   : > { %v1861_v57 = vpop.permute.xlu0 %1860  ;;  %739 = vst.msk [vmem:[#allocation3 + $0x228] sm:$0xff] %vm9265_vm0, %v707_v15 }
 0x11a   : > { %1946 = vst.msk [vmem:[#allocation3 + $0xf8] sm:$0xff] %vm1294_vm5, %v1861_v57  ;;  %v1028_v4 = vpop.permute.xlu1 %1027  ;;  %v2062_v11 = vld [vmem:[#allocation3 + $0xf0] sm:$0xff] }
 0x11b   : > { %1688 = vrot.lane.b32.xlu0 %v1604_v55, %s5843_s28  ;;  %1113 = vst.msk [vmem:[#allocation3 + $0x108] sm:$0xff] %vm1101_vm4, %v1028_v4 }
 0x11c   : > { %854 = vrot.lane.b32.xlu1 %v6508_v54, %s5844_s29 }
 0x11d   : > { %v1478_v36 = vpop.permute.xlu0 %1477 }
 0x11e   : > { %1562 = vst.msk [vmem:[#allocation3 + $0x110] sm:$0xff] %vm908_vm3, %v1478_v36  ;;  %v1221_v23 = vpop.permute.xlu1 %1220 }
 0x11f   : > { %1880 = vrot.lane.b32.xlu0 %v6587_v25, %s5845_s26  ;;  %1306 = vst.msk [vmem:[#allocation3 + $0x108] sm:$0xff] %vm1294_vm5, %v1221_v23  ;;  %v2106_v23 = vld [vmem:[#allocation3 + $0x250] sm:$0xff] }
 0x120   : > { %1047 = vrot.lane.b32.xlu1 %v6541_v59, %s5843_s28  ;;  %5622 = vmatprep.mubr.msk.f32.mxu1 %vm9265_vm0, %v2106_v23  ;;  %v4361_v23 = vld [vmem:[%s9251_s2 + $0x20] sm:$0xff] }
 0x121   : > { %v1671_v52 = vpop.permute.xlu0 %1670  ;;  %v2063_v40 = vld [vmem:[#allocation3 + $0xf8] sm:$0xff]  ;;  %5623 = vmatmul.mubr.msk.f32.gmra.mrb[24].mxu1 %vm9265_vm0, %v2109_v20 }
 0x122   : > { %1755 = vst.msk [vmem:[#allocation3 + $0x110] sm:$0xff] %vm1101_vm4, %v1671_v52  ;;  %2374 = vmatprep.mubr.f32.mxu0 %v2063_v40  ;;  %v837_v54 = vpop.permute.xlu1 %836 }
 0x123   : > { %1497 = vrot.lane.b32.xlu0 %v6601_v28, %s5844_s29  ;;  %921 = vst.msk [vmem:[#allocation3 + $0x120] sm:$0xff] %vm908_vm3, %v837_v54  ;;  %2375 = vmatmul.mubr.f32.gmra.mrb[20].mxu0 %v2062_v11 }
 0x124   : > { %1240 = vrot.lane.b32.xlu1 %v1603_v16, %s5845_s26 }
 0x125   : > { %v1863_v59 = vpop.permute.xlu0 %1862 }
 0x126   : > { %1947 = vst.msk [vmem:[#allocation3 + $0x110] sm:$0xff] %vm1294_vm5, %v1863_v59  ;;  %v1030_v53 = vpop.permute.xlu1 %1029  ;;  %v2065_v30 = vld [vmem:[#allocation3 + $0x108] sm:$0xff] }
 0x127   : > { %1690 = vrot.lane.b32.xlu0 %v1605_v34, %s5843_s28  ;;  %1114 = vst.msk [vmem:[#allocation3 + $0x120] sm:$0xff] %vm1101_vm4, %v1030_v53 }
 0x128   : > { %856 = vrot.lane.b32.xlu1 %v6531_v22, %s5844_s29  ;;  %v6936_v31 = vpop.f32.mrb[4].mxu1 }
 0x129   : > { %v1480_v9 = vpop.permute.xlu0 %1479  ;;  %v6939_v24 = vpop.f32.mrb[5].mxu1 }
 0x12a   : > { %1563 = vst.msk [vmem:[#allocation3 + $0x128] sm:$0xff] %vm908_vm3, %v1480_v9  ;;  %v1223_v45 = vpop.permute.xlu1 %1222  ;;  %v1609_v9 = vld [vmem:[#allocation2 + $0x158] sm:$0xff] }
 0x12b   : > { %1882 = vrot.lane.b32.xlu0 %v6621_v61, %s5845_s26  ;;  %1307 = vst.msk [vmem:[#allocation3 + $0x120] sm:$0xff] %vm1294_vm5, %v1223_v45 }
 0x12c   : > { %1049 = vrot.lane.b32.xlu1 %v6568_v10, %s5843_s28  ;;  %v1606_v10 = vld [vmem:[#allocation2 + $0x138] sm:$0xff] }
 0x12d   : > { %v1673_v43 = vpop.permute.xlu0 %1672  ;;  %v2066_v32 = vld [vmem:[#allocation3 + $0x110] sm:$0xff] }
 0x12e   : > { %1756 = vst.msk [vmem:[#allocation3 + $0x128] sm:$0xff] %vm1101_vm4, %v1673_v43  ;;  %2379 = vmatprep.mubr.f32.mxu0 %v2066_v32  ;;  %v839_v22 = vpop.permute.xlu1 %838  ;;  %v711_v32 = vld [vmem:[#allocation2 + $0x140] sm:$0xff] }
 0x12f   : > { %1499 = vrot.lane.b32.xlu0 %v6632_v0, %s5844_s29  ;;  %922 = vst.msk [vmem:[#allocation3 + $0x138] sm:$0xff] %vm908_vm3, %v839_v22  ;;  %2380 = vmatmul.mubr.f32.gmra.mrb[22].mxu0 %v2065_v30 }
 0x130   : > { %1242 = vrot.lane.b32.xlu1 %v1604_v55, %s5845_s26  ;;  %v709_v55 = vld [vmem:[#allocation2 + $0x128] sm:$0xff]  ;;  %743 = vst.msk [vmem:[#allocation3 + $0x288] sm:$0xff] %vm9265_vm0, %v711_v32  ;;  %v2121_v32 = vld [vmem:[#allocation3 + $0x2c8] sm:$0xff] }
 0x131   : > { %v1865_v58 = vpop.permute.xlu0 %1864  ;;  %741 = vst.msk [vmem:[#allocation3 + $0x258] sm:$0xff] %vm9265_vm0, %v709_v55  ;;  %v4359_v55 = vld [vmem:[%s9251_s2 + $0x10] sm:$0xff] }
 0x132   : > { %1948 = vst.msk [vmem:[#allocation3 + $0x128] sm:$0xff] %vm1294_vm5, %v1865_v58  ;;  %v1032_v7 = vpop.permute.xlu1 %1031  ;;  %v2068_v44 = vld [vmem:[#allocation3 + $0x120] sm:$0xff] }
 0x133   : > { %1692 = vrot.lane.b32.xlu0 %v1606_v10, %s5843_s28  ;;  %1115 = vst.msk [vmem:[#allocation3 + $0x138] sm:$0xff] %vm1101_vm4, %v1032_v7  ;;  %v2112_v7 = vld [vmem:[#allocation3 + $0x280] sm:$0xff] }
 0x134   : > { %858 = vrot.lane.b32.xlu1 %v6556_v2, %s5844_s29  ;;  %5625 = vmatprep.mubr.msk.f32.mxu1 %vm9265_vm0, %v2112_v7 }
 0x135   : > { %v1482_v8 = vpop.permute.xlu0 %1481 }
 0x136   : > { %1564 = vst.msk [vmem:[#allocation3 + $0x140] sm:$0xff] %vm908_vm3, %v1482_v8  ;;  %v1225_v16 = vpop.permute.xlu1 %1224 }
 0x137   : > { %1884 = vrot.lane.b32.xlu0 %v6652_v5, %s5845_s26  ;;  %1308 = vst.msk [vmem:[#allocation3 + $0x138] sm:$0xff] %vm1294_vm5, %v1225_v16  ;;  %v2115_v16 = vld [vmem:[#allocation3 + $0x298] sm:$0xff] }
 0x138   : > { %1051 = vrot.lane.b32.xlu1 %v6601_v28, %s5843_s28  ;;  %5626 = vmatmul.mubr.msk.f32.gmra.mrb[26].mxu1 %vm9265_vm0, %v2115_v16  ;;  %v7125_v16 = vld [vmem:[%s9254_s5] ss:$0 sm:$0xff] }
 0x139   : > { %v1675_v13 = vpop.permute.xlu0 %1674  ;;  %v2069_v62 = vld [vmem:[#allocation3 + $0x128] sm:$0xff] }
 0x13a   : > { %1757 = vst.msk [vmem:[#allocation3 + $0x140] sm:$0xff] %vm1101_vm4, %v1675_v13  ;;  %2384 = vmatprep.mubr.f32.mxu0 %v2069_v62  ;;  %v841_v2 = vpop.permute.xlu1 %840  ;;  %v712_v62 = vld [vmem:[#allocation2 + $0x150] sm:$0xff] }
 0x13b   : > { %1501 = vrot.lane.b32.xlu0 %v6665_v27, %s5844_s29  ;;  %923 = vst.msk [vmem:[#allocation3 + $0x150] sm:$0xff] %vm908_vm3, %v841_v2  ;;  %2385 = vmatmul.mubr.f32.gmra.mrb[24].mxu0 %v2068_v44 }
 0x13c   : > { %1244 = vrot.lane.b32.xlu1 %v1605_v34, %s5845_s26  ;;  %v710_v34 = vld [vmem:[#allocation2 + $0x138] sm:$0xff]  ;;  %744 = vst.msk [vmem:[#allocation3 + $0x2a0] sm:$0xff] %vm9265_vm0, %v712_v62 }
 0x13d   : > { %v1867_v28 = vpop.permute.xlu0 %1866  ;;  %742 = vst.msk [vmem:[#allocation3 + $0x270] sm:$0xff] %vm9265_vm0, %v710_v34 }
 0x13e   : > { %1949 = vst.msk [vmem:[#allocation3 + $0x140] sm:$0xff] %vm1294_vm5, %v1867_v28  ;;  %v1034_v1 = vpop.permute.xlu1 %1033  ;;  %v2071_v35 = vld [vmem:[#allocation3 + $0x138] sm:$0xff]  ;;  %v4357_v28 = vld [vmem:[%s9251_s2] sm:$0xff] }
 0x13f   : > { %1694 = vrot.lane.b32.xlu0 %v1607_v63, %s5843_s28  ;;  %1116 = vst.msk [vmem:[#allocation3 + $0x150] sm:$0xff] %vm1101_vm4, %v1034_v1  ;;  %v4358_v1 = vld [vmem:[%s9251_s2 + $0x8] sm:$0xff] }
 0x140   : > { %860 = vrot.lane.b32.xlu1 %v6587_v25, %s5844_s29  ;;  %v6976_v14 = vpop.f32.mrb[6].mxu1 }
 0x141   : > { %v1484_v37 = vpop.permute.xlu0 %1483  ;;  %v6979_v4 = vpop.f32.mrb[7].mxu1 }
 0x142   : > { %1565 = vst.msk [vmem:[#allocation3 + $0x158] sm:$0xff] %vm908_vm3, %v1484_v37  ;;  %v1227_v38 = vpop.permute.xlu1 %1226  ;;  %v7053_v37 = vld [vmem:[#allocation2 + $0x170] sm:$0xff] }
 0x143   : > { %1886 = vrot.lane.b32.xlu0 %v6685_v39, %s5845_s26  ;;  %1309 = vst.msk [vmem:[#allocation3 + $0x150] sm:$0xff] %vm1294_vm5, %v1227_v38 }
 0x144   : > { %1053 = vrot.lane.b32.xlu1 %v6632_v0, %s5843_s28  ;;  %v1608_v0 = vld [vmem:[#allocation2 + $0x150] sm:$0xff] }
 0x145   : > { %v1677_v41 = vpop.permute.xlu0 %1676  ;;  %v2072_v57 = vld [vmem:[#allocation3 + $0x140] sm:$0xff] }
 0x146   : > { %1758 = vst.msk [vmem:[#allocation3 + $0x158] sm:$0xff] %vm1101_vm4, %v1677_v41  ;;  %2389 = vmatprep.mubr.f32.mxu0 %v2072_v57  ;;  %v843_v25 = vpop.permute.xlu1 %842  ;;  %v4360_v41 = vld [vmem:[%s9251_s2 + $0x18] sm:$0xff] }
 0x147   : > { %1503 = vrot.lane.b32.xlu0 %v6696_v49, %s5844_s29  ;;  %924 = vst.msk [vmem:[#allocation3 + $0x168] sm:$0xff] %vm908_vm3, %v843_v25  ;;  %2390 = vmatmul.mubr.f32.gmra.mrb[26].mxu0 %v2071_v35  ;;  %v5750_v57 = vpack.c.bf16 %v4360_v41, %v4359_v55  ;;  %v7068_v25 = vld [vmem:[#allocation2 + $0x171] sm:$0xff]  ;;  %v4370_v55 = vld [vmem:[%s9251_s2 + $0x68] sm:$0xff] }
 0x148   : > { %1246 = vrot.lane.b32.xlu1 %v1606_v10, %s5845_s26 }
 0x149   : > { %v1869_v36 = vpop.permute.xlu0 %1868 }
 0x14a   : > { %1950 = vst.msk [vmem:[#allocation3 + $0x158] sm:$0xff] %vm1294_vm5, %v1869_v36  ;;  %v1036_v11 = vpop.permute.xlu1 %1035  ;;  %v2074_v54 = vld [vmem:[#allocation3 + $0x150] sm:$0xff] }
 0x14b   : > { %1696 = vrot.lane.b32.xlu0 %v1608_v0, %s5843_s28  ;;  %1117 = vst.msk [vmem:[#allocation3 + $0x168] sm:$0xff] %vm1101_vm4, %v1036_v11  ;;  %v4362_v11 = vld [vmem:[%s9251_s2 + $0x28] sm:$0xff] }
 0x14c   : > { %862 = vrot.lane.b32.xlu1 %v6621_v61, %s5844_s29 }
 0x14d   : > { %v1486_v52 = vpop.permute.xlu0 %1485 }
 0x14e   : > { %1566 = vst.msk [vmem:[#allocation3 + $0x170] sm:$0xff] %vm908_vm3, %v1486_v52  ;;  %v1229_v40 = vpop.permute.xlu1 %1228  ;;  %v713_v52 = vld [vmem:[#allocation2 + $0x158] sm:$0xff] }
 0x14f   : > { %1888 = vrot.lane.b32.xlu0 %v6725_v19, %s5845_s26  ;;  %1310 = vst.msk [vmem:[#allocation3 + $0x168] sm:$0xff] %vm1294_vm5, %v1229_v40  ;;  %v1356_v40 = vld [vmem:[#allocation2 + $0x171] sm:$0xff] }
 0x150   : > { %1055 = vrot.lane.b32.xlu1 %v6665_v27, %s5843_s28  ;;  %745 = vst.msk [vmem:[#allocation3 + $0x2b8] sm:$0xff] %vm9265_vm0, %v713_v52  ;;  %1388 = vst.msk [vmem:[#allocation3 + $0x2c0] sm:$0xff] %vm9265_vm0, %v1356_v40  ;;  %v1805_v40 = vld [vmem:[#allocation2 + $0x189] sm:$0xff] }
 0x151   : > { %v1679_v59 = vpop.permute.xlu0 %1678  ;;  %v2075_v53 = vld [vmem:[#allocation3 + $0x158] sm:$0xff] }
 0x152   : > { %1759 = vst.msk [vmem:[#allocation3 + $0x170] sm:$0xff] %vm1101_vm4, %v1679_v59  ;;  %2394 = vmatprep.mubr.f32.mxu0 %v2075_v53  ;;  %v845_v61 = vpop.permute.xlu1 %844 }
 0x153   : > { %1505 = vrot.lane.b32.xlu0 %v6738_v17, %s5844_s29  ;;  %925 = vst.msk [vmem:[#allocation3 + $0x180] sm:$0xff] %vm908_vm3, %v845_v61  ;;  %2395 = vmatmul.mubr.f32.gmra.mrb[28].mxu0 %v2074_v54 }
 0x154   : > { %1248 = vrot.lane.b32.xlu1 %v1607_v63, %s5845_s26 }
 0x155   : > { %v1871_v27 = vpop.permute.xlu0 %1870 }
 0x156   : > { %1951 = vst.msk [vmem:[#allocation3 + $0x170] sm:$0xff] %vm1294_vm5, %v1871_v27  ;;  %v1038_v45 = vpop.permute.xlu1 %1037  ;;  %v2077_v43 = vld [vmem:[#allocation3 + $0x168] sm:$0xff] }
 0x157   : > { %1698 = vrot.lane.b32.xlu0 %v1609_v9, %s5843_s28  ;;  %1118 = vst.msk [vmem:[#allocation3 + $0x180] sm:$0xff] %vm1101_vm4, %v1038_v45  ;;  %v7102_v45 = vld [vmem:[#allocation2 + $0x180] sm:$0xff] }
 0x158   : > { %864 = vrot.lane.b32.xlu1 %v6652_v5, %s5844_s29  ;;  %v7016_v46 = vpop.f32.mrb[8].mxu1 }
 0x159   : > { %v1488_v30 = vpop.permute.xlu0 %1487  ;;  %v7019_v58 = vpop.f32.mrb[9].mxu1 }
 0x15a   : > { %1567 = vst.msk [vmem:[#allocation3 + $0x188] sm:$0xff] %vm908_vm3, %v1488_v30  ;;  %v1231_v15 = vpop.permute.xlu1 %1230 }
 0x15b   : > { %1890 = vrot.lane.b32.xlu0 %v6757_v26, %s5845_s26  ;;  %1311 = vst.msk [vmem:[#allocation3 + $0x180] sm:$0xff] %vm1294_vm5, %v1231_v15  ;;  %v2118_v15 = vld [vmem:[#allocation3 + $0x2b0] sm:$0xff] }
 0x15c   : > { %1057 = vrot.lane.b32.xlu1 %v6696_v49, %s5843_s28  ;;  %v7025_v49 = vld [vmem:[#allocation2 + $0x168] sm:$0xff]  ;;  %v7084_v59 = vpop.f32.mrb[10].mxu1  ;;  %5628 = vmatprep.mubr.msk.f32.mxu1 %vm9265_vm0, %v2118_v15 }
 0x15d   : > { %v1681_v22 = vpop.permute.xlu0 %1680  ;;  %v2078_v10 = vld [vmem:[#allocation3 + $0x170] sm:$0xff]  ;;  %v7088_v61 = vpop.f32.mrb[11].mxu1  ;;  %5629 = vmatmul.mubr.msk.f32.gmra.mrb[28].mxu1 %vm9265_vm0, %v2121_v32 }
 0x15e   : > { %1760 = vst.msk [vmem:[#allocation3 + $0x188] sm:$0xff] %vm1101_vm4, %v1681_v22  ;;  %2399 = vmatprep.mubr.f32.mxu0 %v2078_v10  ;;  %v847_v5 = vpop.permute.xlu1 %846  ;;  %v4365_v22 = vld [vmem:[%s9251_s2 + $0x40] sm:$0xff]  ;;  %v4366_v10 = vld [vmem:[%s9251_s2 + $0x48] sm:$0xff] }
 0x15f   : > { %1507 = vrot.lane.b32.xlu0 %v6768_v56, %s5844_s29  ;;  %926 = vst.msk [vmem:[#allocation3 + $0x198] sm:$0xff] %vm908_vm3, %v847_v5  ;;  %2400 = vmatmul.mubr.f32.gmra.mrb[30].mxu0 %v2077_v43  ;;  %v1804_v5 = vld [vmem:[#allocation2 + $0x181] sm:$0xff] }
 0x160   : > { %1250 = vrot.lane.b32.xlu1 %v1608_v0, %s5845_s26 }
 0x161   : > { %v1873_v29 = vpop.permute.xlu0 %1872 }
 0x162   : > { %1952 = vst.msk [vmem:[#allocation3 + $0x188] sm:$0xff] %vm1294_vm5, %v1873_v29  ;;  %v1040_v8 = vpop.permute.xlu1 %1039  ;;  %v2080_v13 = vld [vmem:[#allocation3 + $0x180] sm:$0xff] }
 0x163   : > { %1700 = vrot.lane.b32.xlu0 %v7025_v49, %s5843_s28  ;;  %1119 = vst.msk [vmem:[#allocation3 + $0x198] sm:$0xff] %vm1101_vm4, %v1040_v8 }
 0x164   : > { %866 = vrot.lane.b32.xlu1 %v6685_v39, %s5844_s29 }
 0x165   : > { %v1490_v44 = vpop.permute.xlu0 %1489 }
 0x166   : > { %1568 = vst.msk [vmem:[#allocation3 + $0x1a0] sm:$0xff] %vm908_vm3, %v1490_v44  ;;  %v1233_v51 = vpop.permute.xlu1 %1232  ;;  %v4367_v44 = vld [vmem:[%s9251_s2 + $0x50] sm:$0xff] }
 0x167   : > { %1892 = vrot.lane.b32.xlu0 %v6787_v21, %s5845_s26  ;;  %1312 = vst.msk [vmem:[#allocation3 + $0x198] sm:$0xff] %vm1294_vm5, %v1233_v51 }
 0x168   : > { %1059 = vrot.lane.b32.xlu1 %v6738_v17, %s5843_s28  ;;  %v5747_v17 = vpack.c.bf16 %v4358_v1, %v4357_v28  ;;  %v1357_v28 = vld [vmem:[#allocation2 + $0x181] sm:$0xff] }
 0x169   : > { %v1683_v2 = vpop.permute.xlu0 %1682  ;;  %v2081_v63 = vld [vmem:[#allocation3 + $0x188] sm:$0xff]  ;;  %1389 = vst.msk [vmem:[#allocation3 + $0x2d8] sm:$0xff] %vm9265_vm0, %v1357_v28 }
 0x16a   : > { %1761 = vst.msk [vmem:[#allocation3 + $0x1a0] sm:$0xff] %vm1101_vm4, %v1683_v2  ;;  %2404 = vmatprep.mubr.f32.mxu0 %v2081_v63  ;;  %v849_v39 = vpop.permute.xlu1 %848  ;;  %5748 = vmatpush1.bf16.msra.mxu1 %v5747_v17 }
 0x16b   : > { %1509 = vrot.lane.b32.xlu0 %v6800_v6, %s5844_s29  ;;  %927 = vst.msk [vmem:[#allocation3 + $0x1b0] sm:$0xff] %vm908_vm3, %v849_v39  ;;  %2405 = vmatmul.mubr.f32.gmra.mrb[32].mxu0 %v2080_v13  ;;  %v7139_v13 = vld [vmem:[%s9255_s6] ss:$0 sm:$0xff]  ;;  %v714_v39 = vld [vmem:[#allocation2 + $0x168] sm:$0xff] }
 0x16c   : > { %1252 = vrot.lane.b32.xlu1 %v1609_v9, %s5845_s26  ;;  %5749 = vmatprep.subr.bf16.mxu1 %v5842_v3  ;;  %v4364_v9 = vld [vmem:[%s9251_s2 + $0x38] sm:$0xff]  ;;  %746 = vst.msk [vmem:[#allocation3 + $0x2d0] sm:$0xff] %vm9265_vm0, %v714_v39 }
 0x16d   : > { %v1875_v38 = vpop.permute.xlu0 %1874 }
 0x16e   : > { %1953 = vst.msk [vmem:[#allocation3 + $0x1a0] sm:$0xff] %vm1294_vm5, %v1875_v38  ;;  %v1042_v35 = vpop.permute.xlu1 %1041  ;;  %5751 = vmatpush1.bf16.msra.mxu1 %v5750_v57  ;;  %v2083_v20 = vld [vmem:[#allocation3 + $0x198] sm:$0xff] }
 0x16f   : > { %1702 = vrot.lane.b32.xlu0 %v7053_v37, %s5843_s28  ;;  %1120 = vst.msk [vmem:[#allocation3 + $0x1b0] sm:$0xff] %vm1101_vm4, %v1042_v35  ;;  %5752 = vmatprep.subr.bf16.mxu1 %v5842_v3  ;;  %v7149_v35 = vstv %s7105_s27  ;;  %s498_s27 = sld [smem:[#allocation5]] }
 0x170   : > { %868 = vrot.lane.b32.xlu1 %v6725_v19, %s5844_s29  ;;  %v5753_v19 = vpack.c.bf16 %v4362_v11, %v4361_v23 }
 0x171   : > { %v1492_v0 = vpop.permute.xlu0 %1491 }
 0x172   : > { %1569 = vst.msk [vmem:[#allocation3 + $0x1b8] sm:$0xff] %vm908_vm3, %v1492_v0  ;;  %v1235_v36 = vpop.permute.xlu1 %1234  ;;  %5754 = vmatpush1.bf16.msra.mxu1 %v5753_v19  ;;  %v7163_v0 = vld [vmem:[#allocation2 + $0x188] sm:$0xff]  ;;  %v4371_v19 = vld [vmem:[%s9251_s2 + $0x70] sm:$0xff] }
 0x173   : > { %1894 = vrot.lane.b32.xlu0 %v7068_v25, %s5845_s26  ;;  %1313 = vst.msk [vmem:[#allocation3 + $0x1b0] sm:$0xff] %vm1294_vm5, %v1235_v36  ;;  %5755 = vmatprep.subr.bf16.mxu1 %v5842_v3 }
 0x174   : > { %1061 = vrot.lane.b32.xlu1 %v6768_v56, %s5843_s28  ;;  %v4363_v56 = vld [vmem:[%s9251_s2 + $0x30] sm:$0xff] }
 0x175   : > { %v1685_v54 = vpop.permute.xlu0 %1684  ;;  %v2084_v34 = vld [vmem:[#allocation3 + $0x1a0] sm:$0xff]  ;;  %v5756_v27 = vpack.c.bf16 %v4364_v9, %v4363_v56  ;;  %v4373_v9 = vld [vmem:[%s9251_s2 + $0x80] sm:$0xff] }
 0x176   : > { %1762 = vst.msk [vmem:[#allocation3 + $0x1b8] sm:$0xff] %vm1101_vm4, %v1685_v54  ;;  %2409 = vmatprep.mubr.f32.mxu0 %v2084_v34  ;;  %v851_v53 = vpop.permute.xlu1 %850  ;;  %v1998_v34 = vld [vmem:[#allocation2 + $0x19a] sm:$0xff] }
 0x177   : > { %1511 = vrot.lane.b32.xlu0 %v6826_v47, %s5844_s29  ;;  %928 = vst.msk [vmem:[#allocation3 + $0x1c8] sm:$0xff] %vm908_vm3, %v851_v53  ;;  %2410 = vmatmul.mubr.f32.gmra.mrb[34].mxu0 %v2083_v20 }
 0x178   : > { %1254 = vrot.lane.b32.xlu1 %v7025_v49, %s5845_s26  ;;  %5757 = vmatpush1.bf16.msra.mxu1 %v5756_v27  ;;  %v5759_v49 = vpack.c.bf16 %v4366_v10, %v4365_v22  ;;  %v4374_v27 = vld [vmem:[%s9251_s2 + $0x88] sm:$0xff]  ;;  %2030 = vst.msk [vmem:[#allocation3 + $0x2e0] sm:$0xff] %vm9265_vm0, %v1998_v34  ;;  %v715_v22 = vld [vmem:[#allocation2 + $0x170] sm:$0xff] }
 0x179   : > { %v1877_v30 = vpop.permute.xlu0 %1876  ;;  %5758 = vmatprep.subr.bf16.mxu1 %v5842_v3  ;;  %v1358_v10 = vld [vmem:[#allocation2 + $0x189] sm:$0xff]  ;;  %747 = vst.msk [vmem:[#allocation3 + $0x2e8] sm:$0xff] %vm9265_vm0, %v715_v22 }
 0x17a   : > { %1954 = vst.msk [vmem:[#allocation3 + $0x1b8] sm:$0xff] %vm1294_vm5, %v1877_v30  ;;  %v1044_v43 = vpop.permute.xlu1 %1043  ;;  %v2086_v63 = vld [vmem:[#allocation3 + $0x1b0] sm:$0xff] }
 0x17b   : > { %1704 = vrot.lane.b32.xlu0 %v7102_v45, %s5843_s28  ;;  %1121 = vst.msk [vmem:[#allocation3 + $0x1c8] sm:$0xff] %vm1101_vm4, %v1044_v43  ;;  %v1999_v30 = vld [vmem:[#allocation2 + $0x1a2] sm:$0xff]  ;;  %v5771_v43 = vpack.c.bf16 %v4374_v27, %v4373_v9 }
 0x17c   : > { %870 = vrot.lane.b32.xlu1 %v6757_v26, %s5844_s29  ;;  %5760 = vmatpush1.bf16.msra.mxu1 %v5759_v49  ;;  %v4368_v26 = vld [vmem:[%s9251_s2 + $0x58] sm:$0xff]  ;;  %2031 = vst.msk [vmem:[#allocation3 + $0x2f8] sm:$0xff] %vm9265_vm0, %v1999_v30  ;;  %1390 = vst.msk [vmem:[#allocation3 + $0x2f0] sm:$0xff] %vm9265_vm0, %v1358_v10  ;;  %v4381_v9 = vld [vmem:[%s9251_s2 + $0xc0] sm:$0xff] }
 0x17d   : > { %v1494_v29 = vpop.permute.xlu0 %1493  ;;  %5761 = vmatprep.subr.bf16.mxu1 %v5842_v3  ;;  %v5762_v2 = vpack.c.bf16 %v4368_v26, %v4367_v44  ;;  %v4376_v44 = vld [vmem:[%s9251_s2 + $0x98] sm:$0xff]  ;;  %v4382_v27 = vld [vmem:[%s9251_s2 + $0xc8] sm:$0xff] }
 0x17e   : > { %1570 = vst.msk [vmem:[#allocation3 + $0x1d0] sm:$0xff] %vm908_vm3, %v1494_v29  ;;  %v1237_v7 = vpop.permute.xlu1 %1236  ;;  %v2326_v8 = vpop.f32.mrb[0].mxu0 }
 0x17f   : > { %1896 = vrot.lane.b32.xlu0 %v1804_v5, %s5845_s26  ;;  %1314 = vst.msk [vmem:[#allocation3 + $0x1c8] sm:$0xff] %vm1294_vm5, %v1237_v7  ;;  %v2552_v51 = vadd.f32 %v6884_v48, %v2326_v8  ;;  %v2328_v62 = vpop.f32.mrb[1].mxu0  ;;  %v7198_v29 = vpop.f32.mrb[12].mxu1  ;;  %v2124_v28 = vld [vmem:[#allocation3 + $0x2e0] sm:$0xff] }
 0x180   : > { %1063 = vrot.lane.b32.xlu1 %v6800_v6, %s5843_s28  ;;  %5763 = vmatpush1.bf16.msra.mxu1 %v5762_v2  ;;  %v4369_v6 = vld [vmem:[%s9251_s2 + $0x60] sm:$0xff]  ;;  %v7202_v8 = vpop.f32.mrb[13].mxu1  ;;  %4259 = vst.msk [vmem:[#allocation3 + $0x2e0] sm:$0xff] %vm9265_vm0, %v1998_v34 }
 0x181   : > { %v1687_v1 = vpop.permute.xlu0 %1686  ;;  %v2087_v17 = vld [vmem:[#allocation3 + $0x1b8] sm:$0xff]  ;;  %v2717_v48 = vmul.f32 %v7125_v16, %v2552_v51  ;;  %v5765_v57 = vpack.c.bf16 %v4370_v55, %v4369_v6  ;;  %5764 = vmatprep.subr.bf16.mxu1 %v5842_v3  ;;  %5631 = vmatprep.mubr.msk.f32.mxu1 %vm9265_vm0, %v2124_v28  ;;  %v1806_v6 = vld [vmem:[#allocation2 + $0x199] sm:$0xff] }
 0x182   : > { %1763 = vst.msk [vmem:[#allocation3 + $0x1d0] sm:$0xff] %vm1101_vm4, %v1687_v1  ;;  %2414 = vmatprep.mubr.f32.mxu0 %v2087_v17  ;;  %v853_v38 = vpop.permute.xlu1 %852  ;;  %v4377_v17 = vld [vmem:[%s9251_s2 + $0xa0] sm:$0xff] }
 0x183   : > { %1513 = vrot.lane.b32.xlu0 %v6853_v50, %s5844_s29  ;;  %929 = vst.msk [vmem:[#allocation3 + $0x1e0] sm:$0xff] %vm908_vm3, %v853_v38  ;;  %2415 = vmatmul.mubr.f32.gmra.mrb[36].mxu0 %v2086_v63  ;;  %v2756_v41 = vadd.f32 %v7139_v13, %v2717_v48  ;;  %v1614_v63 = vld [vmem:[#allocation2 + $0x198] sm:$0xff]  ;;  %v4378_v38 = vld [vmem:[%s9251_s2 + $0xa8] sm:$0xff]  ;;  %v4385_v28 = vld [vmem:[%s9251_s2 + $0xe0] sm:$0xff] }
 0x184   : > { %1256 = vrot.lane.b32.xlu1 %v7053_v37, %s5845_s26  ;;  %5766 = vmatpush1.bf16.msra.mxu1 %v5765_v57  ;;  %v4372_v37 = vld [vmem:[%s9251_s2 + $0x78] sm:$0xff]  ;;  %v5777_v55 = vpack.c.bf16 %v4378_v38, %v4377_v17 }
 0x185   : > { %vm2788_vm6 = vcmp.ge.f32.partialorder %v2756_v41, 0.0  ;;  %v2821_v36 = vmul.f32 %v7149_v35, %v2756_v41  ;;  %v1879_v23 = vpop.permute.xlu0 %1878  ;;  %5767 = vmatprep.subr.bf16.mxu1 %v5842_v3  ;;  %v5768_v52 = vpack.c.bf16 %v4372_v37, %v4371_v19 }
 0x186   : > { %1955 = vst.msk [vmem:[#allocation3 + $0x1d0] sm:$0xff] %vm1294_vm5, %v1879_v23  ;;  %v1046_v11 = vpop.permute.xlu1 %1045  ;;  %v2089_v32 = vld [vmem:[#allocation3 + $0x1c8] sm:$0xff]  ;;  %v4379_v23 = vld [vmem:[%s9251_s2 + $0xb0] sm:$0xff] }
 0x187   : > { %v2853_v20 = vsel %vm2788_vm6, %v2756_v41, %v2821_v36  ;;  %1706 = vrot.lane.b32.xlu0 %v7163_v0, %s5843_s28  ;;  %1122 = vst.msk [vmem:[#allocation3 + $0x1e0] sm:$0xff] %vm1101_vm4, %v1046_v11  ;;  %v4380_v11 = vld [vmem:[%s9251_s2 + $0xb8] sm:$0xff] }
 0x188   : > { %2885 = vst.msk [vmem:[#allocation2 + $0x19] sm:$0xff] %vm9265_vm0, %v2853_v20  ;;  %872 = vrot.lane.b32.xlu1 %v6787_v21, %s5844_s29  ;;  %5769 = vmatpush1.bf16.msra.mxu1 %v5768_v52  ;;  %v5780_v37 = vpack.c.bf16 %v4380_v11, %v4379_v23  ;;  %v2917_v52 = vld [vmem:[#allocation2] sm:$0xff] }
 0x189   : > { %v1496_v54 = vpop.permute.xlu0 %1495  ;;  %5770 = vmatprep.subr.bf16.mxu1 %v5842_v3  ;;  %2949 = vst.msk [vmem:[#allocation3] sm:$0xff] %vm9265_vm0, %v2917_v52 }
 0x18a   : > { %1571 = vst.msk [vmem:[#allocation3 + $0x1e8] sm:$0xff] %vm908_vm3, %v1496_v54  ;;  %v2331_v53 = vpop.f32.mrb[2].mxu0  ;;  %v1239_v56 = vpop.permute.xlu1 %1238 }
 0x18b   : > { %v2557_v21 = vadd.f32 %v6881_v60, %v2331_v53  ;;  %1898 = vrot.lane.b32.xlu0 %v1805_v40, %s5845_s26  ;;  %v2333_v15 = vpop.f32.mrb[3].mxu0  ;;  %1315 = vst.msk [vmem:[#allocation3 + $0x1e0] sm:$0xff] %vm1294_vm5, %v1239_v56  ;;  %v4390_v53 = vld [vmem:[%s9251_s2 + $0x108] sm:$0xff] }
 0x18c   : > { %1065 = vrot.lane.b32.xlu1 %v6826_v47, %s5843_s28  ;;  %5772 = vmatpush1.bf16.msra.mxu1 %v5771_v43  ;;  %v4375_v47 = vld [vmem:[%s9251_s2 + $0x90] sm:$0xff]  ;;  %v1615_v15 = vld [vmem:[#allocation2 + $0x1a0] sm:$0xff] }
 0x18d   : > { %v2718_v5 = vmul.f32 %v7125_v16, %v2557_v21  ;;  %v1689_v49 = vpop.permute.xlu0 %1688  ;;  %v2090_v60 = vld [vmem:[#allocation3 + $0x1d0] sm:$0xff]  ;;  %v5774_v62 = vpack.c.bf16 %v4376_v44, %v4375_v47  ;;  %5773 = vmatprep.subr.bf16.mxu1 %v5842_v3  ;;  %v5783_v21 = vpack.c.bf16 %v4382_v27, %v4381_v9  ;;  %v4384_v47 = vld [vmem:[%s9251_s2 + $0xd8] sm:$0xff] }
 0x18e   : > { %1764 = vst.msk [vmem:[#allocation3 + $0x1e8] sm:$0xff] %vm1101_vm4, %v1689_v49  ;;  %2419 = vmatprep.mubr.f32.mxu0 %v2090_v60  ;;  %v855_v7 = vpop.permute.xlu1 %854 }
 0x18f   : > { %v2757_v26 = vadd.f32 %v7139_v13, %v2718_v5  ;;  %1515 = vrot.lane.b32.xlu0 %v6873_v33, %s5844_s29  ;;  %930 = vst.msk [vmem:[#allocation3 + $0x1f8] sm:$0xff] %vm908_vm3, %v855_v7  ;;  %2420 = vmatmul.mubr.f32.gmra.mrb[38].mxu0 %v2089_v32  ;;  %v7214_v51 = vld [vmem:[#allocation2 + $0x19] sm:$0xff]  ;;  %v2981_v5 = vld [vmem:[#allocation2 + $0x1] sm:$0xff]  ;;  %v4383_v7 = vld [vmem:[%s9251_s2 + $0xd0] sm:$0xff] }
 0x190   : > { %v2919_v2 = vld [vmem:[#allocation2 + $0x18] sm:$0xff]  ;;  %1258 = vrot.lane.b32.xlu1 %v7102_v45, %s5845_s26  ;;  %3589 = vst.msk [vmem:[#allocation3 + $0x8] sm:$0xff] %vm9265_vm0, %v7214_v51  ;;  %5775 = vmatpush1.bf16.msra.mxu1 %v5774_v62  ;;  %v2127_v45 = vld [vmem:[#allocation3 + $0x2f8] sm:$0xff] }
 0x191   : > { %2951 = vst.msk [vmem:[#allocation3 + $0x30] sm:$0xff] %vm9265_vm0, %v2919_v2  ;;  %vm2789_vm7 = vcmp.ge.f32.partialorder %v2757_v26, 0.0  ;;  %v2822_v33 = vmul.f32 %v7149_v35, %v2757_v26  ;;  %v1881_v39 = vpop.permute.xlu0 %1880  ;;  %5632 = vmatmul.mubr.msk.f32.gmra.mrb[30].mxu1 %vm9265_vm0, %v2127_v45  ;;  %4260 = vst.msk [vmem:[#allocation3 + $0x2f8] sm:$0xff] %vm9265_vm0, %v1999_v30  ;;  %5776 = vmatprep.subr.bf16.mxu1 %v5842_v3  ;;  %v1807_v62 = vld [vmem:[#allocation2 + $0x1a1] sm:$0xff] }
 0x192   : > { %1956 = vst.msk [vmem:[#allocation3 + $0x1e8] sm:$0xff] %vm1294_vm5, %v1881_v39  ;;  %v1048_v1 = vpop.permute.xlu1 %1047  ;;  %v2092_v20 = vld [vmem:[#allocation3 + $0x1e0] sm:$0xff] }
 0x193   : > { %v2854_v48 = vsel %vm2789_vm7, %v2757_v26, %v2822_v33  ;;  %1708 = vrot.lane.b32.xlu0 %v1614_v63, %s5843_s28  ;;  %1123 = vst.msk [vmem:[#allocation3 + $0x1f8] sm:$0xff] %vm1101_vm4, %v1048_v1  ;;  %v5786_v26 = vpack.c.bf16 %v4384_v47, %v4383_v7  ;;  %v3173_v63 = vld [vmem:[#allocation2 + $0x2] sm:$0xff] }
 0x194   : > { %2886 = vst.msk [vmem:[#allocation2 + $0x21] sm:$0xff] %vm9265_vm0, %v2854_v48  ;;  %874 = vrot.lane.b32.xlu1 %v7068_v25, %s5844_s29  ;;  %5778 = vmatpush1.bf16.msra.mxu1 %v5777_v55  ;;  %v4386_v1 = vld [vmem:[%s9251_s2 + $0xe8] sm:$0xff] }
 0x195   : > { %v1498_v41 = vpop.permute.xlu0 %1497  ;;  %5779 = vmatprep.subr.bf16.mxu1 %v5842_v3  ;;  %v5789_v48 = vpack.c.bf16 %v4386_v1, %v4385_v28 }
 0x196   : > { %1572 = vst.msk [vmem:[#allocation3 + $0x200] sm:$0xff] %vm908_vm3, %v1498_v41  ;;  %v2336_v57 = vpop.f32.mrb[4].mxu0  ;;  %v1241_v36 = vpop.permute.xlu1 %1240 }
 0x197   : > { %v2562_v25 = vadd.f32 %v6895_v12, %v2336_v57  ;;  %1900 = vrot.lane.b32.xlu0 %v1806_v6, %s5845_s26  ;;  %1316 = vst.msk [vmem:[#allocation3 + $0x1f8] sm:$0xff] %vm1294_vm5, %v1241_v36  ;;  %v2338_v19 = vpop.f32.mrb[5].mxu0  ;;  %v4389_v12 = vld [vmem:[%s9251_s2 + $0x100] sm:$0xff]  ;;  %v2918_v6 = vld [vmem:[#allocation2 + $0x8] sm:$0xff] }
 0x198   : > { %1067 = vrot.lane.b32.xlu1 %v6853_v50, %s5843_s28  ;;  %5781 = vmatpush1.bf16.msra.mxu1 %v5780_v37  ;;  %v7262_v56 = vpack.c.bf16 %v4390_v53, %v4389_v12  ;;  %2950 = vst.msk [vmem:[#allocation3 + $0x18] sm:$0xff] %vm9265_vm0, %v2918_v6  ;;  %v4388_v19 = vld [vmem:[%s9251_s2 + $0xf8] sm:$0xff]  ;;  %v2982_v53 = vld [vmem:[#allocation2 + $0x9] sm:$0xff] }
 0x199   : > { %v2719_v40 = vmul.f32 %v7125_v16, %v2562_v25  ;;  %v1691_v54 = vpop.permute.xlu0 %1690  ;;  %v2093_v34 = vld [vmem:[#allocation3 + $0x1e8] sm:$0xff]  ;;  %5782 = vmatprep.subr.bf16.mxu1 %v5842_v3  ;;  %v4387_v25 = vld [vmem:[%s9251_s2 + $0xf0] sm:$0xff] }
 0x19a   : > { %1765 = vst.msk [vmem:[#allocation3 + $0x200] sm:$0xff] %vm1101_vm4, %v1691_v54  ;;  %2424 = vmatprep.mubr.f32.mxu0 %v2093_v34  ;;  %v857_v50 = vpop.permute.xlu1 %856  ;;  %5795 = vmatprep.subr.bf16.mxu0 %v7262_v56  ;;  %v5792_v52 = vpack.c.bf16 %v4388_v19, %v4387_v25 }
 0x19b   : > { %v2758_v30 = vadd.f32 %v7139_v13, %v2719_v40  ;;  %1517 = vrot.lane.b32.xlu0 %v6904_v42, %s5844_s29  ;;  %931 = vst.msk [vmem:[#allocation3 + $0x210] sm:$0xff] %vm908_vm3, %v857_v50  ;;  %2425 = vmatmul.mubr.f32.gmra.mrb[40].mxu0 %v2092_v20  ;;  %v7276_v43 = vld [vmem:[#allocation2 + $0x21] sm:$0xff]  ;;  %v4391_v42 = vld [vmem:[%s9251_s2 + $0x110] sm:$0xff]  ;;  %v3365_v20 = vld [vmem:[#allocation2 + $0x18] sm:$0xff] }
 0x19c   : > { %1260 = vrot.lane.b32.xlu1 %v7163_v0, %s5845_s26  ;;  %v2920_v32 = vld [vmem:[#allocation2 + $0x20] sm:$0xff]  ;;  %v4392_v0 = vld [vmem:[%s9251_s2 + $0x118] sm:$0xff]  ;;  %3590 = vst.msk [vmem:[#allocation3 + $0x20] sm:$0xff] %vm9265_vm0, %v7276_v43  ;;  %5784 = vmatpush1.bf16.msra.mxu1 %v5783_v21 }
 0x19d   : > { %vm2790_vm8 = vcmp.ge.f32.partialorder %v2758_v30, 0.0  ;;  %v2823_v22 = vmul.f32 %v7149_v35, %v2758_v30  ;;  %v1883_v10 = vpop.permute.xlu0 %1882  ;;  %2952 = vst.msk [vmem:[#allocation3 + $0x48] sm:$0xff] %vm9265_vm0, %v2920_v32  ;;  %5797 = vmatpush3.bf16.msra.mxu0 %v7262_v56  ;;  %v7292_v60 = vpack.c.bf16 %v4392_v0, %v4391_v42  ;;  %5785 = vmatprep.subr.bf16.mxu1 %v5842_v3  ;;  %v7325_v23 = vld [vmem:[#allocation2 + $0x1a] sm:$0xff]  ;;  %v7363_v47 = vld [vmem:[#allocation2 + $0x22] sm:$0xff] }
 0x19e   : > { %1957 = vst.msk [vmem:[#allocation3 + $0x200] sm:$0xff] %vm1294_vm5, %v1883_v10  ;;  %v1050_v49 = vpop.permute.xlu1 %1049  ;;  %v2095_v38 = vld [vmem:[#allocation3 + $0x1f8] sm:$0xff] }
 0x19f   : > { %v2855_v44 = vsel %vm2790_vm8, %v2758_v30, %v2823_v22  ;;  %1710 = vrot.lane.b32.xlu0 %v1615_v15, %s5843_s28  ;;  %1124 = vst.msk [vmem:[#allocation3 + $0x210] sm:$0xff] %vm1101_vm4, %v1050_v49  ;;  %5799 = vmatprep.subr.bf16.mxu0 %v7292_v60  ;;  %v3174_v30 = vld [vmem:[#allocation2 + $0xa] sm:$0xff] }
 0x1a0   : > { %2887 = vst.msk [vmem:[#allocation2 + $0x31] sm:$0xff] %vm9265_vm0, %v2855_v44  ;;  %3045 = vrot.lane.b32.xlu1 %v2981_v5, %s5844_s29  ;;  %5787 = vmatpush1.bf16.msra.mxu1 %v5786_v26  ;;  %v3366_v44 = vld [vmem:[#allocation2 + $0x20] sm:$0xff] }
 0x1a1   : > { %v1500_v2 = vpop.permute.xlu0 %1499  ;;  %5801 = vmatpush3.bf16.msra.mxu0 %v7292_v60  ;;  %5788 = vmatprep.subr.bf16.mxu1 %v5842_v3  ;;  %v7322_v36 = vpop.f32.mrb[14].mxu1 }
 0x1a2   : > { %1573 = vst.msk [vmem:[#allocation3 + $0x218] sm:$0xff] %vm908_vm3, %v1500_v2  ;;  %v2341_v33 = vpop.f32.mrb[6].mxu0  ;;  %v1243_v39 = vpop.permute.xlu1 %1242 }
 0x1a3   : > { %v2567_v45 = vadd.f32 %v6892_v18, %v2341_v33  ;;  %1902 = vrot.lane.b32.xlu0 %v1807_v62, %s5845_s26  ;;  %1317 = vst.msk [vmem:[#allocation3 + $0x210] sm:$0xff] %vm1294_vm5, %v1243_v39  ;;  %v2343_v17 = vpop.f32.mrb[7].mxu0  ;;  %v7327_v11 = vpop.f32.mrb[15].mxu1 }
 0x1a4   : > { %3237 = vrot.lane.b32.xlu1 %v3173_v63, %s5843_s28  ;;  %5790 = vmatpush1.bf16.msra.mxu1 %v5789_v48 }
 0x1a5   : > { %v2720_v55 = vmul.f32 %v7125_v16, %v2567_v45  ;;  %v1693_v41 = vpop.permute.xlu0 %1692  ;;  %v2096_v57 = vld [vmem:[#allocation3 + $0x200] sm:$0xff]  ;;  %5791 = vmatprep.subr.bf16.mxu1 %v5842_v3  ;;  %v7400_v19 = vpop.f32.mrb[16].mxu1 }
 0x1a6   : > { %1766 = vst.msk [vmem:[#allocation3 + $0x218] sm:$0xff] %vm1101_vm4, %v1693_v41  ;;  %2429 = vmatprep.mubr.f32.mxu0 %v2096_v57  ;;  %v859_v18 = vpop.permute.xlu1 %858 }
 0x1a7   : > { %v2759_v37 = vadd.f32 %v7139_v13, %v2720_v55  ;;  %932 = vst.msk [vmem:[#allocation3 + $0x228] sm:$0xff] %vm908_vm3, %v859_v18  ;;  %3685 = vrot.lane.b32.xlu0 %v7325_v23, %s5844_s29  ;;  %2430 = vmatmul.mubr.f32.gmra.mrb[42].mxu0 %v2095_v38  ;;  %v3559_v40 = vld [vmem:[#allocation2 + $0x31] sm:$0xff] }
 0x1a8   : > { %3429 = vrot.lane.b32.xlu1 %v3365_v20, %s5845_s26  ;;  %3591 = vst.msk [vmem:[#allocation3 + $0x38] sm:$0xff] %vm9265_vm0, %v3559_v40  ;;  %v2921_v54 = vld [vmem:[#allocation2 + $0x30] sm:$0xff]  ;;  %5793 = vmatpush1.bf16.msra.mxu1 %v5792_v52 }
 0x1a9   : > { %vm2791_vm9 = vcmp.ge.f32.partialorder %v2759_v37, 0.0  ;;  %v2824_v34 = vmul.f32 %v7149_v35, %v2759_v37  ;;  %v1885_v12 = vpop.permute.xlu0 %1884  ;;  %2953 = vst.msk [vmem:[#allocation3 + $0x60] sm:$0xff] %vm9265_vm0, %v2921_v54  ;;  %v7345_v9 = vld [vmem:[#allocation2 + $0x30] sm:$0xff]  ;;  %5802 = vmatprep.subr.bf16.mxu1 %v7262_v56 }
 0x1aa   : > { %1958 = vst.msk [vmem:[#allocation3 + $0x218] sm:$0xff] %vm1294_vm5, %v1885_v12  ;;  %v1052_v50 = vpop.permute.xlu1 %1051  ;;  %v7354_v32 = vld [vmem:[#allocation2 + $0x31] sm:$0xff]  ;;  %v2098_v5 = vld [vmem:[#allocation3 + $0x210] sm:$0xff] }
 0x1ab   : > { %v2856_v27 = vsel %vm2791_vm9, %v2759_v37, %v2824_v34  ;;  %1125 = vst.msk [vmem:[#allocation3 + $0x228] sm:$0xff] %vm1101_vm4, %v1052_v50  ;;  %3877 = vrot.lane.b32.xlu0 %v7345_v9, %s5843_s28  ;;  %v7403_v37 = vpop.f32.mrb[17].mxu1 }
 0x1ac   : > { %2888 = vst.msk [vmem:[#allocation2 + $0x39] sm:$0xff] %vm9265_vm0, %v2856_v27  ;;  %3047 = vrot.lane.b32.xlu1 %v2982_v53, %s5844_s29 }
 0x1ad   : > { %v1502_v3 = vpop.permute.xlu0 %1501 }
 0x1ae   : > { %1574 = vst.msk [vmem:[#allocation3 + $0x230] sm:$0xff] %vm908_vm3, %v1502_v3  ;;  %v2346_v21 = vpop.f32.mrb[8].mxu0  ;;  %v1245_v15 = vpop.permute.xlu1 %1244 }
 0x1af   : > { %v2572_v22 = vadd.f32 %v6939_v24, %v2346_v21  ;;  %1318 = vst.msk [vmem:[#allocation3 + $0x228] sm:$0xff] %vm1294_vm5, %v1245_v15  ;;  %4069 = vrot.lane.b32.xlu0 %v7354_v32, %s5845_s26  ;;  %v2348_v10 = vpop.f32.mrb[9].mxu0 }
 0x1b0   : > { %3239 = vrot.lane.b32.xlu1 %v3174_v30, %s5843_s28 }
 0x1b1   : > { %v2721_v42 = vmul.f32 %v7125_v16, %v2572_v22  ;;  %v1695_v0 = vpop.permute.xlu0 %1694  ;;  %v2099_v49 = vld [vmem:[#allocation3 + $0x218] sm:$0xff] }
 0x1b2   : > { %1767 = vst.msk [vmem:[#allocation3 + $0x230] sm:$0xff] %vm1101_vm4, %v1695_v0  ;;  %2434 = vmatprep.mubr.f32.mxu0 %v2099_v49  ;;  %v861_v7 = vpop.permute.xlu1 %860 }
 0x1b3   : > { %v2760_v24 = vadd.f32 %v7139_v13, %v2721_v42  ;;  %933 = vst.msk [vmem:[#allocation3 + $0x240] sm:$0xff] %vm908_vm3, %v861_v7  ;;  %2435 = vmatmul.mubr.f32.gmra.mrb[44].mxu0 %v2098_v5  ;;  %3687 = vrot.lane.b32.xlu0 %v7363_v47, %s5844_s29  ;;  %v7369_v26 = vld [vmem:[#allocation2 + $0x32] sm:$0xff]  ;;  %v7372_v62 = vld [vmem:[#allocation2 + $0x3a] sm:$0xff] }
 0x1b4   : > { %3431 = vrot.lane.b32.xlu1 %v3366_v44, %s5845_s26  ;;  %4229 = vst.msk [vmem:[#allocation3 + $0x10] sm:$0xff] %vm9265_vm0, %v7369_v26  ;;  %v3560_v2 = vld [vmem:[#allocation2 + $0x39] sm:$0xff]  ;;  %4230 = vst.msk [vmem:[#allocation3 + $0x28] sm:$0xff] %vm9265_vm0, %v7372_v62 }
 0x1b5   : > { %v2922_v63 = vld [vmem:[#allocation2 + $0x38] sm:$0xff]  ;;  %vm2792_vm10 = vcmp.ge.f32.partialorder %v2760_v24, 0.0  ;;  %v2825_v33 = vmul.f32 %v7149_v35, %v2760_v24  ;;  %v1887_v39 = vpop.permute.xlu0 %1886  ;;  %3592 = vst.msk [vmem:[#allocation3 + $0x50] sm:$0xff] %vm9265_vm0, %v3560_v2 }
 0x1b6   : > { %2954 = vst.msk [vmem:[#allocation3 + $0x78] sm:$0xff] %vm9265_vm0, %v2922_v63  ;;  %v1054_v28 = vpop.permute.xlu1 %1053  ;;  %v7382_v1 = vld [vmem:[#allocation2 + $0x38] sm:$0xff] }
 0x1b7   : > { %1959 = vst.msk [vmem:[#allocation3 + $0x230] sm:$0xff] %vm1294_vm5, %v1887_v39  ;;  %v2857_v45 = vsel %vm2792_vm10, %v2760_v24, %v2825_v33  ;;  %3879 = vrot.lane.b32.xlu0 %v7382_v1, %s5843_s28  ;;  %v7391_v6 = vld [vmem:[#allocation2 + $0x39] sm:$0xff] }
 0x1b8   : > { %1126 = vst.msk [vmem:[#allocation3 + $0x240] sm:$0xff] %vm1101_vm4, %v1054_v28  ;;  %3049 = vrot.lane.b32.xlu1 %v7214_v51, %s5844_s29  ;;  %v2101_v57 = vld [vmem:[#allocation3 + $0x228] sm:$0xff] }
 0x1b9   : > { %2889 = vst.msk [vmem:[#allocation2 + $0x49] sm:$0xff] %vm9265_vm0, %v2857_v45  ;;  %v1504_v17 = vpop.permute.xlu0 %1503 }
 0x1ba   : > { %1575 = vst.msk [vmem:[#allocation3 + $0x248] sm:$0xff] %vm908_vm3, %v1504_v17  ;;  %v2351_v48 = vpop.f32.mrb[10].mxu0  ;;  %v1247_v38 = vpop.permute.xlu1 %1246 }
 0x1bb   : > { %v2577_v55 = vadd.f32 %v6936_v31, %v2351_v48  ;;  %1319 = vst.msk [vmem:[#allocation3 + $0x240] sm:$0xff] %vm1294_vm5, %v1247_v38  ;;  %4071 = vrot.lane.b32.xlu0 %v7391_v6, %s5845_s26  ;;  %v2353_v41 = vpop.f32.mrb[11].mxu0 }
 0x1bc   : > { %3241 = vrot.lane.b32.xlu1 %v7325_v23, %s5843_s28 }
 0x1bd   : > { %v2722_v51 = vmul.f32 %v7125_v16, %v2577_v55  ;;  %v1697_v18 = vpop.permute.xlu0 %1696 }
 0x1be   : > { %v2102_v25 = vld [vmem:[#allocation3 + $0x230] sm:$0xff]  ;;  %1768 = vst.msk [vmem:[#allocation3 + $0x248] sm:$0xff] %vm1101_vm4, %v1697_v18  ;;  %v863_v31 = vpop.permute.xlu1 %862 }
 0x1bf   : > { %2439 = vmatprep.mubr.f32.mxu0 %v2102_v25  ;;  %v2761_v20 = vadd.f32 %v7139_v13, %v2722_v51  ;;  %934 = vst.msk [vmem:[#allocation3 + $0x258] sm:$0xff] %vm908_vm3, %v863_v31  ;;  %3689 = vrot.lane.b32.xlu0 %v7369_v26, %s5844_s29 }
 0x1c0   : > { %2440 = vmatmul.mubr.f32.gmra.mrb[46].mxu0 %v2101_v57  ;;  %v3561_v23 = vld [vmem:[#allocation2 + $0x49] sm:$0xff]  ;;  %3433 = vrot.lane.b32.xlu1 %v7345_v9, %s5845_s26 }
 0x1c1   : > { %3593 = vst.msk [vmem:[#allocation3 + $0x68] sm:$0xff] %vm9265_vm0, %v3561_v23  ;;  %v2923_v52 = vld [vmem:[#allocation2 + $0x48] sm:$0xff]  ;;  %vm2793_vm11 = vcmp.ge.f32.partialorder %v2761_v20, 0.0  ;;  %v2826_v40 = vmul.f32 %v7149_v35, %v2761_v20  ;;  %v1889_v54 = vpop.permute.xlu0 %1888 }
 0x1c2   : > { %2955 = vst.msk [vmem:[#allocation3 + $0x90] sm:$0xff] %vm9265_vm0, %v2923_v52  ;;  %v1056_v34 = vpop.permute.xlu1 %1055  ;;  %v7415_v12 = vld [vmem:[#allocation2 + $0x48] sm:$0xff]  ;;  %v2104_v15 = vld [vmem:[#allocation3 + $0x240] sm:$0xff] }
 0x1c3   : > { %1960 = vst.msk [vmem:[#allocation3 + $0x248] sm:$0xff] %vm1294_vm5, %v1889_v54  ;;  %v2858_v53 = vsel %vm2793_vm11, %v2761_v20, %v2826_v40  ;;  %3881 = vrot.lane.b32.xlu0 %v7415_v12, %s5843_s28  ;;  %v7424_v3 = vld [vmem:[#allocation2 + $0x49] sm:$0xff] }
 0x1c4   : > { %1127 = vst.msk [vmem:[#allocation3 + $0x258] sm:$0xff] %vm1101_vm4, %v1056_v34  ;;  %3051 = vrot.lane.b32.xlu1 %v7276_v43, %s5844_s29 }
 0x1c5   : > { %2890 = vst.msk [vmem:[#allocation2 + $0x51] sm:$0xff] %vm9265_vm0, %v2858_v53  ;;  %v1506_v50 = vpop.permute.xlu0 %1505 }
 0x1c6   : > { %1576 = vst.msk [vmem:[#allocation3 + $0x260] sm:$0xff] %vm908_vm3, %v1506_v50  ;;  %v2356_v9 = vpop.f32.mrb[12].mxu0  ;;  %v1249_v27 = vpop.permute.xlu1 %1248 }
 0x1c7   : > { %v2582_v30 = vadd.f32 %v6979_v4, %v2356_v9  ;;  %1320 = vst.msk [vmem:[#allocation3 + $0x258] sm:$0xff] %vm1294_vm5, %v1249_v27  ;;  %4073 = vrot.lane.b32.xlu0 %v7424_v3, %s5845_s26  ;;  %v2358_v21 = vpop.f32.mrb[13].mxu0 }
 0x1c8   : > { %3243 = vrot.lane.b32.xlu1 %v7363_v47, %s5843_s28 }
 0x1c9   : > { %v2723_v43 = vmul.f32 %v7125_v16, %v2582_v30  ;;  %v1699_v22 = vpop.permute.xlu0 %1698 }
 0x1ca   : > { %v2105_v10 = vld [vmem:[#allocation3 + $0x248] sm:$0xff]  ;;  %1769 = vst.msk [vmem:[#allocation3 + $0x260] sm:$0xff] %vm1101_vm4, %v1699_v22  ;;  %v865_v5 = vpop.permute.xlu1 %864 }
 0x1cb   : > { %2444 = vmatprep.mubr.f32.mxu0 %v2105_v10  ;;  %v2762_v4 = vadd.f32 %v7139_v13, %v2723_v43  ;;  %935 = vst.msk [vmem:[#allocation3 + $0x270] sm:$0xff] %vm908_vm3, %v865_v5  ;;  %3691 = vrot.lane.b32.xlu0 %v7372_v62, %s5844_s29 }
 0x1cc   : > { %2445 = vmatmul.mubr.f32.gmra.mrb[48].mxu0 %v2104_v15  ;;  %v7438_v42 = vld [vmem:[#allocation2 + $0x4a] sm:$0xff]  ;;  %3435 = vrot.lane.b32.xlu1 %v7382_v1, %s5845_s26  ;;  %v7442_v0 = vld [vmem:[#allocation2 + $0x52] sm:$0xff]  ;;  %v7470_v41 = vpop.f32.mrb[18].mxu1 }
 0x1cd   : > { %4231 = vst.msk [vmem:[#allocation3 + $0x40] sm:$0xff] %vm9265_vm0, %v7438_v42  ;;  %v3562_v49 = vld [vmem:[#allocation2 + $0x51] sm:$0xff]  ;;  %vm2794_vm12 = vcmp.ge.f32.partialorder %v2762_v4, 0.0  ;;  %v2827_v47 = vmul.f32 %v7149_v35, %v2762_v4  ;;  %v1891_v24 = vpop.permute.xlu0 %1890  ;;  %4232 = vst.msk [vmem:[#allocation3 + $0x58] sm:$0xff] %vm9265_vm0, %v7442_v0  ;;  %v7473_v57 = vpop.f32.mrb[19].mxu1 }
 0x1ce   : > { %v2924_v7 = vld [vmem:[#allocation2 + $0x50] sm:$0xff]  ;;  %3594 = vst.msk [vmem:[#allocation3 + $0x80] sm:$0xff] %vm9265_vm0, %v3562_v49  ;;  %v1058_v44 = vpop.permute.xlu1 %1057  ;;  %v2107_v48 = vld [vmem:[#allocation3 + $0x258] sm:$0xff] }
 0x1cf   : > { %2956 = vst.msk [vmem:[#allocation3 + $0xa8] sm:$0xff] %vm9265_vm0, %v2924_v7  ;;  %v7452_v2 = vld [vmem:[#allocation2 + $0x50] sm:$0xff]  ;;  %v2859_v63 = vsel %vm2794_vm12, %v2762_v4, %v2827_v47 }
 0x1d0   : > { %1961 = vst.msk [vmem:[#allocation3 + $0x260] sm:$0xff] %vm1294_vm5, %v1891_v24  ;;  %3883 = vrot.lane.b32.xlu0 %v7452_v2, %s5843_s28  ;;  %3053 = vrot.lane.b32.xlu1 %v7354_v32, %s5844_s29  ;;  %v7461_v1 = vld [vmem:[#allocation2 + $0x51] sm:$0xff] }
 0x1d1   : > { %1128 = vst.msk [vmem:[#allocation3 + $0x270] sm:$0xff] %vm1101_vm4, %v1058_v44  ;;  %v1508_v33 = vpop.permute.xlu0 %1507 }
 0x1d2   : > { %2891 = vst.msk [vmem:[#allocation2 + $0x61] sm:$0xff] %vm9265_vm0, %v2859_v63  ;;  %v2361_v39 = vpop.f32.mrb[14].mxu0  ;;  %v1251_v28 = vpop.permute.xlu1 %1250 }
 0x1d3   : > { %1577 = vst.msk [vmem:[#allocation3 + $0x278] sm:$0xff] %vm908_vm3, %v1508_v33  ;;  %v2587_v45 = vadd.f32 %v6976_v14, %v2361_v39  ;;  %v2363_v17 = vpop.f32.mrb[15].mxu0 }
 0x1d4   : > { %1321 = vst.msk [vmem:[#allocation3 + $0x270] sm:$0xff] %vm1294_vm5, %v1251_v28  ;;  %4075 = vrot.lane.b32.xlu0 %v7461_v1, %s5845_s26  ;;  %3245 = vrot.lane.b32.xlu1 %v7369_v26, %s5843_s28  ;;  %v7540_v17 = vpop.f32.mrb[20].mxu1 }
 0x1d5   : > { %v2724_v32 = vmul.f32 %v7125_v16, %v2587_v45  ;;  %v1701_v38 = vpop.permute.xlu0 %1700 }
 0x1d6   : > { %1770 = vst.msk [vmem:[#allocation3 + $0x278] sm:$0xff] %vm1101_vm4, %v1701_v38  ;;  %v867_v14 = vpop.permute.xlu1 %866 }
 0x1d7   : > { %v2108_v55 = vld [vmem:[#allocation3 + $0x260] sm:$0xff]  ;;  %v2763_v51 = vadd.f32 %v7139_v13, %v2724_v32  ;;  %936 = vst.msk [vmem:[#allocation3 + $0x288] sm:$0xff] %vm908_vm3, %v867_v14 }
 0x1d8   : > { %2449 = vmatprep.mubr.f32.mxu0 %v2108_v55  ;;  %3693 = vrot.lane.b32.xlu0 %v7438_v42, %s5844_s29 }
 0x1d9   : > { %2450 = vmatmul.mubr.f32.gmra.mrb[50].mxu0 %v2107_v48  ;;  %v3563_v26 = vld [vmem:[#allocation2 + $0x61] sm:$0xff]  ;;  %3437 = vrot.lane.b32.xlu1 %v7415_v12, %s5845_s26  ;;  %vm2795_vm13 = vcmp.ge.f32.partialorder %v2763_v51, 0.0  ;;  %v2828_v25 = vmul.f32 %v7149_v35, %v2763_v51  ;;  %v1893_v31 = vpop.permute.xlu0 %1892  ;;  %v7543_v48 = vpop.f32.mrb[21].mxu1 }
 0x1da   : > { %3595 = vst.msk [vmem:[#allocation3 + $0x98] sm:$0xff] %vm9265_vm0, %v3563_v26  ;;  %v2925_v18 = vld [vmem:[#allocation2 + $0x60] sm:$0xff]  ;;  %v1060_v20 = vpop.permute.xlu1 %1059 }
 0x1db   : > { %2957 = vst.msk [vmem:[#allocation3 + $0xc0] sm:$0xff] %vm9265_vm0, %v2925_v18  ;;  %v7485_v23 = vld [vmem:[#allocation2 + $0x60] sm:$0xff]  ;;  %v2860_v52 = vsel %vm2795_vm13, %v2763_v51, %v2828_v25 }
 0x1dc   : > { %1962 = vst.msk [vmem:[#allocation3 + $0x278] sm:$0xff] %vm1294_vm5, %v1893_v31  ;;  %3885 = vrot.lane.b32.xlu0 %v7485_v23, %s5843_s28  ;;  %v7494_v12 = vld [vmem:[#allocation2 + $0x61] sm:$0xff] }
 0x1dd   : > { %1129 = vst.msk [vmem:[#allocation3 + $0x288] sm:$0xff] %vm1101_vm4, %v1060_v20  ;;  %3055 = vrot.lane.b32.xlu1 %v7391_v6, %s5844_s29  ;;  %v1510_v40 = vpop.permute.xlu0 %1509  ;;  %v2110_v9 = vld [vmem:[#allocation3 + $0x270] sm:$0xff] }
 0x1de   : > { %2892 = vst.msk [vmem:[#allocation2 + $0x69] sm:$0xff] %vm9265_vm0, %v2860_v52  ;;  %v2366_v54 = vpop.f32.mrb[16].mxu0  ;;  %v1253_v34 = vpop.permute.xlu1 %1252 }
 0x1df   : > { %1578 = vst.msk [vmem:[#allocation3 + $0x290] sm:$0xff] %vm908_vm3, %v1510_v40  ;;  %v2592_v53 = vadd.f32 %v7019_v58, %v2366_v54  ;;  %v2368_v50 = vpop.f32.mrb[17].mxu0 }
 0x1e0   : > { %1322 = vst.msk [vmem:[#allocation3 + $0x288] sm:$0xff] %vm1294_vm5, %v1253_v34  ;;  %4077 = vrot.lane.b32.xlu0 %v7494_v12, %s5845_s26 }
 0x1e1   : > { %3247 = vrot.lane.b32.xlu1 %v7372_v62, %s5843_s28  ;;  %v2725_v6 = vmul.f32 %v7125_v16, %v2592_v53  ;;  %v1703_v27 = vpop.permute.xlu0 %1702 }
 0x1e2   : > { %1771 = vst.msk [vmem:[#allocation3 + $0x290] sm:$0xff] %vm1101_vm4, %v1703_v27  ;;  %v869_v21 = vpop.permute.xlu1 %868 }
 0x1e3   : > { %v2111_v30 = vld [vmem:[#allocation3 + $0x278] sm:$0xff]  ;;  %v2764_v58 = vadd.f32 %v7139_v13, %v2725_v6  ;;  %937 = vst.msk [vmem:[#allocation3 + $0x2a0] sm:$0xff] %vm908_vm3, %v869_v21 }
 0x1e4   : > { %2454 = vmatprep.mubr.f32.mxu0 %v2111_v30  ;;  %3695 = vrot.lane.b32.xlu0 %v7442_v0, %s5844_s29 }
 0x1e5   : > { %2455 = vmatmul.mubr.f32.gmra.mrb[52].mxu0 %v2110_v9  ;;  %v7508_v15 = vld [vmem:[#allocation2 + $0x62] sm:$0xff]  ;;  %3439 = vrot.lane.b32.xlu1 %v7452_v2, %s5845_s26  ;;  %v7512_v62 = vld [vmem:[#allocation2 + $0x6a] sm:$0xff]  ;;  %vm2796_vm14 = vcmp.ge.f32.partialorder %v2764_v58, 0.0  ;;  %v2829_v10 = vmul.f32 %v7149_v35, %v2764_v58  ;;  %v1895_v5 = vpop.permute.xlu0 %1894 }
 0x1e6   : > { %4233 = vst.msk [vmem:[#allocation3 + $0x70] sm:$0xff] %vm9265_vm0, %v7508_v15  ;;  %v3564_v43 = vld [vmem:[#allocation2 + $0x69] sm:$0xff]  ;;  %4234 = vst.msk [vmem:[#allocation3 + $0x88] sm:$0xff] %vm9265_vm0, %v7512_v62  ;;  %v1062_v4 = vpop.permute.xlu1 %1061 }
 0x1e7   : > { %v2926_v22 = vld [vmem:[#allocation2 + $0x68] sm:$0xff]  ;;  %3596 = vst.msk [vmem:[#allocation3 + $0xb0] sm:$0xff] %vm9265_vm0, %v3564_v43  ;;  %v2861_v7 = vsel %vm2796_vm14, %v2764_v58, %v2829_v10  ;;  %v2113_v39 = vld [vmem:[#allocation3 + $0x288] sm:$0xff] }
 0x1e8   : > { %2958 = vst.msk [vmem:[#allocation3 + $0xd8] sm:$0xff] %vm9265_vm0, %v2926_v22  ;;  %v7522_v49 = vld [vmem:[#allocation2 + $0x68] sm:$0xff]  ;;  %2893 = vst.msk [vmem:[#allocation2 + $0x79] sm:$0xff] %vm9265_vm0, %v2861_v7 }
 0x1e9   : > { %1963 = vst.msk [vmem:[#allocation3 + $0x290] sm:$0xff] %vm1294_vm5, %v1895_v5  ;;  %3887 = vrot.lane.b32.xlu0 %v7522_v49, %s5843_s28  ;;  %3057 = vrot.lane.b32.xlu1 %v7424_v3, %s5844_s29  ;;  %v1512_v47 = vpop.permute.xlu0 %1511  ;;  %v7531_v2 = vld [vmem:[#allocation2 + $0x69] sm:$0xff] }
 0x1ea   : > { %1130 = vst.msk [vmem:[#allocation3 + $0x2a0] sm:$0xff] %vm1101_vm4, %v1062_v4  ;;  %v2371_v24 = vpop.f32.mrb[18].mxu0  ;;  %v1255_v44 = vpop.permute.xlu1 %1254 }
 0x1eb   : > { %1579 = vst.msk [vmem:[#allocation3 + $0x2a8] sm:$0xff] %vm908_vm3, %v1512_v47  ;;  %v2597_v63 = vadd.f32 %v7016_v46, %v2371_v24  ;;  %v2373_v33 = vpop.f32.mrb[19].mxu0 }
 0x1ec   : > { %1323 = vst.msk [vmem:[#allocation3 + $0x2a0] sm:$0xff] %vm1294_vm5, %v1255_v44 }
 0x1ed   : > { %4079 = vrot.lane.b32.xlu0 %v7531_v2, %s5845_s26  ;;  %3249 = vrot.lane.b32.xlu1 %v7438_v42, %s5843_s28  ;;  %v2726_v3 = vmul.f32 %v7125_v16, %v2597_v63  ;;  %v1705_v28 = vpop.permute.xlu0 %1704 }
 0x1ee   : > { %1772 = vst.msk [vmem:[#allocation3 + $0x2a8] sm:$0xff] %vm1101_vm4, %v1705_v28  ;;  %v871_v46 = vpop.permute.xlu1 %870 }
 0x1ef   : > { %v2765_v32 = vadd.f32 %v7139_v13, %v2726_v3  ;;  %938 = vst.msk [vmem:[#allocation3 + $0x2b8] sm:$0xff] %vm908_vm3, %v871_v46  ;;  %v3565_v42 = vld [vmem:[#allocation2 + $0x79] sm:$0xff] }
 0x1f0   : > { %v2114_v45 = vld [vmem:[#allocation3 + $0x290] sm:$0xff]  ;;  %3597 = vst.msk [vmem:[#allocation3 + $0xc8] sm:$0xff] %vm9265_vm0, %v3565_v42  ;;  %v2927_v38 = vld [vmem:[#allocation2 + $0x78] sm:$0xff] }
 0x1f1   : > { %2459 = vmatprep.mubr.f32.mxu0 %v2114_v45  ;;  %3697 = vrot.lane.b32.xlu0 %v7508_v15, %s5844_s29  ;;  %vm2797_vm15 = vcmp.ge.f32.partialorder %v2765_v32, 0.0  ;;  %v2830_v55 = vmul.f32 %v7149_v35, %v2765_v32  ;;  %v1897_v14 = vpop.permute.xlu0 %1896  ;;  %2959 = vst.msk [vmem:[#allocation3 + $0xf0] sm:$0xff] %vm9265_vm0, %v2927_v38  ;;  %v7555_v26 = vld [vmem:[#allocation2 + $0x78] sm:$0xff] }
 0x1f2   : > { %2460 = vmatmul.mubr.f32.gmra.mrb[54].mxu0 %v2113_v39  ;;  %3441 = vrot.lane.b32.xlu1 %v7485_v23, %s5845_s26  ;;  %1964 = vst.msk [vmem:[#allocation3 + $0x2a8] sm:$0xff] %vm1294_vm5, %v1897_v14  ;;  %v1064_v51 = vpop.permute.xlu1 %1063  ;;  %v7564_v23 = vld [vmem:[#allocation2 + $0x79] sm:$0xff] }
 0x1f3   : > { %v2862_v18 = vsel %vm2797_vm15, %v2765_v32, %v2830_v55  ;;  %1131 = vst.msk [vmem:[#allocation3 + $0x2b8] sm:$0xff] %vm1101_vm4, %v1064_v51  ;;  %v2116_v54 = vld [vmem:[#allocation3 + $0x2a0] sm:$0xff] }
 0x1f4   : > { %2894 = vst.msk [vmem:[#allocation2 + $0x81] sm:$0xff] %vm9265_vm0, %v2862_v18 }
 0x1f5   : > { %3889 = vrot.lane.b32.xlu0 %v7555_v26, %s5843_s28  ;;  %v1514_v25 = vpop.permute.xlu0 %1513 }
 0x1f6   : > { %3059 = vrot.lane.b32.xlu1 %v7461_v1, %s5844_s29  ;;  %1580 = vst.msk [vmem:[#allocation3 + $0x2c0] sm:$0xff] %vm908_vm3, %v1514_v25  ;;  %v2376_v31 = vpop.f32.mrb[20].mxu0  ;;  %v1257_v20 = vpop.permute.xlu1 %1256 }
 0x1f7   : > { %v2602_v52 = vadd.f32 %v7088_v61, %v2376_v31  ;;  %1324 = vst.msk [vmem:[#allocation3 + $0x2b8] sm:$0xff] %vm1294_vm5, %v1257_v20  ;;  %v2378_v40 = vpop.f32.mrb[21].mxu0 }
 0x1f9   : > { %4081 = vrot.lane.b32.xlu0 %v7564_v23, %s5845_s26  ;;  %v2727_v1 = vmul.f32 %v7125_v16, %v2602_v52  ;;  %v1707_v34 = vpop.permute.xlu0 %1706  ;;  %v2117_v53 = vld [vmem:[#allocation3 + $0x2a8] sm:$0xff] }
 0x1fa   : > { %3251 = vrot.lane.b32.xlu1 %v7442_v0, %s5843_s28  ;;  %1773 = vst.msk [vmem:[#allocation3 + $0x2c0] sm:$0xff] %vm1101_vm4, %v1707_v34  ;;  %2464 = vmatprep.mubr.f32.mxu0 %v2117_v53  ;;  %v873_v50 = vpop.permute.xlu1 %872 }
 0x1fb   : > { %v2766_v61 = vadd.f32 %v7139_v13, %v2727_v1  ;;  %939 = vst.msk [vmem:[#allocation3 + $0x2d0] sm:$0xff] %vm908_vm3, %v873_v50  ;;  %2465 = vmatmul.mubr.f32.gmra.mrb[56].mxu0 %v2116_v54  ;;  %v7578_v9 = vld [vmem:[#allocation2 + $0x7a] sm:$0xff]  ;;  %v7582_v16 = vld [vmem:[#allocation2 + $0x82] sm:$0xff] }
 0x1fc   : > { %4235 = vst.msk [vmem:[#allocation3 + $0xa0] sm:$0xff] %vm9265_vm0, %v7578_v9  ;;  %v3566_v0 = vld [vmem:[#allocation2 + $0x81] sm:$0xff]  ;;  %4236 = vst.msk [vmem:[#allocation3 + $0xb8] sm:$0xff] %vm9265_vm0, %v7582_v16 }
 0x1fd   : > { %3699 = vrot.lane.b32.xlu0 %v7512_v62, %s5844_s29  ;;  %v2928_v6 = vld [vmem:[#allocation2 + $0x80] sm:$0xff]  ;;  %vm2798_vm1 = vcmp.ge.f32.partialorder %v2766_v61, 0.0  ;;  %v2831_v13 = vmul.f32 %v7149_v35, %v2766_v61  ;;  %v1899_v27 = vpop.permute.xlu0 %1898  ;;  %3598 = vst.msk [vmem:[#allocation3 + $0xe0] sm:$0xff] %vm9265_vm0, %v3566_v0 }
 0x1fe   : > { %3443 = vrot.lane.b32.xlu1 %v7522_v49, %s5845_s26  ;;  %2960 = vst.msk [vmem:[#allocation3 + $0x108] sm:$0xff] %vm9265_vm0, %v2928_v6  ;;  %v1066_v30 = vpop.permute.xlu1 %1065  ;;  %v7592_v21 = vld [vmem:[#allocation2 + $0x80] sm:$0xff]  ;;  %v2119_v7 = vld [vmem:[#allocation3 + $0x2b8] sm:$0xff] }
 0x1ff   : > { %1965 = vst.msk [vmem:[#allocation3 + $0x2c0] sm:$0xff] %vm1294_vm5, %v1899_v27  ;;  %v2863_v58 = vsel %vm2798_vm1, %v2766_v61, %v2831_v13  ;;  %v7601_v5 = vld [vmem:[#allocation2 + $0x81] sm:$0xff] }
 0x200   : > { %1132 = vst.msk [vmem:[#allocation3 + $0x2d0] sm:$0xff] %vm1101_vm4, %v1066_v30 }
 0x201   : > { %3891 = vrot.lane.b32.xlu0 %v7592_v21, %s5843_s28  ;;  %2895 = vst.msk [vmem:[#allocation2 + $0x91] sm:$0xff] %vm9265_vm0, %v2863_v58  ;;  %v1516_v43 = vpop.permute.xlu0 %1515 }
 0x202   : > { %3061 = vrot.lane.b32.xlu1 %v7494_v12, %s5844_s29  ;;  %1581 = vst.msk [vmem:[#allocation3 + $0x2d8] sm:$0xff] %vm908_vm3, %v1516_v43  ;;  %v2381_v22 = vpop.f32.mrb[22].mxu0  ;;  %v1259_v10 = vpop.permute.xlu1 %1258  ;;  %v7612_v12 = vld [vmem:[%s9254_s5] ss:$0 sm:$0xff] }
 0x203   : > { %v2607_v4 = vadd.f32 %v7084_v59, %v2381_v22  ;;  %1325 = vst.msk [vmem:[#allocation3 + $0x2d0] sm:$0xff] %vm1294_vm5, %v1259_v10  ;;  %v2383_v49 = vpop.f32.mrb[23].mxu0  ;;  %v7615_v59 = vpop.f32.mrb[22].mxu1 }
 0x204   : > { %v7618_v33 = vpop.f32.mrb[23].mxu1 }
 0x205   : > { %4083 = vrot.lane.b32.xlu0 %v7601_v5, %s5845_s26  ;;  %v2728_v47 = vmul.f32 %v7612_v12, %v2607_v4  ;;  %v1709_v24 = vpop.permute.xlu0 %1708 }
 0x206   : > { %3253 = vrot.lane.b32.xlu1 %v7508_v15, %s5843_s28  ;;  %v2120_v44 = vld [vmem:[#allocation3 + $0x2c0] sm:$0xff]  ;;  %1774 = vst.msk [vmem:[#allocation3 + $0x2d8] sm:$0xff] %vm1101_vm4, %v1709_v24  ;;  %v875_v63 = vpop.permute.xlu1 %874  ;;  %v7623_v15 = vld [vmem:[%s9255_s6] ss:$0 sm:$0xff] }
 0x207   : > { %2469 = vmatprep.mubr.f32.mxu0 %v2120_v44  ;;  %v2767_v39 = vadd.f32 %v7623_v15, %v2728_v47  ;;  %940 = vst.msk [vmem:[#allocation3 + $0x2e8] sm:$0xff] %vm908_vm3, %v875_v63 }
 0x208   : > { %2470 = vmatmul.mubr.f32.gmra.mrb[58].mxu0 %v2119_v7  ;;  %v3567_v3 = vld [vmem:[#allocation2 + $0x91] sm:$0xff]  ;;  %v7691_v7 = vpop.f32.mrb[24].mxu1 }
 0x209   : > { %3701 = vrot.lane.b32.xlu0 %v7578_v9, %s5844_s29  ;;  %3599 = vst.msk [vmem:[#allocation3 + $0xf8] sm:$0xff] %vm9265_vm0, %v3567_v3  ;;  %v2929_v28 = vld [vmem:[#allocation2 + $0x90] sm:$0xff]  ;;  %vm2799_vm6 = vcmp.ge.f32.partialorder %v2767_v39, 0.0  ;;  %v2832_v45 = vmul.f32 %v7149_v35, %v2767_v39  ;;  %v1901_v46 = vpop.permute.xlu0 %1900  ;;  %v7699_v24 = vpop.f32.mrb[25].mxu1 }
 0x20a   : > { %3445 = vrot.lane.b32.xlu1 %v7555_v26, %s5845_s26  ;;  %2961 = vst.msk [vmem:[#allocation3 + $0x120] sm:$0xff] %vm9265_vm0, %v2929_v28  ;;  %v1068_v32 = vpop.permute.xlu1 %1067  ;;  %v7635_v42 = vld [vmem:[#allocation2 + $0x90] sm:$0xff]  ;;  %v2122_v31 = vld [vmem:[#allocation3 + $0x2d0] sm:$0xff]  ;;  %v4266_v28 = vld [vmem:[#allocation3 + $0x28] sm:$0xff] }
 0x20b   : > { %1966 = vst.msk [vmem:[#allocation3 + $0x2d8] sm:$0xff] %vm1294_vm5, %v1901_v46  ;;  %v2864_v38 = vsel %vm2799_vm6, %v2767_v39, %v2832_v45  ;;  %v7644_v26 = vld [vmem:[#allocation2 + $0x91] sm:$0xff] }
 0x20c   : > { %1133 = vst.msk [vmem:[#allocation3 + $0x2e8] sm:$0xff] %vm1101_vm4, %v1068_v32  ;;  %v4269_v32 = vld [vmem:[#allocation3 + $0x40] sm:$0xff] }
 0x20d   : > { %3893 = vrot.lane.b32.xlu0 %v7635_v42, %s5843_s28  ;;  %2896 = vst.msk [vmem:[#allocation2 + $0x99] sm:$0xff] %vm9265_vm0, %v2864_v38  ;;  %v1518_v55 = vpop.permute.xlu0 %1517 }
 0x20e   : > { %3063 = vrot.lane.b32.xlu1 %v7531_v2, %s5844_s29  ;;  %1582 = vst.msk [vmem:[#allocation3 + $0x2f0] sm:$0xff] %vm908_vm3, %v1518_v55  ;;  %v2386_v14 = vpop.f32.mrb[24].mxu0  ;;  %v1261_v51 = vpop.permute.xlu1 %1260 }
 0x20f   : > { %v2612_v18 = vadd.f32 %v7202_v8, %v2386_v14  ;;  %1326 = vst.msk [vmem:[#allocation3 + $0x2e8] sm:$0xff] %vm1294_vm5, %v1261_v51  ;;  %v2388_v25 = vpop.f32.mrb[25].mxu0  ;;  %v4272_v14 = vld [vmem:[#allocation3 + $0x58] sm:$0xff] }
 0x210   : > { %v4275_v25 = vld [vmem:[#allocation3 + $0x70] sm:$0xff] }
 0x211   : > { %4085 = vrot.lane.b32.xlu0 %v7644_v26, %s5845_s26  ;;  %v2729_v2 = vmul.f32 %v7612_v12, %v2612_v18  ;;  %v1711_v20 = vpop.permute.xlu0 %1710 }
 0x212   : > { %3255 = vrot.lane.b32.xlu1 %v7512_v62, %s5843_s28  ;;  %v2123_v52 = vld [vmem:[#allocation3 + $0x2d8] sm:$0xff]  ;;  %1775 = vst.msk [vmem:[#allocation3 + $0x2f0] sm:$0xff] %vm1101_vm4, %v1711_v20  ;;  %v3046_v40 = vpop.permute.xlu1 %3045 }
 0x213   : > { %2474 = vmatprep.mubr.f32.mxu0 %v2123_v52  ;;  %v2768_v8 = vadd.f32 %v7623_v15, %v2729_v2  ;;  %3141 = vst.msk [vmem:[#allocation3] sm:$0xff] %vm908_vm3, %v3046_v40  ;;  %v4278_v52 = vld [vmem:[#allocation3 + $0x88] sm:$0xff] }
 0x214   : > { %2475 = vmatmul.mubr.f32.gmra.mrb[60].mxu0 %v2122_v31  ;;  %v7658_v54 = vld [vmem:[#allocation2 + $0x92] sm:$0xff]  ;;  %v7662_v62 = vld [vmem:[#allocation2 + $0x9a] sm:$0xff] }
 0x215   : > { %3703 = vrot.lane.b32.xlu0 %v7582_v16, %s5844_s29  ;;  %4237 = vst.msk [vmem:[#allocation3 + $0xd0] sm:$0xff] %vm9265_vm0, %v7658_v54  ;;  %v3568_v1 = vld [vmem:[#allocation2 + $0x99] sm:$0xff]  ;;  %vm2800_vm7 = vcmp.ge.f32.partialorder %v2768_v8, 0.0  ;;  %v2833_v53 = vmul.f32 %v7149_v35, %v2768_v8  ;;  %v1903_v50 = vpop.permute.xlu0 %1902  ;;  %4238 = vst.msk [vmem:[#allocation3 + $0xe8] sm:$0xff] %vm9265_vm0, %v7662_v62 }
 0x216   : > { %3447 = vrot.lane.b32.xlu1 %v7592_v21, %s5845_s26  ;;  %v2930_v34 = vld [vmem:[#allocation2 + $0x98] sm:$0xff]  ;;  %3600 = vst.msk [vmem:[#allocation3 + $0x110] sm:$0xff] %vm9265_vm0, %v3568_v1  ;;  %v3238_v61 = vpop.permute.xlu1 %3237 }
 0x217   : > { %2962 = vst.msk [vmem:[#allocation3 + $0x138] sm:$0xff] %vm9265_vm0, %v2930_v34  ;;  %v7672_v0 = vld [vmem:[#allocation2 + $0x98] sm:$0xff]  ;;  %v2865_v6 = vsel %vm2800_vm7, %v2768_v8, %v2833_v53  ;;  %v4281_v8 = vld [vmem:[#allocation3 + $0xa0] sm:$0xff] }
 0x218   : > { %1967 = vst.msk [vmem:[#allocation3 + $0x2f0] sm:$0xff] %vm1294_vm5, %v1903_v50  ;;  %v7681_v21 = vld [vmem:[#allocation2 + $0x99] sm:$0xff] }
 0x219   : > { %3333 = vst.msk [vmem:[#allocation3] sm:$0xff] %vm1101_vm4, %v3238_v61  ;;  %3895 = vrot.lane.b32.xlu0 %v7672_v0, %s5843_s28  ;;  %v3686_v13 = vpop.permute.xlu0 %3685  ;;  %v2125_v22 = vld [vmem:[#allocation3 + $0x2e8] sm:$0xff] }
 0x21a   : > { %2897 = vst.msk [vmem:[#allocation2 + $0xa9] sm:$0xff] %vm9265_vm0, %v2865_v6  ;;  %3065 = vrot.lane.b32.xlu1 %v7564_v23, %s5844_s29  ;;  %v2391_v27 = vpop.f32.mrb[26].mxu0  ;;  %v3430_v30 = vpop.permute.xlu1 %3429 }
 0x21b   : > { %3781 = vst.msk [vmem:[#allocation3 + $0x8] sm:$0xff] %vm908_vm3, %v3686_v13  ;;  %v2617_v58 = vadd.f32 %v7198_v29, %v2391_v27  ;;  %v2393_v43 = vpop.f32.mrb[27].mxu0  ;;  %v4284_v13 = vld [vmem:[#allocation3 + $0xb8] sm:$0xff] }
 0x21c   : > { %3525 = vst.msk [vmem:[#allocation3] sm:$0xff] %vm1294_vm5, %v3430_v30 }
 0x21d   : > { %4087 = vrot.lane.b32.xlu0 %v7681_v21, %s5845_s26  ;;  %v2730_v23 = vmul.f32 %v7612_v12, %v2617_v58  ;;  %v3878_v10 = vpop.permute.xlu0 %3877 }
 0x21e   : > { %3257 = vrot.lane.b32.xlu1 %v7578_v9, %s5843_s28  ;;  %3973 = vst.msk [vmem:[#allocation3 + $0x8] sm:$0xff] %vm1101_vm4, %v3878_v10  ;;  %v3048_v49 = vpop.permute.xlu1 %3047  ;;  %v4263_v9 = vld [vmem:[#allocation3 + $0x10] sm:$0xff] }
 0x21f   : > { %v2126_v4 = vld [vmem:[#allocation3 + $0x2f0] sm:$0xff]  ;;  %v2769_v29 = vadd.f32 %v7623_v15, %v2730_v23  ;;  %3142 = vst.msk [vmem:[#allocation3 + $0x18] sm:$0xff] %vm908_vm3, %v3048_v49 }
 0x220   : > { %2479 = vmatprep.mubr.f32.mxu0 %v2126_v4 }
 0x221   : > { %2480 = vmatmul.mubr.f32.gmra.mrb[62].mxu0 %v2125_v22  ;;  %3705 = vrot.lane.b32.xlu0 %v7658_v54, %s5844_s29  ;;  %v7697_v47 = vld [vmem:[#allocation2 + $0xa9] sm:$0xff]  ;;  %vm2801_vm8 = vcmp.ge.f32.partialorder %v2769_v29, 0.0  ;;  %v2834_v63 = vmul.f32 %v7149_v35, %v2769_v29  ;;  %v4070_v39 = vpop.permute.xlu0 %4069  ;;  %v4290_v22 = vld [vmem:[#allocation3 + $0xe8] sm:$0xff] }
 0x222   : > { %v2931_v44 = vld [vmem:[#allocation2 + $0xa8] sm:$0xff]  ;;  %5642 = vmatprep.mubr.msk.f32.mxu0 %vm9265_vm0, %v4263_v9  ;;  %3449 = vrot.lane.b32.xlu1 %v7635_v42, %s5845_s26  ;;  %3601 = vst.msk [vmem:[#allocation3 + $0x128] sm:$0xff] %vm9265_vm0, %v7697_v47  ;;  %v3240_v3 = vpop.permute.xlu1 %3239 }
 0x223   : > { %2963 = vst.msk [vmem:[#allocation3 + $0x150] sm:$0xff] %vm9265_vm0, %v2931_v44  ;;  %v7709_v45 = vld [vmem:[#allocation2 + $0xa8] sm:$0xff]  ;;  %v2866_v46 = vsel %vm2801_vm8, %v2769_v29, %v2834_v63  ;;  %v4261_v20 = vld [vmem:[#allocation3] sm:$0xff]  ;;  %v7777_v44 = vpop.f32.mrb[26].mxu1 }
 0x224   : > { %4165 = vst.msk [vmem:[#allocation3 + $0x8] sm:$0xff] %vm1294_vm5, %v4070_v39 }
 0x225   : > { %3334 = vst.msk [vmem:[#allocation3 + $0x18] sm:$0xff] %vm1101_vm4, %v3240_v3  ;;  %5643 = vmatmul.mubr.msk.f32.vlgmr.msra.gmra.mrb[64].mxu0 %vm9265_vm0, %v4266_v28  ;;  %3897 = vrot.lane.b32.xlu0 %v7709_v45, %s5843_s28  ;;  %v3688_v42 = vpop.permute.xlu0 %3687  ;;  %v7784_v3 = vpop.f32.mrb[27].mxu1 }
 0x226   : > { %2898 = vst.msk [vmem:[#allocation2 + $0xb1] sm:$0xff] %vm9265_vm0, %v2866_v46  ;;  %5645 = vmatprep.mubr.msk.f32.mxu0 %vm9265_vm0, %v4269_v32  ;;  %3067 = vrot.lane.b32.xlu1 %v7601_v5, %s5844_s29  ;;  %v2396_v38 = vpop.f32.mrb[28].mxu0  ;;  %v3432_v55 = vpop.permute.xlu1 %3431 }
 0x227   : > { %3782 = vst.msk [vmem:[#allocation3 + $0x20] sm:$0xff] %vm908_vm3, %v3688_v42  ;;  %v2622_v51 = vadd.f32 %v7327_v11, %v2396_v38  ;;  %v2398_v18 = vpop.f32.mrb[29].mxu0 }
 0x228   : > { %3526 = vst.msk [vmem:[#allocation3 + $0x18] sm:$0xff] %vm1294_vm5, %v3432_v55 }
 0x229   : > { %5646 = vmatmul.mubr.msk.f32.gmra.mrb[66].mxu0 %vm9265_vm0, %v4272_v14  ;;  %4089 = vrot.lane.b32.xlu0 %v7697_v47, %s5845_s26  ;;  %v2731_v5 = vmul.f32 %v7612_v12, %v2622_v51  ;;  %v3880_v31 = vpop.permute.xlu0 %3879 }
 0x22a   : > { %5648 = vmatprep.mubr.msk.f32.mxu0 %vm9265_vm0, %v4275_v25  ;;  %3259 = vrot.lane.b32.xlu1 %v7582_v16, %s5843_s28  ;;  %3974 = vst.msk [vmem:[#allocation3 + $0x20] sm:$0xff] %vm1101_vm4, %v3880_v31  ;;  %v3050_v11 = vpop.permute.xlu1 %3049 }
 0x22b   : > { %v4262_v2 = vld [vmem:[#allocation3 + $0x8] sm:$0xff]  ;;  %v2770_v40 = vadd.f32 %v7623_v15, %v2731_v5  ;;  %3143 = vst.msk [vmem:[#allocation3 + $0x30] sm:$0xff] %vm908_vm3, %v3050_v11 }
 0x22c   : > { %4553 = vmatprep.mubr.f32.mxu1 %v4262_v2 }
 0x22d   : > { %4554 = vmatmul.mubr.f32.vlgmr.msra.gmra.mrb[32].mxu1 %v4261_v20  ;;  %5649 = vmatmul.mubr.msk.f32.gmra.mrb[68].mxu0 %vm9265_vm0, %v4278_v52  ;;  %v7733_v1 = vld [vmem:[#allocation2 + $0xb1] sm:$0xff]  ;;  %vm2802_vm9 = vcmp.ge.f32.partialorder %v2770_v40, 0.0  ;;  %v2835_v50 = vmul.f32 %v7149_v35, %v2770_v40  ;;  %v4072_v61 = vpop.permute.xlu0 %4071 }
 0x22e   : > { %v7735_v16 = vld [vmem:[#allocation2 + $0xaa] sm:$0xff]  ;;  %3707 = vrot.lane.b32.xlu0 %v7662_v62, %s5844_s29  ;;  %5651 = vmatprep.mubr.msk.f32.mxu0 %vm9265_vm0, %v4281_v8  ;;  %v7742_v34 = vld [vmem:[#allocation2 + $0xb2] sm:$0xff]  ;;  %3602 = vst.msk [vmem:[#allocation3 + $0x140] sm:$0xff] %vm9265_vm0, %v7733_v1  ;;  %v3242_v6 = vpop.permute.xlu1 %3241 }
 0x22f   : > { %4239 = vst.msk [vmem:[#allocation3 + $0x100] sm:$0xff] %vm9265_vm0, %v7735_v16  ;;  %v2932_v53 = vld [vmem:[#allocation2 + $0xb0] sm:$0xff]  ;;  %3451 = vrot.lane.b32.xlu1 %v7672_v0, %s5845_s26  ;;  %4240 = vst.msk [vmem:[#allocation3 + $0x118] sm:$0xff] %vm9265_vm0, %v7742_v34  ;;  %5804 = vmatpush3.bf16.msra.mxu1 %v7262_v56  ;;  %v2867_v27 = vsel %vm2802_vm9, %v2770_v40, %v2835_v50  ;;  %v4287_v0 = vld [vmem:[#allocation3 + $0xd0] sm:$0xff] }
 0x230   : > { %2964 = vst.msk [vmem:[#allocation3 + $0x168] sm:$0xff] %vm9265_vm0, %v2932_v53  ;;  %5803 = vmatprep.subr.bf16.mxu1 %v7292_v60  ;;  %v7757_v30 = vld [vmem:[#allocation2 + $0xb0] sm:$0xff]  ;;  %2899 = vst.msk [vmem:[#allocation2 + $0xc1] sm:$0xff] %vm9265_vm0, %v2867_v27  ;;  %v4264_v29 = vld [vmem:[#allocation3 + $0x18] sm:$0xff] }
 0x231   : > { %4166 = vst.msk [vmem:[#allocation3 + $0x20] sm:$0xff] %vm1294_vm5, %v4072_v61  ;;  %5652 = vmatmul.mubr.msk.f32.gmra.mrb[70].mxu0 %vm9265_vm0, %v4284_v13  ;;  %v3690_v56 = vpop.permute.xlu0 %3689 }
 0x232   : > { %3335 = vst.msk [vmem:[#allocation3 + $0x30] sm:$0xff] %vm1101_vm4, %v3242_v6  ;;  %3899 = vrot.lane.b32.xlu0 %v7757_v30, %s5843_s28  ;;  %5654 = vmatprep.mubr.msk.f32.mxu0 %vm9265_vm0, %v4287_v0  ;;  %v2401_v58 = vpop.f32.mrb[30].mxu0  ;;  %v3434_v43 = vpop.permute.xlu1 %3433 }
 0x233   : > { %3069 = vrot.lane.b32.xlu1 %v7644_v26, %s5844_s29  ;;  %5805 = vmatpush3.bf16.msra.mxu1 %v7292_v60  ;;  %3783 = vst.msk [vmem:[#allocation3 + $0x38] sm:$0xff] %vm908_vm3, %v3690_v56  ;;  %v2627_v23 = vadd.f32 %v7322_v36, %v2401_v58  ;;  %v2403_v10 = vpop.f32.mrb[31].mxu0 }
 0x234   : > { %3527 = vst.msk [vmem:[#allocation3 + $0x30] sm:$0xff] %vm1294_vm5, %v3434_v43  ;;  %v7852_v10 = vpop.f32.mrb[28].mxu1 }
 0x235   : > { %5655 = vmatmul.mubr.msk.f32.gmra.mrb[72].mxu0 %vm9265_vm0, %v4290_v22  ;;  %v2732_v60 = vmul.f32 %v7612_v12, %v2627_v23  ;;  %v3882_v26 = vpop.permute.xlu0 %3881 }
 0x236   : > { %v4293_v4 = vld [vmem:[#allocation3 + $0x100] sm:$0xff]  ;;  %4091 = vrot.lane.b32.xlu0 %v7733_v1, %s5845_s26  ;;  %3975 = vst.msk [vmem:[#allocation3 + $0x38] sm:$0xff] %vm1101_vm4, %v3882_v26  ;;  %v3052_v36 = vpop.permute.xlu1 %3051  ;;  %v4296_v9 = vld [vmem:[#allocation3 + $0x118] sm:$0xff]  ;;  %v7858_v26 = vpop.f32.mrb[29].mxu1 }
 0x237   : > { %5657 = vmatprep.mubr.msk.f32.mxu0 %vm9265_vm0, %v4293_v4  ;;  %3261 = vrot.lane.b32.xlu1 %v7658_v54, %s5843_s28  ;;  %v2771_v63 = vadd.f32 %v7623_v15, %v2732_v60  ;;  %3144 = vst.msk [vmem:[#allocation3 + $0x48] sm:$0xff] %vm908_vm3, %v3052_v36  ;;  %v7782_v39 = vld [vmem:[#allocation2 + $0xc1] sm:$0xff] }
 0x238   : > { %v4265_v49 = vld [vmem:[#allocation3 + $0x20] sm:$0xff]  ;;  %v2933_v54 = vld [vmem:[#allocation2 + $0xc0] sm:$0xff]  ;;  %3603 = vst.msk [vmem:[#allocation3 + $0x158] sm:$0xff] %vm9265_vm0, %v7782_v39 }
 0x239   : > { %4558 = vmatprep.mubr.f32.mxu1 %v4265_v49  ;;  %5658 = vmatmul.mubr.msk.f32.gmra.mrb[74].mxu0 %vm9265_vm0, %v4296_v9  ;;  %2965 = vst.msk [vmem:[#allocation3 + $0x180] sm:$0xff] %vm9265_vm0, %v2933_v54  ;;  %vm2803_vm10 = vcmp.ge.f32.partialorder %v2771_v63, 0.0  ;;  %v2836_v28 = vmul.f32 %v7149_v35, %v2771_v63  ;;  %v4074_v46 = vpop.permute.xlu0 %4073  ;;  %v7796_v38 = vld [vmem:[#allocation2 + $0xc0] sm:$0xff] }
 0x23a   : > { %4559 = vmatmul.mubr.f32.gmra.mrb[34].mxu1 %v4264_v29  ;;  %3709 = vrot.lane.b32.xlu0 %v7735_v16, %s5844_s29  ;;  %4167 = vst.msk [vmem:[#allocation3 + $0x38] sm:$0xff] %vm1294_vm5, %v4074_v46  ;;  %v3244_v32 = vpop.permute.xlu1 %3243 }
 0x23b   : > { %3453 = vrot.lane.b32.xlu1 %v7709_v45, %s5845_s26  ;;  %v2868_v42 = vsel %vm2803_vm10, %v2771_v63, %v2836_v28  ;;  %3336 = vst.msk [vmem:[#allocation3 + $0x48] sm:$0xff] %vm1101_vm4, %v3244_v32  ;;  %v4267_v2 = vld [vmem:[#allocation3 + $0x30] sm:$0xff] }
 0x23c   : > { %2900 = vst.msk [vmem:[#allocation2 + $0xc9] sm:$0xff] %vm9265_vm0, %v2868_v42 }
 0x23d   : > { %v3692_v55 = vpop.permute.xlu0 %3691 }
 0x23e   : > { %3901 = vrot.lane.b32.xlu0 %v7796_v38, %s5843_s28  ;;  %3784 = vst.msk [vmem:[#allocation3 + $0x50] sm:$0xff] %vm908_vm3, %v3692_v55  ;;  %v2406_v45 = vpop.f32.mrb[32].mxu0  ;;  %v3436_v14 = vpop.permute.xlu1 %3435 }
 0x23f   : > { %3071 = vrot.lane.b32.xlu1 %v7681_v21, %s5844_s29  ;;  %v2632_v51 = vadd.f32 %v7403_v37, %v2406_v45  ;;  %3528 = vst.msk [vmem:[#allocation3 + $0x48] sm:$0xff] %vm1294_vm5, %v3436_v14  ;;  %v2408_v18 = vpop.f32.mrb[33].mxu0 }
 0x241   : > { %v2733_v25 = vmul.f32 %v7612_v12, %v2632_v51  ;;  %v4268_v31 = vld [vmem:[#allocation3 + $0x38] sm:$0xff] }
 0x242   : > { %4093 = vrot.lane.b32.xlu0 %v7782_v39, %s5845_s26  ;;  %v3884_v5 = vpop.permute.xlu0 %3883  ;;  %4563 = vmatprep.mubr.f32.mxu1 %v4268_v31  ;;  %v3054_v21 = vpop.permute.xlu1 %3053 }
 0x243   : > { %3263 = vrot.lane.b32.xlu1 %v7662_v62, %s5843_s28  ;;  %3976 = vst.msk [vmem:[#allocation3 + $0x50] sm:$0xff] %vm1101_vm4, %v3884_v5  ;;  %v2772_v37 = vadd.f32 %v7623_v15, %v2733_v25  ;;  %4564 = vmatmul.mubr.f32.gmra.mrb[36].mxu1 %v4267_v2  ;;  %v7814_v11 = vld [vmem:[#allocation2 + $0xc9] sm:$0xff] }
 0x244   : > { %3145 = vst.msk [vmem:[#allocation3 + $0x60] sm:$0xff] %vm908_vm3, %v3054_v21  ;;  %v7816_v20 = vld [vmem:[#allocation2 + $0xc2] sm:$0xff]  ;;  %v7822_v62 = vld [vmem:[#allocation2 + $0xca] sm:$0xff] }
 0x245   : > { %4241 = vst.msk [vmem:[#allocation3 + $0x130] sm:$0xff] %vm9265_vm0, %v7816_v20  ;;  %3604 = vst.msk [vmem:[#allocation3 + $0x170] sm:$0xff] %vm9265_vm0, %v7814_v11  ;;  %v2934_v52 = vld [vmem:[#allocation2 + $0xc8] sm:$0xff]  ;;  %vm2804_vm11 = vcmp.ge.f32.partialorder %v2772_v37, 0.0  ;;  %v2837_v40 = vmul.f32 %v7149_v35, %v2772_v37 }
 0x246   : > { %3711 = vrot.lane.b32.xlu0 %v7742_v34, %s5844_s29  ;;  %v4076_v8 = vpop.permute.xlu0 %4075  ;;  %4242 = vst.msk [vmem:[#allocation3 + $0x148] sm:$0xff] %vm9265_vm0, %v7822_v62  ;;  %2966 = vst.msk [vmem:[#allocation3 + $0x198] sm:$0xff] %vm9265_vm0, %v2934_v52  ;;  %v3246_v53 = vpop.permute.xlu1 %3245  ;;  %v7834_v61 = vld [vmem:[#allocation2 + $0xc8] sm:$0xff]  ;;  %v4270_v23 = vld [vmem:[#allocation3 + $0x48] sm:$0xff] }
 0x247   : > { %3455 = vrot.lane.b32.xlu1 %v7757_v30, %s5845_s26  ;;  %4168 = vst.msk [vmem:[#allocation3 + $0x50] sm:$0xff] %vm1294_vm5, %v4076_v8  ;;  %v2869_v50 = vsel %vm2804_vm11, %v2772_v37, %v2837_v40 }
 0x248   : > { %3337 = vst.msk [vmem:[#allocation3 + $0x60] sm:$0xff] %vm1101_vm4, %v3246_v53 }
 0x249   : > { %2901 = vst.msk [vmem:[#allocation2 + $0xd9] sm:$0xff] %vm9265_vm0, %v2869_v50 }
 0x24a   : > { %3903 = vrot.lane.b32.xlu0 %v7834_v61, %s5843_s28  ;;  %v3694_v6 = vpop.permute.xlu0 %3693  ;;  %v2411_v13 = vpop.f32.mrb[34].mxu0 }
 0x24b   : > { %3073 = vrot.lane.b32.xlu1 %v7697_v47, %s5844_s29  ;;  %3785 = vst.msk [vmem:[#allocation3 + $0x68] sm:$0xff] %vm908_vm3, %v3694_v6  ;;  %v3438_v27 = vpop.permute.xlu1 %3437  ;;  %v2637_v30 = vadd.f32 %v7400_v19, %v2411_v13  ;;  %v2413_v0 = vpop.f32.mrb[35].mxu0 }
 0x24c   : > { %3529 = vst.msk [vmem:[#allocation3 + $0x60] sm:$0xff] %vm1294_vm5, %v3438_v27  ;;  %v4299_v56 = vld [vmem:[#allocation3 + $0x130] sm:$0xff] }
 0x24d   : > { %5660 = vmatprep.mubr.msk.f32.mxu0 %vm9265_vm0, %v4299_v56  ;;  %v4302_v58 = vld [vmem:[#allocation3 + $0x148] sm:$0xff]  ;;  %v2734_v43 = vmul.f32 %v7612_v12, %v2637_v30 }
 0x24e   : > { %4095 = vrot.lane.b32.xlu0 %v7814_v11, %s5845_s26  ;;  %v3886_v22 = vpop.permute.xlu0 %3885  ;;  %5661 = vmatmul.mubr.msk.f32.gmra.mrb[76].mxu0 %vm9265_vm0, %v4302_v58  ;;  %v4271_v47 = vld [vmem:[#allocation3 + $0x50] sm:$0xff] }
 0x24f   : > { %3265 = vrot.lane.b32.xlu1 %v7735_v16, %s5843_s28  ;;  %3977 = vst.msk [vmem:[#allocation3 + $0x68] sm:$0xff] %vm1101_vm4, %v3886_v22  ;;  %4568 = vmatprep.mubr.f32.mxu1 %v4271_v47  ;;  %v3056_v19 = vpop.permute.xlu1 %3055  ;;  %v2773_v4 = vadd.f32 %v7623_v15, %v2734_v43 }
 0x250   : > { %3146 = vst.msk [vmem:[#allocation3 + $0x78] sm:$0xff] %vm908_vm3, %v3056_v19  ;;  %4569 = vmatmul.mubr.f32.gmra.mrb[38].mxu1 %v4270_v23  ;;  %v7856_v60 = vld [vmem:[#allocation2 + $0xd9] sm:$0xff] }
 0x251   : > { %v2935_v16 = vld [vmem:[#allocation2 + $0xd8] sm:$0xff]  ;;  %3605 = vst.msk [vmem:[#allocation3 + $0x188] sm:$0xff] %vm9265_vm0, %v7856_v60  ;;  %vm2805_vm12 = vcmp.ge.f32.partialorder %v2773_v4, 0.0  ;;  %v2838_v49 = vmul.f32 %v7149_v35, %v2773_v4 }
 0x252   : > { %3713 = vrot.lane.b32.xlu0 %v7816_v20, %s5844_s29  ;;  %2967 = vst.msk [vmem:[#allocation3 + $0x1b0] sm:$0xff] %vm9265_vm0, %v2935_v16  ;;  %v4078_v36 = vpop.permute.xlu0 %4077  ;;  %v7870_v63 = vld [vmem:[#allocation2 + $0xd8] sm:$0xff] }
 0x253   : > { %3457 = vrot.lane.b32.xlu1 %v7796_v38, %s5845_s26  ;;  %4169 = vst.msk [vmem:[#allocation3 + $0x68] sm:$0xff] %vm1294_vm5, %v4078_v36  ;;  %v3248_v29 = vpop.permute.xlu1 %3247  ;;  %v2870_v9 = vsel %vm2805_vm12, %v2773_v4, %v2838_v49  ;;  %v4273_v14 = vld [vmem:[#allocation3 + $0x60] sm:$0xff] }
 0x254   : > { %3338 = vst.msk [vmem:[#allocation3 + $0x78] sm:$0xff] %vm1101_vm4, %v3248_v29 }
 0x255   : > { %2902 = vst.msk [vmem:[#allocation2 + $0xe1] sm:$0xff] %vm9265_vm0, %v2870_v9 }
 0x256   : > { %3905 = vrot.lane.b32.xlu0 %v7870_v63, %s5843_s28  ;;  %v3696_v54 = vpop.permute.xlu0 %3695  ;;  %v2416_v28 = vpop.f32.mrb[36].mxu0 }
 0x257   : > { %3075 = vrot.lane.b32.xlu1 %v7733_v1, %s5844_s29  ;;  %3786 = vst.msk [vmem:[#allocation3 + $0x80] sm:$0xff] %vm908_vm3, %v3696_v54  ;;  %v3440_v46 = vpop.permute.xlu1 %3439  ;;  %v2642_v32 = vadd.f32 %v7473_v57, %v2416_v28  ;;  %v2418_v42 = vpop.f32.mrb[37].mxu0 }
 0x258   : > { %3530 = vst.msk [vmem:[#allocation3 + $0x78] sm:$0xff] %vm1294_vm5, %v3440_v46 }
 0x259   : > { %v2735_v38 = vmul.f32 %v7612_v12, %v2642_v32 }
 0x25a   : > { %4097 = vrot.lane.b32.xlu0 %v7856_v60, %s5845_s26  ;;  %v4274_v45 = vld [vmem:[#allocation3 + $0x68] sm:$0xff] }
 0x25b   : > { %v3888_v55 = vpop.permute.xlu0 %3887  ;;  %3267 = vrot.lane.b32.xlu1 %v7742_v34, %s5843_s28  ;;  %4573 = vmatprep.mubr.f32.mxu1 %v4274_v45  ;;  %v3058_v1 = vpop.permute.xlu1 %3057  ;;  %v2774_v57 = vadd.f32 %v7623_v15, %v2735_v38 }
 0x25c   : > { %3978 = vst.msk [vmem:[#allocation3 + $0x80] sm:$0xff] %vm1101_vm4, %v3888_v55  ;;  %4574 = vmatmul.mubr.f32.gmra.mrb[40].mxu1 %v4273_v14  ;;  %v7888_v51 = vld [vmem:[#allocation2 + $0xe1] sm:$0xff] }
 0x25d   : > { %3147 = vst.msk [vmem:[#allocation3 + $0x90] sm:$0xff] %vm908_vm3, %v3058_v1  ;;  %v7890_v18 = vld [vmem:[#allocation2 + $0xda] sm:$0xff]  ;;  %v7896_v34 = vld [vmem:[#allocation2 + $0xe2] sm:$0xff]  ;;  %vm2806_vm13 = vcmp.ge.f32.partialorder %v2774_v57, 0.0  ;;  %v2839_v5 = vmul.f32 %v7149_v35, %v2774_v57 }
 0x25e   : > { %3715 = vrot.lane.b32.xlu0 %v7822_v62, %s5844_s29  ;;  %4243 = vst.msk [vmem:[#allocation3 + $0x160] sm:$0xff] %vm9265_vm0, %v7890_v18  ;;  %3606 = vst.msk [vmem:[#allocation3 + $0x1a0] sm:$0xff] %vm9265_vm0, %v7888_v51  ;;  %v2936_v25 = vld [vmem:[#allocation2 + $0xe0] sm:$0xff] }
 0x25f   : > { %v4080_v31 = vpop.permute.xlu0 %4079  ;;  %3459 = vrot.lane.b32.xlu1 %v7834_v61, %s5845_s26  ;;  %4244 = vst.msk [vmem:[#allocation3 + $0x178] sm:$0xff] %vm9265_vm0, %v7896_v34  ;;  %2968 = vst.msk [vmem:[#allocation3 + $0x1c8] sm:$0xff] %vm9265_vm0, %v2936_v25  ;;  %v3250_v21 = vpop.permute.xlu1 %3249  ;;  %v2871_v2 = vsel %vm2806_vm13, %v2774_v57, %v2839_v5  ;;  %v7908_v37 = vld [vmem:[#allocation2 + $0xe0] sm:$0xff]  ;;  %v4276_v30 = vld [vmem:[#allocation3 + $0x78] sm:$0xff] }
 0x260   : > { %4170 = vst.msk [vmem:[#allocation3 + $0x80] sm:$0xff] %vm1294_vm5, %v4080_v31 }
 0x261   : > { %3339 = vst.msk [vmem:[#allocation3 + $0x90] sm:$0xff] %vm1101_vm4, %v3250_v21 }
 0x262   : > { %2903 = vst.msk [vmem:[#allocation2 + $0xf1] sm:$0xff] %vm9265_vm0, %v2871_v2  ;;  %3907 = vrot.lane.b32.xlu0 %v7908_v37, %s5843_s28  ;;  %v2421_v40 = vpop.f32.mrb[38].mxu0 }
 0x263   : > { %v3698_v52 = vpop.permute.xlu0 %3697  ;;  %3077 = vrot.lane.b32.xlu1 %v7782_v39, %s5844_s29  ;;  %v2647_v53 = vadd.f32 %v7470_v41, %v2421_v40  ;;  %v2423_v50 = vpop.f32.mrb[39].mxu0 }
 0x264   : > { %3787 = vst.msk [vmem:[#allocation3 + $0x98] sm:$0xff] %vm908_vm3, %v3698_v52  ;;  %v3442_v8 = vpop.permute.xlu1 %3441  ;;  %v7926_v0 = vpop.f32.mrb[30].mxu1 }
 0x265   : > { %3531 = vst.msk [vmem:[#allocation3 + $0x90] sm:$0xff] %vm1294_vm5, %v3442_v8  ;;  %v4305_v61 = vld [vmem:[#allocation3 + $0x160] sm:$0xff]  ;;  %v2736_v13 = vmul.f32 %v7612_v12, %v2647_v53  ;;  %v7932_v43 = vpop.f32.mrb[31].mxu1 }
 0x266   : > { %4099 = vrot.lane.b32.xlu0 %v7888_v51, %s5845_s26  ;;  %5663 = vmatprep.mubr.msk.f32.mxu0 %vm9265_vm0, %v4305_v61  ;;  %v4308_v6 = vld [vmem:[#allocation3 + $0x178] sm:$0xff] }
 0x267   : > { %v3890_v27 = vpop.permute.xlu0 %3889  ;;  %3269 = vrot.lane.b32.xlu1 %v7816_v20, %s5843_s28  ;;  %5664 = vmatmul.mubr.msk.f32.gmra.mrb[78].mxu0 %vm9265_vm0, %v4308_v6  ;;  %v4277_v39 = vld [vmem:[#allocation3 + $0x80] sm:$0xff]  ;;  %v2775_v56 = vadd.f32 %v7623_v15, %v2736_v13 }
 0x268   : > { %3979 = vst.msk [vmem:[#allocation3 + $0x98] sm:$0xff] %vm1101_vm4, %v3890_v27  ;;  %4578 = vmatprep.mubr.f32.mxu1 %v4277_v39  ;;  %v3060_v41 = vpop.permute.xlu1 %3059 }
 0x269   : > { %3148 = vst.msk [vmem:[#allocation3 + $0xa8] sm:$0xff] %vm908_vm3, %v3060_v41  ;;  %4579 = vmatmul.mubr.f32.gmra.mrb[42].mxu1 %v4276_v30  ;;  %v7930_v58 = vld [vmem:[#allocation2 + $0xf1] sm:$0xff]  ;;  %vm2807_vm14 = vcmp.ge.f32.partialorder %v2775_v56, 0.0  ;;  %v2840_v22 = vmul.f32 %v7149_v35, %v2775_v56 }
 0x26a   : > { %v2937_v20 = vld [vmem:[#allocation2 + $0xf0] sm:$0xff]  ;;  %3717 = vrot.lane.b32.xlu0 %v7890_v18, %s5844_s29  ;;  %3607 = vst.msk [vmem:[#allocation3 + $0x1b8] sm:$0xff] %vm9265_vm0, %v7930_v58 }
 0x26b   : > { %2969 = vst.msk [vmem:[#allocation3 + $0x1e0] sm:$0xff] %vm9265_vm0, %v2937_v20  ;;  %v4082_v47 = vpop.permute.xlu0 %4081  ;;  %3461 = vrot.lane.b32.xlu1 %v7870_v63, %s5845_s26  ;;  %v2872_v23 = vsel %vm2807_vm14, %v2775_v56, %v2840_v22  ;;  %v7944_v4 = vld [vmem:[#allocation2 + $0xf0] sm:$0xff] }
 0x26c   : > { %4171 = vst.msk [vmem:[#allocation3 + $0x98] sm:$0xff] %vm1294_vm5, %v4082_v47  ;;  %v3252_v19 = vpop.permute.xlu1 %3251  ;;  %v4279_v46 = vld [vmem:[#allocation3 + $0x90] sm:$0xff] }
 0x26d   : > { %3340 = vst.msk [vmem:[#allocation3 + $0xa8] sm:$0xff] %vm1101_vm4, %v3252_v19 }
 0x26e   : > { %2904 = vst.msk [vmem:[#allocation2 + $0xf9] sm:$0xff] %vm9265_vm0, %v2872_v23  ;;  %3909 = vrot.lane.b32.xlu0 %v7944_v4, %s5843_s28  ;;  %v2426_v49 = vpop.f32.mrb[40].mxu0 }
 0x26f   : > { %v3700_v16 = vpop.permute.xlu0 %3699  ;;  %3079 = vrot.lane.b32.xlu1 %v7814_v11, %s5844_s29  ;;  %v2652_v29 = vadd.f32 %v7543_v48, %v2426_v49  ;;  %v2428_v9 = vpop.f32.mrb[41].mxu0 }
 0x270   : > { %3788 = vst.msk [vmem:[#allocation3 + $0xb0] sm:$0xff] %vm908_vm3, %v3700_v16  ;;  %v3444_v36 = vpop.permute.xlu1 %3443 }
 0x271   : > { %3532 = vst.msk [vmem:[#allocation3 + $0xa8] sm:$0xff] %vm1294_vm5, %v3444_v36  ;;  %v2737_v63 = vmul.f32 %v7612_v12, %v2652_v29 }
 0x272   : > { %4101 = vrot.lane.b32.xlu0 %v7930_v58, %s5845_s26 }
 0x273   : > { %v3892_v54 = vpop.permute.xlu0 %3891  ;;  %3271 = vrot.lane.b32.xlu1 %v7822_v62, %s5843_s28  ;;  %v4280_v28 = vld [vmem:[#allocation3 + $0x98] sm:$0xff]  ;;  %v2776_v48 = vadd.f32 %v7623_v15, %v2737_v63 }
 0x274   : > { %3980 = vst.msk [vmem:[#allocation3 + $0xb0] sm:$0xff] %vm1101_vm4, %v3892_v54  ;;  %4583 = vmatprep.mubr.f32.mxu1 %v4280_v28  ;;  %v3062_v11 = vpop.permute.xlu1 %3061 }
 0x275   : > { %3149 = vst.msk [vmem:[#allocation3 + $0xc0] sm:$0xff] %vm908_vm3, %v3062_v11  ;;  %4584 = vmatmul.mubr.f32.gmra.mrb[44].mxu1 %v4279_v46  ;;  %v7962_v32 = vld [vmem:[#allocation2 + $0xf9] sm:$0xff]  ;;  %vm2808_vm15 = vcmp.ge.f32.partialorder %v2776_v48, 0.0  ;;  %v2841_v55 = vmul.f32 %v7149_v35, %v2776_v48 }
 0x276   : > { %v7964_v42 = vld [vmem:[#allocation2 + $0xf2] sm:$0xff]  ;;  %3719 = vrot.lane.b32.xlu0 %v7896_v34, %s5844_s29  ;;  %v7970_v62 = vld [vmem:[#allocation2 + $0xfa] sm:$0xff]  ;;  %3608 = vst.msk [vmem:[#allocation3 + $0x1d0] sm:$0xff] %vm9265_vm0, %v7962_v32 }
 0x277   : > { %4245 = vst.msk [vmem:[#allocation3 + $0x190] sm:$0xff] %vm9265_vm0, %v7964_v42  ;;  %v2938_v38 = vld [vmem:[#allocation2 + $0xf8] sm:$0xff]  ;;  %v4084_v45 = vpop.permute.xlu0 %4083  ;;  %3463 = vrot.lane.b32.xlu1 %v7908_v37, %s5845_s26  ;;  %4246 = vst.msk [vmem:[#allocation3 + $0x1a8] sm:$0xff] %vm9265_vm0, %v7970_v62  ;;  %v2873_v14 = vsel %vm2808_vm15, %v2776_v48, %v2841_v55 }
 0x278   : > { %2970 = vst.msk [vmem:[#allocation3 + $0x1f8] sm:$0xff] %vm9265_vm0, %v2938_v38  ;;  %v3254_v1 = vpop.permute.xlu1 %3253  ;;  %v7982_v57 = vld [vmem:[#allocation2 + $0xf8] sm:$0xff]  ;;  %2905 = vst.msk [vmem:[#allocation2 + $0x109] sm:$0xff] %vm9265_vm0, %v2873_v14 }
 0x279   : > { %4172 = vst.msk [vmem:[#allocation3 + $0xb0] sm:$0xff] %vm1294_vm5, %v4084_v45  ;;  %v4282_v53 = vld [vmem:[#allocation3 + $0xa8] sm:$0xff] }
 0x27a   : > { %3341 = vst.msk [vmem:[#allocation3 + $0xc0] sm:$0xff] %vm1101_vm4, %v3254_v1  ;;  %3911 = vrot.lane.b32.xlu0 %v7982_v57, %s5843_s28  ;;  %v2431_v5 = vpop.f32.mrb[42].mxu0 }
 0x27b   : > { %v3702_v25 = vpop.permute.xlu0 %3701  ;;  %3081 = vrot.lane.b32.xlu1 %v7856_v60, %s5844_s29  ;;  %v2657_v21 = vadd.f32 %v7540_v17, %v2431_v5  ;;  %v2433_v2 = vpop.f32.mrb[43].mxu0 }
 0x27c   : > { %3789 = vst.msk [vmem:[#allocation3 + $0xc8] sm:$0xff] %vm908_vm3, %v3702_v25  ;;  %v3446_v31 = vpop.permute.xlu1 %3445 }
 0x27d   : > { %3533 = vst.msk [vmem:[#allocation3 + $0xc0] sm:$0xff] %vm1294_vm5, %v3446_v31  ;;  %v2738_v40 = vmul.f32 %v7612_v12, %v2657_v21 }
 0x27e   : > { %v4311_v37 = vld [vmem:[#allocation3 + $0x190] sm:$0xff]  ;;  %4103 = vrot.lane.b32.xlu0 %v7962_v32, %s5845_s26  ;;  %v4314_v52 = vld [vmem:[#allocation3 + $0x1a8] sm:$0xff] }
 0x27f   : > { %5666 = vmatprep.mubr.msk.f32.mxu0 %vm9265_vm0, %v4311_v37  ;;  %v3894_v8 = vpop.permute.xlu0 %3893  ;;  %3273 = vrot.lane.b32.xlu1 %v7890_v18, %s5843_s28  ;;  %v2777_v50 = vadd.f32 %v7623_v15, %v2738_v40  ;;  %v8002_v61 = vld [vmem:[#allocation2 + $0x109] sm:$0xff] }
 0x280   : > { %5667 = vmatmul.mubr.msk.f32.gmra.mrb[80].mxu0 %vm9265_vm0, %v4314_v52  ;;  %v4283_v60 = vld [vmem:[#allocation3 + $0xb0] sm:$0xff]  ;;  %3981 = vst.msk [vmem:[#allocation3 + $0xc8] sm:$0xff] %vm1101_vm4, %v3894_v8  ;;  %v3064_v17 = vpop.permute.xlu1 %3063  ;;  %v2939_v18 = vld [vmem:[#allocation2 + $0x108] sm:$0xff] }
 0x281   : > { %4588 = vmatprep.mubr.f32.mxu1 %v4283_v60  ;;  %3150 = vst.msk [vmem:[#allocation3 + $0xd8] sm:$0xff] %vm908_vm3, %v3064_v17  ;;  %vm2809_vm1 = vcmp.ge.f32.partialorder %v2777_v50, 0.0  ;;  %v2842_v6 = vmul.f32 %v7149_v35, %v2777_v50  ;;  %v8014_v41 = vld [vmem:[#allocation2 + $0x108] sm:$0xff] }
 0x282   : > { %4589 = vmatmul.mubr.f32.gmra.mrb[46].mxu1 %v4282_v53  ;;  %3721 = vrot.lane.b32.xlu0 %v7964_v42, %s5844_s29  ;;  %3609 = vst.msk [vmem:[#allocation3 + $0x1e8] sm:$0xff] %vm9265_vm0, %v8002_v61  ;;  %2971 = vst.msk [vmem:[#allocation3 + $0x210] sm:$0xff] %vm9265_vm0, %v2939_v18  ;;  %v8093_v53 = vld [vmem:[%s9254_s5] ss:$0 sm:$0xff] }
 0x283   : > { %v4086_v13 = vpop.permute.xlu0 %4085  ;;  %3465 = vrot.lane.b32.xlu1 %v7944_v4, %s5845_s26  ;;  %v2874_v39 = vsel %vm2809_vm1, %v2777_v50, %v2842_v6  ;;  %v8101_v6 = vld [vmem:[%s9255_s6] ss:$0 sm:$0xff] }
 0x284   : > { %4173 = vst.msk [vmem:[#allocation3 + $0xc8] sm:$0xff] %vm1294_vm5, %v4086_v13  ;;  %v3256_v27 = vpop.permute.xlu1 %3255  ;;  %v4285_v16 = vld [vmem:[#allocation3 + $0xc0] sm:$0xff] }
 0x285   : > { %3342 = vst.msk [vmem:[#allocation3 + $0xd8] sm:$0xff] %vm1101_vm4, %v3256_v27 }
 0x286   : > { %2906 = vst.msk [vmem:[#allocation2 + $0x111] sm:$0xff] %vm9265_vm0, %v2874_v39  ;;  %3913 = vrot.lane.b32.xlu0 %v8014_v41, %s5843_s28  ;;  %v2436_v56 = vpop.f32.mrb[44].mxu0 }
 0x287   : > { %v3704_v30 = vpop.permute.xlu0 %3703  ;;  %3083 = vrot.lane.b32.xlu1 %v7888_v51, %s5844_s29  ;;  %v2662_v22 = vadd.f32 %v7618_v33, %v2436_v56  ;;  %v2438_v47 = vpop.f32.mrb[45].mxu0 }
 0x288   : > { %3790 = vst.msk [vmem:[#allocation3 + $0xe0] sm:$0xff] %vm908_vm3, %v3704_v30  ;;  %v3448_v20 = vpop.permute.xlu1 %3447 }
 0x289   : > { %3534 = vst.msk [vmem:[#allocation3 + $0xd8] sm:$0xff] %vm1294_vm5, %v3448_v20  ;;  %v2739_v19 = vmul.f32 %v7612_v12, %v2662_v22 }
 0x28a   : > { %4105 = vrot.lane.b32.xlu0 %v8002_v61, %s5845_s26 }
 0x28b   : > { %v3896_v23 = vpop.permute.xlu0 %3895  ;;  %3275 = vrot.lane.b32.xlu1 %v7896_v34, %s5843_s28  ;;  %v4286_v4 = vld [vmem:[#allocation3 + $0xc8] sm:$0xff]  ;;  %v2778_v33 = vadd.f32 %v7623_v15, %v2739_v19 }
 0x28c   : > { %3982 = vst.msk [vmem:[#allocation3 + $0xe0] sm:$0xff] %vm1101_vm4, %v3896_v23  ;;  %4593 = vmatprep.mubr.f32.mxu1 %v4286_v4  ;;  %v3066_v51 = vpop.permute.xlu1 %3065 }
 0x28d   : > { %3151 = vst.msk [vmem:[#allocation3 + $0xf0] sm:$0xff] %vm908_vm3, %v3066_v51  ;;  %4594 = vmatmul.mubr.f32.gmra.mrb[48].mxu1 %v4285_v16  ;;  %v8032_v49 = vld [vmem:[#allocation2 + $0x111] sm:$0xff]  ;;  %vm2810_vm6 = vcmp.ge.f32.partialorder %v2778_v33, 0.0  ;;  %v2843_v29 = vmul.f32 %v7149_v35, %v2778_v33 }
 0x28e   : > { %3723 = vrot.lane.b32.xlu0 %v7970_v62, %s5844_s29  ;;  %3610 = vst.msk [vmem:[#allocation3 + $0x200] sm:$0xff] %vm9265_vm0, %v8032_v49  ;;  %v2940_v34 = vld [vmem:[#allocation2 + $0x110] sm:$0xff] }
 0x28f   : > { %v4215_v36 = vld [vmem:[#allocation2 + $0x10a] sm:$0xff]  ;;  %v4088_v9 = vpop.permute.xlu0 %4087  ;;  %3467 = vrot.lane.b32.xlu1 %v7982_v57, %s5845_s26  ;;  %2972 = vst.msk [vmem:[#allocation3 + $0x228] sm:$0xff] %vm9265_vm0, %v2940_v34  ;;  %v4216_v63 = vld [vmem:[#allocation2 + $0x112] sm:$0xff]  ;;  %v2875_v28 = vsel %vm2810_vm6, %v2778_v33, %v2843_v29 }
 0x290   : > { %4247 = vst.msk [vmem:[#allocation3 + $0x1c0] sm:$0xff] %vm9265_vm0, %v4215_v36  ;;  %v3258_v54 = vpop.permute.xlu1 %3257  ;;  %4248 = vst.msk [vmem:[#allocation3 + $0x1d8] sm:$0xff] %vm9265_vm0, %v4216_v63  ;;  %v8046_v11 = vld [vmem:[#allocation2 + $0x110] sm:$0xff]  ;;  %v4288_v25 = vld [vmem:[#allocation3 + $0xd8] sm:$0xff] }
 0x291   : > { %4174 = vst.msk [vmem:[#allocation3 + $0xe0] sm:$0xff] %vm1294_vm5, %v4088_v9  ;;  %v8064_v5 = vld [vmem:[#allocation2 + $0x10a] sm:$0xff]  ;;  %v8105_v39 = vld [vmem:[#allocation2 + $0x112] sm:$0xff] }
 0x292   : > { %3343 = vst.msk [vmem:[#allocation3 + $0xf0] sm:$0xff] %vm1101_vm4, %v3258_v54  ;;  %3915 = vrot.lane.b32.xlu0 %v8046_v11, %s5843_s28 }
 0x293   : > { %2907 = vst.msk [vmem:[#allocation2 + $0x121] sm:$0xff] %vm9265_vm0, %v2875_v28  ;;  %v3706_v46 = vpop.permute.xlu0 %3705  ;;  %3085 = vrot.lane.b32.xlu1 %v7930_v58, %s5844_s29  ;;  %v2441_v48 = vpop.f32.mrb[46].mxu0 }
 0x294   : > { %3791 = vst.msk [vmem:[#allocation3 + $0xf8] sm:$0xff] %vm908_vm3, %v3706_v46  ;;  %v3450_v38 = vpop.permute.xlu1 %3449  ;;  %v2667_v55 = vadd.f32 %v7615_v59, %v2441_v48  ;;  %v2443_v45 = vpop.f32.mrb[47].mxu0 }
 0x295   : > { %3535 = vst.msk [vmem:[#allocation3 + $0xf0] sm:$0xff] %vm1294_vm5, %v3450_v38 }
 0x296   : > { %4107 = vrot.lane.b32.xlu0 %v8032_v49, %s5845_s26  ;;  %v2740_v1 = vmul.f32 %v7612_v12, %v2667_v55 }
 0x297   : > { %v3898_v14 = vpop.permute.xlu0 %3897  ;;  %3277 = vrot.lane.b32.xlu1 %v7964_v42, %s5843_s28 }
 0x298   : > { %v4289_v57 = vld [vmem:[#allocation3 + $0xe0] sm:$0xff]  ;;  %3983 = vst.msk [vmem:[#allocation3 + $0xf8] sm:$0xff] %vm1101_vm4, %v3898_v14  ;;  %v3068_v58 = vpop.permute.xlu1 %3067  ;;  %v2779_v59 = vadd.f32 %v7623_v15, %v2740_v1 }
 0x299   : > { %4598 = vmatprep.mubr.f32.mxu1 %v4289_v57  ;;  %3152 = vst.msk [vmem:[#allocation3 + $0x108] sm:$0xff] %vm908_vm3, %v3068_v58 }
 0x29a   : > { %4599 = vmatmul.mubr.f32.gmra.mrb[50].mxu1 %v4288_v25  ;;  %v8066_v31 = vld [vmem:[#allocation2 + $0x121] sm:$0xff]  ;;  %3725 = vrot.lane.b32.xlu0 %v8064_v5, %s5844_s29  ;;  %vm2811_vm7 = vcmp.ge.f32.partialorder %v2779_v59, 0.0  ;;  %v2844_v42 = vmul.f32 %v7149_v35, %v2779_v59 }
 0x29b   : > { %3611 = vst.msk [vmem:[#allocation3 + $0x218] sm:$0xff] %vm9265_vm0, %v8066_v31  ;;  %v2941_v12 = vld [vmem:[#allocation2 + $0x120] sm:$0xff]  ;;  %v4090_v21 = vpop.permute.xlu0 %4089  ;;  %3469 = vrot.lane.b32.xlu1 %v8014_v41, %s5845_s26 }
 0x29c   : > { %2973 = vst.msk [vmem:[#allocation3 + $0x240] sm:$0xff] %vm9265_vm0, %v2941_v12  ;;  %v3260_v15 = vpop.permute.xlu1 %3259  ;;  %v2876_v2 = vsel %vm2811_vm7, %v2779_v59, %v2844_v42  ;;  %v8078_v37 = vld [vmem:[#allocation2 + $0x120] sm:$0xff] }
 0x29d   : > { %4175 = vst.msk [vmem:[#allocation3 + $0xf8] sm:$0xff] %vm1294_vm5, %v4090_v21 }
 0x29e   : > { %3344 = vst.msk [vmem:[#allocation3 + $0x108] sm:$0xff] %vm1101_vm4, %v3260_v15  ;;  %3917 = vrot.lane.b32.xlu0 %v8078_v37, %s5843_s28 }
 0x29f   : > { %2908 = vst.msk [vmem:[#allocation2 + $0x129] sm:$0xff] %vm9265_vm0, %v2876_v2  ;;  %3087 = vrot.lane.b32.xlu1 %v7962_v32, %s5844_s29  ;;  %v2446_v40 = vpop.f32.mrb[48].mxu0 }
 0x2a0   : > { %v3708_v52 = vpop.permute.xlu0 %3707  ;;  %v2672_v8 = vadd.f32 %v7699_v24, %v2446_v40  ;;  %v2448_v17 = vpop.f32.mrb[49].mxu0  ;;  %v4291_v24 = vld [vmem:[#allocation3 + $0xf0] sm:$0xff] }
 0x2a1   : > { %3792 = vst.msk [vmem:[#allocation3 + $0x110] sm:$0xff] %vm908_vm3, %v3708_v52  ;;  %v3452_v60 = vpop.permute.xlu1 %3451 }
 0x2a2   : > { %3536 = vst.msk [vmem:[#allocation3 + $0x108] sm:$0xff] %vm1294_vm5, %v3452_v60  ;;  %4109 = vrot.lane.b32.xlu0 %v8066_v31, %s5845_s26  ;;  %v2741_v32 = vmul.f32 %v8093_v53, %v2672_v8 }
 0x2a3   : > { %3279 = vrot.lane.b32.xlu1 %v7970_v62, %s5843_s28 }
 0x2a4   : > { %v4292_v50 = vld [vmem:[#allocation3 + $0xf8] sm:$0xff]  ;;  %v3900_v18 = vpop.permute.xlu0 %3899  ;;  %v2780_v13 = vadd.f32 %v8101_v6, %v2741_v32 }
 0x2a5   : > { %4603 = vmatprep.mubr.f32.mxu1 %v4292_v50  ;;  %3984 = vst.msk [vmem:[#allocation3 + $0x110] sm:$0xff] %vm1101_vm4, %v3900_v18  ;;  %v3070_v27 = vpop.permute.xlu1 %3069 }
 0x2a6   : > { %4604 = vmatmul.mubr.f32.gmra.mrb[52].mxu1 %v4291_v24  ;;  %v8107_v41 = vld [vmem:[#allocation2 + $0x128] sm:$0xff]  ;;  %3153 = vst.msk [vmem:[#allocation3 + $0x120] sm:$0xff] %vm908_vm3, %v3070_v27  ;;  %3727 = vrot.lane.b32.xlu0 %v8105_v39, %s5844_s29  ;;  %vm2812_vm8 = vcmp.ge.f32.partialorder %v2780_v13, 0.0  ;;  %v2845_v56 = vmul.f32 %v7149_v35, %v2780_v13 }
 0x2a7   : > { %v8109_v62 = vld [vmem:[#allocation2 + $0x129] sm:$0xff]  ;;  %2974 = vst.msk [vmem:[#allocation3 + $0x258] sm:$0xff] %vm9265_vm0, %v8107_v41  ;;  %3471 = vrot.lane.b32.xlu1 %v8046_v11, %s5845_s26 }
 0x2a8   : > { %3612 = vst.msk [vmem:[#allocation3 + $0x230] sm:$0xff] %vm9265_vm0, %v8109_v62  ;;  %v4217_v30 = vld [vmem:[#allocation2 + $0x122] sm:$0xff]  ;;  %v4218_v20 = vld [vmem:[#allocation2 + $0x12a] sm:$0xff]  ;;  %v4092_v22 = vpop.permute.xlu0 %4091  ;;  %v2877_v47 = vsel %vm2812_vm8, %v2780_v13, %v2845_v56 }
 0x2a9   : > { %4249 = vst.msk [vmem:[#allocation3 + $0x1f0] sm:$0xff] %vm9265_vm0, %v4217_v30  ;;  %4250 = vst.msk [vmem:[#allocation3 + $0x208] sm:$0xff] %vm9265_vm0, %v4218_v20  ;;  %v3262_v19 = vpop.permute.xlu1 %3261  ;;  %v8138_v29 = vld [vmem:[#allocation2 + $0x122] sm:$0xff]  ;;  %v4294_v63 = vld [vmem:[#allocation3 + $0x108] sm:$0xff] }
 0x2aa   : > { %4176 = vst.msk [vmem:[#allocation3 + $0x110] sm:$0xff] %vm1294_vm5, %v4092_v22  ;;  %3919 = vrot.lane.b32.xlu0 %v8107_v41, %s5843_s28  ;;  %v8171_v59 = vld [vmem:[#allocation2 + $0x12a] sm:$0xff] }
 0x2ab   : > { %2909 = vst.msk [vmem:[#allocation2 + $0x139] sm:$0xff] %vm9265_vm0, %v2877_v47  ;;  %3089 = vrot.lane.b32.xlu1 %v8002_v61, %s5844_s29 }
 0x2ac   : > { %3345 = vst.msk [vmem:[#allocation3 + $0x120] sm:$0xff] %vm1101_vm4, %v3262_v19  ;;  %v3710_v23 = vpop.permute.xlu0 %3709  ;;  %v2451_v4 = vpop.f32.mrb[50].mxu0 }
 0x2ad   : > { %3793 = vst.msk [vmem:[#allocation3 + $0x128] sm:$0xff] %vm908_vm3, %v3710_v23  ;;  %v2677_v51 = vadd.f32 %v7691_v7, %v2451_v4  ;;  %v3454_v16 = vpop.permute.xlu1 %3453  ;;  %v2453_v33 = vpop.f32.mrb[51].mxu0 }
 0x2ae   : > { %3537 = vst.msk [vmem:[#allocation3 + $0x120] sm:$0xff] %vm1294_vm5, %v3454_v16  ;;  %4111 = vrot.lane.b32.xlu0 %v8109_v62, %s5845_s26 }
 0x2af   : > { %v2742_v34 = vmul.f32 %v8093_v53, %v2677_v51  ;;  %3281 = vrot.lane.b32.xlu1 %v8064_v5, %s5843_s28 }
 0x2b0   : > { %v3902_v36 = vpop.permute.xlu0 %3901 }
 0x2b1   : > { %v4295_v61 = vld [vmem:[#allocation3 + $0x110] sm:$0xff]  ;;  %v2781_v9 = vadd.f32 %v8101_v6, %v2742_v34  ;;  %3985 = vst.msk [vmem:[#allocation3 + $0x128] sm:$0xff] %vm1101_vm4, %v3902_v36  ;;  %v3072_v7 = vpop.permute.xlu1 %3071 }
 0x2b2   : > { %4608 = vmatprep.mubr.f32.mxu1 %v4295_v61  ;;  %v8142_v54 = vld [vmem:[#allocation2 + $0x138] sm:$0xff]  ;;  %3154 = vst.msk [vmem:[#allocation3 + $0x138] sm:$0xff] %vm908_vm3, %v3072_v7  ;;  %3729 = vrot.lane.b32.xlu0 %v8138_v29, %s5844_s29 }
 0x2b3   : > { %v8144_v28 = vld [vmem:[#allocation2 + $0x139] sm:$0xff]  ;;  %4609 = vmatmul.mubr.f32.gmra.mrb[54].mxu1 %v4294_v63  ;;  %2975 = vst.msk [vmem:[#allocation3 + $0x270] sm:$0xff] %vm9265_vm0, %v8142_v54  ;;  %vm2813_vm9 = vcmp.ge.f32.partialorder %v2781_v9, 0.0  ;;  %v2846_v11 = vmul.f32 %v7149_v35, %v2781_v9  ;;  %3473 = vrot.lane.b32.xlu1 %v8078_v37, %s5845_s26 }
 0x2b4   : > { %3613 = vst.msk [vmem:[#allocation3 + $0x248] sm:$0xff] %vm9265_vm0, %v8144_v28  ;;  %v4094_v46 = vpop.permute.xlu0 %4093 }
 0x2b5   : > { %v2878_v48 = vsel %vm2813_vm9, %v2781_v9, %v2846_v11  ;;  %4177 = vst.msk [vmem:[#allocation3 + $0x128] sm:$0xff] %vm1294_vm5, %v4094_v46  ;;  %v3264_v38 = vpop.permute.xlu1 %3263  ;;  %v4297_v12 = vld [vmem:[#allocation3 + $0x120] sm:$0xff] }
 0x2b6   : > { %2910 = vst.msk [vmem:[#allocation2 + $0x141] sm:$0xff] %vm9265_vm0, %v2878_v48  ;;  %3921 = vrot.lane.b32.xlu0 %v8142_v54, %s5843_s28 }
 0x2b7   : > { %3346 = vst.msk [vmem:[#allocation3 + $0x138] sm:$0xff] %vm1101_vm4, %v3264_v38  ;;  %3091 = vrot.lane.b32.xlu1 %v8032_v49, %s5844_s29 }
 0x2b8   : > { %v3712_v55 = vpop.permute.xlu0 %3711  ;;  %v2456_v45 = vpop.f32.mrb[52].mxu0 }
 0x2b9   : > { %3794 = vst.msk [vmem:[#allocation3 + $0x140] sm:$0xff] %vm908_vm3, %v3712_v55  ;;  %v2682_v1 = vadd.f32 %v7784_v3, %v2456_v45  ;;  %v3456_v14 = vpop.permute.xlu1 %3455  ;;  %v2458_v57 = vpop.f32.mrb[53].mxu0 }
 0x2ba   : > { %3538 = vst.msk [vmem:[#allocation3 + $0x138] sm:$0xff] %vm1294_vm5, %v3456_v14  ;;  %4113 = vrot.lane.b32.xlu0 %v8144_v28, %s5845_s26 }
 0x2bb   : > { %v2743_v58 = vmul.f32 %v8093_v53, %v2682_v1  ;;  %3283 = vrot.lane.b32.xlu1 %v8105_v39, %s5843_s28 }
 0x2bc   : > { %v3904_v25 = vpop.permute.xlu0 %3903  ;;  %v4298_v49 = vld [vmem:[#allocation3 + $0x128] sm:$0xff] }
 0x2bd   : > { %v2782_v5 = vadd.f32 %v8101_v6, %v2743_v58  ;;  %3986 = vst.msk [vmem:[#allocation3 + $0x140] sm:$0xff] %vm1101_vm4, %v3904_v25  ;;  %4613 = vmatprep.mubr.f32.mxu1 %v4298_v49  ;;  %v3074_v3 = vpop.permute.xlu1 %3073  ;;  %v8175_v42 = vld [vmem:[#allocation2 + $0x140] sm:$0xff] }
 0x2be   : > { %v8177_v21 = vld [vmem:[#allocation2 + $0x141] sm:$0xff]  ;;  %3155 = vst.msk [vmem:[#allocation3 + $0x150] sm:$0xff] %vm908_vm3, %v3074_v3  ;;  %4614 = vmatmul.mubr.f32.gmra.mrb[56].mxu1 %v4297_v12  ;;  %3731 = vrot.lane.b32.xlu0 %v8171_v59, %s5844_s29 }
 0x2bf   : > { %3614 = vst.msk [vmem:[#allocation3 + $0x260] sm:$0xff] %vm9265_vm0, %v8177_v21  ;;  %2976 = vst.msk [vmem:[#allocation3 + $0x288] sm:$0xff] %vm9265_vm0, %v8175_v42  ;;  %v4219_v15 = vld [vmem:[#allocation2 + $0x13a] sm:$0xff]  ;;  %v4220_v2 = vld [vmem:[#allocation2 + $0x142] sm:$0xff]  ;;  %vm2814_vm10 = vcmp.ge.f32.partialorder %v2782_v5, 0.0  ;;  %v2847_v37 = vmul.f32 %v7149_v35, %v2782_v5  ;;  %3475 = vrot.lane.b32.xlu1 %v8107_v41, %s5845_s26 }
 0x2c0   : > { %4251 = vst.msk [vmem:[#allocation3 + $0x220] sm:$0xff] %vm9265_vm0, %v4219_v15  ;;  %4252 = vst.msk [vmem:[#allocation3 + $0x238] sm:$0xff] %vm9265_vm0, %v4220_v2  ;;  %v4096_v52 = vpop.permute.xlu0 %4095  ;;  %v8206_v27 = vld [vmem:[#allocation2 + $0x13a] sm:$0xff]  ;;  %v8239_v61 = vld [vmem:[#allocation2 + $0x142] sm:$0xff] }
 0x2c1   : > { %v2879_v40 = vsel %vm2814_vm10, %v2782_v5, %v2847_v37  ;;  %4178 = vst.msk [vmem:[#allocation3 + $0x140] sm:$0xff] %vm1294_vm5, %v4096_v52  ;;  %v3266_v8 = vpop.permute.xlu1 %3265  ;;  %v4300_v41 = vld [vmem:[#allocation3 + $0x138] sm:$0xff] }
 0x2c2   : > { %2911 = vst.msk [vmem:[#allocation2 + $0x151] sm:$0xff] %vm9265_vm0, %v2879_v40  ;;  %3923 = vrot.lane.b32.xlu0 %v8175_v42, %s5843_s28 }
 0x2c3   : > { %3347 = vst.msk [vmem:[#allocation3 + $0x150] sm:$0xff] %vm1101_vm4, %v3266_v8  ;;  %3093 = vrot.lane.b32.xlu1 %v8066_v31, %s5844_s29 }
 0x2c4   : > { %v3714_v60 = vpop.permute.xlu0 %3713 }
 0x2c5   : > { %v2461_v17 = vpop.f32.mrb[54].mxu0  ;;  %3795 = vst.msk [vmem:[#allocation3 + $0x158] sm:$0xff] %vm908_vm3, %v3714_v60  ;;  %v3458_v50 = vpop.permute.xlu1 %3457 }
 0x2c6   : > { %v2687_v32 = vadd.f32 %v7777_v44, %v2461_v17  ;;  %v2463_v18 = vpop.f32.mrb[55].mxu0  ;;  %3539 = vst.msk [vmem:[#allocation3 + $0x150] sm:$0xff] %vm1294_vm5, %v3458_v50  ;;  %4115 = vrot.lane.b32.xlu0 %v8177_v21, %s5845_s26 }
 0x2c7   : > { %3285 = vrot.lane.b32.xlu1 %v8138_v29, %s5843_s28 }
 0x2c8   : > { %v2744_v24 = vmul.f32 %v8093_v53, %v2687_v32  ;;  %v3906_v13 = vpop.permute.xlu0 %3905  ;;  %v4301_v31 = vld [vmem:[#allocation3 + $0x140] sm:$0xff] }
 0x2c9   : > { %3987 = vst.msk [vmem:[#allocation3 + $0x158] sm:$0xff] %vm1101_vm4, %v3906_v13  ;;  %4618 = vmatprep.mubr.f32.mxu1 %v4301_v31  ;;  %v3076_v44 = vpop.permute.xlu1 %3075  ;;  %v8210_v30 = vld [vmem:[#allocation2 + $0x150] sm:$0xff] }
 0x2ca   : > { %v2783_v39 = vadd.f32 %v8101_v6, %v2744_v24  ;;  %v8212_v56 = vld [vmem:[#allocation2 + $0x151] sm:$0xff]  ;;  %3156 = vst.msk [vmem:[#allocation3 + $0x168] sm:$0xff] %vm908_vm3, %v3076_v44  ;;  %4619 = vmatmul.mubr.f32.gmra.mrb[58].mxu1 %v4300_v41  ;;  %3733 = vrot.lane.b32.xlu0 %v8206_v27, %s5844_s29 }
 0x2cb   : > { %3615 = vst.msk [vmem:[#allocation3 + $0x278] sm:$0xff] %vm9265_vm0, %v8212_v56  ;;  %2977 = vst.msk [vmem:[#allocation3 + $0x2a0] sm:$0xff] %vm9265_vm0, %v8210_v30  ;;  %3477 = vrot.lane.b32.xlu1 %v8142_v54, %s5845_s26 }
 0x2cc   : > { %vm2815_vm11 = vcmp.ge.f32.partialorder %v2783_v39, 0.0  ;;  %v2848_v20 = vmul.f32 %v7149_v35, %v2783_v39  ;;  %v4098_v22 = vpop.permute.xlu0 %4097 }
 0x2cd   : > { %4179 = vst.msk [vmem:[#allocation3 + $0x158] sm:$0xff] %vm1294_vm5, %v4098_v22  ;;  %v3268_v19 = vpop.permute.xlu1 %3267  ;;  %v4303_v9 = vld [vmem:[#allocation3 + $0x150] sm:$0xff] }
 0x2ce   : > { %v2880_v47 = vsel %vm2815_vm11, %v2783_v39, %v2848_v20  ;;  %3348 = vst.msk [vmem:[#allocation3 + $0x168] sm:$0xff] %vm1101_vm4, %v3268_v19  ;;  %3925 = vrot.lane.b32.xlu0 %v8210_v30, %s5843_s28  ;;  %v2466_v4 = vpop.f32.mrb[56].mxu0 }
 0x2cf   : > { %2912 = vst.msk [vmem:[#allocation2 + $0x159] sm:$0xff] %vm9265_vm0, %v2880_v47  ;;  %3095 = vrot.lane.b32.xlu1 %v8109_v62, %s5844_s29  ;;  %v2692_v51 = vadd.f32 %v7858_v26, %v2466_v4  ;;  %v2468_v33 = vpop.f32.mrb[57].mxu0 }
 0x2d0   : > { %v3716_v23 = vpop.permute.xlu0 %3715 }
 0x2d1   : > { %3796 = vst.msk [vmem:[#allocation3 + $0x170] sm:$0xff] %vm908_vm3, %v3716_v23  ;;  %v3460_v16 = vpop.permute.xlu1 %3459  ;;  %v2745_v34 = vmul.f32 %v8093_v53, %v2692_v51 }
 0x2d2   : > { %3540 = vst.msk [vmem:[#allocation3 + $0x168] sm:$0xff] %vm1294_vm5, %v3460_v16  ;;  %4117 = vrot.lane.b32.xlu0 %v8212_v56, %s5845_s26 }
 0x2d3   : > { %3287 = vrot.lane.b32.xlu1 %v8171_v59, %s5843_s28  ;;  %v2784_v29 = vadd.f32 %v8101_v6, %v2745_v34 }
 0x2d4   : > { %v3908_v36 = vpop.permute.xlu0 %3907  ;;  %v4304_v62 = vld [vmem:[#allocation3 + $0x158] sm:$0xff] }
 0x2d5   : > { %3988 = vst.msk [vmem:[#allocation3 + $0x170] sm:$0xff] %vm1101_vm4, %v3908_v36  ;;  %4623 = vmatprep.mubr.f32.mxu1 %v4304_v62  ;;  %v3078_v26 = vpop.permute.xlu1 %3077  ;;  %vm2816_vm12 = vcmp.ge.f32.partialorder %v2784_v29, 0.0  ;;  %v2849_v46 = vmul.f32 %v7149_v35, %v2784_v29 }
 0x2d6   : > { %v8243_v7 = vld [vmem:[#allocation2 + $0x158] sm:$0xff]  ;;  %3157 = vst.msk [vmem:[#allocation3 + $0x180] sm:$0xff] %vm908_vm3, %v3078_v26  ;;  %4624 = vmatmul.mubr.f32.gmra.mrb[60].mxu1 %v4303_v9  ;;  %3735 = vrot.lane.b32.xlu0 %v8239_v61, %s5844_s29 }
 0x2d7   : > { %v8245_v63 = vld [vmem:[#allocation2 + $0x159] sm:$0xff]  ;;  %2978 = vst.msk [vmem:[#allocation3 + $0x2b8] sm:$0xff] %vm9265_vm0, %v8243_v7  ;;  %3479 = vrot.lane.b32.xlu1 %v8175_v42, %s5845_s26  ;;  %v2881_v38 = vsel %vm2816_vm12, %v2784_v29, %v2849_v46 }
 0x2d8   : > { %v8250_v54 = vld [vmem:[#allocation2 + $0x15a] sm:$0xff]  ;;  %3616 = vst.msk [vmem:[#allocation3 + $0x290] sm:$0xff] %vm9265_vm0, %v8245_v63  ;;  %v4221_v11 = vld [vmem:[#allocation2 + $0x152] sm:$0xff]  ;;  %v4100_v48 = vpop.permute.xlu0 %4099  ;;  %2913 = vst.msk [vmem:[#allocation2 + $0x169] sm:$0xff] %vm9265_vm0, %v2881_v38 }
 0x2d9   : > { %4253 = vst.msk [vmem:[#allocation3 + $0x250] sm:$0xff] %vm9265_vm0, %v4221_v11  ;;  %4254 = vst.msk [vmem:[#allocation3 + $0x268] sm:$0xff] %vm9265_vm0, %v8250_v54  ;;  %v3270_v55 = vpop.permute.xlu1 %3269  ;;  %v8277_v59 = vld [vmem:[#allocation2 + $0x152] sm:$0xff] }
 0x2da   : > { %4180 = vst.msk [vmem:[#allocation3 + $0x170] sm:$0xff] %vm1294_vm5, %v4100_v48  ;;  %3927 = vrot.lane.b32.xlu0 %v8243_v7, %s5843_s28  ;;  %v4306_v3 = vld [vmem:[#allocation3 + $0x168] sm:$0xff] }
 0x2db   : > { %3349 = vst.msk [vmem:[#allocation3 + $0x180] sm:$0xff] %vm1101_vm4, %v3270_v55  ;;  %3097 = vrot.lane.b32.xlu1 %v8144_v28, %s5844_s29  ;;  %v2471_v1 = vpop.f32.mrb[58].mxu0 }
 0x2dc   : > { %v3718_v45 = vpop.permute.xlu0 %3717  ;;  %v2697_v14 = vadd.f32 %v7852_v10, %v2471_v1  ;;  %v2473_v58 = vpop.f32.mrb[59].mxu0 }
 0x2dd   : > { %3797 = vst.msk [vmem:[#allocation3 + $0x188] sm:$0xff] %vm908_vm3, %v3718_v45  ;;  %v3462_v57 = vpop.permute.xlu1 %3461 }
 0x2de   : > { %3541 = vst.msk [vmem:[#allocation3 + $0x180] sm:$0xff] %vm1294_vm5, %v3462_v57  ;;  %4119 = vrot.lane.b32.xlu0 %v8245_v63, %s5845_s26  ;;  %v2746_v25 = vmul.f32 %v8093_v53, %v2697_v14 }
 0x2df   : > { %3289 = vrot.lane.b32.xlu1 %v8206_v27, %s5843_s28  ;;  %v8281_v12 = vld [vmem:[#allocation2 + $0x168] sm:$0xff] }
 0x2e0   : > { %v3910_v49 = vpop.permute.xlu0 %3909  ;;  %v2785_v5 = vadd.f32 %v8101_v6, %v2746_v25  ;;  %v8283_v42 = vld [vmem:[#allocation2 + $0x169] sm:$0xff]  ;;  %2979 = vst.msk [vmem:[#allocation3 + $0x2d0] sm:$0xff] %vm9265_vm0, %v8281_v12 }
 0x2e1   : > { %v4307_v28 = vld [vmem:[#allocation3 + $0x170] sm:$0xff]  ;;  %3989 = vst.msk [vmem:[#allocation3 + $0x188] sm:$0xff] %vm1101_vm4, %v3910_v49  ;;  %v3080_v10 = vpop.permute.xlu1 %3079 }
 0x2e2   : > { %4628 = vmatprep.mubr.f32.mxu1 %v4307_v28  ;;  %3158 = vst.msk [vmem:[#allocation3 + $0x198] sm:$0xff] %vm908_vm3, %v3080_v10  ;;  %3737 = vrot.lane.b32.xlu0 %v8277_v59, %s5844_s29  ;;  %vm2817_vm13 = vcmp.ge.f32.partialorder %v2785_v5, 0.0  ;;  %v2850_v15 = vmul.f32 %v7149_v35, %v2785_v5 }
 0x2e3   : > { %4629 = vmatmul.mubr.f32.gmra.mrb[62].mxu1 %v4306_v3  ;;  %3617 = vst.msk [vmem:[#allocation3 + $0x2a8] sm:$0xff] %vm9265_vm0, %v8283_v42  ;;  %3481 = vrot.lane.b32.xlu1 %v8210_v30, %s5845_s26 }
 0x2e4   : > { %v4102_v2 = vpop.permute.xlu0 %4101  ;;  %v2882_v37 = vsel %vm2817_vm13, %v2785_v5, %v2850_v15 }
 0x2e5   : > { %4181 = vst.msk [vmem:[#allocation3 + $0x188] sm:$0xff] %vm1294_vm5, %v4102_v2  ;;  %v3272_v52 = vpop.permute.xlu1 %3271  ;;  %v4309_v24 = vld [vmem:[#allocation3 + $0x180] sm:$0xff] }
 0x2e6   : > { %2914 = vst.msk [vmem:[#allocation2 + $0x171] sm:$0xff] %vm9265_vm0, %v2882_v37  ;;  %3929 = vrot.lane.b32.xlu0 %v8281_v12, %s5843_s28 }
 0x2e7   : > { %3350 = vst.msk [vmem:[#allocation3 + $0x198] sm:$0xff] %vm1101_vm4, %v3272_v52  ;;  %3099 = vrot.lane.b32.xlu1 %v8177_v21, %s5844_s29  ;;  %v2476_v8 = vpop.f32.mrb[60].mxu0 }
 0x2e8   : > { %v3720_v40 = vpop.permute.xlu0 %3719  ;;  %v2702_v60 = vadd.f32 %v7932_v43, %v2476_v8  ;;  %v2478_v32 = vpop.f32.mrb[61].mxu0 }
 0x2e9   : > { %3798 = vst.msk [vmem:[#allocation3 + $0x1a0] sm:$0xff] %vm908_vm3, %v3720_v40  ;;  %v3464_v17 = vpop.permute.xlu1 %3463 }
 0x2ea   : > { %3542 = vst.msk [vmem:[#allocation3 + $0x198] sm:$0xff] %vm1294_vm5, %v3464_v17  ;;  %4121 = vrot.lane.b32.xlu0 %v8283_v42, %s5845_s26  ;;  %v2747_v50 = vmul.f32 %v8093_v53, %v2702_v60 }
 0x2eb   : > { %3291 = vrot.lane.b32.xlu1 %v8239_v61, %s5843_s28 }
 0x2ec   : > { %v3912_v18 = vpop.permute.xlu0 %3911  ;;  %v4310_v21 = vld [vmem:[#allocation3 + $0x188] sm:$0xff]  ;;  %v2786_v13 = vadd.f32 %v8101_v6, %v2747_v50 }
 0x2ed   : > { %3990 = vst.msk [vmem:[#allocation3 + $0x1a0] sm:$0xff] %vm1101_vm4, %v3912_v18  ;;  %4633 = vmatprep.mubr.f32.mxu1 %v4310_v21  ;;  %v3082_v43 = vpop.permute.xlu1 %3081  ;;  %v8312_v31 = vld [vmem:[#allocation2 + $0x170] sm:$0xff] }
 0x2ee   : > { %v8314_v27 = vld [vmem:[#allocation2 + $0x171] sm:$0xff]  ;;  %3159 = vst.msk [vmem:[#allocation3 + $0x1b0] sm:$0xff] %vm908_vm3, %v3082_v43  ;;  %4634 = vmatmul.mubr.f32.gmra.mrb[64].mxu1 %v4309_v24  ;;  %3739 = vrot.lane.b32.xlu0 %v8250_v54, %s5844_s29  ;;  %vm2818_vm14 = vcmp.ge.f32.partialorder %v2786_v13, 0.0  ;;  %v2851_v41 = vmul.f32 %v7149_v35, %v2786_v13 }
 0x2ef   : > { %v8316_v39 = vld [vmem:[#allocation2 + $0x16a] sm:$0xff]  ;;  %v8321_v44 = vld [vmem:[#allocation2 + $0x172] sm:$0xff]  ;;  %3618 = vst.msk [vmem:[#allocation3 + $0x2c0] sm:$0xff] %vm9265_vm0, %v8314_v27  ;;  %2980 = vst.msk [vmem:[#allocation3 + $0x2e8] sm:$0xff] %vm9265_vm0, %v8312_v31  ;;  %3483 = vrot.lane.b32.xlu1 %v8243_v7, %s5845_s26 }
 0x2f0   : > { %4255 = vst.msk [vmem:[#allocation3 + $0x280] sm:$0xff] %vm9265_vm0, %v8316_v39  ;;  %4256 = vst.msk [vmem:[#allocation3 + $0x298] sm:$0xff] %vm9265_vm0, %v8321_v44  ;;  %v4104_v30 = vpop.permute.xlu0 %4103  ;;  %v2883_v20 = vsel %vm2818_vm14, %v2786_v13, %v2851_v41  ;;  %v3843_v13 = vld [vmem:[#allocation2 + $0x198] sm:$0xff] }
 0x2f1   : > { %4182 = vst.msk [vmem:[#allocation3 + $0x1a0] sm:$0xff] %vm1294_vm5, %v4104_v30  ;;  %v3274_v22 = vpop.permute.xlu1 %3273  ;;  %v4312_v62 = vld [vmem:[#allocation3 + $0x198] sm:$0xff] }
 0x2f2   : > { %2915 = vst.msk [vmem:[#allocation2 + $0x181] sm:$0xff] %vm9265_vm0, %v2883_v20  ;;  %3931 = vrot.lane.b32.xlu0 %v8312_v31, %s5843_s28 }
 0x2f3   : > { %3351 = vst.msk [vmem:[#allocation3 + $0x1b0] sm:$0xff] %vm1101_vm4, %v3274_v22  ;;  %3101 = vrot.lane.b32.xlu1 %v8212_v56, %s5844_s29 }
 0x2f4   : > { %v3722_v47 = vpop.permute.xlu0 %3721  ;;  %v2481_v19 = vpop.f32.mrb[62].mxu0 }
 0x2f5   : > { %3799 = vst.msk [vmem:[#allocation3 + $0x1b8] sm:$0xff] %vm908_vm3, %v3722_v47  ;;  %v2707_v23 = vadd.f32 %v7926_v0, %v2481_v19  ;;  %v3466_v4 = vpop.permute.xlu1 %3465  ;;  %v2483_v51 = vpop.f32.mrb[63].mxu0 }
 0x2f6   : > { %3543 = vst.msk [vmem:[#allocation3 + $0x1b0] sm:$0xff] %vm1294_vm5, %v3466_v4  ;;  %4123 = vrot.lane.b32.xlu0 %v8314_v27, %s5845_s26  ;;  %v3844_v51 = vld [vmem:[#allocation2 + $0x1a0] sm:$0xff] }
 0x2f7   : > { %v2748_v16 = vmul.f32 %v8093_v53, %v2707_v23  ;;  %3293 = vrot.lane.b32.xlu1 %v8277_v59, %s5843_s28 }
 0x2f8   : > { %v3914_v33 = vpop.permute.xlu0 %3913  ;;  %v4313_v56 = vld [vmem:[#allocation3 + $0x1a0] sm:$0xff]  ;;  %v8349_v34 = vpop.f32.mrb[64].mxu0 }
 0x2f9   : > { %v2787_v36 = vadd.f32 %v8101_v6, %v2748_v16  ;;  %3991 = vst.msk [vmem:[#allocation3 + $0x1b8] sm:$0xff] %vm1101_vm4, %v3914_v33  ;;  %4638 = vmatprep.mubr.f32.mxu1 %v4313_v56  ;;  %v3084_v0 = vpop.permute.xlu1 %3083  ;;  %v4780_v61 = vpop.f32.mrb[65].mxu0  ;;  %v4033_v29 = vld [vmem:[#allocation2 + $0x181] sm:$0xff] }
 0x2fa   : > { %3160 = vst.msk [vmem:[#allocation3 + $0x1c8] sm:$0xff] %vm908_vm3, %v3084_v0  ;;  %4639 = vmatmul.mubr.f32.gmra.mrb[66].mxu1 %v4312_v62  ;;  %3741 = vrot.lane.b32.xlu0 %v8316_v39, %s5844_s29  ;;  %v8363_v11 = vld [vmem:[#allocation2 + $0x180] sm:$0xff] }
 0x2fb   : > { %3619 = vst.msk [vmem:[#allocation3 + $0x2d8] sm:$0xff] %vm9265_vm0, %v4033_v29  ;;  %vm2819_vm15 = vcmp.ge.f32.partialorder %v2787_v36, 0.0  ;;  %v2852_v53 = vmul.f32 %v7149_v35, %v2787_v36  ;;  %3485 = vrot.lane.b32.xlu1 %v8281_v12, %s5845_s26 }
 0x2fc   : > { %v4106_v6 = vpop.permute.xlu0 %4105  ;;  %v8360_v26 = vpop.f32.mrb[66].mxu0 }
 0x2fd   : > { %v2884_v9 = vsel %vm2819_vm15, %v2787_v36, %v2852_v53  ;;  %4183 = vst.msk [vmem:[#allocation3 + $0x1b8] sm:$0xff] %vm1294_vm5, %v4106_v6  ;;  %v3276_v7 = vpop.permute.xlu1 %3275  ;;  %v8365_v46 = vpop.f32.mrb[67].mxu0  ;;  %v4315_v49 = vld [vmem:[#allocation3 + $0x1b0] sm:$0xff] }
 0x2fe   : > { %2916 = vst.msk [vmem:[#allocation2 + $0x189] sm:$0xff] %vm9265_vm0, %v2884_v9  ;;  %3933 = vrot.lane.b32.xlu0 %v8363_v11, %s5843_s28 }
 0x2ff   : > { %3352 = vst.msk [vmem:[#allocation3 + $0x1c8] sm:$0xff] %vm1101_vm4, %v3276_v7  ;;  %3103 = vrot.lane.b32.xlu1 %v8245_v63, %s5844_s29 }
 0x300   : > { %v3724_v48 = vpop.permute.xlu0 %3723  ;;  %v4555_v38 = vpop.f32.mrb[32].mxu1 }
 0x301   : > { %3800 = vst.msk [vmem:[#allocation3 + $0x1d0] sm:$0xff] %vm908_vm3, %v3724_v48  ;;  %v8374_v55 = vadd.f32 %v4780_v61, %v4555_v38  ;;  %v8376_v45 = vpop.f32.mrb[68].mxu0  ;;  %v4557_v1 = vpop.f32.mrb[33].mxu1 }
 0x302   : > { %v3468_v14 = vpop.permute.xlu1 %3467  ;;  %4125 = vrot.lane.b32.xlu0 %v4033_v29, %s5845_s26  ;;  %v8379_v57 = vpop.f32.mrb[69].mxu0 }
 0x303   : > { %3544 = vst.msk [vmem:[#allocation3 + $0x1c8] sm:$0xff] %vm1294_vm5, %v3468_v14  ;;  %3295 = vrot.lane.b32.xlu1 %v8250_v54, %s5843_s28 }
 0x304   : > { %v3916_v63 = vpop.permute.xlu0 %3915  ;;  %v4316_v58 = vld [vmem:[#allocation3 + $0x1b8] sm:$0xff]  ;;  %v8384_v25 = vpop.f32.mrb[70].mxu0 }
 0x305   : > { %3992 = vst.msk [vmem:[#allocation3 + $0x1d0] sm:$0xff] %vm1101_vm4, %v3916_v63  ;;  %4643 = vmatprep.mubr.f32.mxu1 %v4316_v58  ;;  %v8387_v28 = vpop.f32.mrb[71].mxu0  ;;  %v4034_v59 = vld [vmem:[#allocation2 + $0x189] sm:$0xff] }
 0x306   : > { %v3651_v5 = vld [vmem:[#allocation2 + $0x182] sm:$0xff]  ;;  %v3086_v10 = vpop.permute.xlu1 %3085  ;;  %4644 = vmatmul.mubr.f32.gmra.mrb[68].mxu1 %v4315_v49  ;;  %3743 = vrot.lane.b32.xlu0 %v8321_v44, %s5844_s29  ;;  %v3652_v3 = vld [vmem:[#allocation2 + $0x18a] sm:$0xff]  ;;  %3620 = vst.msk [vmem:[#allocation3 + $0x2f0] sm:$0xff] %vm9265_vm0, %v4034_v59 }
 0x307   : > { %4257 = vst.msk [vmem:[#allocation3 + $0x2b0] sm:$0xff] %vm9265_vm0, %v3651_v5  ;;  %3487 = vrot.lane.b32.xlu1 %v8312_v31, %s5845_s26  ;;  %4258 = vst.msk [vmem:[#allocation3 + $0x2c8] sm:$0xff] %vm9265_vm0, %v3652_v3  ;;  %v3842_v15 = vld [vmem:[#allocation2 + $0x188] sm:$0xff] }
 0x308   : > { %3161 = vst.msk [vmem:[#allocation3 + $0x1e0] sm:$0xff] %vm908_vm3, %v3086_v10  ;;  %v4108_v54 = vpop.permute.xlu0 %4107  ;;  %v8397_v12 = vpop.f32.mrb[72].mxu0 }
 0x309   : > { %4184 = vst.msk [vmem:[#allocation3 + $0x1d0] sm:$0xff] %vm1294_vm5, %v4108_v54  ;;  %v8400_v2 = vpop.f32.mrb[73].mxu0 }
 0x30a   : > { %v3278_v37 = vpop.permute.xlu1 %3277  ;;  %3935 = vrot.lane.b32.xlu0 %v3842_v15, %s5843_s28  ;;  %v4318_v21 = vld [vmem:[#allocation3 + $0x1c8] sm:$0xff] }
 0x30b   : > { %3353 = vst.msk [vmem:[#allocation3 + $0x1e0] sm:$0xff] %vm1101_vm4, %v3278_v37  ;;  %3105 = vrot.lane.b32.xlu1 %v8283_v42, %s5844_s29 }
 0x30c   : > { %v3726_v52 = vpop.permute.xlu0 %3725  ;;  %v8410_v60 = vpop.f32.mrb[74].mxu0 }
 0x30d   : > { %v4560_v40 = vpop.f32.mrb[34].mxu1  ;;  %3801 = vst.msk [vmem:[#allocation3 + $0x1e8] sm:$0xff] %vm908_vm3, %v3726_v52  ;;  %v8413_v50 = vpop.f32.mrb[75].mxu0 }
 0x30e   : > { %v8408_v8 = vadd.f32 %v8349_v34, %v4560_v40  ;;  %v4562_v17 = vpop.f32.mrb[35].mxu1  ;;  %v3470_v32 = vpop.permute.xlu1 %3469  ;;  %4127 = vrot.lane.b32.xlu0 %v4034_v59, %s5845_s26  ;;  %v4036_v34 = vld [vmem:[#allocation2 + $0x1a1] sm:$0xff] }
 0x30f   : > { %3545 = vst.msk [vmem:[#allocation3 + $0x1e0] sm:$0xff] %vm1294_vm5, %v3470_v32  ;;  %3297 = vrot.lane.b32.xlu1 %v8316_v39, %s5843_s28  ;;  %v4035_v39 = vld [vmem:[#allocation2 + $0x199] sm:$0xff] }
 0x310   : > { %v3918_v42 = vpop.permute.xlu0 %3917  ;;  %v4319_v18 = vld [vmem:[#allocation3 + $0x1d0] sm:$0xff] }
 0x311   : > { %3993 = vst.msk [vmem:[#allocation3 + $0x1e8] sm:$0xff] %vm1101_vm4, %v3918_v42  ;;  %4648 = vmatprep.mubr.f32.mxu1 %v4319_v18 }
 0x312   : > { %v3088_v24 = vpop.permute.xlu1 %3087  ;;  %4649 = vmatmul.mubr.f32.gmra.mrb[70].mxu1 %v4318_v21  ;;  %3745 = vrot.lane.b32.xlu0 %v3651_v5, %s5844_s29 }
 0x313   : > { %3162 = vst.msk [vmem:[#allocation3 + $0x1f8] sm:$0xff] %vm908_vm3, %v3088_v24  ;;  %3489 = vrot.lane.b32.xlu1 %v8363_v11, %s5845_s26 }
 0x314   : > { %v4110_v43 = vpop.permute.xlu0 %4109 }
 0x315   : > { %4185 = vst.msk [vmem:[#allocation3 + $0x1e8] sm:$0xff] %vm1294_vm5, %v4110_v43 }
 0x316   : > { %v3280_v31 = vpop.permute.xlu1 %3279  ;;  %3937 = vrot.lane.b32.xlu0 %v3843_v13, %s5843_s28  ;;  %v4565_v30 = vpop.f32.mrb[36].mxu1 }
 0x317   : > { %3354 = vst.msk [vmem:[#allocation3 + $0x1f8] sm:$0xff] %vm1101_vm4, %v3280_v31  ;;  %3107 = vrot.lane.b32.xlu1 %v8314_v27, %s5844_s29  ;;  %v8430_v20 = vadd.f32 %v8365_v46, %v4565_v30  ;;  %v4567_v22 = vpop.f32.mrb[37].mxu1  ;;  %v4321_v27 = vld [vmem:[#allocation3 + $0x1e0] sm:$0xff] }
 0x318   : > { %v3728_v41 = vpop.permute.xlu0 %3727 }
 0x319   : > { %3802 = vst.msk [vmem:[#allocation3 + $0x200] sm:$0xff] %vm908_vm3, %v3728_v41 }
 0x31a   : > { %v3472_v47 = vpop.permute.xlu1 %3471  ;;  %4129 = vrot.lane.b32.xlu0 %v4035_v39, %s5845_s26 }
 0x31b   : > { %3546 = vst.msk [vmem:[#allocation3 + $0x1f8] sm:$0xff] %vm1294_vm5, %v3472_v47  ;;  %3299 = vrot.lane.b32.xlu1 %v8321_v44, %s5843_s28 }
 0x31c   : > { %v3920_v19 = vpop.permute.xlu0 %3919  ;;  %v4322_v23 = vld [vmem:[#allocation3 + $0x1e8] sm:$0xff] }
 0x31d   : > { %3994 = vst.msk [vmem:[#allocation3 + $0x200] sm:$0xff] %vm1101_vm4, %v3920_v19  ;;  %4653 = vmatprep.mubr.f32.mxu1 %v4322_v23 }
 0x31e   : > { %v3090_v4 = vpop.permute.xlu1 %3089  ;;  %4654 = vmatmul.mubr.f32.gmra.mrb[72].mxu1 %v4321_v27  ;;  %3747 = vrot.lane.b32.xlu0 %v3652_v3, %s5844_s29 }
 0x31f   : > { %3163 = vst.msk [vmem:[#allocation3 + $0x210] sm:$0xff] %vm908_vm3, %v3090_v4  ;;  %3491 = vrot.lane.b32.xlu1 %v3842_v15, %s5845_s26 }
 0x320   : > { %v4112_v16 = vpop.permute.xlu0 %4111 }
 0x321   : > { %4186 = vst.msk [vmem:[#allocation3 + $0x200] sm:$0xff] %vm1294_vm5, %v4112_v16  ;;  %v8442_v44 = vpop.f32.mrb[76].mxu0 }
 0x322   : > { %v3282_v33 = vpop.permute.xlu1 %3281  ;;  %3939 = vrot.lane.b32.xlu0 %v3844_v51, %s5843_s28  ;;  %v8445_v56 = vpop.f32.mrb[77].mxu0  ;;  %v4324_v9 = vld [vmem:[#allocation3 + $0x1f8] sm:$0xff] }
 0x323   : > { %3355 = vst.msk [vmem:[#allocation3 + $0x210] sm:$0xff] %vm1101_vm4, %v3282_v33  ;;  %v4570_v0 = vpop.f32.mrb[38].mxu1 }
 0x324   : > { %v3730_v36 = vpop.permute.xlu0 %3729  ;;  %v8449_v62 = vadd.f32 %v8360_v26, %v4570_v0  ;;  %v4572_v61 = vpop.f32.mrb[39].mxu1 }
 0x325   : > { %3803 = vst.msk [vmem:[#allocation3 + $0x218] sm:$0xff] %vm908_vm3, %v3730_v36 }
 0x326   : > { %v3474_v29 = vpop.permute.xlu1 %3473  ;;  %4131 = vrot.lane.b32.xlu0 %v4036_v34, %s5845_s26 }
 0x327   : > { %3547 = vst.msk [vmem:[#allocation3 + $0x210] sm:$0xff] %vm1294_vm5, %v3474_v29 }
 0x328   : > { %v3922_v53 = vpop.permute.xlu0 %3921  ;;  %v4325_v6 = vld [vmem:[#allocation3 + $0x200] sm:$0xff] }
 0x329   : > { %3995 = vst.msk [vmem:[#allocation3 + $0x218] sm:$0xff] %vm1101_vm4, %v3922_v53  ;;  %4658 = vmatprep.mubr.f32.mxu1 %v4325_v6 }
 0x32a   : > { %v3092_v7 = vpop.permute.xlu1 %3091  ;;  %4659 = vmatmul.mubr.f32.gmra.mrb[74].mxu1 %v4324_v9 }
 0x32b   : > { %3164 = vst.msk [vmem:[#allocation3 + $0x228] sm:$0xff] %vm908_vm3, %v3092_v7 }
 0x32c   : > { %v4114_v11 = vpop.permute.xlu0 %4113 }
 0x32d   : > { %4187 = vst.msk [vmem:[#allocation3 + $0x218] sm:$0xff] %vm1294_vm5, %v4114_v11 }
 0x32e   : > { %v3284_v26 = vpop.permute.xlu1 %3283  ;;  %v4327_v49 = vld [vmem:[#allocation3 + $0x210] sm:$0xff] }
 0x32f   : > { %3356 = vst.msk [vmem:[#allocation3 + $0x228] sm:$0xff] %vm1101_vm4, %v3284_v26  ;;  %v4575_v48 = vpop.f32.mrb[40].mxu1 }
 0x330   : > { %v3732_v46 = vpop.permute.xlu0 %3731  ;;  %v8459_v38 = vadd.f32 %v8379_v57, %v4575_v48  ;;  %v4577_v1 = vpop.f32.mrb[41].mxu1 }
 0x331   : > { %3804 = vst.msk [vmem:[#allocation3 + $0x230] sm:$0xff] %vm908_vm3, %v3732_v46 }
 0x332   : > { %v3476_v14 = vpop.permute.xlu1 %3475 }
 0x333   : > { %3548 = vst.msk [vmem:[#allocation3 + $0x228] sm:$0xff] %vm1294_vm5, %v3476_v14 }
 0x334   : > { %v3924_v63 = vpop.permute.xlu0 %3923  ;;  %v4328_v58 = vld [vmem:[#allocation3 + $0x218] sm:$0xff] }
 0x335   : > { %3996 = vst.msk [vmem:[#allocation3 + $0x230] sm:$0xff] %vm1101_vm4, %v3924_v63  ;;  %4663 = vmatprep.mubr.f32.mxu1 %v4328_v58 }
 0x336   : > { %v3094_v59 = vpop.permute.xlu1 %3093  ;;  %4664 = vmatmul.mubr.f32.gmra.mrb[76].mxu1 %v4327_v49 }
 0x337   : > { %3165 = vst.msk [vmem:[#allocation3 + $0x240] sm:$0xff] %vm908_vm3, %v3094_v59 }
 0x338   : > { %v4116_v5 = vpop.permute.xlu0 %4115 }
 0x339   : > { %4188 = vst.msk [vmem:[#allocation3 + $0x230] sm:$0xff] %vm1294_vm5, %v4116_v5 }
 0x33a   : > { %v3286_v10 = vpop.permute.xlu1 %3285  ;;  %v8465_v57 = vpop.f32.mrb[78].mxu0  ;;  %v4330_v42 = vld [vmem:[#allocation3 + $0x228] sm:$0xff] }
 0x33b   : > { %3357 = vst.msk [vmem:[#allocation3 + $0x240] sm:$0xff] %vm1101_vm4, %v3286_v10  ;;  %v8468_v3 = vpop.f32.mrb[79].mxu0 }
 0x33c   : > { %v3734_v54 = vpop.permute.xlu0 %3733  ;;  %v4580_v15 = vpop.f32.mrb[42].mxu1 }
 0x33d   : > { %3805 = vst.msk [vmem:[#allocation3 + $0x248] sm:$0xff] %vm908_vm3, %v3734_v54  ;;  %v8472_v37 = vadd.f32 %v8376_v45, %v4580_v15  ;;  %v4582_v52 = vpop.f32.mrb[43].mxu1 }
 0x33e   : > { %v3478_v40 = vpop.permute.xlu1 %3477 }
 0x33f   : > { %3549 = vst.msk [vmem:[#allocation3 + $0x240] sm:$0xff] %vm1294_vm5, %v3478_v40 }
 0x340   : > { %v3926_v17 = vpop.permute.xlu0 %3925  ;;  %v4331_v32 = vld [vmem:[#allocation3 + $0x230] sm:$0xff] }
 0x341   : > { %3997 = vst.msk [vmem:[#allocation3 + $0x248] sm:$0xff] %vm1101_vm4, %v3926_v17  ;;  %4668 = vmatprep.mubr.f32.mxu1 %v4331_v32 }
 0x342   : > { %v3096_v18 = vpop.permute.xlu1 %3095  ;;  %4669 = vmatmul.mubr.f32.gmra.mrb[78].mxu1 %v4330_v42 }
 0x343   : > { %3166 = vst.msk [vmem:[#allocation3 + $0x258] sm:$0xff] %vm908_vm3, %v3096_v18 }
 0x344   : > { %v4118_v21 = vpop.permute.xlu0 %4117 }
 0x345   : > { %4189 = vst.msk [vmem:[#allocation3 + $0x248] sm:$0xff] %vm1294_vm5, %v4118_v21 }
 0x346   : > { %v3288_v24 = vpop.permute.xlu1 %3287  ;;  %v4333_v22 = vld [vmem:[#allocation3 + $0x240] sm:$0xff] }
 0x347   : > { %3358 = vst.msk [vmem:[#allocation3 + $0x258] sm:$0xff] %vm1101_vm4, %v3288_v24 }
 0x348   : > { %v3736_v45 = vpop.permute.xlu0 %3735  ;;  %v4585_v13 = vpop.f32.mrb[44].mxu1 }
 0x349   : > { %3806 = vst.msk [vmem:[#allocation3 + $0x260] sm:$0xff] %vm908_vm3, %v3736_v45  ;;  %v8481_v43 = vadd.f32 %v8387_v28, %v4585_v13  ;;  %v4587_v31 = vpop.f32.mrb[45].mxu1 }
 0x34a   : > { %v3480_v39 = vpop.permute.xlu1 %3479 }
 0x34b   : > { %3550 = vst.msk [vmem:[#allocation3 + $0x258] sm:$0xff] %vm1294_vm5, %v3480_v39 }
 0x34c   : > { %v3928_v41 = vpop.permute.xlu0 %3927  ;;  %v4334_v30 = vld [vmem:[#allocation3 + $0x248] sm:$0xff] }
 0x34d   : > { %3998 = vst.msk [vmem:[#allocation3 + $0x260] sm:$0xff] %vm1101_vm4, %v3928_v41  ;;  %4673 = vmatprep.mubr.f32.mxu1 %v4334_v30 }
 0x34e   : > { %v3098_v47 = vpop.permute.xlu1 %3097  ;;  %4674 = vmatmul.mubr.f32.gmra.mrb[80].mxu1 %v4333_v22 }
 0x34f   : > { %3167 = vst.msk [vmem:[#allocation3 + $0x270] sm:$0xff] %vm908_vm3, %v3098_v47 }
 0x350   : > { %v4120_v19 = vpop.permute.xlu0 %4119 }
 0x351   : > { %4190 = vst.msk [vmem:[#allocation3 + $0x260] sm:$0xff] %vm1294_vm5, %v4120_v19 }
 0x352   : > { %v3290_v23 = vpop.permute.xlu1 %3289  ;;  %v4336_v61 = vld [vmem:[#allocation3 + $0x258] sm:$0xff] }
 0x353   : > { %v8487_v28 = vpop.f32.mrb[80].mxu0  ;;  %3359 = vst.msk [vmem:[#allocation3 + $0x270] sm:$0xff] %vm1101_vm4, %v3290_v23 }
 0x354   : > { %v8490_v27 = vpop.f32.mrb[81].mxu0  ;;  %v3738_v4 = vpop.permute.xlu0 %3737 }
 0x355   : > { %v4590_v51 = vpop.f32.mrb[46].mxu1  ;;  %3807 = vst.msk [vmem:[#allocation3 + $0x278] sm:$0xff] %vm908_vm3, %v3738_v4 }
 0x356   : > { %v8494_v16 = vadd.f32 %v8384_v25, %v4590_v51  ;;  %v4592_v33 = vpop.f32.mrb[47].mxu1  ;;  %v3482_v34 = vpop.permute.xlu1 %3481 }
 0x357   : > { %3551 = vst.msk [vmem:[#allocation3 + $0x270] sm:$0xff] %vm1294_vm5, %v3482_v34 }
 0x358   : > { %v3930_v36 = vpop.permute.xlu0 %3929  ;;  %v4337_v0 = vld [vmem:[#allocation3 + $0x260] sm:$0xff] }
 0x359   : > { %3999 = vst.msk [vmem:[#allocation3 + $0x278] sm:$0xff] %vm1101_vm4, %v3930_v36  ;;  %4678 = vmatprep.mubr.f32.mxu1 %v4337_v0 }
 0x35a   : > { %v3100_v29 = vpop.permute.xlu1 %3099  ;;  %4679 = vmatmul.mubr.f32.gmra.mrb[82].mxu1 %v4336_v61 }
 0x35b   : > { %3168 = vst.msk [vmem:[#allocation3 + $0x288] sm:$0xff] %vm908_vm3, %v3100_v29 }
 0x35c   : > { %v4122_v53 = vpop.permute.xlu0 %4121 }
 0x35d   : > { %4191 = vst.msk [vmem:[#allocation3 + $0x278] sm:$0xff] %vm1294_vm5, %v4122_v53 }
 0x35e   : > { %v3292_v6 = vpop.permute.xlu1 %3291  ;;  %v4339_v1 = vld [vmem:[#allocation3 + $0x270] sm:$0xff] }
 0x35f   : > { %3360 = vst.msk [vmem:[#allocation3 + $0x288] sm:$0xff] %vm1101_vm4, %v3292_v6 }
 0x360   : > { %v3740_v25 = vpop.permute.xlu0 %3739  ;;  %v4595_v9 = vpop.f32.mrb[48].mxu1 }
 0x361   : > { %3808 = vst.msk [vmem:[#allocation3 + $0x290] sm:$0xff] %vm908_vm3, %v3740_v25  ;;  %v8503_v7 = vadd.f32 %v8400_v2, %v4595_v9  ;;  %v4597_v11 = vpop.f32.mrb[49].mxu1 }
 0x362   : > { %v3484_v26 = vpop.permute.xlu1 %3483 }
 0x363   : > { %3552 = vst.msk [vmem:[#allocation3 + $0x288] sm:$0xff] %vm1294_vm5, %v3484_v26 }
 0x364   : > { %v3932_v46 = vpop.permute.xlu0 %3931  ;;  %v4340_v48 = vld [vmem:[#allocation3 + $0x278] sm:$0xff] }
 0x365   : > { %4000 = vst.msk [vmem:[#allocation3 + $0x290] sm:$0xff] %vm1101_vm4, %v3932_v46  ;;  %4683 = vmatprep.mubr.f32.mxu1 %v4340_v48 }
 0x366   : > { %v3102_v14 = vpop.permute.xlu1 %3101  ;;  %4684 = vmatmul.mubr.f32.gmra.mrb[84].mxu1 %v4339_v1 }
 0x367   : > { %3169 = vst.msk [vmem:[#allocation3 + $0x2a0] sm:$0xff] %vm908_vm3, %v3102_v14 }
 0x368   : > { %v4124_v63 = vpop.permute.xlu0 %4123 }
 0x369   : > { %4192 = vst.msk [vmem:[#allocation3 + $0x290] sm:$0xff] %vm1294_vm5, %v4124_v63  ;;  %v4317_v63 = vld [vmem:[#allocation3 + $0x1c0] sm:$0xff] }
 0x36a   : > { %v3294_v58 = vpop.permute.xlu1 %3293  ;;  %v4342_v52 = vld [vmem:[#allocation3 + $0x288] sm:$0xff] }
 0x36b   : > { %3361 = vst.msk [vmem:[#allocation3 + $0x2a0] sm:$0xff] %vm1101_vm4, %v3294_v58  ;;  %v4320_v58 = vld [vmem:[#allocation3 + $0x1d8] sm:$0xff] }
 0x36c   : > { %v3742_v2 = vpop.permute.xlu0 %3741 }
 0x36d   : > { %v4600_v49 = vpop.f32.mrb[50].mxu1  ;;  %3809 = vst.msk [vmem:[#allocation3 + $0x2a8] sm:$0xff] %vm908_vm3, %v3742_v2  ;;  %v4323_v2 = vld [vmem:[#allocation3 + $0x1f0] sm:$0xff] }
 0x36e   : > { %v8512_v59 = vadd.f32 %v8397_v12, %v4600_v49  ;;  %v4602_v5 = vpop.f32.mrb[51].mxu1  ;;  %v3486_v10 = vpop.permute.xlu1 %3485 }
 0x36f   : > { %3553 = vst.msk [vmem:[#allocation3 + $0x2a0] sm:$0xff] %vm1294_vm5, %v3486_v10  ;;  %v4326_v5 = vld [vmem:[#allocation3 + $0x208] sm:$0xff] }
 0x370   : > { %v3934_v54 = vpop.permute.xlu0 %3933  ;;  %v4343_v15 = vld [vmem:[#allocation3 + $0x290] sm:$0xff] }
 0x371   : > { %4001 = vst.msk [vmem:[#allocation3 + $0x2a8] sm:$0xff] %vm1101_vm4, %v3934_v54  ;;  %4688 = vmatprep.mubr.f32.mxu1 %v4343_v15  ;;  %v4329_v54 = vld [vmem:[#allocation3 + $0x220] sm:$0xff]  ;;  %v4332_v15 = vld [vmem:[#allocation3 + $0x238] sm:$0xff] }
 0x372   : > { %v3104_v40 = vpop.permute.xlu1 %3103  ;;  %4689 = vmatmul.mubr.f32.gmra.mrb[86].mxu1 %v4342_v52  ;;  %v4335_v52 = vld [vmem:[#allocation3 + $0x250] sm:$0xff] }
 0x373   : > { %3170 = vst.msk [vmem:[#allocation3 + $0x2b8] sm:$0xff] %vm908_vm3, %v3104_v40  ;;  %v4338_v40 = vld [vmem:[#allocation3 + $0x268] sm:$0xff] }
 0x374   : > { %v4126_v17 = vpop.permute.xlu0 %4125 }
 0x375   : > { %4193 = vst.msk [vmem:[#allocation3 + $0x2a8] sm:$0xff] %vm1294_vm5, %v4126_v17  ;;  %v4341_v17 = vld [vmem:[#allocation3 + $0x280] sm:$0xff] }
 0x376   : > { %v3296_v32 = vpop.permute.xlu1 %3295  ;;  %v4345_v31 = vld [vmem:[#allocation3 + $0x2a0] sm:$0xff] }
 0x377   : > { %3362 = vst.msk [vmem:[#allocation3 + $0x2b8] sm:$0xff] %vm1101_vm4, %v3296_v32  ;;  %v4344_v32 = vld [vmem:[#allocation3 + $0x298] sm:$0xff] }
 0x378   : > { %v3744_v12 = vpop.permute.xlu0 %3743 }
 0x379   : > { %v4605_v42 = vpop.f32.mrb[52].mxu1  ;;  %3810 = vst.msk [vmem:[#allocation3 + $0x2c0] sm:$0xff] %vm908_vm3, %v3744_v12 }
 0x37a   : > { %v8521_v18 = vadd.f32 %v8413_v50, %v4605_v42  ;;  %v4607_v21 = vpop.f32.mrb[53].mxu1  ;;  %v3488_v24 = vpop.permute.xlu1 %3487 }
 0x37b   : > { %3554 = vst.msk [vmem:[#allocation3 + $0x2b8] sm:$0xff] %vm1294_vm5, %v3488_v24  ;;  %v4347_v21 = vld [vmem:[#allocation3 + $0x2b0] sm:$0xff]  ;;  %v4353_v24 = vld [vmem:[#allocation3 + $0x2e0] sm:$0xff] }
 0x37c   : > { %v3936_v45 = vpop.permute.xlu0 %3935  ;;  %v4346_v13 = vld [vmem:[#allocation3 + $0x2a8] sm:$0xff] }
 0x37d   : > { %4002 = vst.msk [vmem:[#allocation3 + $0x2c0] sm:$0xff] %vm1101_vm4, %v3936_v45  ;;  %4693 = vmatprep.mubr.f32.mxu1 %v4346_v13  ;;  %v4350_v45 = vld [vmem:[#allocation3 + $0x2c8] sm:$0xff]  ;;  %v4356_v13 = vld [vmem:[#allocation3 + $0x2f8] sm:$0xff] }
 0x37e   : > { %v3106_v39 = vpop.permute.xlu1 %3105  ;;  %4694 = vmatmul.mubr.f32.gmra.mrb[88].mxu1 %v4345_v31 }
 0x37f   : > { %3171 = vst.msk [vmem:[#allocation3 + $0x2d0] sm:$0xff] %vm908_vm3, %v3106_v39 }
 0x380   : > { %v4128_v41 = vpop.permute.xlu0 %4127 }
 0x381   : > { %4194 = vst.msk [vmem:[#allocation3 + $0x2c0] sm:$0xff] %vm1294_vm5, %v4128_v41 }
 0x382   : > { %v3298_v30 = vpop.permute.xlu1 %3297  ;;  %v4348_v33 = vld [vmem:[#allocation3 + $0x2b8] sm:$0xff] }
 0x383   : > { %3363 = vst.msk [vmem:[#allocation3 + $0x2d0] sm:$0xff] %vm1101_vm4, %v3298_v30 }
 0x384   : > { %v3746_v50 = vpop.permute.xlu0 %3745 }
 0x385   : > { %3811 = vst.msk [vmem:[#allocation3 + $0x2d8] sm:$0xff] %vm908_vm3, %v3746_v50 }
 0x386   : > { %v4610_v22 = vpop.f32.mrb[54].mxu1  ;;  %v3490_v23 = vpop.permute.xlu1 %3489 }
 0x387   : > { %v8530_v47 = vadd.f32 %v8410_v60, %v4610_v22  ;;  %v4612_v19 = vpop.f32.mrb[55].mxu1  ;;  %3555 = vst.msk [vmem:[#allocation3 + $0x2d0] sm:$0xff] %vm1294_vm5, %v3490_v23 }
 0x388   : > { %v3938_v4 = vpop.permute.xlu0 %3937  ;;  %v4349_v51 = vld [vmem:[#allocation3 + $0x2c0] sm:$0xff] }
 0x389   : > { %4003 = vst.msk [vmem:[#allocation3 + $0x2d8] sm:$0xff] %vm1101_vm4, %v3938_v4  ;;  %4698 = vmatprep.mubr.f32.mxu1 %v4349_v51 }
 0x38a   : > { %v3108_v34 = vpop.permute.xlu1 %3107  ;;  %4699 = vmatmul.mubr.f32.gmra.mrb[90].mxu1 %v4348_v33 }
 0x38b   : > { %3172 = vst.msk [vmem:[#allocation3 + $0x2e8] sm:$0xff] %vm908_vm3, %v3108_v34 }
 0x38c   : > { %v4130_v36 = vpop.permute.xlu0 %4129 }
 0x38d   : > { %4195 = vst.msk [vmem:[#allocation3 + $0x2d8] sm:$0xff] %vm1294_vm5, %v4130_v36 }
 0x38e   : > { %v3300_v0 = vpop.permute.xlu1 %3299  ;;  %v4351_v11 = vld [vmem:[#allocation3 + $0x2d0] sm:$0xff] }
 0x38f   : > { %3364 = vst.msk [vmem:[#allocation3 + $0x2e8] sm:$0xff] %vm1101_vm4, %v3300_v0 }
 0x390   : > { %v3748_v60 = vpop.permute.xlu0 %3747 }
 0x391   : > { %3812 = vst.msk [vmem:[#allocation3 + $0x2f0] sm:$0xff] %vm908_vm3, %v3748_v60  ;;  %v4615_v61 = vpop.f32.mrb[56].mxu1 }
 0x392   : > { %v8539_v29 = vadd.f32 %v8445_v56, %v4615_v61  ;;  %v4617_v53 = vpop.f32.mrb[57].mxu1  ;;  %v3492_v6 = vpop.permute.xlu1 %3491 }
 0x393   : > { %3556 = vst.msk [vmem:[#allocation3 + $0x2e8] sm:$0xff] %vm1294_vm5, %v3492_v6 }
 0x394   : > { %v3940_v25 = vpop.permute.xlu0 %3939  ;;  %v4352_v9 = vld [vmem:[#allocation3 + $0x2d8] sm:$0xff] }
 0x395   : > { %4004 = vst.msk [vmem:[#allocation3 + $0x2f0] sm:$0xff] %vm1101_vm4, %v3940_v25  ;;  %4703 = vmatprep.mubr.f32.mxu1 %v4352_v9 }
 0x396   : > { %4704 = vmatmul.mubr.f32.gmra.mrb[92].mxu1 %v4351_v11 }
 0x398   : > { %v4132_v26 = vpop.permute.xlu0 %4131 }
 0x399   : > { %4196 = vst.msk [vmem:[#allocation3 + $0x2f0] sm:$0xff] %vm1294_vm5, %v4132_v26 }
 0x39a   : > { %v4354_v14 = vld [vmem:[#allocation3 + $0x2e8] sm:$0xff] }
 0x39d   : > { %v4620_v46 = vpop.f32.mrb[58].mxu1 }
 0x39e   : > { %v8545_v48 = vadd.f32 %v8442_v44, %v4620_v46  ;;  %v4622_v56 = vpop.f32.mrb[59].mxu1 }
 0x3a0   : > { %v4355_v1 = vld [vmem:[#allocation3 + $0x2f0] sm:$0xff] }
 0x3a1   : > { %4708 = vmatprep.mubr.f32.mxu1 %v4355_v1 }
 0x3a2   : > { %4709 = vmatmul.mubr.f32.gmra.mrb[94].mxu1 %v4354_v14  ;;  %v8598_v14 = vld [vmem:[%s9256_s7] ss:$0 sm:$0xff] }
 0x3a3   : > { %5669 = vmatprep.mubr.msk.f32.mxu1 %vm9265_vm0, %v4317_v63  ;;  %v4947_v63 = vmul.f32 %v8598_v14, %v8408_v8 }
 0x3a6   : > { %5670 = vmatmul.mubr.msk.f32.vlgmr.msra.gmra.mrb[96].mxu1 %vm9265_vm0, %v4320_v58  ;;  %v4946_v58 = vmul.f32 %v8598_v14, %v8374_v55  ;;  %v4950_v55 = vmul.f32 %v8598_v14, %v8459_v38 }
 0x3a7   : > { %5672 = vmatprep.mubr.msk.f32.mxu1 %vm9265_vm0, %v4323_v2  ;;  %v4948_v2 = vmul.f32 %v8598_v14, %v8430_v20 }
 0x3a9   : > { %v4625_v49 = vpop.f32.mrb[60].mxu1 }
 0x3aa   : > { %v8551_v10 = vadd.f32 %v8468_v3, %v4625_v49  ;;  %v4627_v44 = vpop.f32.mrb[61].mxu1  ;;  %5673 = vmatmul.mubr.msk.f32.gmra.mrb[98].mxu1 %vm9265_vm0, %v4326_v5  ;;  %v8609_v49 = vld [vmem:[%s9257_s8] ss:$0 sm:$0xff] }
 0x3ab   : > { %5675 = vmatprep.mubr.msk.f32.mxu1 %vm9265_vm0, %v4329_v54  ;;  %v8612_v5 = vadd.f32 %v8609_v49, %v4947_v63  ;;  %v4949_v44 = vmul.f32 %v8598_v14, %v8449_v62  ;;  %v8617_v54 = vadd.f32 %v8609_v49, %v4946_v58  ;;  %v8620_v8 = vadd.f32 %v8609_v49, %v4948_v2 }
 0x3ac   : > { %v8638_v38 = vadd.f32 %v8609_v49, %v4950_v55 }
 0x3ad   : > { %v5018_v20 = vsel %vm9265_vm0, %v8612_v5, 0.0 }
 0x3ae   : > { %5676 = vmatmul.mubr.msk.f32.gmra.mrb[100].mxu1 %vm9265_vm0, %v4332_v15  ;;  %v8627_v15 = vadd.f32 %v8609_v49, %v4949_v44 }
 0x3af   : > { %5678 = vmatprep.mubr.msk.f32.mxu1 %vm9265_vm0, %v4335_v52  ;;  %v4951_v52 = vmul.f32 %v8598_v14, %v8472_v37 }
 0x3b1   : > { %v8645_v37 = vadd.f32 %v8609_v49, %v4951_v52 }
 0x3b2   : > { %5679 = vmatmul.mubr.msk.f32.gmra.mrb[102].mxu1 %vm9265_vm0, %v4338_v40 }
 0x3b3   : > { %5681 = vmatprep.mubr.msk.f32.mxu1 %vm9265_vm0, %v4341_v17  ;;  %v5017_v17 = vsel %vm9265_vm0, %v8617_v54, 0.0 }
 0x3b6   : > { %v4630_v3 = vpop.f32.mrb[62].mxu1  ;;  %5682 = vmatmul.mubr.msk.f32.gmra.mrb[104].mxu1 %vm9265_vm0, %v4344_v32  ;;  %v4952_v32 = vmul.f32 %v8598_v14, %v8481_v43  ;;  %v4954_v43 = vmul.f32 %v8598_v14, %v8503_v7  ;;  %v4956_v7 = vmul.f32 %v8598_v14, %v8521_v18  ;;  %v4958_v18 = vmul.f32 %v8598_v14, %v8539_v29 }
 0x3b7   : > { %v8560_v12 = vadd.f32 %v8465_v57, %v4630_v3  ;;  %v4632_v42 = vpop.f32.mrb[63].mxu1  ;;  %5684 = vmatprep.mubr.msk.f32.mxu1 %vm9265_vm0, %v4347_v21  ;;  %v5020_v3 = vsel %vm9265_vm0, %v8620_v8, 0.0  ;;  %v5022_v21 = vsel %vm9265_vm0, %v8627_v15, 0.0  ;;  %v4960_v29 = vmul.f32 %v8598_v14, %v8551_v10 }
 0x3b8   : > { %v5019_v42 = vadd.f32 %v5018_v20, %v5017_v17  ;;  %v8696_v20 = vadd.f32 %v8609_v49, %v4958_v18 }
 0x3ba   : > { %5685 = vmatmul.mubr.msk.f32.gmra.mrb[106].mxu1 %vm9265_vm0, %v4350_v45  ;;  %v5021_v45 = vadd.f32 %v5020_v3, %v5019_v42  ;;  %v8710_v42 = vadd.f32 %v8609_v49, %v4960_v29 }
 0x3bb   : > { %5687 = vmatprep.mubr.msk.f32.mxu1 %vm9265_vm0, %v4353_v24  ;;  %v4953_v24 = vmul.f32 %v8598_v14, %v8494_v16  ;;  %v4955_v16 = vmul.f32 %v8598_v14, %v8512_v59  ;;  %v4957_v59 = vmul.f32 %v8598_v14, %v8530_v47  ;;  %v4959_v47 = vmul.f32 %v8598_v14, %v8545_v48 }
 0x3bc   : > { %v4961_v48 = vmul.f32 %v8598_v14, %v8560_v12 }
 0x3bd   : > { %v8689_v2 = vadd.f32 %v8609_v49, %v4957_v59  ;;  %v8703_v17 = vadd.f32 %v8609_v49, %v4959_v47 }
 0x3be   : > { %5688 = vmatmul.mubr.msk.f32.gmra.mrb[108].mxu1 %vm9265_vm0, %v4356_v13  ;;  %v5024_v13 = vsel %vm9265_vm0, %v8638_v38, 0.0 }
 0x3c1   : > { %v4635_v31 = vpop.f32.mrb[64].mxu1 }
 0x3c2   : > { %v8568_v39 = vadd.f32 %v8490_v27, %v4635_v31  ;;  %v4637_v57 = vpop.f32.mrb[65].mxu1  ;;  %v8652_v31 = vadd.f32 %v8609_v49, %v4952_v32  ;;  %v5040_v32 = vsel %vm9265_vm0, %v8696_v20, 0.0 }
 0x3c3   : > { %v5023_v57 = vadd.f32 %v5022_v21, %v5021_v45  ;;  %v8717_v45 = vadd.f32 %v8609_v49, %v4961_v48 }
 0x3c4   : > { %v4962_v10 = vmul.f32 %v8598_v14, %v8568_v39 }
 0x3cd   : > { %v4640_v41 = vpop.f32.mrb[66].mxu1 }
 0x3ce   : > { %v8571_v30 = vadd.f32 %v8487_v28, %v4640_v41  ;;  %v4642_v50 = vpop.f32.mrb[67].mxu1  ;;  %v5026_v41 = vsel %vm9265_vm0, %v8645_v37, 0.0 }
 0x3cf   : > { %v8659_v50 = vadd.f32 %v8609_v49, %v4953_v24  ;;  %v5042_v24 = vsel %vm9265_vm0, %v8703_v17, 0.0 }
 0x3d0   : > { %v4963_v12 = vmul.f32 %v8598_v14, %v8571_v30 }
 0x3d9   : > { %v8573_v22 = vpop.f32.mrb[68].mxu1 }
 0x3da   : > { %v4647_v19 = vpop.f32.mrb[69].mxu1 }
 0x3db   : > { %v5025_v19 = vadd.f32 %v5024_v13, %v5023_v57 }
 0x3e5   : > { %v8575_v23 = vpop.f32.mrb[70].mxu1 }
 0x3e6   : > { %v4652_v4 = vpop.f32.mrb[71].mxu1 }
 0x3e7   : > { %v5028_v4 = vsel %vm9265_vm0, %v8652_v31, 0.0 }
 0x3f1   : > { %v8577_v51 = vpop.f32.mrb[72].mxu1 }
 0x3f2   : > { %v4657_v33 = vpop.f32.mrb[73].mxu1 }
 0x3f3   : > { %v8666_v33 = vadd.f32 %v8609_v49, %v4954_v43 }
 0x3fd   : > { %v8579_v34 = vpop.f32.mrb[74].mxu1 }
 0x3fe   : > { %v4662_v36 = vpop.f32.mrb[75].mxu1 }
 0x3ff   : > { %v5027_v36 = vadd.f32 %v5026_v41, %v5025_v19  ;;  %v5044_v41 = vsel %vm9265_vm0, %v8710_v42, 0.0  ;;  %v5046_v19 = vsel %vm9265_vm0, %v8717_v45, 0.0 }
 0x409   : > { %v8581_v27 = vpop.f32.mrb[76].mxu1 }
 0x40a   : > { %v4667_v0 = vpop.f32.mrb[77].mxu1 }
 0x40b   : > { %v5030_v0 = vsel %vm9265_vm0, %v8659_v50, 0.0 }
 0x415   : > { %v8583_v60 = vpop.f32.mrb[78].mxu1 }
 0x416   : > { %v4672_v28 = vpop.f32.mrb[79].mxu1 }
 0x417   : > { %v8673_v28 = vadd.f32 %v8609_v49, %v4955_v16  ;;  %v8726_v16 = vadd.f32 %v8609_v49, %v4962_v10 }
 0x419   : > { %v5034_v58 = vsel %vm9265_vm0, %v8673_v28, 0.0  ;;  %v5048_v59 = vsel %vm9265_vm0, %v8726_v16, 0.0 }
 0x421   : > { %v8585_v61 = vpop.f32.mrb[80].mxu1 }
 0x422   : > { %v4677_v53 = vpop.f32.mrb[81].mxu1 }
 0x42d   : > { %v8587_v6 = vpop.f32.mrb[82].mxu1 }
 0x42e   : > { %v4682_v25 = vpop.f32.mrb[83].mxu1 }
 0x42f   : > { %v5029_v25 = vadd.f32 %v5028_v4, %v5027_v36  ;;  %v8731_v4 = vadd.f32 %v8609_v49, %v4963_v12 }
 0x431   : > { %v5031_v63 = vadd.f32 %v5030_v0, %v5029_v25  ;;  %v5050_v18 = vsel %vm9265_vm0, %v8731_v4, 0.0 }
 0x439   : > { %v8589_v9 = vpop.f32.mrb[84].mxu1 }
 0x43a   : > { %v4687_v11 = vpop.f32.mrb[85].mxu1 }
 0x445   : > { %v8591_v26 = vpop.f32.mrb[86].mxu1 }
 0x446   : > { %v4692_v46 = vpop.f32.mrb[87].mxu1 }
 0x447   : > { %v5032_v46 = vsel %vm9265_vm0, %v8666_v33, 0.0 }
 0x448   : > { %v5033_v44 = vadd.f32 %v5032_v46, %v5031_v63 }
 0x44a   : > { %v5035_v52 = vadd.f32 %v5034_v58, %v5033_v44 }
 0x451   : > { %v8593_v56 = vpop.f32.mrb[88].mxu1 }
 0x452   : > { %v4697_v1 = vpop.f32.mrb[89].mxu1 }
 0x453   : > { %v8682_v1 = vadd.f32 %v8609_v49, %v4956_v7 }
 0x455   : > { %v5036_v55 = vsel %vm9265_vm0, %v8682_v1, 0.0 }
 0x456   : > { %v5037_v3 = vadd.f32 %v5036_v55, %v5035_v52 }
 0x45d   : > { %v8631_v40 = vpop.f32.mrb[90].mxu1 }
 0x45e   : > { %v4702_v62 = vpop.f32.mrb[91].mxu1 }
 0x45f   : > { %v5038_v62 = vsel %vm9265_vm0, %v8689_v2, 0.0 }
 0x460   : > { %v5039_v21 = vadd.f32 %v5038_v62, %v5037_v3 }
 0x462   : > { %v5041_v43 = vadd.f32 %v5040_v32, %v5039_v21 }
 0x464   : > { %v5043_v39 = vadd.f32 %v5042_v24, %v5041_v43 }
 0x466   : > { %v5045_v36 = vadd.f32 %v5044_v41, %v5043_v39 }
 0x469   : > { %v8677_v53 = vpop.f32.mrb[92].mxu1 }
 0x46a   : > { %v4707_v11 = vpop.f32.mrb[93].mxu1 }
 0x46b   : > { %v5047_v11 = vadd.f32 %v5046_v19, %v5045_v36 }
 0x46d   : > { %v5049_v47 = vadd.f32 %v5048_v59, %v5047_v11 }
 0x46f   : > { %v5051_v52 = vadd.f32 %v5050_v18, %v5049_v47 }
 0x475   : > { %v8721_v13 = vpop.f32.mrb[94].mxu1 }
 0x476   : > { %v4712_v57 = vpop.f32.mrb[95].mxu1 }
 0x479   : > { %v5671_v7 = vpop.f32.mrb[96].mxu1 }
 0x47a   : > { %v4876_v30 = vadd.f32 %v5671_v7, %v8575_v23  ;;  %v4870_v0 = vpop.f32.mrb[97].mxu1 }
 0x47b   : > { %v4871_v25 = vadd.f32 %v4870_v0, %v8573_v22 }
 0x47c   : > { %v4965_v46 = vmul.f32 %v8598_v14, %v4876_v30 }
 0x47d   : > { %v4964_v63 = vmul.f32 %v8598_v14, %v4871_v25  ;;  %v5674_v58 = vpop.f32.mrb[98].mxu1 }
 0x47e   : > { %v4886_v44 = vadd.f32 %v5674_v58, %v8579_v34  ;;  %v4880_v55 = vpop.f32.mrb[99].mxu1  ;;  %v8743_v23 = vadd.f32 %v8609_v49, %v4965_v46 }
 0x47f   : > { %v8746_v29 = vadd.f32 %v8609_v49, %v4964_v63  ;;  %v4881_v22 = vadd.f32 %v4880_v55, %v8577_v51 }
 0x480   : > { %v4967_v62 = vmul.f32 %v8598_v14, %v4886_v44  ;;  %v5054_v24 = vsel %vm9265_vm0, %v8743_v23, 0.0 }
 0x481   : > { %v5052_v48 = vsel %vm9265_vm0, %v8746_v29, 0.0  ;;  %v4966_v3 = vmul.f32 %v8598_v14, %v4881_v22  ;;  %v5677_v32 = vpop.f32.mrb[100].mxu1 }
 0x482   : > { %v5053_v10 = vadd.f32 %v5052_v48, %v5051_v52  ;;  %v4896_v34 = vadd.f32 %v5677_v32, %v8583_v60  ;;  %v4890_v21 = vpop.f32.mrb[101].mxu1  ;;  %v8757_v12 = vadd.f32 %v8609_v49, %v4967_v62 }
 0x483   : > { %v8760_v51 = vadd.f32 %v8609_v49, %v4966_v3  ;;  %v4891_v43 = vadd.f32 %v4890_v21, %v8581_v27 }
 0x484   : > { %v5055_v57 = vadd.f32 %v5054_v24, %v5053_v10  ;;  %v4969_v41 = vmul.f32 %v8598_v14, %v4896_v34  ;;  %v5058_v0 = vsel %vm9265_vm0, %v8757_v12, 0.0 }
 0x485   : > { %v5056_v39 = vsel %vm9265_vm0, %v8760_v51, 0.0  ;;  %v4968_v60 = vmul.f32 %v8598_v14, %v4891_v43  ;;  %v5680_v19 = vpop.f32.mrb[102].mxu1 }
 0x486   : > { %v5057_v7 = vadd.f32 %v5056_v39, %v5055_v57  ;;  %v4906_v36 = vadd.f32 %v5680_v19, %v8587_v6  ;;  %v4900_v30 = vpop.f32.mrb[103].mxu1  ;;  %v8771_v59 = vadd.f32 %v8609_v49, %v4969_v41 }
 0x487   : > { %v8774_v27 = vadd.f32 %v8609_v49, %v4968_v60  ;;  %v4901_v25 = vadd.f32 %v4900_v30, %v8585_v61 }
 0x488   : > { %v5059_v11 = vadd.f32 %v5058_v0, %v5057_v7  ;;  %v4971_v46 = vmul.f32 %v8598_v14, %v4906_v36  ;;  %v5062_v55 = vsel %vm9265_vm0, %v8771_v59, 0.0 }
 0x489   : > { %v5060_v18 = vsel %vm9265_vm0, %v8774_v27, 0.0  ;;  %v4970_v6 = vmul.f32 %v8598_v14, %v4901_v25  ;;  %v5683_v63 = vpop.f32.mrb[104].mxu1 }
 0x48a   : > { %v5061_v58 = vadd.f32 %v5060_v18, %v5059_v11  ;;  %v4916_v47 = vadd.f32 %v5683_v63, %v8591_v26  ;;  %v4910_v44 = vpop.f32.mrb[105].mxu1  ;;  %v8785_v22 = vadd.f32 %v8609_v49, %v4971_v46 }
 0x48b   : > { %v8788_v61 = vadd.f32 %v8609_v49, %v4970_v6  ;;  %v4911_v52 = vadd.f32 %v4910_v44, %v8589_v9 }
 0x48c   : > { %v5063_v62 = vadd.f32 %v5062_v55, %v5061_v58  ;;  %v4973_v48 = vmul.f32 %v8598_v14, %v4916_v47  ;;  %v5066_v24 = vsel %vm9265_vm0, %v8785_v22, 0.0 }
 0x48d   : > { %v5064_v3 = vsel %vm9265_vm0, %v8788_v61, 0.0  ;;  %v4972_v26 = vmul.f32 %v8598_v14, %v4911_v52  ;;  %v5686_v32 = vpop.f32.mrb[106].mxu1 }
 0x48e   : > { %v5065_v10 = vadd.f32 %v5064_v3, %v5063_v62  ;;  %v4926_v34 = vadd.f32 %v5686_v32, %v8631_v40  ;;  %v4920_v21 = vpop.f32.mrb[107].mxu1  ;;  %v8799_v43 = vadd.f32 %v8609_v49, %v4973_v48 }
 0x48f   : > { %v8802_v9 = vadd.f32 %v8609_v49, %v4972_v26  ;;  %v4921_v57 = vadd.f32 %v4920_v21, %v8593_v56  ;;  %v5088_v21 = vld [vmem:[%s9259_s10] sm:$0x1] }
 0x490   : > { %v5067_v41 = vadd.f32 %v5066_v24, %v5065_v10  ;;  %v4975_v39 = vmul.f32 %v8598_v14, %v4926_v34  ;;  %v5070_v0 = vsel %vm9265_vm0, %v8799_v43, 0.0 }
 0x491   : > { %v5068_v60 = vsel %vm9265_vm0, %v8802_v9, 0.0  ;;  %v4974_v40 = vmul.f32 %v8598_v14, %v4921_v57  ;;  %v5689_v19 = vpop.f32.mrb[108].mxu1 }
 0x492   : > { %v5069_v7 = vadd.f32 %v5068_v60, %v5067_v41  ;;  %v4936_v36 = vadd.f32 %v5689_v19, %v8721_v13  ;;  %v4930_v30 = vpop.f32.mrb[109].mxu1  ;;  %v8813_v25 = vadd.f32 %v8609_v49, %v4975_v39 }
 0x493   : > { %v8816_v56 = vadd.f32 %v8609_v49, %v4974_v40  ;;  %v4931_v11 = vadd.f32 %v4930_v30, %v8677_v53  ;;  %v5113_v40 = vlaneseq }
 0x494   : > { %v5071_v46 = vadd.f32 %v5070_v0, %v5069_v7  ;;  %v4977_v18 = vmul.f32 %v8598_v14, %v4936_v36  ;;  %v5074_v58 = vsel %vm9265_vm0, %v8813_v25, 0.0  ;;  %v5093_v36 = vld [vmem:[%s9260_s11] sm:$0x1]  ;;  %v5846_v0 = vmov 0  }
 0x495   : > { %v5072_v6 = vsel %vm9265_vm0, %v8816_v56, 0.0  ;;  %v4976_v13 = vmul.f32 %v8598_v14, %v4931_v11  ;;  %v5114_v19 = vshrl.u32 %v5113_v40, 7  ;;  %5821 = vset.pattern.permute.xlu1 %v5846_v0  ;;  %5822 = vset.pattern.permute.xlu0 %v5846_v0  ;;  %v5096_v11 = vstv %s498_s27 }
 0x496   : > { %v5073_v63 = vadd.f32 %v5072_v6, %v5071_v46  ;;  %v8826_v47 = vadd.f32 %v8609_v49, %v4977_v18 }
 0x497   : > { %v8829_v44 = vadd.f32 %v8609_v49, %v4976_v13  ;;  %v5107_v49 = vld [vmem:[%s9259_s10 + $0x1] sm:$0x1]  ;;  %v5115_v7 = vsub.s32 0, %v5114_v19 }
 0x498   : > { %v5075_v55 = vadd.f32 %v5074_v58, %v5073_v63  ;;  %v5078_v62 = vsel %vm9265_vm0, %v8826_v47, 0.0 }
 0x499   : > { %v5076_v53 = vsel %vm9265_vm0, %v8829_v44, 0.0  ;;  %v5116_v30 = vrot.slane %v5093_v36, %v5115_v7 }
 0x49a   : > { %v5077_v52 = vadd.f32 %v5076_v53, %v5075_v55 }
 0x49c   : > { %v5079_v48 = vadd.f32 %v5078_v62, %v5077_v52  ;;  %v5099_v62 = vld [vmem:[%s9261_s12] sm:$0x1] }
 0x49e   : > { %v5080_v14 = vrot.slane %v5079_v48, 4 }
 0x4a0   : > { %v5081_v3 = vadd.f32 %v5080_v14, %v5079_v48 }
 0x4a2   : > { %v5082_v26 = vrot.slane %v5081_v3, 2 }
 0x4a4   : > { %v5083_v32 = vadd.f32 %v5082_v26, %v5081_v3  ;;  %v5087_v3 = vld [vmem:[%s9262_s13] sm:$0x1]  ;;  %v5124_v26 = vld [vmem:[%s9261_s12 + $0x1] sm:$0x1] }
 0x4a6   : > { %v5084_v10 = vrot.slane %v5083_v32, 1 }
 0x4a8   : > { %v5085_v34 = vadd.f32 %v5084_v10, %v5083_v32 }
 0x4aa   : > { %v5086_v24 = vmul.f32 0.00390625, %v5085_v34 }
 0x4ac   : > { %v5108_v57 = vmul.f32 %v5107_v49, %v5086_v24  ;;  %v5089_v41 = vmul.f32 %v5088_v21, %v5086_v24 }
 0x4ae   : > { %v5109_v39 = vsel %vm509_vm2, %v5108_v57, 0.0  ;;  %v5090_v60 = vsel %vm509_vm2, %v5089_v41, 0.0 }
 0x4af   : > { %5110 = vadd.xlane.f32.xlu1 %v5109_v39  ;;  %5091 = vadd.xlane.f32.xlu0 %v5090_v60 }
 0x4c5   : > { %5117 = vrot.lane.b32.xlu0 %v5116_v30, %s5847_s14 }
 0x53c   : > { %v5092_v46 = vpop.xlane.xlu0 %5091  ;;  %v5111_v13 = vpop.xlane.xlu1 %5110 }
 0x53d   : > { %v5094_v18 = vadd.f32 %v5093_v36, %v5092_v46 }
 0x53f   : > { %vm5095_vm2 = vcmp.ge.f32.partialorder %v5094_v18, 0.0  ;;  %v5097_v6 = vmul.f32 %v5096_v11, %v5094_v18 }
 0x540   : > { %v5118_v63 = vpop.permute.xlu0 %5117 }
 0x541   : > { %v5120_v58 = vadd.f32 %v5118_v63, %v5111_v13  ;;  %v5098_v55 = vsel %vm5095_vm2, %v5094_v18, %v5097_v6  ;;  %v5176_v18 = vld [vmem:[%s6014_s21] sm:$0xff]  ;;  %v5179_v6 = vld [vmem:[%s6014_s21 + $0x18] sm:$0xff] }
 0x542   : > { %5102 = vperm.xlu1 %5821, %v5098_v55   ;;  %v5183_v63 = vld [vmem:[%s6014_s21 + $0x38] sm:$0xff] }
 0x543   : > { %vm5121_vm3 = vcmp.ge.f32.partialorder %v5120_v58, 0.0  ;;  %v5122_v53 = vmul.f32 %v5120_v58, %v5096_v11 }
 0x545   : > { %v5123_v52 = vsel %vm5121_vm3, %v5120_v58, %v5122_v53 }
 0x546   : > { %5127 = vperm.xlu0 %5822, %v5123_v52  }
 0x5c1   : > { %v5103_v48 = vpop.permute.xlu1 %5102 }
 0x5c2   : > { %v5105_v14 = vmul.f32 %v5103_v48, %v5099_v62 }
 0x5c4   : > { %v5106_v10 = vadd.f32 %v5105_v14, %v5087_v3  ;;  %v5189_v14 = vld [vmem:[%s6014_s21 + $0x68] sm:$0xff] }
 0x5c5   : > { %v5128_v32 = vpop.permute.xlu0 %5127 }
 0x5c6   : > { %v5130_v34 = vmul.f32 %v5128_v32, %v5124_v26  ;;  %v5192_v32 = vld [vmem:[%s6014_s21 + $0x80] sm:$0xff] }
 0x5c8   : > { %v5131_v49 = vadd.f32 %v5130_v34, %v5106_v10 }
 0x5ca   : > { %v5132_v21 = vsub.f32 0.0, %v5131_v49  ;;  %v5195_v49 = vld [vmem:[%s6014_s21 + $0x98] sm:$0xff] }
 0x5cc   : > { %v5133_v24 = vmul.f32 1.442695, %v5132_v21 }
 0x5ce   : > { %5823 = vpow2.f32 %v5133_v24 }
 0x5d8   : > { %v5824_v57 = vpop.eup %5823 }
 0x5d9   : > { %v5135_v41 = vadd.f32 1.0, %v5824_v57  ;;  %v5198_v57 = vld [vmem:[%s6014_s21 + $0xb0] sm:$0xff] }
 0x5db   : > { %5825 = vrcp.f32 %v5135_v41 }
 0x5e5   : > { %v5826_v39 = vpop.eup %5825 }
 0x5e6   : > { %v5142_v60 = vrot.slane %v5826_v39, %v5115_v7 }
 0x5e8   : > { %v5144_v40 = vmul.f32 %v5142_v60, %v8617_v54  ;;  %v5145_v19 = vmul.f32 %v5142_v60, %v8612_v5  ;;  %v5146_v36 = vmul.f32 %v5142_v60, %v8620_v8  ;;  %v5147_v30 = vmul.f32 %v5142_v60, %v8627_v15 }
 0x5e9   : > { %v5148_v0 = vmul.f32 %v5142_v60, %v8638_v38  ;;  %v5149_v11 = vmul.f32 %v5142_v60, %v8645_v37  ;;  %v5150_v46 = vmul.f32 %v5142_v60, %v8652_v31  ;;  %v5151_v7 = vmul.f32 %v5142_v60, %v8659_v50  ;;  %v5177_v38 = vld [vmem:[%s6014_s21 + $0x8] sm:$0xff]  ;;  %v5178_v37 = vld [vmem:[%s6014_s21 + $0x10] sm:$0xff] }
 0x5ea   : > { %v5152_v54 = vmul.f32 %v5142_v60, %v8666_v33  ;;  %v5153_v5 = vmul.f32 %v5142_v60, %v8673_v28  ;;  %v5154_v8 = vmul.f32 %v5142_v60, %v8682_v1  ;;  %v5155_v15 = vmul.f32 %v5142_v60, %v8689_v2  ;;  %v5180_v28 = vld [vmem:[%s6014_s21 + $0x20] sm:$0xff]  ;;  %v5181_v1 = vld [vmem:[%s6014_s21 + $0x28] sm:$0xff]  ;;  %v5182_v2 = vld [vmem:[%s6014_s21 + $0x30] sm:$0xff] }
 0x5eb   : > { %v5156_v31 = vmul.f32 %v5142_v60, %v8696_v20  ;;  %v5157_v50 = vmul.f32 %v5142_v60, %v8703_v17  ;;  %v5158_v13 = vmul.f32 %v5142_v60, %v8710_v42  ;;  %v5159_v33 = vmul.f32 %v5142_v60, %v8717_v45  ;;  %v5184_v17 = vld [vmem:[%s6014_s21 + $0x40] sm:$0xff]  ;;  %v5185_v42 = vld [vmem:[%s6014_s21 + $0x48] sm:$0xff]  ;;  %v5186_v45 = vld [vmem:[%s6014_s21 + $0x50] sm:$0xff] }
 0x5ec   : > { %v5160_v58 = vmul.f32 %v5142_v60, %v8726_v16  ;;  %v5161_v55 = vmul.f32 %v5142_v60, %v8731_v4  ;;  %v5162_v53 = vmul.f32 %v5142_v60, %v8746_v29  ;;  %v5163_v20 = vmul.f32 %v5142_v60, %v8743_v23  ;;  %v5187_v4 = vld [vmem:[%s6014_s21 + $0x58] sm:$0xff]  ;;  %v5188_v29 = vld [vmem:[%s6014_s21 + $0x60] sm:$0xff] }
 0x5ed   : > { %v5164_v52 = vmul.f32 %v5142_v60, %v8760_v51  ;;  %v5165_v62 = vmul.f32 %v5142_v60, %v8757_v12  ;;  %v5166_v48 = vmul.f32 %v5142_v60, %v8774_v27  ;;  %v5167_v16 = vmul.f32 %v5142_v60, %v8771_v59  ;;  %v5190_v12 = vld [vmem:[%s6014_s21 + $0x70] sm:$0xff]  ;;  %v5191_v27 = vld [vmem:[%s6014_s21 + $0x78] sm:$0xff] }
 0x5ee   : > { %v5168_v23 = vmul.f32 %v5142_v60, %v8788_v61  ;;  %v5169_v3 = vmul.f32 %v5142_v60, %v8785_v22  ;;  %v5170_v26 = vmul.f32 %v5142_v60, %v8802_v9  ;;  %v5171_v51 = vmul.f32 %v5142_v60, %v8799_v43  ;;  %v5193_v22 = vld [vmem:[%s6014_s21 + $0x88] sm:$0xff]  ;;  %v5194_v9 = vld [vmem:[%s6014_s21 + $0x90] sm:$0xff] }
 0x5ef   : > { %v5172_v59 = vmul.f32 %v5142_v60, %v8816_v56  ;;  %v5173_v10 = vmul.f32 %v5142_v60, %v8813_v25  ;;  %v5174_v34 = vmul.f32 %v5142_v60, %v8829_v44  ;;  %v5175_v61 = vmul.f32 %v5142_v60, %v8826_v47  ;;  %v5196_v25 = vld [vmem:[%s6014_s21 + $0xa0] sm:$0xff]  ;;  %v5197_v44 = vld [vmem:[%s6014_s21 + $0xa8] sm:$0xff] }
 0x5f0   : > { %v8907_v43 = vadd.f32 %v5176_v18, %v5144_v40  ;;  %v8909_v21 = vadd.f32 %v5177_v38, %v5145_v19  ;;  %v8911_v24 = vadd.f32 %v5178_v37, %v5146_v36  ;;  %v8913_v56 = vadd.f32 %v5179_v6, %v5147_v30  ;;  %v5199_v40 = vld [vmem:[%s6014_s21 + $0xb8] sm:$0xff]  ;;  %v5200_v19 = vld [vmem:[%s6014_s21 + $0xc0] sm:$0xff]  ;;  %v5201_v36 = vld [vmem:[%s6014_s21 + $0xc8] sm:$0xff] }
 0x5f1   : > { %v8918_v47 = vadd.f32 %v5180_v28, %v5148_v0  ;;  %v8920_v41 = vadd.f32 %v5181_v1, %v5149_v11  ;;  %v8922_v39 = vadd.f32 %v5182_v2, %v5150_v46  ;;  %v8924_v60 = vadd.f32 %v5183_v63, %v5151_v7  ;;  %v5202_v11 = vld [vmem:[%s6014_s21 + $0xd0] sm:$0xff]  ;;  %v5203_v37 = vld [vmem:[%s6014_s21 + $0xd8] sm:$0xff]  ;;  %v5204_v46 = vld [vmem:[%s6014_s21 + $0xe0] sm:$0xff] }
 0x5f2   : > { %v8929_v30 = vadd.f32 %v5184_v17, %v5152_v54  ;;  %v8931_v18 = vadd.f32 %v5185_v42, %v5153_v5  ;;  %v8933_v38 = vadd.f32 %v5186_v45, %v5154_v8  ;;  %v8935_v0 = vadd.f32 %v5187_v4, %v5155_v15  ;;  %v5205_v2 = vld [vmem:[%s6014_s21 + $0xe8] sm:$0xff]  ;;  %v5206_v54 = vld [vmem:[%s6014_s21 + $0xf0] sm:$0xff]  ;;  %v5207_v63 = vld [vmem:[%s6014_s21 + $0xf8] sm:$0xff] }
 0x5f3   : > { %v8940_v6 = vadd.f32 %v5188_v29, %v5156_v31  ;;  %v8942_v7 = vadd.f32 %v5189_v14, %v5157_v50  ;;  %v8944_v28 = vadd.f32 %v5190_v12, %v5158_v13  ;;  %v8946_v1 = vadd.f32 %v5191_v27, %v5159_v33 }
 0x5f4   : > { %v8951_v5 = vadd.f32 %v5192_v32, %v5160_v58  ;;  %v8953_v8 = vadd.f32 %v5193_v22, %v5161_v55  ;;  %v8955_v15 = vadd.f32 %v5194_v9, %v5162_v53  ;;  %v8957_v17 = vadd.f32 %v5195_v49, %v5163_v20 }
 0x5f5   : > { %v8959_v42 = vadd.f32 %v5196_v25, %v5164_v52  ;;  %v8961_v31 = vadd.f32 %v5197_v44, %v5165_v62  ;;  %v8963_v50 = vadd.f32 %v5198_v57, %v5166_v48  ;;  %v8965_v13 = vadd.f32 %v5199_v40, %v5167_v16 }
 0x5f6   : > { %v8967_v33 = vadd.f32 %v5200_v19, %v5168_v23  ;;  %v8969_v45 = vadd.f32 %v5201_v36, %v5169_v3  ;;  %v8971_v58 = vadd.f32 %v5202_v11, %v5170_v26  ;;  %v8973_v55 = vadd.f32 %v5203_v37, %v5171_v51 }
 0x5f7   : > { %v8975_v53 = vadd.f32 %v5204_v46, %v5172_v59  ;;  %v8977_v20 = vadd.f32 %v5205_v2, %v5173_v10  ;;  %v8979_v52 = vadd.f32 %v5206_v54, %v5174_v34  ;;  %v8981_v62 = vadd.f32 %v5207_v63, %v5175_v61 }
 0x5f8   : > { %9277 = vst [vmem:[#allocation6_spill] sm:$0xff] %v8969_v45  ;;  %9278 = vst [vmem:[#allocation7_spill] sm:$0xff] %v8971_v58  ;;  %vm5240_vm4 = vcmp.ge.f32.partialorder %v8907_v43, 0.0  ;;  %vm5241_vm5 = vcmp.ge.f32.partialorder %v8909_v21, 0.0  ;;  %vm5242_vm1 = vcmp.ge.f32.partialorder %v8911_v24, 0.0  ;;  %vm5243_vm6 = vcmp.ge.f32.partialorder %v8913_v56, 0.0 }
 0x5f9   : > { %9279 = vst [vmem:[#allocation8_spill] sm:$0xff] %v8973_v55  ;;  %9280 = vst [vmem:[#allocation9_spill] sm:$0xff] %v8977_v20  ;;  %vm5244_vm7 = vcmp.ge.f32.partialorder %v8918_v47, 0.0  ;;  %vm5245_vm8 = vcmp.ge.f32.partialorder %v8920_v41, 0.0  ;;  %vm5246_vm9 = vcmp.ge.f32.partialorder %v8922_v39, 0.0  ;;  %vm5247_vm10 = vcmp.ge.f32.partialorder %v8924_v60, 0.0 }
 0x5fa   : > { %9281 = vst [vmem:[#allocation10_spill] sm:$0xff] %v8979_v52  ;;  %vm5248_vm11 = vcmp.ge.f32.partialorder %v8929_v30, 0.0  ;;  %vm5249_vm12 = vcmp.ge.f32.partialorder %v8931_v18, 0.0  ;;  %vm5250_vm13 = vcmp.ge.f32.partialorder %v8933_v38, 0.0  ;;  %vm5251_vm14 = vcmp.ge.f32.partialorder %v8935_v0, 0.0 }
 0x5fb   : > { %v5272_v48 = vmul.f32 %v8907_v43, %v7149_v35  ;;  %v5273_v16 = vmul.f32 %v8909_v21, %v7149_v35  ;;  %v5274_v4 = vmul.f32 %v8911_v24, %v7149_v35  ;;  %v5275_v29 = vmul.f32 %v8913_v56, %v7149_v35 }
 0x5fc   : > { %v5276_v14 = vmul.f32 %v8918_v47, %v7149_v35  ;;  %v5277_v23 = vmul.f32 %v8920_v41, %v7149_v35  ;;  %v5278_v3 = vmul.f32 %v8922_v39, %v7149_v35  ;;  %v5279_v26 = vmul.f32 %v8924_v60, %v7149_v35 }
 0x5fd   : > { %v5280_v51 = vmul.f32 %v8929_v30, %v7149_v35  ;;  %v5281_v12 = vmul.f32 %v8931_v18, %v7149_v35  ;;  %v5282_v27 = vmul.f32 %v8933_v38, %v7149_v35  ;;  %v5283_v32 = vmul.f32 %v8935_v0, %v7149_v35 }
 0x5fe   : > { %v5284_v59 = vmul.f32 %v8940_v6, %v7149_v35  ;;  %v5285_v10 = vmul.f32 %v8942_v7, %v7149_v35  ;;  %v5286_v34 = vmul.f32 %v8944_v28, %v7149_v35  ;;  %v5287_v61 = vmul.f32 %v8946_v1, %v7149_v35 }
 0x5ff   : > { %vm5268_vm15 = vcmp.ge.f32.partialorder %v8975_v53, 0.0  ;;  %vm5269_vm2 = vcmp.ge.f32.partialorder %v8977_v20, 0.0  ;;  %vm5270_vm3 = vcmp.ge.f32.partialorder %v8979_v52, 0.0  ;;  %vm5271_vm0 = vcmp.ge.f32.partialorder %v8981_v62, 0.0 }
 0x600   : > { %v5288_v22 = vmul.f32 %v8951_v5, %v7149_v35  ;;  %v5289_v9 = vmul.f32 %v8953_v8, %v7149_v35  ;;  %v5290_v49 = vmul.f32 %v8955_v15, %v7149_v35  ;;  %v5291_v25 = vmul.f32 %v8957_v17, %v7149_v35 }
 0x601   : > { %v5292_v44 = vmul.f32 %v8959_v42, %v7149_v35  ;;  %v5293_v57 = vmul.f32 %v8961_v31, %v7149_v35  ;;  %v5294_v40 = vmul.f32 %v8963_v50, %v7149_v35  ;;  %v5295_v19 = vmul.f32 %v8965_v13, %v7149_v35 }
 0x602   : > { %v5296_v36 = vmul.f32 %v8967_v33, %v7149_v35  ;;  %v5297_v11 = vmul.f32 %v8969_v45, %v7149_v35  ;;  %v5298_v37 = vmul.f32 %v8971_v58, %v7149_v35  ;;  %v5299_v46 = vmul.f32 %v8973_v55, %v7149_v35 }
 0x603   : > { %v5300_v2 = vmul.f32 %v8975_v53, %v7149_v35  ;;  %v5301_v54 = vmul.f32 %v8977_v20, %v7149_v35  ;;  %v5302_v63 = vmul.f32 %v8979_v52, %v7149_v35  ;;  %v5303_v45 = vmul.f32 %v8981_v62, %v7149_v35 }
 0x604   : > { %v5304_v58 = vsel %vm5240_vm4, %v8907_v43, %v5272_v48  ;;  %v5305_v55 = vsel %vm5241_vm5, %v8909_v21, %v5273_v16  ;;  %v5306_v20 = vsel %vm5242_vm1, %v8911_v24, %v5274_v4  ;;  %v5307_v52 = vsel %vm5243_vm6, %v8913_v56, %v5275_v29  ;;  %v9325_v48 = vld [vmem:[#allocation10_spill] sm:$0xff] }
 0x605   : > { %v5308_v35 = vsel %vm5244_vm7, %v8918_v47, %v5276_v14  ;;  %v5309_v43 = vsel %vm5245_vm8, %v8920_v41, %v5277_v23  ;;  %v5310_v21 = vsel %vm5246_vm9, %v8922_v39, %v5278_v3  ;;  %v5311_v24 = vsel %vm5247_vm10, %v8924_v60, %v5279_v26 }
 0x606   : > { %vm9282_vm4 = vcmask 261120   ;;  %v5312_v56 = vsel %vm5248_vm11, %v8929_v30, %v5280_v51  ;;  %v5313_v47 = vsel %vm5249_vm12, %v8931_v18, %v5281_v12  ;;  %v5314_v41 = vsel %vm5250_vm13, %v8933_v38, %v5282_v27 }
 0x607   : > { %5336 = vst.msk [vmem:[%s9068_s18] sm:$0xff] %vm9282_vm4, %v5304_v58  ;;  %vm9283_vm5 = vmmov %vm9282_vm4  ;;  %v5315_v39 = vsel %vm5251_vm14, %v8935_v0, %v5283_v32  ;;  %vm9290_vm11 = vcmp.ge.f32.partialorder %v8940_v6, 0.0  ;;  %vm9291_vm12 = vcmp.ge.f32.partialorder %v8942_v7, 0.0  ;;  %vm9292_vm13 = vcmp.ge.f32.partialorder %v8944_v28, 0.0  ;;  %v9318_v58 = vld [vmem:[#allocation8_spill] sm:$0xff] }
 0x608   : > { %5337 = vst.msk [vmem:[%s9068_s18 + $0x8] sm:$0xff] %vm9283_vm5, %v5305_v55  ;;  %vm9284_vm1 = vmmov %vm9282_vm4  ;;  %v5316_v60 = vsel %vm9290_vm11, %v8940_v6, %v5284_v59  ;;  %v5317_v30 = vsel %vm9291_vm12, %v8942_v7, %v5285_v10  ;;  %v5318_v18 = vsel %vm9292_vm13, %v8944_v28, %v5286_v34  ;;  %vm9293_vm14 = vcmp.ge.f32.partialorder %v8946_v1, 0.0 }
 0x609   : > { %5338 = vst.msk [vmem:[%s9068_s18 + $0x10] sm:$0xff] %vm9284_vm1, %v5306_v20  ;;  %vm9285_vm6 = vmmov %vm9284_vm1  ;;  %v5319_v38 = vsel %vm9293_vm14, %v8946_v1, %v5287_v61  ;;  %v9324_v20 = vld [vmem:[#allocation9_spill] sm:$0xff]  ;;  %v5334_v16 = vsel %vm5270_vm3, %v9325_v48, %v5302_v63  ;;  %v5335_v4 = vsel %vm5271_vm0, %v8981_v62, %v5303_v45 }
 0x60a   : > { %5339 = vst.msk [vmem:[%s9068_s18 + $0x18] sm:$0xff] %vm9285_vm6, %v5307_v52  ;;  %vm9286_vm7 = vmmov %vm9284_vm1  ;;  %v5333_v52 = vsel %vm5269_vm2, %v9324_v20, %v5301_v54 }
 0x60b   : > { %5340 = vst.msk [vmem:[%s9068_s18 + $0x20] sm:$0xff] %vm9286_vm7, %v5308_v35  ;;  %vm9287_vm8 = vmmov %vm9284_vm1  ;;  %vm9297_vm7 = vcmp.ge.f32.partialorder %v8951_v5, 0.0 }
 0x60c   : > { %5341 = vst.msk [vmem:[%s9068_s18 + $0x28] sm:$0xff] %vm9287_vm8, %v5309_v43  ;;  %vm9288_vm9 = vmmov %vm9284_vm1  ;;  %v5320_v0 = vsel %vm9297_vm7, %v8951_v5, %v5288_v22  ;;  %vm9298_vm8 = vcmp.ge.f32.partialorder %v8953_v8, 0.0 }
 0x60d   : > { %5342 = vst.msk [vmem:[%s9068_s18 + $0x30] sm:$0xff] %vm9288_vm9, %v5310_v21  ;;  %vm9289_vm10 = vmmov %vm9284_vm1  ;;  %v5321_v6 = vsel %vm9298_vm8, %v8953_v8, %v5289_v9  ;;  %vm9299_vm9 = vcmp.ge.f32.partialorder %v8955_v15, 0.0 }
 0x60e   : > { %5343 = vst.msk [vmem:[%s9068_s18 + $0x38] sm:$0xff] %vm9289_vm10, %v5311_v24  ;;  %vm9294_vm4 = vmmov %vm9284_vm1  ;;  %v5322_v7 = vsel %vm9299_vm9, %v8955_v15, %v5290_v49  ;;  %vm9300_vm10 = vcmp.ge.f32.partialorder %v8957_v17, 0.0 }
 0x60f   : > { %5344 = vst.msk [vmem:[%s9068_s18 + $0x40] sm:$0xff] %vm9294_vm4, %v5312_v56  ;;  %vm9295_vm5 = vmmov %vm9284_vm1  ;;  %v5323_v28 = vsel %vm9300_vm10, %v8957_v17, %v5291_v25  ;;  %vm9305_vm4 = vcmp.ge.f32.partialorder %v8959_v42, 0.0 }
 0x610   : > { %5345 = vst.msk [vmem:[%s9068_s18 + $0x48] sm:$0xff] %vm9295_vm5, %v5313_v47  ;;  %vm9296_vm6 = vmmov %vm9284_vm1  ;;  %v5324_v1 = vsel %vm9305_vm4, %v8959_v42, %v5292_v44  ;;  %vm9306_vm5 = vcmp.ge.f32.partialorder %v8961_v31, 0.0  ;;  %v9314_v42 = vld [vmem:[#allocation6_spill] sm:$0xff] }
 0x611   : > { %5346 = vst.msk [vmem:[%s9068_s18 + $0x50] sm:$0xff] %vm9284_vm1, %v5314_v41  ;;  %vm9301_vm11 = vmmov %vm9284_vm1  ;;  %v5325_v5 = vsel %vm9306_vm5, %v8961_v31, %v5293_v57 }
 0x612   : > { %5347 = vst.msk [vmem:[%s9068_s18 + $0x58] sm:$0xff] %vm9296_vm6, %v5315_v39  ;;  %vm9302_vm12 = vmmov %vm9284_vm1  ;;  %vm9308_vm6 = vcmp.ge.f32.partialorder %v8965_v13, 0.0 }
 0x613   : > { %5348 = vst.msk [vmem:[%s9068_s18 + $0x60] sm:$0xff] %vm9301_vm11, %v5316_v60  ;;  %vm9303_vm13 = vmmov %vm9284_vm1  ;;  %v5327_v15 = vsel %vm9308_vm6, %v8965_v13, %v5295_v19 }
 0x614   : > { %5349 = vst.msk [vmem:[%s9068_s18 + $0x68] sm:$0xff] %vm9302_vm12, %v5317_v30  ;;  %vm9304_vm14 = vmmov %vm9284_vm1  ;;  %vm9307_vm1 = vcmp.ge.f32.partialorder %v8963_v50, 0.0  ;;  %vm9315_vm12 = vcmp.ge.f32.partialorder %v9314_v42, 0.0 }
 0x615   : > { %5350 = vst.msk [vmem:[%s9068_s18 + $0x70] sm:$0xff] %vm9303_vm13, %v5318_v18  ;;  %v5326_v8 = vsel %vm9307_vm1, %v8963_v50, %v5294_v40  ;;  %vm9309_vm7 = vmmov %vm9301_vm11  ;;  %vm9313_vm11 = vcmp.ge.f32.partialorder %v8967_v33, 0.0  ;;  %v5329_v31 = vsel %vm9315_vm12, %v9314_v42, %v5297_v11  ;;  %v9316_v50 = vld [vmem:[#allocation7_spill] sm:$0xff] }
 0x616   : > { %5351 = vst.msk [vmem:[%s9068_s18 + $0x78] sm:$0xff] %vm9304_vm14, %v5319_v38  ;;  %vm9310_vm8 = vmmov %vm9309_vm7  ;;  %v5328_v17 = vsel %vm9313_vm11, %v8967_v33, %v5296_v36  ;;  %vm9317_vm13 = vcmp.ge.f32.partialorder %v9316_v50, 0.0  ;;  %vm9319_vm14 = vcmp.ge.f32.partialorder %v9318_v58, 0.0  ;;  %v5332_v33 = vsel %vm5268_vm15, %v8975_v53, %v5300_v2 }
 0x617   : > { %5352 = vst.msk [vmem:[%s9068_s18 + $0x80] sm:$0xff] %vm9309_vm7, %v5320_v0  ;;  %vm9311_vm9 = vmmov %vm9309_vm7  ;;  %v5330_v13 = vsel %vm9317_vm13, %v9316_v50, %v5298_v37  ;;  %v5331_v55 = vsel %vm9319_vm14, %v9318_v58, %v5299_v46 }
 0x618   : > { %5353 = vst.msk [vmem:[%s9068_s18 + $0x88] sm:$0xff] %vm9310_vm8, %v5321_v6  ;;  %vm9312_vm10 = vmmov %vm9309_vm7 }
 0x619   : > { %5354 = vst.msk [vmem:[%s9068_s18 + $0x90] sm:$0xff] %vm9311_vm9, %v5322_v7  ;;  %vm9320_vm4 = vmmov %vm9309_vm7 }
 0x61a   : > { %5355 = vst.msk [vmem:[%s9068_s18 + $0x98] sm:$0xff] %vm9312_vm10, %v5323_v28  ;;  %vm9321_vm5 = vmmov %vm9320_vm4 }
 0x61b   : > { %5356 = vst.msk [vmem:[%s9068_s18 + $0xa0] sm:$0xff] %vm9320_vm4, %v5324_v1  ;;  %vm9322_vm1 = vmmov %vm9320_vm4 }
 0x61c   : > { %5357 = vst.msk [vmem:[%s9068_s18 + $0xa8] sm:$0xff] %vm9321_vm5, %v5325_v5  ;;  %vm9323_vm6 = vmmov %vm9322_vm1 }
 0x61d   : > { %5358 = vst.msk [vmem:[%s9068_s18 + $0xb0] sm:$0xff] %vm9322_vm1, %v5326_v8  ;;  %vm9326_vm7 = vmmov %vm9322_vm1 }
 0x61e   : > { %5359 = vst.msk [vmem:[%s9068_s18 + $0xb8] sm:$0xff] %vm9323_vm6, %v5327_v15  ;;  %vm9327_vm8 = vmmov %vm9322_vm1 }
 0x61f   : > { %5360 = vst.msk [vmem:[%s9068_s18 + $0xc0] sm:$0xff] %vm9326_vm7, %v5328_v17  ;;  %vm9328_vm9 = vmmov %vm9322_vm1 }
 0x620   : > { %5361 = vst.msk [vmem:[%s9068_s18 + $0xc8] sm:$0xff] %vm9327_vm8, %v5329_v31  ;;  %vm9329_vm10 = vmmov %vm9322_vm1 }
 0x621   : > { %5362 = vst.msk [vmem:[%s9068_s18 + $0xd0] sm:$0xff] %vm9328_vm9, %v5330_v13  ;;  %vm9330_vm15 = vmmov %vm9322_vm1 }
 0x622   : > { %5363 = vst.msk [vmem:[%s9068_s18 + $0xd8] sm:$0xff] %vm9329_vm10, %v5331_v55  ;;  %vm9331_vm11 = vmmov %vm9322_vm1 }
 0x623   : > { %5364 = vst.msk [vmem:[%s9068_s18 + $0xe0] sm:$0xff] %vm9330_vm15, %v5332_v33  ;;  %vm9332_vm2 = vmmov %vm9322_vm1 }
 0x624   : > { %5365 = vst.msk [vmem:[%s9068_s18 + $0xe8] sm:$0xff] %vm9331_vm11, %v5333_v52  ;;  %vm9333_vm12 = vmmov %vm9322_vm1 }
 0x625   : > { %5366 = vst.msk [vmem:[%s9068_s18 + $0xf0] sm:$0xff] %vm9332_vm2, %v5334_v16 }
 0x626   : > { %5367 = vst.msk [vmem:[%s9068_s18 + $0xf8] sm:$0xff] %vm9333_vm12, %v5335_v4 }
 0x627 PF: > { %s27_s22 = sadd.s32 1, %s5839_s22  }
 0x628   : > { %p24_p4 = scmp.ge.s32.totalorder %s27_s22, 4  }
 0x62a   :  { %26 = sbr.rel (!%p24_p4) target bundleno = 3 (0x3), region = 113 }

</bundles_post_ra>
